<compile_context>
chip_gen: v7x
topology: tpu7x:2x2x1
jax: 0.10.0
libtpu: 0.0.40
codegen_flags: <defaults>
</compile_context>

<pallas_src>
import jax
import jax.numpy as jnp
from jax.experimental import pallas as pl
from jax.experimental.pallas import tpu as pltpu

C = 128   # lane-padded channel width (real channels = 40)
NF = 32   # padded fc1 width (real = 20)


# --------------------------------------------------------------------------
# fused forward kernel (one grid step = TB images)
# --------------------------------------------------------------------------
def _fused_forward_kernel(
    patch1_ref, w1_ref, b1_ref,        # conv1 (im2col patch built in wrapper)
    w2_ref, b2_ref,                    # conv2 (9, C, C)
    wfc1_ref, bfc1_ref,                # fc1  (49*C, NF)
    wfc2_ref, bfc2_ref,                # fc2  (NF, 49*C), (s, c)-ordered cols
    wd1_ref, bd1_ref,                  # deconv1 (4 taps concatenated on N)
    wd2_ref, bd2_ref,                  # deconv2 (block-diagonal over taps)
    out_ref,                           # (TB*49, 16) tap-separated decoder output
    map_ref, m2_ref, fc1in_ref, x2_ref,  # VMEM scratch
):
    f32 = jnp.float32
    bf16 = jnp.bfloat16
    TB = map_ref.shape[0]

    # ---- conv1 + ReLU: one im2col matmul (K = 16: 9 taps zero-padded) -----
    a1 = jnp.dot(patch1_ref[...], w1_ref[...], preferred_element_type=f32)
    a1 = jnp.maximum(a1 + b1_ref[...], 0.0)             # (TB*896, C) f32
    a1 = a1.reshape(TB, 28, 2, 16, C)                    # rows = (b, h, w%2, w//2)

    # ---- max_pool2d(2,2) #1: parity max (w pairs), then h-pair max ---------
    m = jnp.maximum(a1[:, :, 0], a1[:, :, 1])            # (TB, 28, 16, C)
    m = m.reshape(TB, 14, 2, 16, C)
    p1 = jnp.maximum(m[:, :, 0], m[:, :, 1])             # (TB, 14, 16, C); w=14,15 junk

    # ---- conv2 input map: re-zero ONLY the halo ring conv2 actually reads --
    # Windows read rows 0..15 and cols 7..24; the interior (rows 1..14,
    # cols 8..21) is fully overwritten below; cols 0..6 / 25..31 are never read.
    # (Scratch persists across invocations, so the halo is re-zeroed every step.)
    map_ref[:, 0:1, 7:25, :] = jnp.zeros((TB, 1, 18, C), f32)
    map_ref[:, 15:16, 7:25, :] = jnp.zeros((TB, 1, 18, C), f32)
    map_ref[:, 1:15, 7:8, :] = jnp.zeros((TB, 14, 1, C), f32)
    map_ref[:, 1:15, 22:25, :] = jnp.zeros((TB, 14, 3, C), f32)
    map_ref[:, 1:15, 8:22, :] = p1[:, :, 0:14, :]

    # ---- conv2 + ReLU: 9 accumulating K=128 bf16 dots (no patch2 temp) -----
    acc = None
    for t in range(9):
        dy, dx = t // 3, t % 3
        win = map_ref[:, dy:dy + 14, 7 + dx:7 + dx + 16, :].reshape(TB * 224, C)
        d = jnp.dot(win.astype(bf16), w2_ref[t], preferred_element_type=f32)
        acc = d if acc is None else acc + d
    c2 = jnp.maximum(acc + b2_ref[...], 0.0)              # (TB*224, C); w=14,15 junk

    # ---- max_pool2d(2,2) #2, step 1: vectorized h-pair max -----------------
    c2 = c2.reshape(TB, 7, 2, 16, C)
    m2_ref[...] = jnp.maximum(c2[:, :, 0], c2[:, :, 1])   # (TB, 7, 16, C)

    # ---- pool #2 step 2 (w-pair max) fused with fc1-operand relayout -------
    # One full (TB, 128) slab per real spatial slot s = h*7 + w (no junk cols).
    for h in range(7):
        for w in range(7):
            s = h * 7 + w
            fc1in_ref[:, s * C:(s + 1) * C] = jnp.maximum(
                m2_ref[:, h, 2 * w, :], m2_ref[:, h, 2 * w + 1, :])

    # ---- fc1 / fc2 (no activation, matching the reference module) ----------
    h1 = jnp.dot(fc1in_ref[...].astype(bf16), wfc1_ref[...],
                 preferred_element_type=f32) + bfc1_ref[...]          # (TB, NF)
    y = jnp.dot(h1.astype(bf16), wfc2_ref[...],
                preferred_element_type=f32) + bfc2_ref[...]           # (TB, 49*C)

    # ---- decoder input relayout: rows ordered (s, b), lanes = channels -----
    for s in range(49):
        x2_ref[s * TB:(s + 1) * TB, :] = y[:, s * C:(s + 1) * C]

    # ---- deconv1 (k=2, s=2) + ReLU: all 4 taps in one matmul ---------------
    t1 = jnp.dot(x2_ref[...].astype(bf16), wd1_ref[...],
                 preferred_element_type=f32)
    t1 = jnp.maximum(t1 + bd1_ref[...], 0.0)               # (TB*49, 4*C)

    # ---- deconv2 (k=2, s=2, Cout=1) + ReLU: block-diagonal matmul ----------
    z = jnp.dot(t1.astype(bf16), wd2_ref[...], preferred_element_type=f32)
    out_ref[...] = jnp.maximum(z + bd2_ref[...], 0.0)      # (TB*49, 16)


# --------------------------------------------------------------------------
# wrapper glue
# --------------------------------------------------------------------------
def _build_conv1_patch(img):
    # img: (B, 28, 28) f32 -> im2col patch, rows ordered (b, h, w%2, w//2),
    # cols = 9 conv taps (dy*3+dx) padded to 16.  Tiny (~115 KiB/image f32).
    B = img.shape[0]
    imgp = jnp.pad(img, ((0, 0), (1, 1), (1, 1)))
    taps = [imgp[:, dy:dy + 28, dx:dx + 28] for dy in range(3) for dx in range(3)]
    pat = jnp.stack(taps, axis=-1)                        # (B, 28, 28, 9)
    pat = jnp.pad(pat, ((0, 0), (0, 0), (0, 4), (0, 7)))  # (B, 28, 32, 16)
    pat = pat.reshape(B, 28, 16, 2, 16)                   # w -> (w//2, w%2)
    pat = jnp.transpose(pat, (0, 1, 3, 2, 4))             # (B, 28, parity, half, K)
    return pat.reshape(B * 896, 16)


def _resident_spec(arr):
    # whole array as one block, same block every grid step -> stays VMEM-resident
    zeros = (0,) * arr.ndim
    return pl.BlockSpec(arr.shape, lambda i, _z=zeros: _z)


def autoencoder_forward(prep, x_nchw, tile_batch=8):
    B = x_nchw.shape[0]
    TB = tile_batch if B >= tile_batch else B
    num_tiles = -(-B // TB)
    Bp = num_tiles * TB

    img = x_nchw[:, 0].astype(jnp.float32)                 # (B, 28, 28)
    if Bp != B:
        img = jnp.pad(img, ((0, Bp - B), (0, 0), (0, 0)))
    patch1 = _build_conv1_patch(img).astype(jnp.bfloat16)  # (Bp*896, 16)

    w_names = ("w1", "b1", "w2", "b2", "wfc1", "bfc1", "wfc2", "bfc2",
               "wd1", "bd1", "wd2", "bd2")
    weights = [prep[k] for k in w_names]

    zz = pl.pallas_call(
        _fused_forward_kernel,
        out_shape=jax.ShapeDtypeStruct((Bp * 49, 16), jnp.float32),
        grid_spec=pltpu.PrefetchScalarGridSpec(
            num_scalar_prefetch=0,
            grid=(num_tiles,),
            in_specs=[pl.BlockSpec((TB * 896, 16), lambda i: (i, 0))]
                     + [_resident_spec(w) for w in weights],
            out_specs=pl.BlockSpec((TB * 49, 16), lambda i: (i, 0)),
            scratch_shapes=[
                pltpu.VMEM((TB, 16, 32, C), jnp.float32),   # halo-padded conv2 input map
                pltpu.VMEM((TB, 7, 16, C), jnp.float32),    # pool2 h-pair max
                pltpu.VMEM((TB, 49 * C), jnp.float32),      # fc1 operand (lane-major)
                pltpu.VMEM((TB * 49, C), jnp.float32),      # decoder rows (s, b)
            ]),
        compiler_params=pltpu.CompilerParams(
            dimension_semantics=("parallel",),
            vmem_limit_bytes=32 * 1024 * 1024),
    )(patch1, *weights)

    # un-tile + 6 KiB/image tap -> pixel interleave (pure output formatting).
    zz = zz.reshape(num_tiles, 49, TB, 16)
    zz = jnp.transpose(zz, (0, 2, 1, 3)).reshape(Bp, 49, 16)[:B]
    zz = zz.reshape(B, 7, 7, 2, 2, 2, 2)                   # (b, h, w, dy, dx, ey, ex)
    out = jnp.transpose(zz, (0, 1, 3, 5, 2, 4, 6)).reshape(B, 28, 28)
    return out[:, None, :, :]                              # (B, 1, 28, 28) NCHW


# --------------------------------------------------------------------------
# parameters (torch layouts) + one-time kernel-layout preprocessing
# --------------------------------------------------------------------------
def init_params(key):
    ks = jax.random.split(key, 12)

    def nrm(k, shape, fan_in):
        return jax.random.normal(k, shape, jnp.float32) / jnp.sqrt(jnp.float32(fan_in))

    return {  # exact torch parameter shapes
        "conv1_w": nrm(ks[0], (40, 1, 3, 3), 9),
        "conv1_b": nrm(ks[1], (40,), 9),
        "conv2_w": nrm(ks[2], (40, 40, 3, 3), 360),
        "conv2_b": nrm(ks[3], (40,), 360),
        "fc1_w":  nrm(ks[4], (20, 1960), 1960),
        "fc1_b":  nrm(ks[5], (20,), 1960),
        "fc2_w":  nrm(ks[6], (1960, 20), 20),
        "fc2_b":  nrm(ks[7], (1960,), 20),
        "d1_w":   nrm(ks[8], (40, 40, 2, 2), 160),
        "d1_b":   nrm(ks[9], (40,), 160),
        "d2_w":   nrm(ks[10], (40, 1, 2, 2), 160),
        "d2_b":   nrm(ks[11], (1,), 160),
    }


def prepare_params(p):
    f32 = jnp.float32
    bf16 = jnp.bfloat16

    # conv1: (40,1,3,3) -> (16, C): rows = tap (dy*3+dx, zero-padded), cols = cout
    w1 = jnp.transpose(p["conv1_w"], (2, 3, 1, 0)).reshape(9, 40)
    w1 = jnp.zeros((16, C), f32).at[:9, :40].set(w1)
    b1 = jnp.zeros((1, C), f32).at[0, :40].set(p["conv1_b"])

    # conv2: (40,40,3,3) -> (9, C, C): [tap, cin, cout]
    w2 = jnp.transpose(p["conv2_w"], (2, 3, 1, 0)).reshape(9, 40, 40)
    w2 = jnp.zeros((9, C, C), f32).at[:, :40, :40].set(w2)
    b2 = jnp.zeros((1, C), f32).at[0, :40].set(p["conv2_b"])

    # fc1: torch (20, 1960) with input index c*49+s -> (49*C, NF), row = s*C + c
    wf1 = jnp.transpose(p["fc1_w"].reshape(20, 40, 49), (2, 1, 0))        # (s, c, n)
    wf1 = jnp.zeros((49, C, NF), f32).at[:, :40, :20].set(wf1).reshape(49 * C, NF)
    bf1 = jnp.zeros((1, NF), f32).at[0, :20].set(p["fc1_b"])

    # fc2: torch (1960, 20) with output index c*49+s -> (NF, 49*C), col = s*C + c
    wf2 = jnp.transpose(p["fc2_w"].reshape(40, 49, 20), (2, 1, 0))        # (n, s, c)
    wf2 = jnp.zeros((NF, 49, C), f32).at[:20, :, :40].set(wf2).reshape(NF, 49 * C)
    bf2 = jnp.zeros((49, C), f32).at[:, :40].set(
        jnp.transpose(p["fc2_b"].reshape(40, 49))).reshape(1, 49 * C)

    # deconv1: torch (cin=40, cout=40, 2, 2) -> (C, 4*C), col = tap*C + cout
    wd1 = jnp.transpose(p["d1_w"], (0, 2, 3, 1)).reshape(40, 4, 40)       # (ci, tap, co)
    wd1 = jnp.zeros((C, 4, C), f32).at[:40, :, :40].set(wd1).reshape(C, 4 * C)
    bd1 = jnp.zeros((4, C), f32).at[:, :40].set(
        jnp.broadcast_to(p["d1_b"], (4, 40))).reshape(1, 4 * C)

    # deconv2: torch (cin=40, 1, 2, 2) -> block-diagonal (4*C, 16),
    #          row = tap*C + cin, col = tap*4 + (ey*2+ex)
    base = p["d2_w"].reshape(40, 4)                                        # (ci, e)
    wd2 = jnp.zeros((4, C, 4, 4), f32)
    for tap in range(4):
        wd2 = wd2.at[tap, :40, tap, :].set(base)
    wd2 = wd2.reshape(4 * C, 16)
    bd2 = jnp.full((1, 16), p["d2_b"][0], f32)

    # MXU weights in bf16 (padded entries are exact zeros, so padded lanes stay
    # exactly zero through every ReLU); biases stay f32 (added post-accumulation).
    return {"w1": w1.astype(bf16), "b1": b1,
            "w2": w2.astype(bf16), "b2": b2,
            "wfc1": wf1.astype(bf16), "bfc1": bf1,
            "wfc2": wf2.astype(bf16), "bfc2": bf2,
            "wd1": wd1.astype(bf16), "bd1": bd1,
            "wd2": wd2.astype(bf16), "bd2": bd2}


if __name__ == "__main__":
    key = jax.random.PRNGKey(0)
    k_x, k_p = jax.random.split(key)
    # Spatial size is fixed by the module (40*7*7 flatten => 28x28 input).
    x = jax.random.normal(k_x, (2, 1, 28, 28), dtype=jnp.float32)
    params = init_params(k_p)
    prep = prepare_params(params)          # one-time weight re-layout (not in hot path)

    fwd = jax.jit(autoencoder_forward)
    y = jax.block_until_ready(fwd(prep, x))

    assert y.shape == (2, 1, 28, 28), y.shape
    assert bool(jnp.all(jnp.isfinite(y)))
    assert bool(jnp.all(y >= 0.0))         # final ReLU
    print("KERNEL_OK")
</pallas_src>

<mosaic_0001>
module attributes {stable_mosaic.version = 11 : i64} {
  func.func @_fused_forward_kernel(%arg0: i32, %arg1: memref<1792x16xbf16, #tpu.memory_space<vmem>>, %arg2: memref<16x128xbf16, #tpu.memory_space<vmem>>, %arg3: memref<1x128xf32, #tpu.memory_space<vmem>>, %arg4: memref<9x128x128xbf16, #tpu.memory_space<vmem>>, %arg5: memref<1x128xf32, #tpu.memory_space<vmem>>, %arg6: memref<6272x32xbf16, #tpu.memory_space<vmem>>, %arg7: memref<1x32xf32, #tpu.memory_space<vmem>>, %arg8: memref<32x6272xbf16, #tpu.memory_space<vmem>>, %arg9: memref<1x6272xf32, #tpu.memory_space<vmem>>, %arg10: memref<128x512xbf16, #tpu.memory_space<vmem>>, %arg11: memref<1x512xf32, #tpu.memory_space<vmem>>, %arg12: memref<512x16xbf16, #tpu.memory_space<vmem>>, %arg13: memref<1x16xf32, #tpu.memory_space<vmem>>, %arg14: memref<98x16xf32, #tpu.memory_space<vmem>>, %arg15: memref<2x16x32x128xf32, #tpu.memory_space<vmem>>, %arg16: memref<2x7x16x128xf32, #tpu.memory_space<vmem>>, %arg17: memref<2x6272xf32, #tpu.memory_space<vmem>>, %arg18: memref<98x128xf32, #tpu.memory_space<vmem>>) attributes {dimension_semantics = [#tpu.dimension_semantics<parallel>], iteration_bounds = array<i64: 1>, scalar_prefetch = 0 : i64, scratch_operands = 4 : i64, tpu.core_type = #tpu.core_type<tc>, window_params = [{transform_indices = @transform_0, window_bounds = array<i64: 1792, 16>}, {pipeline_mode = #tpu.pipeline_mode<synchronous>, transform_indices = @transform_1, window_bounds = array<i64: 16, 128>}, {pipeline_mode = #tpu.pipeline_mode<synchronous>, transform_indices = @transform_2, window_bounds = array<i64: 1, 128>}, {pipeline_mode = #tpu.pipeline_mode<synchronous>, transform_indices = @transform_3, window_bounds = array<i64: 9, 128, 128>}, {pipeline_mode = #tpu.pipeline_mode<synchronous>, transform_indices = @transform_4, window_bounds = array<i64: 1, 128>}, {pipeline_mode = #tpu.pipeline_mode<synchronous>, transform_indices = @transform_5, window_bounds = array<i64: 6272, 32>}, {pipeline_mode = #tpu.pipeline_mode<synchronous>, transform_indices = @transform_6, window_bounds = array<i64: 1, 32>}, {pipeline_mode = #tpu.pipeline_mode<synchronous>, transform_indices = @transform_7, window_bounds = array<i64: 32, 6272>}, {pipeline_mode = #tpu.pipeline_mode<synchronous>, transform_indices = @transform_8, window_bounds = array<i64: 1, 6272>}, {pipeline_mode = #tpu.pipeline_mode<synchronous>, transform_indices = @transform_9, window_bounds = array<i64: 128, 512>}, {pipeline_mode = #tpu.pipeline_mode<synchronous>, transform_indices = @transform_10, window_bounds = array<i64: 1, 512>}, {pipeline_mode = #tpu.pipeline_mode<synchronous>, transform_indices = @transform_11, window_bounds = array<i64: 512, 16>}, {pipeline_mode = #tpu.pipeline_mode<synchronous>, transform_indices = @transform_12, window_bounds = array<i64: 1, 16>}, {transform_indices = @transform_13, window_bounds = array<i64: 98, 16>}]} {
    %c0 = arith.constant 0 : index
    %c0_0 = arith.constant 0 : index
    %0 = vector.load %arg1[%c0, %c0_0] : memref<1792x16xbf16, #tpu.memory_space<vmem>>, vector<1792x16xbf16>
    %c0_1 = arith.constant 0 : index
    %c0_2 = arith.constant 0 : index
    %1 = vector.load %arg2[%c0_1, %c0_2] : memref<16x128xbf16, #tpu.memory_space<vmem>>, vector<16x128xbf16>
    %cst = arith.constant dense<0.000000e+00> : vector<1792x128xf32>
    %2 = tpu.matmul %0, %1, %cst {dimension_numbers = #tpu.dot_dimension_numbers<[1], [0], [0], [1], [0, 0, 1, 1], [], []>} : vector<1792x16xbf16>, vector<16x128xbf16>, vector<1792x128xf32> -> vector<1792x128xf32>
    %c0_3 = arith.constant 0 : index
    %c0_4 = arith.constant 0 : index
    %3 = vector.load %arg3[%c0_3, %c0_4] : memref<1x128xf32, #tpu.memory_space<vmem>>, vector<1x128xf32>
    %4 = vector.broadcast %3 : vector<1x128xf32> to vector<1792x128xf32>
    %5 = arith.addf %2, %4 : vector<1792x128xf32>
    %cst_5 = arith.constant 0.000000e+00 : f32
    %6 = vector.broadcast %cst_5 : f32 to vector<1792x128xf32>
    %7 = arith.maximumf %5, %6 : vector<1792x128xf32>
    %8 = vector.shape_cast %7 : vector<1792x128xf32> to vector<2x28x2x16x128xf32>
    %9 = vector.extract_strided_slice %8 {offsets = [0, 0, 0, 0, 0], sizes = [2, 28, 1, 16, 128], strides = [1, 1, 1, 1, 1]} : vector<2x28x2x16x128xf32> to vector<2x28x1x16x128xf32>
    %10 = vector.shape_cast %9 : vector<2x28x1x16x128xf32> to vector<2x28x16x128xf32>
    %11 = vector.extract_strided_slice %8 {offsets = [0, 0, 1, 0, 0], sizes = [2, 28, 1, 16, 128], strides = [1, 1, 1, 1, 1]} : vector<2x28x2x16x128xf32> to vector<2x28x1x16x128xf32>
    %12 = vector.shape_cast %11 : vector<2x28x1x16x128xf32> to vector<2x28x16x128xf32>
    %13 = arith.maximumf %10, %12 : vector<2x28x16x128xf32>
    %14 = vector.shape_cast %13 : vector<2x28x16x128xf32> to vector<2x14x2x16x128xf32>
    %15 = vector.extract_strided_slice %14 {offsets = [0, 0, 0, 0, 0], sizes = [2, 14, 1, 16, 128], strides = [1, 1, 1, 1, 1]} : vector<2x14x2x16x128xf32> to vector<2x14x1x16x128xf32>
    %16 = vector.shape_cast %15 : vector<2x14x1x16x128xf32> to vector<2x14x16x128xf32>
    %17 = vector.extract_strided_slice %14 {offsets = [0, 0, 1, 0, 0], sizes = [2, 14, 1, 16, 128], strides = [1, 1, 1, 1, 1]} : vector<2x14x2x16x128xf32> to vector<2x14x1x16x128xf32>
    %18 = vector.shape_cast %17 : vector<2x14x1x16x128xf32> to vector<2x14x16x128xf32>
    %19 = arith.maximumf %16, %18 : vector<2x14x16x128xf32>
    %cst_6 = arith.constant 0.000000e+00 : f32
    %20 = vector.broadcast %cst_6 : f32 to vector<2x1x18x128xf32>
    %c0_7 = arith.constant 0 : index
    %c0_8 = arith.constant 0 : index
    %c7 = arith.constant 7 : index
    %c0_9 = arith.constant 0 : index
    %21 = vector.load %arg15[%c0_7, %c0_8, %c7, %c0_9] : memref<2x16x32x128xf32, #tpu.memory_space<vmem>>, vector<2x1x18x128xf32>
    tpu.vector_store %arg15[%c0_7, %c0_8, %c7, %c0_9], %20 {strides = array<i32>} : memref<2x16x32x128xf32, #tpu.memory_space<vmem>>, vector<2x1x18x128xf32>,
    %cst_10 = arith.constant 0.000000e+00 : f32
    %22 = vector.broadcast %cst_10 : f32 to vector<2x1x18x128xf32>
    %c0_11 = arith.constant 0 : index
    %c15 = arith.constant 15 : index
    %c7_12 = arith.constant 7 : index
    %c0_13 = arith.constant 0 : index
    %23 = vector.load %arg15[%c0_11, %c15, %c7_12, %c0_13] : memref<2x16x32x128xf32, #tpu.memory_space<vmem>>, vector<2x1x18x128xf32>
    tpu.vector_store %arg15[%c0_11, %c15, %c7_12, %c0_13], %22 {strides = array<i32>} : memref<2x16x32x128xf32, #tpu.memory_space<vmem>>, vector<2x1x18x128xf32>,
    %cst_14 = arith.constant 0.000000e+00 : f32
    %24 = vector.broadcast %cst_14 : f32 to vector<2x14x1x128xf32>
    %c0_15 = arith.constant 0 : index
    %c1 = arith.constant 1 : index
    %c7_16 = arith.constant 7 : index
    %c0_17 = arith.constant 0 : index
    %25 = vector.load %arg15[%c0_15, %c1, %c7_16, %c0_17] : memref<2x16x32x128xf32, #tpu.memory_space<vmem>>, vector<2x14x1x128xf32>
    tpu.vector_store %arg15[%c0_15, %c1, %c7_16, %c0_17], %24 {strides = array<i32>} : memref<2x16x32x128xf32, #tpu.memory_space<vmem>>, vector<2x14x1x128xf32>,
    %cst_18 = arith.constant 0.000000e+00 : f32
    %26 = vector.broadcast %cst_18 : f32 to vector<2x14x3x128xf32>
    %c0_19 = arith.constant 0 : index
    %c1_20 = arith.constant 1 : index
    %c22 = arith.constant 22 : index
    %c0_21 = arith.constant 0 : index
    %27 = vector.load %arg15[%c0_19, %c1_20, %c22, %c0_21] : memref<2x16x32x128xf32, #tpu.memory_space<vmem>>, vector<2x14x3x128xf32>
    tpu.vector_store %arg15[%c0_19, %c1_20, %c22, %c0_21], %26 {strides = array<i32>} : memref<2x16x32x128xf32, #tpu.memory_space<vmem>>, vector<2x14x3x128xf32>,
    %28 = vector.extract_strided_slice %19 {offsets = [0, 0, 0, 0], sizes = [2, 14, 14, 128], strides = [1, 1, 1, 1]} : vector<2x14x16x128xf32> to vector<2x14x14x128xf32>
    %c0_22 = arith.constant 0 : index
    %c1_23 = arith.constant 1 : index
    %c8 = arith.constant 8 : index
    %c0_24 = arith.constant 0 : index
    %29 = vector.load %arg15[%c0_22, %c1_23, %c8, %c0_24] : memref<2x16x32x128xf32, #tpu.memory_space<vmem>>, vector<2x14x14x128xf32>
    tpu.vector_store %arg15[%c0_22, %c1_23, %c8, %c0_24], %28 {strides = array<i32>} : memref<2x16x32x128xf32, #tpu.memory_space<vmem>>, vector<2x14x14x128xf32>,
    %c0_25 = arith.constant 0 : index
    %c0_26 = arith.constant 0 : index
    %c7_27 = arith.constant 7 : index
    %c0_28 = arith.constant 0 : index
    %30 = vector.load %arg15[%c0_25, %c0_26, %c7_27, %c0_28] : memref<2x16x32x128xf32, #tpu.memory_space<vmem>>, vector<2x14x16x128xf32>
    %31 = vector.shape_cast %30 : vector<2x14x16x128xf32> to vector<448x128xf32>
    %32 = arith.truncf %31 : vector<448x128xf32> to vector<448x128xbf16>
    %c0_29 = arith.constant 0 : index
    %c0_30 = arith.constant 0 : index
    %c0_31 = arith.constant 0 : index
    %33 = vector.load %arg4[%c0_29, %c0_30, %c0_31] : memref<9x128x128xbf16, #tpu.memory_space<vmem>>, vector<1x128x128xbf16>
    %34 = vector.shape_cast %33 : vector<1x128x128xbf16> to vector<128x128xbf16>
    %cst_32 = arith.constant dense<0.000000e+00> : vector<448x128xf32>
    %35 = tpu.matmul %32, %34, %cst_32 {dimension_numbers = #tpu.dot_dimension_numbers<[1], [0], [0], [1], [0, 0, 1, 1], [], []>} : vector<448x128xbf16>, vector<128x128xbf16>, vector<448x128xf32> -> vector<448x128xf32>
    %c0_33 = arith.constant 0 : index
    %c0_34 = arith.constant 0 : index
    %c8_35 = arith.constant 8 : index
    %c0_36 = arith.constant 0 : index
    %36 = vector.load %arg15[%c0_33, %c0_34, %c8_35, %c0_36] : memref<2x16x32x128xf32, #tpu.memory_space<vmem>>, vector<2x14x16x128xf32>
    %37 = vector.shape_cast %36 : vector<2x14x16x128xf32> to vector<448x128xf32>
    %38 = arith.truncf %37 : vector<448x128xf32> to vector<448x128xbf16>
    %c1_37 = arith.constant 1 : index
    %c0_38 = arith.constant 0 : index
    %c0_39 = arith.constant 0 : index
    %39 = vector.load %arg4[%c1_37, %c0_38, %c0_39] : memref<9x128x128xbf16, #tpu.memory_space<vmem>>, vector<1x128x128xbf16>
    %40 = vector.shape_cast %39 : vector<1x128x128xbf16> to vector<128x128xbf16>
    %cst_40 = arith.constant dense<0.000000e+00> : vector<448x128xf32>
    %41 = tpu.matmul %38, %40, %cst_40 {dimension_numbers = #tpu.dot_dimension_numbers<[1], [0], [0], [1], [0, 0, 1, 1], [], []>} : vector<448x128xbf16>, vector<128x128xbf16>, vector<448x128xf32> -> vector<448x128xf32>
    %42 = arith.addf %35, %41 : vector<448x128xf32>
    %c0_41 = arith.constant 0 : index
    %c0_42 = arith.constant 0 : index
    %c9 = arith.constant 9 : index
    %c0_43 = arith.constant 0 : index
    %43 = vector.load %arg15[%c0_41, %c0_42, %c9, %c0_43] : memref<2x16x32x128xf32, #tpu.memory_space<vmem>>, vector<2x14x16x128xf32>
    %44 = vector.shape_cast %43 : vector<2x14x16x128xf32> to vector<448x128xf32>
    %45 = arith.truncf %44 : vector<448x128xf32> to vector<448x128xbf16>
    %c2 = arith.constant 2 : index
    %c0_44 = arith.constant 0 : index
    %c0_45 = arith.constant 0 : index
    %46 = vector.load %arg4[%c2, %c0_44, %c0_45] : memref<9x128x128xbf16, #tpu.memory_space<vmem>>, vector<1x128x128xbf16>
    %47 = vector.shape_cast %46 : vector<1x128x128xbf16> to vector<128x128xbf16>
    %cst_46 = arith.constant dense<0.000000e+00> : vector<448x128xf32>
    %48 = tpu.matmul %45, %47, %cst_46 {dimension_numbers = #tpu.dot_dimension_numbers<[1], [0], [0], [1], [0, 0, 1, 1], [], []>} : vector<448x128xbf16>, vector<128x128xbf16>, vector<448x128xf32> -> vector<448x128xf32>
    %49 = arith.addf %42, %48 : vector<448x128xf32>
    %c0_47 = arith.constant 0 : index
    %c1_48 = arith.constant 1 : index
    %c7_49 = arith.constant 7 : index
    %c0_50 = arith.constant 0 : index
    %50 = vector.load %arg15[%c0_47, %c1_48, %c7_49, %c0_50] : memref<2x16x32x128xf32, #tpu.memory_space<vmem>>, vector<2x14x16x128xf32>
    %51 = vector.shape_cast %50 : vector<2x14x16x128xf32> to vector<448x128xf32>
    %52 = arith.truncf %51 : vector<448x128xf32> to vector<448x128xbf16>
    %c3 = arith.constant 3 : index
    %c0_51 = arith.constant 0 : index
    %c0_52 = arith.constant 0 : index
    %53 = vector.load %arg4[%c3, %c0_51, %c0_52] : memref<9x128x128xbf16, #tpu.memory_space<vmem>>, vector<1x128x128xbf16>
    %54 = vector.shape_cast %53 : vector<1x128x128xbf16> to vector<128x128xbf16>
    %cst_53 = arith.constant dense<0.000000e+00> : vector<448x128xf32>
    %55 = tpu.matmul %52, %54, %cst_53 {dimension_numbers = #tpu.dot_dimension_numbers<[1], [0], [0], [1], [0, 0, 1, 1], [], []>} : vector<448x128xbf16>, vector<128x128xbf16>, vector<448x128xf32> -> vector<448x128xf32>
    %56 = arith.addf %49, %55 : vector<448x128xf32>
    %c0_54 = arith.constant 0 : index
    %c1_55 = arith.constant 1 : index
    %c8_56 = arith.constant 8 : index
    %c0_57 = arith.constant 0 : index
    %57 = vector.load %arg15[%c0_54, %c1_55, %c8_56, %c0_57] : memref<2x16x32x128xf32, #tpu.memory_space<vmem>>, vector<2x14x16x128xf32>
    %58 = vector.shape_cast %57 : vector<2x14x16x128xf32> to vector<448x128xf32>
    %59 = arith.truncf %58 : vector<448x128xf32> to vector<448x128xbf16>
    %c4 = arith.constant 4 : index
    %c0_58 = arith.constant 0 : index
    %c0_59 = arith.constant 0 : index
    %60 = vector.load %arg4[%c4, %c0_58, %c0_59] : memref<9x128x128xbf16, #tpu.memory_space<vmem>>, vector<1x128x128xbf16>
    %61 = vector.shape_cast %60 : vector<1x128x128xbf16> to vector<128x128xbf16>
    %cst_60 = arith.constant dense<0.000000e+00> : vector<448x128xf32>
    %62 = tpu.matmul %59, %61, %cst_60 {dimension_numbers = #tpu.dot_dimension_numbers<[1], [0], [0], [1], [0, 0, 1, 1], [], []>} : vector<448x128xbf16>, vector<128x128xbf16>, vector<448x128xf32> -> vector<448x128xf32>
    %63 = arith.addf %56, %62 : vector<448x128xf32>
    %c0_61 = arith.constant 0 : index
    %c1_62 = arith.constant 1 : index
    %c9_63 = arith.constant 9 : index
    %c0_64 = arith.constant 0 : index
    %64 = vector.load %arg15[%c0_61, %c1_62, %c9_63, %c0_64] : memref<2x16x32x128xf32, #tpu.memory_space<vmem>>, vector<2x14x16x128xf32>
    %65 = vector.shape_cast %64 : vector<2x14x16x128xf32> to vector<448x128xf32>
    %66 = arith.truncf %65 : vector<448x128xf32> to vector<448x128xbf16>
    %c5 = arith.constant 5 : index
    %c0_65 = arith.constant 0 : index
    %c0_66 = arith.constant 0 : index
    %67 = vector.load %arg4[%c5, %c0_65, %c0_66] : memref<9x128x128xbf16, #tpu.memory_space<vmem>>, vector<1x128x128xbf16>
    %68 = vector.shape_cast %67 : vector<1x128x128xbf16> to vector<128x128xbf16>
    %cst_67 = arith.constant dense<0.000000e+00> : vector<448x128xf32>
    %69 = tpu.matmul %66, %68, %cst_67 {dimension_numbers = #tpu.dot_dimension_numbers<[1], [0], [0], [1], [0, 0, 1, 1], [], []>} : vector<448x128xbf16>, vector<128x128xbf16>, vector<448x128xf32> -> vector<448x128xf32>
    %70 = arith.addf %63, %69 : vector<448x128xf32>
    %c0_68 = arith.constant 0 : index
    %c2_69 = arith.constant 2 : index
    %c7_70 = arith.constant 7 : index
    %c0_71 = arith.constant 0 : index
    %71 = vector.load %arg15[%c0_68, %c2_69, %c7_70, %c0_71] : memref<2x16x32x128xf32, #tpu.memory_space<vmem>>, vector<2x14x16x128xf32>
    %72 = vector.shape_cast %71 : vector<2x14x16x128xf32> to vector<448x128xf32>
    %73 = arith.truncf %72 : vector<448x128xf32> to vector<448x128xbf16>
    %c6 = arith.constant 6 : index
    %c0_72 = arith.constant 0 : index
    %c0_73 = arith.constant 0 : index
    %74 = vector.load %arg4[%c6, %c0_72, %c0_73] : memref<9x128x128xbf16, #tpu.memory_space<vmem>>, vector<1x128x128xbf16>
    %75 = vector.shape_cast %74 : vector<1x128x128xbf16> to vector<128x128xbf16>
    %cst_74 = arith.constant dense<0.000000e+00> : vector<448x128xf32>
    %76 = tpu.matmul %73, %75, %cst_74 {dimension_numbers = #tpu.dot_dimension_numbers<[1], [0], [0], [1], [0, 0, 1, 1], [], []>} : vector<448x128xbf16>, vector<128x128xbf16>, vector<448x128xf32> -> vector<448x128xf32>
    %77 = arith.addf %70, %76 : vector<448x128xf32>
    %c0_75 = arith.constant 0 : index
    %c2_76 = arith.constant 2 : index
    %c8_77 = arith.constant 8 : index
    %c0_78 = arith.constant 0 : index
    %78 = vector.load %arg15[%c0_75, %c2_76, %c8_77, %c0_78] : memref<2x16x32x128xf32, #tpu.memory_space<vmem>>, vector<2x14x16x128xf32>
    %79 = vector.shape_cast %78 : vector<2x14x16x128xf32> to vector<448x128xf32>
    %80 = arith.truncf %79 : vector<448x128xf32> to vector<448x128xbf16>
    %c7_79 = arith.constant 7 : index
    %c0_80 = arith.constant 0 : index
    %c0_81 = arith.constant 0 : index
    %81 = vector.load %arg4[%c7_79, %c0_80, %c0_81] : memref<9x128x128xbf16, #tpu.memory_space<vmem>>, vector<1x128x128xbf16>
    %82 = vector.shape_cast %81 : vector<1x128x128xbf16> to vector<128x128xbf16>
    %cst_82 = arith.constant dense<0.000000e+00> : vector<448x128xf32>
    %83 = tpu.matmul %80, %82, %cst_82 {dimension_numbers = #tpu.dot_dimension_numbers<[1], [0], [0], [1], [0, 0, 1, 1], [], []>} : vector<448x128xbf16>, vector<128x128xbf16>, vector<448x128xf32> -> vector<448x128xf32>
    %84 = arith.addf %77, %83 : vector<448x128xf32>
    %c0_83 = arith.constant 0 : index
    %c2_84 = arith.constant 2 : index
    %c9_85 = arith.constant 9 : index
    %c0_86 = arith.constant 0 : index
    %85 = vector.load %arg15[%c0_83, %c2_84, %c9_85, %c0_86] : memref<2x16x32x128xf32, #tpu.memory_space<vmem>>, vector<2x14x16x128xf32>
    %86 = vector.shape_cast %85 : vector<2x14x16x128xf32> to vector<448x128xf32>
    %87 = arith.truncf %86 : vector<448x128xf32> to vector<448x128xbf16>
    %c8_87 = arith.constant 8 : index
    %c0_88 = arith.constant 0 : index
    %c0_89 = arith.constant 0 : index
    %88 = vector.load %arg4[%c8_87, %c0_88, %c0_89] : memref<9x128x128xbf16, #tpu.memory_space<vmem>>, vector<1x128x128xbf16>
    %89 = vector.shape_cast %88 : vector<1x128x128xbf16> to vector<128x128xbf16>
    %cst_90 = arith.constant dense<0.000000e+00> : vector<448x128xf32>
    %90 = tpu.matmul %87, %89, %cst_90 {dimension_numbers = #tpu.dot_dimension_numbers<[1], [0], [0], [1], [0, 0, 1, 1], [], []>} : vector<448x128xbf16>, vector<128x128xbf16>, vector<448x128xf32> -> vector<448x128xf32>
    %91 = arith.addf %84, %90 : vector<448x128xf32>
    %c0_91 = arith.constant 0 : index
    %c0_92 = arith.constant 0 : index
    %92 = vector.load %arg5[%c0_91, %c0_92] : memref<1x128xf32, #tpu.memory_space<vmem>>, vector<1x128xf32>
    %93 = vector.broadcast %92 : vector<1x128xf32> to vector<448x128xf32>
    %94 = arith.addf %91, %93 : vector<448x128xf32>
    %cst_93 = arith.constant 0.000000e+00 : f32
    %95 = vector.broadcast %cst_93 : f32 to vector<448x128xf32>
    %96 = arith.maximumf %94, %95 : vector<448x128xf32>
    %97 = vector.shape_cast %96 : vector<448x128xf32> to vector<2x7x2x16x128xf32>
    %98 = vector.extract_strided_slice %97 {offsets = [0, 0, 0, 0, 0], sizes = [2, 7, 1, 16, 128], strides = [1, 1, 1, 1, 1]} : vector<2x7x2x16x128xf32> to vector<2x7x1x16x128xf32>
    %99 = vector.shape_cast %98 : vector<2x7x1x16x128xf32> to vector<2x7x16x128xf32>
    %100 = vector.extract_strided_slice %97 {offsets = [0, 0, 1, 0, 0], sizes = [2, 7, 1, 16, 128], strides = [1, 1, 1, 1, 1]} : vector<2x7x2x16x128xf32> to vector<2x7x1x16x128xf32>
    %101 = vector.shape_cast %100 : vector<2x7x1x16x128xf32> to vector<2x7x16x128xf32>
    %102 = arith.maximumf %99, %101 : vector<2x7x16x128xf32>
    %c0_94 = arith.constant 0 : index
    %c0_95 = arith.constant 0 : index
    %c0_96 = arith.constant 0 : index
    %c0_97 = arith.constant 0 : index
    %103 = vector.load %arg16[%c0_94, %c0_95, %c0_96, %c0_97] : memref<2x7x16x128xf32, #tpu.memory_space<vmem>>, vector<2x7x16x128xf32>
    tpu.vector_store %arg16[%c0_94, %c0_95, %c0_96, %c0_97], %102 {strides = array<i32>} : memref<2x7x16x128xf32, #tpu.memory_space<vmem>>, vector<2x7x16x128xf32>,
    %c0_98 = arith.constant 0 : index
    %c0_99 = arith.constant 0 : index
    %c0_100 = arith.constant 0 : index
    %c0_101 = arith.constant 0 : index
    %104 = vector.load %arg16[%c0_98, %c0_99, %c0_100, %c0_101] : memref<2x7x16x128xf32, #tpu.memory_space<vmem>>, vector<2x1x1x128xf32>
    %105 = vector.shape_cast %104 : vector<2x1x1x128xf32> to vector<2x128xf32>
    %c0_102 = arith.constant 0 : index
    %c0_103 = arith.constant 0 : index
    %c1_104 = arith.constant 1 : index
    %c0_105 = arith.constant 0 : index
    %106 = vector.load %arg16[%c0_102, %c0_103, %c1_104, %c0_105] : memref<2x7x16x128xf32, #tpu.memory_space<vmem>>, vector<2x1x1x128xf32>
    %107 = vector.shape_cast %106 : vector<2x1x1x128xf32> to vector<2x128xf32>
    %108 = arith.maximumf %105, %107 : vector<2x128xf32>
    %c0_106 = arith.constant 0 : index
    %c0_107 = arith.constant 0 : index
    %109 = vector.load %arg17[%c0_106, %c0_107] : memref<2x6272xf32, #tpu.memory_space<vmem>>, vector<2x128xf32>
    tpu.vector_store %arg17[%c0_106, %c0_107], %108 {strides = array<i32>} : memref<2x6272xf32, #tpu.memory_space<vmem>>, vector<2x128xf32>,
    %c0_108 = arith.constant 0 : index
    %c0_109 = arith.constant 0 : index
    %c2_110 = arith.constant 2 : index
    %c0_111 = arith.constant 0 : index
    %110 = vector.load %arg16[%c0_108, %c0_109, %c2_110, %c0_111] : memref<2x7x16x128xf32, #tpu.memory_space<vmem>>, vector<2x1x1x128xf32>
    %111 = vector.shape_cast %110 : vector<2x1x1x128xf32> to vector<2x128xf32>
    %c0_112 = arith.constant 0 : index
    %c0_113 = arith.constant 0 : index
    %c3_114 = arith.constant 3 : index
    %c0_115 = arith.constant 0 : index
    %112 = vector.load %arg16[%c0_112, %c0_113, %c3_114, %c0_115] : memref<2x7x16x128xf32, #tpu.memory_space<vmem>>, vector<2x1x1x128xf32>
    %113 = vector.shape_cast %112 : vector<2x1x1x128xf32> to vector<2x128xf32>
    %114 = arith.maximumf %111, %113 : vector<2x128xf32>
    %c0_116 = arith.constant 0 : index
    %c128 = arith.constant 128 : index
    %115 = vector.load %arg17[%c0_116, %c128] : memref<2x6272xf32, #tpu.memory_space<vmem>>, vector<2x128xf32>
    tpu.vector_store %arg17[%c0_116, %c128], %114 {strides = array<i32>} : memref<2x6272xf32, #tpu.memory_space<vmem>>, vector<2x128xf32>,
    %c0_117 = arith.constant 0 : index
    %c0_118 = arith.constant 0 : index
    %c4_119 = arith.constant 4 : index
    %c0_120 = arith.constant 0 : index
    %116 = vector.load %arg16[%c0_117, %c0_118, %c4_119, %c0_120] : memref<2x7x16x128xf32, #tpu.memory_space<vmem>>, vector<2x1x1x128xf32>
    %117 = vector.shape_cast %116 : vector<2x1x1x128xf32> to vector<2x128xf32>
    %c0_121 = arith.constant 0 : index
    %c0_122 = arith.constant 0 : index
    %c5_123 = arith.constant 5 : index
    %c0_124 = arith.constant 0 : index
    %118 = vector.load %arg16[%c0_121, %c0_122, %c5_123, %c0_124] : memref<2x7x16x128xf32, #tpu.memory_space<vmem>>, vector<2x1x1x128xf32>
    %119 = vector.shape_cast %118 : vector<2x1x1x128xf32> to vector<2x128xf32>
    %120 = arith.maximumf %117, %119 : vector<2x128xf32>
    %c0_125 = arith.constant 0 : index
    %c256 = arith.constant 256 : index
    %121 = vector.load %arg17[%c0_125, %c256] : memref<2x6272xf32, #tpu.memory_space<vmem>>, vector<2x128xf32>
    tpu.vector_store %arg17[%c0_125, %c256], %120 {strides = array<i32>} : memref<2x6272xf32, #tpu.memory_space<vmem>>, vector<2x128xf32>,
    %c0_126 = arith.constant 0 : index
    %c0_127 = arith.constant 0 : index
    %c6_128 = arith.constant 6 : index
    %c0_129 = arith.constant 0 : index
    %122 = vector.load %arg16[%c0_126, %c0_127, %c6_128, %c0_129] : memref<2x7x16x128xf32, #tpu.memory_space<vmem>>, vector<2x1x1x128xf32>
    %123 = vector.shape_cast %122 : vector<2x1x1x128xf32> to vector<2x128xf32>
    %c0_130 = arith.constant 0 : index
    %c0_131 = arith.constant 0 : index
    %c7_132 = arith.constant 7 : index
    %c0_133 = arith.constant 0 : index
    %124 = vector.load %arg16[%c0_130, %c0_131, %c7_132, %c0_133] : memref<2x7x16x128xf32, #tpu.memory_space<vmem>>, vector<2x1x1x128xf32>
    %125 = vector.shape_cast %124 : vector<2x1x1x128xf32> to vector<2x128xf32>
    %126 = arith.maximumf %123, %125 : vector<2x128xf32>
    %c0_134 = arith.constant 0 : index
    %c384 = arith.constant 384 : index
    %127 = vector.load %arg17[%c0_134, %c384] : memref<2x6272xf32, #tpu.memory_space<vmem>>, vector<2x128xf32>
    tpu.vector_store %arg17[%c0_134, %c384], %126 {strides = array<i32>} : memref<2x6272xf32, #tpu.memory_space<vmem>>, vector<2x128xf32>,
    %c0_135 = arith.constant 0 : index
    %c0_136 = arith.constant 0 : index
    %c8_137 = arith.constant 8 : index
    %c0_138 = arith.constant 0 : index
    %128 = vector.load %arg16[%c0_135, %c0_136, %c8_137, %c0_138] : memref<2x7x16x128xf32, #tpu.memory_space<vmem>>, vector<2x1x1x128xf32>
    %129 = vector.shape_cast %128 : vector<2x1x1x128xf32> to vector<2x128xf32>
    %c0_139 = arith.constant 0 : index
    %c0_140 = arith.constant 0 : index
    %c9_141 = arith.constant 9 : index
    %c0_142 = arith.constant 0 : index
    %130 = vector.load %arg16[%c0_139, %c0_140, %c9_141, %c0_142] : memref<2x7x16x128xf32, #tpu.memory_space<vmem>>, vector<2x1x1x128xf32>
    %131 = vector.shape_cast %130 : vector<2x1x1x128xf32> to vector<2x128xf32>
    %132 = arith.maximumf %129, %131 : vector<2x128xf32>
    %c0_143 = arith.constant 0 : index
    %c512 = arith.constant 512 : index
    %133 = vector.load %arg17[%c0_143, %c512] : memref<2x6272xf32, #tpu.memory_space<vmem>>, vector<2x128xf32>
    tpu.vector_store %arg17[%c0_143, %c512], %132 {strides = array<i32>} : memref<2x6272xf32, #tpu.memory_space<vmem>>, vector<2x128xf32>,
    %c0_144 = arith.constant 0 : index
    %c0_145 = arith.constant 0 : index
    %c10 = arith.constant 10 : index
    %c0_146 = arith.constant 0 : index
    %134 = vector.load %arg16[%c0_144, %c0_145, %c10, %c0_146] : memref<2x7x16x128xf32, #tpu.memory_space<vmem>>, vector<2x1x1x128xf32>
    %135 = vector.shape_cast %134 : vector<2x1x1x128xf32> to vector<2x128xf32>
    %c0_147 = arith.constant 0 : index
    %c0_148 = arith.constant 0 : index
    %c11 = arith.constant 11 : index
    %c0_149 = arith.constant 0 : index
    %136 = vector.load %arg16[%c0_147, %c0_148, %c11, %c0_149] : memref<2x7x16x128xf32, #tpu.memory_space<vmem>>, vector<2x1x1x128xf32>
    %137 = vector.shape_cast %136 : vector<2x1x1x128xf32> to vector<2x128xf32>
    %138 = arith.maximumf %135, %137 : vector<2x128xf32>
    %c0_150 = arith.constant 0 : index
    %c640 = arith.constant 640 : index
    %139 = vector.load %arg17[%c0_150, %c640] : memref<2x6272xf32, #tpu.memory_space<vmem>>, vector<2x128xf32>
    tpu.vector_store %arg17[%c0_150, %c640], %138 {strides = array<i32>} : memref<2x6272xf32, #tpu.memory_space<vmem>>, vector<2x128xf32>,
    %c0_151 = arith.constant 0 : index
    %c0_152 = arith.constant 0 : index
    %c12 = arith.constant 12 : index
    %c0_153 = arith.constant 0 : index
    %140 = vector.load %arg16[%c0_151, %c0_152, %c12, %c0_153] : memref<2x7x16x128xf32, #tpu.memory_space<vmem>>, vector<2x1x1x128xf32>
    %141 = vector.shape_cast %140 : vector<2x1x1x128xf32> to vector<2x128xf32>
    %c0_154 = arith.constant 0 : index
    %c0_155 = arith.constant 0 : index
    %c13 = arith.constant 13 : index
    %c0_156 = arith.constant 0 : index
    %142 = vector.load %arg16[%c0_154, %c0_155, %c13, %c0_156] : memref<2x7x16x128xf32, #tpu.memory_space<vmem>>, vector<2x1x1x128xf32>
    %143 = vector.shape_cast %142 : vector<2x1x1x128xf32> to vector<2x128xf32>
    %144 = arith.maximumf %141, %143 : vector<2x128xf32>
    %c0_157 = arith.constant 0 : index
    %c768 = arith.constant 768 : index
    %145 = vector.load %arg17[%c0_157, %c768] : memref<2x6272xf32, #tpu.memory_space<vmem>>, vector<2x128xf32>
    tpu.vector_store %arg17[%c0_157, %c768], %144 {strides = array<i32>} : memref<2x6272xf32, #tpu.memory_space<vmem>>, vector<2x128xf32>,
    %c0_158 = arith.constant 0 : index
    %c1_159 = arith.constant 1 : index
    %c0_160 = arith.constant 0 : index
    %c0_161 = arith.constant 0 : index
    %146 = vector.load %arg16[%c0_158, %c1_159, %c0_160, %c0_161] : memref<2x7x16x128xf32, #tpu.memory_space<vmem>>, vector<2x1x1x128xf32>
    %147 = vector.shape_cast %146 : vector<2x1x1x128xf32> to vector<2x128xf32>
    %c0_162 = arith.constant 0 : index
    %c1_163 = arith.constant 1 : index
    %c1_164 = arith.constant 1 : index
    %c0_165 = arith.constant 0 : index
    %148 = vector.load %arg16[%c0_162, %c1_163, %c1_164, %c0_165] : memref<2x7x16x128xf32, #tpu.memory_space<vmem>>, vector<2x1x1x128xf32>
    %149 = vector.shape_cast %148 : vector<2x1x1x128xf32> to vector<2x128xf32>
    %150 = arith.maximumf %147, %149 : vector<2x128xf32>
    %c0_166 = arith.constant 0 : index
    %c896 = arith.constant 896 : index
    %151 = vector.load %arg17[%c0_166, %c896] : memref<2x6272xf32, #tpu.memory_space<vmem>>, vector<2x128xf32>
    tpu.vector_store %arg17[%c0_166, %c896], %150 {strides = array<i32>} : memref<2x6272xf32, #tpu.memory_space<vmem>>, vector<2x128xf32>,
    %c0_167 = arith.constant 0 : index
    %c1_168 = arith.constant 1 : index
    %c2_169 = arith.constant 2 : index
    %c0_170 = arith.constant 0 : index
    %152 = vector.load %arg16[%c0_167, %c1_168, %c2_169, %c0_170] : memref<2x7x16x128xf32, #tpu.memory_space<vmem>>, vector<2x1x1x128xf32>
    %153 = vector.shape_cast %152 : vector<2x1x1x128xf32> to vector<2x128xf32>
    %c0_171 = arith.constant 0 : index
    %c1_172 = arith.constant 1 : index
    %c3_173 = arith.constant 3 : index
    %c0_174 = arith.constant 0 : index
    %154 = vector.load %arg16[%c0_171, %c1_172, %c3_173, %c0_174] : memref<2x7x16x128xf32, #tpu.memory_space<vmem>>, vector<2x1x1x128xf32>
    %155 = vector.shape_cast %154 : vector<2x1x1x128xf32> to vector<2x128xf32>
    %156 = arith.maximumf %153, %155 : vector<2x128xf32>
    %c0_175 = arith.constant 0 : index
    %c1024 = arith.constant 1024 : index
    %157 = vector.load %arg17[%c0_175, %c1024] : memref<2x6272xf32, #tpu.memory_space<vmem>>, vector<2x128xf32>
    tpu.vector_store %arg17[%c0_175, %c1024], %156 {strides = array<i32>} : memref<2x6272xf32, #tpu.memory_space<vmem>>, vector<2x128xf32>,
    %c0_176 = arith.constant 0 : index
    %c1_177 = arith.constant 1 : index
    %c4_178 = arith.constant 4 : index
    %c0_179 = arith.constant 0 : index
    %158 = vector.load %arg16[%c0_176, %c1_177, %c4_178, %c0_179] : memref<2x7x16x128xf32, #tpu.memory_space<vmem>>, vector<2x1x1x128xf32>
    %159 = vector.shape_cast %158 : vector<2x1x1x128xf32> to vector<2x128xf32>
    %c0_180 = arith.constant 0 : index
    %c1_181 = arith.constant 1 : index
    %c5_182 = arith.constant 5 : index
    %c0_183 = arith.constant 0 : index
    %160 = vector.load %arg16[%c0_180, %c1_181, %c5_182, %c0_183] : memref<2x7x16x128xf32, #tpu.memory_space<vmem>>, vector<2x1x1x128xf32>
    %161 = vector.shape_cast %160 : vector<2x1x1x128xf32> to vector<2x128xf32>
    %162 = arith.maximumf %159, %161 : vector<2x128xf32>
    %c0_184 = arith.constant 0 : index
    %c1152 = arith.constant 1152 : index
    %163 = vector.load %arg17[%c0_184, %c1152] : memref<2x6272xf32, #tpu.memory_space<vmem>>, vector<2x128xf32>
    tpu.vector_store %arg17[%c0_184, %c1152], %162 {strides = array<i32>} : memref<2x6272xf32, #tpu.memory_space<vmem>>, vector<2x128xf32>,
    %c0_185 = arith.constant 0 : index
    %c1_186 = arith.constant 1 : index
    %c6_187 = arith.constant 6 : index
    %c0_188 = arith.constant 0 : index
    %164 = vector.load %arg16[%c0_185, %c1_186, %c6_187, %c0_188] : memref<2x7x16x128xf32, #tpu.memory_space<vmem>>, vector<2x1x1x128xf32>
    %165 = vector.shape_cast %164 : vector<2x1x1x128xf32> to vector<2x128xf32>
    %c0_189 = arith.constant 0 : index
    %c1_190 = arith.constant 1 : index
    %c7_191 = arith.constant 7 : index
    %c0_192 = arith.constant 0 : index
    %166 = vector.load %arg16[%c0_189, %c1_190, %c7_191, %c0_192] : memref<2x7x16x128xf32, #tpu.memory_space<vmem>>, vector<2x1x1x128xf32>
    %167 = vector.shape_cast %166 : vector<2x1x1x128xf32> to vector<2x128xf32>
    %168 = arith.maximumf %165, %167 : vector<2x128xf32>
    %c0_193 = arith.constant 0 : index
    %c1280 = arith.constant 1280 : index
    %169 = vector.load %arg17[%c0_193, %c1280] : memref<2x6272xf32, #tpu.memory_space<vmem>>, vector<2x128xf32>
    tpu.vector_store %arg17[%c0_193, %c1280], %168 {strides = array<i32>} : memref<2x6272xf32, #tpu.memory_space<vmem>>, vector<2x128xf32>,
    %c0_194 = arith.constant 0 : index
    %c1_195 = arith.constant 1 : index
    %c8_196 = arith.constant 8 : index
    %c0_197 = arith.constant 0 : index
    %170 = vector.load %arg16[%c0_194, %c1_195, %c8_196, %c0_197] : memref<2x7x16x128xf32, #tpu.memory_space<vmem>>, vector<2x1x1x128xf32>
    %171 = vector.shape_cast %170 : vector<2x1x1x128xf32> to vector<2x128xf32>
    %c0_198 = arith.constant 0 : index
    %c1_199 = arith.constant 1 : index
    %c9_200 = arith.constant 9 : index
    %c0_201 = arith.constant 0 : index
    %172 = vector.load %arg16[%c0_198, %c1_199, %c9_200, %c0_201] : memref<2x7x16x128xf32, #tpu.memory_space<vmem>>, vector<2x1x1x128xf32>
    %173 = vector.shape_cast %172 : vector<2x1x1x128xf32> to vector<2x128xf32>
    %174 = arith.maximumf %171, %173 : vector<2x128xf32>
    %c0_202 = arith.constant 0 : index
    %c1408 = arith.constant 1408 : index
    %175 = vector.load %arg17[%c0_202, %c1408] : memref<2x6272xf32, #tpu.memory_space<vmem>>, vector<2x128xf32>
    tpu.vector_store %arg17[%c0_202, %c1408], %174 {strides = array<i32>} : memref<2x6272xf32, #tpu.memory_space<vmem>>, vector<2x128xf32>,
    %c0_203 = arith.constant 0 : index
    %c1_204 = arith.constant 1 : index
    %c10_205 = arith.constant 10 : index
    %c0_206 = arith.constant 0 : index
    %176 = vector.load %arg16[%c0_203, %c1_204, %c10_205, %c0_206] : memref<2x7x16x128xf32, #tpu.memory_space<vmem>>, vector<2x1x1x128xf32>
    %177 = vector.shape_cast %176 : vector<2x1x1x128xf32> to vector<2x128xf32>
    %c0_207 = arith.constant 0 : index
    %c1_208 = arith.constant 1 : index
    %c11_209 = arith.constant 11 : index
    %c0_210 = arith.constant 0 : index
    %178 = vector.load %arg16[%c0_207, %c1_208, %c11_209, %c0_210] : memref<2x7x16x128xf32, #tpu.memory_space<vmem>>, vector<2x1x1x128xf32>
    %179 = vector.shape_cast %178 : vector<2x1x1x128xf32> to vector<2x128xf32>
    %180 = arith.maximumf %177, %179 : vector<2x128xf32>
    %c0_211 = arith.constant 0 : index
    %c1536 = arith.constant 1536 : index
    %181 = vector.load %arg17[%c0_211, %c1536] : memref<2x6272xf32, #tpu.memory_space<vmem>>, vector<2x128xf32>
    tpu.vector_store %arg17[%c0_211, %c1536], %180 {strides = array<i32>} : memref<2x6272xf32, #tpu.memory_space<vmem>>, vector<2x128xf32>,
    %c0_212 = arith.constant 0 : index
    %c1_213 = arith.constant 1 : index
    %c12_214 = arith.constant 12 : index
    %c0_215 = arith.constant 0 : index
    %182 = vector.load %arg16[%c0_212, %c1_213, %c12_214, %c0_215] : memref<2x7x16x128xf32, #tpu.memory_space<vmem>>, vector<2x1x1x128xf32>
    %183 = vector.shape_cast %182 : vector<2x1x1x128xf32> to vector<2x128xf32>
    %c0_216 = arith.constant 0 : index
    %c1_217 = arith.constant 1 : index
    %c13_218 = arith.constant 13 : index
    %c0_219 = arith.constant 0 : index
    %184 = vector.load %arg16[%c0_216, %c1_217, %c13_218, %c0_219] : memref<2x7x16x128xf32, #tpu.memory_space<vmem>>, vector<2x1x1x128xf32>
    %185 = vector.shape_cast %184 : vector<2x1x1x128xf32> to vector<2x128xf32>
    %186 = arith.maximumf %183, %185 : vector<2x128xf32>
    %c0_220 = arith.constant 0 : index
    %c1664 = arith.constant 1664 : index
    %187 = vector.load %arg17[%c0_220, %c1664] : memref<2x6272xf32, #tpu.memory_space<vmem>>, vector<2x128xf32>
    tpu.vector_store %arg17[%c0_220, %c1664], %186 {strides = array<i32>} : memref<2x6272xf32, #tpu.memory_space<vmem>>, vector<2x128xf32>,
    %c0_221 = arith.constant 0 : index
    %c2_222 = arith.constant 2 : index
    %c0_223 = arith.constant 0 : index
    %c0_224 = arith.constant 0 : index
    %188 = vector.load %arg16[%c0_221, %c2_222, %c0_223, %c0_224] : memref<2x7x16x128xf32, #tpu.memory_space<vmem>>, vector<2x1x1x128xf32>
    %189 = vector.shape_cast %188 : vector<2x1x1x128xf32> to vector<2x128xf32>
    %c0_225 = arith.constant 0 : index
    %c2_226 = arith.constant 2 : index
    %c1_227 = arith.constant 1 : index
    %c0_228 = arith.constant 0 : index
    %190 = vector.load %arg16[%c0_225, %c2_226, %c1_227, %c0_228] : memref<2x7x16x128xf32, #tpu.memory_space<vmem>>, vector<2x1x1x128xf32>
    %191 = vector.shape_cast %190 : vector<2x1x1x128xf32> to vector<2x128xf32>
    %192 = arith.maximumf %189, %191 : vector<2x128xf32>
    %c0_229 = arith.constant 0 : index
    %c1792 = arith.constant 1792 : index
    %193 = vector.load %arg17[%c0_229, %c1792] : memref<2x6272xf32, #tpu.memory_space<vmem>>, vector<2x128xf32>
    tpu.vector_store %arg17[%c0_229, %c1792], %192 {strides = array<i32>} : memref<2x6272xf32, #tpu.memory_space<vmem>>, vector<2x128xf32>,
    %c0_230 = arith.constant 0 : index
    %c2_231 = arith.constant 2 : index
    %c2_232 = arith.constant 2 : index
    %c0_233 = arith.constant 0 : index
    %194 = vector.load %arg16[%c0_230, %c2_231, %c2_232, %c0_233] : memref<2x7x16x128xf32, #tpu.memory_space<vmem>>, vector<2x1x1x128xf32>
    %195 = vector.shape_cast %194 : vector<2x1x1x128xf32> to vector<2x128xf32>
    %c0_234 = arith.constant 0 : index
    %c2_235 = arith.constant 2 : index
    %c3_236 = arith.constant 3 : index
    %c0_237 = arith.constant 0 : index
    %196 = vector.load %arg16[%c0_234, %c2_235, %c3_236, %c0_237] : memref<2x7x16x128xf32, #tpu.memory_space<vmem>>, vector<2x1x1x128xf32>
    %197 = vector.shape_cast %196 : vector<2x1x1x128xf32> to vector<2x128xf32>
    %198 = arith.maximumf %195, %197 : vector<2x128xf32>
    %c0_238 = arith.constant 0 : index
    %c1920 = arith.constant 1920 : index
    %199 = vector.load %arg17[%c0_238, %c1920] : memref<2x6272xf32, #tpu.memory_space<vmem>>, vector<2x128xf32>
    tpu.vector_store %arg17[%c0_238, %c1920], %198 {strides = array<i32>} : memref<2x6272xf32, #tpu.memory_space<vmem>>, vector<2x128xf32>,
    %c0_239 = arith.constant 0 : index
    %c2_240 = arith.constant 2 : index
    %c4_241 = arith.constant 4 : index
    %c0_242 = arith.constant 0 : index
    %200 = vector.load %arg16[%c0_239, %c2_240, %c4_241, %c0_242] : memref<2x7x16x128xf32, #tpu.memory_space<vmem>>, vector<2x1x1x128xf32>
    %201 = vector.shape_cast %200 : vector<2x1x1x128xf32> to vector<2x128xf32>
    %c0_243 = arith.constant 0 : index
    %c2_244 = arith.constant 2 : index
    %c5_245 = arith.constant 5 : index
    %c0_246 = arith.constant 0 : index
    %202 = vector.load %arg16[%c0_243, %c2_244, %c5_245, %c0_246] : memref<2x7x16x128xf32, #tpu.memory_space<vmem>>, vector<2x1x1x128xf32>
    %203 = vector.shape_cast %202 : vector<2x1x1x128xf32> to vector<2x128xf32>
    %204 = arith.maximumf %201, %203 : vector<2x128xf32>
    %c0_247 = arith.constant 0 : index
    %c2048 = arith.constant 2048 : index
    %205 = vector.load %arg17[%c0_247, %c2048] : memref<2x6272xf32, #tpu.memory_space<vmem>>, vector<2x128xf32>
    tpu.vector_store %arg17[%c0_247, %c2048], %204 {strides = array<i32>} : memref<2x6272xf32, #tpu.memory_space<vmem>>, vector<2x128xf32>,
    %c0_248 = arith.constant 0 : index
    %c2_249 = arith.constant 2 : index
    %c6_250 = arith.constant 6 : index
    %c0_251 = arith.constant 0 : index
    %206 = vector.load %arg16[%c0_248, %c2_249, %c6_250, %c0_251] : memref<2x7x16x128xf32, #tpu.memory_space<vmem>>, vector<2x1x1x128xf32>
    %207 = vector.shape_cast %206 : vector<2x1x1x128xf32> to vector<2x128xf32>
    %c0_252 = arith.constant 0 : index
    %c2_253 = arith.constant 2 : index
    %c7_254 = arith.constant 7 : index
    %c0_255 = arith.constant 0 : index
    %208 = vector.load %arg16[%c0_252, %c2_253, %c7_254, %c0_255] : memref<2x7x16x128xf32, #tpu.memory_space<vmem>>, vector<2x1x1x128xf32>
    %209 = vector.shape_cast %208 : vector<2x1x1x128xf32> to vector<2x128xf32>
    %210 = arith.maximumf %207, %209 : vector<2x128xf32>
    %c0_256 = arith.constant 0 : index
    %c2176 = arith.constant 2176 : index
    %211 = vector.load %arg17[%c0_256, %c2176] : memref<2x6272xf32, #tpu.memory_space<vmem>>, vector<2x128xf32>
    tpu.vector_store %arg17[%c0_256, %c2176], %210 {strides = array<i32>} : memref<2x6272xf32, #tpu.memory_space<vmem>>, vector<2x128xf32>,
    %c0_257 = arith.constant 0 : index
    %c2_258 = arith.constant 2 : index
    %c8_259 = arith.constant 8 : index
    %c0_260 = arith.constant 0 : index
    %212 = vector.load %arg16[%c0_257, %c2_258, %c8_259, %c0_260] : memref<2x7x16x128xf32, #tpu.memory_space<vmem>>, vector<2x1x1x128xf32>
    %213 = vector.shape_cast %212 : vector<2x1x1x128xf32> to vector<2x128xf32>
    %c0_261 = arith.constant 0 : index
    %c2_262 = arith.constant 2 : index
    %c9_263 = arith.constant 9 : index
    %c0_264 = arith.constant 0 : index
    %214 = vector.load %arg16[%c0_261, %c2_262, %c9_263, %c0_264] : memref<2x7x16x128xf32, #tpu.memory_space<vmem>>, vector<2x1x1x128xf32>
    %215 = vector.shape_cast %214 : vector<2x1x1x128xf32> to vector<2x128xf32>
    %216 = arith.maximumf %213, %215 : vector<2x128xf32>
    %c0_265 = arith.constant 0 : index
    %c2304 = arith.constant 2304 : index
    %217 = vector.load %arg17[%c0_265, %c2304] : memref<2x6272xf32, #tpu.memory_space<vmem>>, vector<2x128xf32>
    tpu.vector_store %arg17[%c0_265, %c2304], %216 {strides = array<i32>} : memref<2x6272xf32, #tpu.memory_space<vmem>>, vector<2x128xf32>,
    %c0_266 = arith.constant 0 : index
    %c2_267 = arith.constant 2 : index
    %c10_268 = arith.constant 10 : index
    %c0_269 = arith.constant 0 : index
    %218 = vector.load %arg16[%c0_266, %c2_267, %c10_268, %c0_269] : memref<2x7x16x128xf32, #tpu.memory_space<vmem>>, vector<2x1x1x128xf32>
    %219 = vector.shape_cast %218 : vector<2x1x1x128xf32> to vector<2x128xf32>
    %c0_270 = arith.constant 0 : index
    %c2_271 = arith.constant 2 : index
    %c11_272 = arith.constant 11 : index
    %c0_273 = arith.constant 0 : index
    %220 = vector.load %arg16[%c0_270, %c2_271, %c11_272, %c0_273] : memref<2x7x16x128xf32, #tpu.memory_space<vmem>>, vector<2x1x1x128xf32>
    %221 = vector.shape_cast %220 : vector<2x1x1x128xf32> to vector<2x128xf32>
    %222 = arith.maximumf %219, %221 : vector<2x128xf32>
    %c0_274 = arith.constant 0 : index
    %c2432 = arith.constant 2432 : index
    %223 = vector.load %arg17[%c0_274, %c2432] : memref<2x6272xf32, #tpu.memory_space<vmem>>, vector<2x128xf32>
    tpu.vector_store %arg17[%c0_274, %c2432], %222 {strides = array<i32>} : memref<2x6272xf32, #tpu.memory_space<vmem>>, vector<2x128xf32>,
    %c0_275 = arith.constant 0 : index
    %c2_276 = arith.constant 2 : index
    %c12_277 = arith.constant 12 : index
    %c0_278 = arith.constant 0 : index
    %224 = vector.load %arg16[%c0_275, %c2_276, %c12_277, %c0_278] : memref<2x7x16x128xf32, #tpu.memory_space<vmem>>, vector<2x1x1x128xf32>
    %225 = vector.shape_cast %224 : vector<2x1x1x128xf32> to vector<2x128xf32>
    %c0_279 = arith.constant 0 : index
    %c2_280 = arith.constant 2 : index
    %c13_281 = arith.constant 13 : index
    %c0_282 = arith.constant 0 : index
    %226 = vector.load %arg16[%c0_279, %c2_280, %c13_281, %c0_282] : memref<2x7x16x128xf32, #tpu.memory_space<vmem>>, vector<2x1x1x128xf32>
    %227 = vector.shape_cast %226 : vector<2x1x1x128xf32> to vector<2x128xf32>
    %228 = arith.maximumf %225, %227 : vector<2x128xf32>
    %c0_283 = arith.constant 0 : index
    %c2560 = arith.constant 2560 : index
    %229 = vector.load %arg17[%c0_283, %c2560] : memref<2x6272xf32, #tpu.memory_space<vmem>>, vector<2x128xf32>
    tpu.vector_store %arg17[%c0_283, %c2560], %228 {strides = array<i32>} : memref<2x6272xf32, #tpu.memory_space<vmem>>, vector<2x128xf32>,
    %c0_284 = arith.constant 0 : index
    %c3_285 = arith.constant 3 : index
    %c0_286 = arith.constant 0 : index
    %c0_287 = arith.constant 0 : index
    %230 = vector.load %arg16[%c0_284, %c3_285, %c0_286, %c0_287] : memref<2x7x16x128xf32, #tpu.memory_space<vmem>>, vector<2x1x1x128xf32>
    %231 = vector.shape_cast %230 : vector<2x1x1x128xf32> to vector<2x128xf32>
    %c0_288 = arith.constant 0 : index
    %c3_289 = arith.constant 3 : index
    %c1_290 = arith.constant 1 : index
    %c0_291 = arith.constant 0 : index
    %232 = vector.load %arg16[%c0_288, %c3_289, %c1_290, %c0_291] : memref<2x7x16x128xf32, #tpu.memory_space<vmem>>, vector<2x1x1x128xf32>
    %233 = vector.shape_cast %232 : vector<2x1x1x128xf32> to vector<2x128xf32>
    %234 = arith.maximumf %231, %233 : vector<2x128xf32>
    %c0_292 = arith.constant 0 : index
    %c2688 = arith.constant 2688 : index
    %235 = vector.load %arg17[%c0_292, %c2688] : memref<2x6272xf32, #tpu.memory_space<vmem>>, vector<2x128xf32>
    tpu.vector_store %arg17[%c0_292, %c2688], %234 {strides = array<i32>} : memref<2x6272xf32, #tpu.memory_space<vmem>>, vector<2x128xf32>,
    %c0_293 = arith.constant 0 : index
    %c3_294 = arith.constant 3 : index
    %c2_295 = arith.constant 2 : index
    %c0_296 = arith.constant 0 : index
    %236 = vector.load %arg16[%c0_293, %c3_294, %c2_295, %c0_296] : memref<2x7x16x128xf32, #tpu.memory_space<vmem>>, vector<2x1x1x128xf32>
    %237 = vector.shape_cast %236 : vector<2x1x1x128xf32> to vector<2x128xf32>
    %c0_297 = arith.constant 0 : index
    %c3_298 = arith.constant 3 : index
    %c3_299 = arith.constant 3 : index
    %c0_300 = arith.constant 0 : index
    %238 = vector.load %arg16[%c0_297, %c3_298, %c3_299, %c0_300] : memref<2x7x16x128xf32, #tpu.memory_space<vmem>>, vector<2x1x1x128xf32>
    %239 = vector.shape_cast %238 : vector<2x1x1x128xf32> to vector<2x128xf32>
    %240 = arith.maximumf %237, %239 : vector<2x128xf32>
    %c0_301 = arith.constant 0 : index
    %c2816 = arith.constant 2816 : index
    %241 = vector.load %arg17[%c0_301, %c2816] : memref<2x6272xf32, #tpu.memory_space<vmem>>, vector<2x128xf32>
    tpu.vector_store %arg17[%c0_301, %c2816], %240 {strides = array<i32>} : memref<2x6272xf32, #tpu.memory_space<vmem>>, vector<2x128xf32>,
    %c0_302 = arith.constant 0 : index
    %c3_303 = arith.constant 3 : index
    %c4_304 = arith.constant 4 : index
    %c0_305 = arith.constant 0 : index
    %242 = vector.load %arg16[%c0_302, %c3_303, %c4_304, %c0_305] : memref<2x7x16x128xf32, #tpu.memory_space<vmem>>, vector<2x1x1x128xf32>
    %243 = vector.shape_cast %242 : vector<2x1x1x128xf32> to vector<2x128xf32>
    %c0_306 = arith.constant 0 : index
    %c3_307 = arith.constant 3 : index
    %c5_308 = arith.constant 5 : index
    %c0_309 = arith.constant 0 : index
    %244 = vector.load %arg16[%c0_306, %c3_307, %c5_308, %c0_309] : memref<2x7x16x128xf32, #tpu.memory_space<vmem>>, vector<2x1x1x128xf32>
    %245 = vector.shape_cast %244 : vector<2x1x1x128xf32> to vector<2x128xf32>
    %246 = arith.maximumf %243, %245 : vector<2x128xf32>
    %c0_310 = arith.constant 0 : index
    %c2944 = arith.constant 2944 : index
    %247 = vector.load %arg17[%c0_310, %c2944] : memref<2x6272xf32, #tpu.memory_space<vmem>>, vector<2x128xf32>
    tpu.vector_store %arg17[%c0_310, %c2944], %246 {strides = array<i32>} : memref<2x6272xf32, #tpu.memory_space<vmem>>, vector<2x128xf32>,
    %c0_311 = arith.constant 0 : index
    %c3_312 = arith.constant 3 : index
    %c6_313 = arith.constant 6 : index
    %c0_314 = arith.constant 0 : index
    %248 = vector.load %arg16[%c0_311, %c3_312, %c6_313, %c0_314] : memref<2x7x16x128xf32, #tpu.memory_space<vmem>>, vector<2x1x1x128xf32>
    %249 = vector.shape_cast %248 : vector<2x1x1x128xf32> to vector<2x128xf32>
    %c0_315 = arith.constant 0 : index
    %c3_316 = arith.constant 3 : index
    %c7_317 = arith.constant 7 : index
    %c0_318 = arith.constant 0 : index
    %250 = vector.load %arg16[%c0_315, %c3_316, %c7_317, %c0_318] : memref<2x7x16x128xf32, #tpu.memory_space<vmem>>, vector<2x1x1x128xf32>
    %251 = vector.shape_cast %250 : vector<2x1x1x128xf32> to vector<2x128xf32>
    %252 = arith.maximumf %249, %251 : vector<2x128xf32>
    %c0_319 = arith.constant 0 : index
    %c3072 = arith.constant 3072 : index
    %253 = vector.load %arg17[%c0_319, %c3072] : memref<2x6272xf32, #tpu.memory_space<vmem>>, vector<2x128xf32>
    tpu.vector_store %arg17[%c0_319, %c3072], %252 {strides = array<i32>} : memref<2x6272xf32, #tpu.memory_space<vmem>>, vector<2x128xf32>,
    %c0_320 = arith.constant 0 : index
    %c3_321 = arith.constant 3 : index
    %c8_322 = arith.constant 8 : index
    %c0_323 = arith.constant 0 : index
    %254 = vector.load %arg16[%c0_320, %c3_321, %c8_322, %c0_323] : memref<2x7x16x128xf32, #tpu.memory_space<vmem>>, vector<2x1x1x128xf32>
    %255 = vector.shape_cast %254 : vector<2x1x1x128xf32> to vector<2x128xf32>
    %c0_324 = arith.constant 0 : index
    %c3_325 = arith.constant 3 : index
    %c9_326 = arith.constant 9 : index
    %c0_327 = arith.constant 0 : index
    %256 = vector.load %arg16[%c0_324, %c3_325, %c9_326, %c0_327] : memref<2x7x16x128xf32, #tpu.memory_space<vmem>>, vector<2x1x1x128xf32>
    %257 = vector.shape_cast %256 : vector<2x1x1x128xf32> to vector<2x128xf32>
    %258 = arith.maximumf %255, %257 : vector<2x128xf32>
    %c0_328 = arith.constant 0 : index
    %c3200 = arith.constant 3200 : index
    %259 = vector.load %arg17[%c0_328, %c3200] : memref<2x6272xf32, #tpu.memory_space<vmem>>, vector<2x128xf32>
    tpu.vector_store %arg17[%c0_328, %c3200], %258 {strides = array<i32>} : memref<2x6272xf32, #tpu.memory_space<vmem>>, vector<2x128xf32>,
    %c0_329 = arith.constant 0 : index
    %c3_330 = arith.constant 3 : index
    %c10_331 = arith.constant 10 : index
    %c0_332 = arith.constant 0 : index
    %260 = vector.load %arg16[%c0_329, %c3_330, %c10_331, %c0_332] : memref<2x7x16x128xf32, #tpu.memory_space<vmem>>, vector<2x1x1x128xf32>
    %261 = vector.shape_cast %260 : vector<2x1x1x128xf32> to vector<2x128xf32>
    %c0_333 = arith.constant 0 : index
    %c3_334 = arith.constant 3 : index
    %c11_335 = arith.constant 11 : index
    %c0_336 = arith.constant 0 : index
    %262 = vector.load %arg16[%c0_333, %c3_334, %c11_335, %c0_336] : memref<2x7x16x128xf32, #tpu.memory_space<vmem>>, vector<2x1x1x128xf32>
    %263 = vector.shape_cast %262 : vector<2x1x1x128xf32> to vector<2x128xf32>
    %264 = arith.maximumf %261, %263 : vector<2x128xf32>
    %c0_337 = arith.constant 0 : index
    %c3328 = arith.constant 3328 : index
    %265 = vector.load %arg17[%c0_337, %c3328] : memref<2x6272xf32, #tpu.memory_space<vmem>>, vector<2x128xf32>
    tpu.vector_store %arg17[%c0_337, %c3328], %264 {strides = array<i32>} : memref<2x6272xf32, #tpu.memory_space<vmem>>, vector<2x128xf32>,
    %c0_338 = arith.constant 0 : index
    %c3_339 = arith.constant 3 : index
    %c12_340 = arith.constant 12 : index
    %c0_341 = arith.constant 0 : index
    %266 = vector.load %arg16[%c0_338, %c3_339, %c12_340, %c0_341] : memref<2x7x16x128xf32, #tpu.memory_space<vmem>>, vector<2x1x1x128xf32>
    %267 = vector.shape_cast %266 : vector<2x1x1x128xf32> to vector<2x128xf32>
    %c0_342 = arith.constant 0 : index
    %c3_343 = arith.constant 3 : index
    %c13_344 = arith.constant 13 : index
    %c0_345 = arith.constant 0 : index
    %268 = vector.load %arg16[%c0_342, %c3_343, %c13_344, %c0_345] : memref<2x7x16x128xf32, #tpu.memory_space<vmem>>, vector<2x1x1x128xf32>
    %269 = vector.shape_cast %268 : vector<2x1x1x128xf32> to vector<2x128xf32>
    %270 = arith.maximumf %267, %269 : vector<2x128xf32>
    %c0_346 = arith.constant 0 : index
    %c3456 = arith.constant 3456 : index
    %271 = vector.load %arg17[%c0_346, %c3456] : memref<2x6272xf32, #tpu.memory_space<vmem>>, vector<2x128xf32>
    tpu.vector_store %arg17[%c0_346, %c3456], %270 {strides = array<i32>} : memref<2x6272xf32, #tpu.memory_space<vmem>>, vector<2x128xf32>,
    %c0_347 = arith.constant 0 : index
    %c4_348 = arith.constant 4 : index
    %c0_349 = arith.constant 0 : index
    %c0_350 = arith.constant 0 : index
    %272 = vector.load %arg16[%c0_347, %c4_348, %c0_349, %c0_350] : memref<2x7x16x128xf32, #tpu.memory_space<vmem>>, vector<2x1x1x128xf32>
    %273 = vector.shape_cast %272 : vector<2x1x1x128xf32> to vector<2x128xf32>
    %c0_351 = arith.constant 0 : index
    %c4_352 = arith.constant 4 : index
    %c1_353 = arith.constant 1 : index
    %c0_354 = arith.constant 0 : index
    %274 = vector.load %arg16[%c0_351, %c4_352, %c1_353, %c0_354] : memref<2x7x16x128xf32, #tpu.memory_space<vmem>>, vector<2x1x1x128xf32>
    %275 = vector.shape_cast %274 : vector<2x1x1x128xf32> to vector<2x128xf32>
    %276 = arith.maximumf %273, %275 : vector<2x128xf32>
    %c0_355 = arith.constant 0 : index
    %c3584 = arith.constant 3584 : index
    %277 = vector.load %arg17[%c0_355, %c3584] : memref<2x6272xf32, #tpu.memory_space<vmem>>, vector<2x128xf32>
    tpu.vector_store %arg17[%c0_355, %c3584], %276 {strides = array<i32>} : memref<2x6272xf32, #tpu.memory_space<vmem>>, vector<2x128xf32>,
    %c0_356 = arith.constant 0 : index
    %c4_357 = arith.constant 4 : index
    %c2_358 = arith.constant 2 : index
    %c0_359 = arith.constant 0 : index
    %278 = vector.load %arg16[%c0_356, %c4_357, %c2_358, %c0_359] : memref<2x7x16x128xf32, #tpu.memory_space<vmem>>, vector<2x1x1x128xf32>
    %279 = vector.shape_cast %278 : vector<2x1x1x128xf32> to vector<2x128xf32>
    %c0_360 = arith.constant 0 : index
    %c4_361 = arith.constant 4 : index
    %c3_362 = arith.constant 3 : index
    %c0_363 = arith.constant 0 : index
    %280 = vector.load %arg16[%c0_360, %c4_361, %c3_362, %c0_363] : memref<2x7x16x128xf32, #tpu.memory_space<vmem>>, vector<2x1x1x128xf32>
    %281 = vector.shape_cast %280 : vector<2x1x1x128xf32> to vector<2x128xf32>
    %282 = arith.maximumf %279, %281 : vector<2x128xf32>
    %c0_364 = arith.constant 0 : index
    %c3712 = arith.constant 3712 : index
    %283 = vector.load %arg17[%c0_364, %c3712] : memref<2x6272xf32, #tpu.memory_space<vmem>>, vector<2x128xf32>
    tpu.vector_store %arg17[%c0_364, %c3712], %282 {strides = array<i32>} : memref<2x6272xf32, #tpu.memory_space<vmem>>, vector<2x128xf32>,
    %c0_365 = arith.constant 0 : index
    %c4_366 = arith.constant 4 : index
    %c4_367 = arith.constant 4 : index
    %c0_368 = arith.constant 0 : index
    %284 = vector.load %arg16[%c0_365, %c4_366, %c4_367, %c0_368] : memref<2x7x16x128xf32, #tpu.memory_space<vmem>>, vector<2x1x1x128xf32>
    %285 = vector.shape_cast %284 : vector<2x1x1x128xf32> to vector<2x128xf32>
    %c0_369 = arith.constant 0 : index
    %c4_370 = arith.constant 4 : index
    %c5_371 = arith.constant 5 : index
    %c0_372 = arith.constant 0 : index
    %286 = vector.load %arg16[%c0_369, %c4_370, %c5_371, %c0_372] : memref<2x7x16x128xf32, #tpu.memory_space<vmem>>, vector<2x1x1x128xf32>
    %287 = vector.shape_cast %286 : vector<2x1x1x128xf32> to vector<2x128xf32>
    %288 = arith.maximumf %285, %287 : vector<2x128xf32>
    %c0_373 = arith.constant 0 : index
    %c3840 = arith.constant 3840 : index
    %289 = vector.load %arg17[%c0_373, %c3840] : memref<2x6272xf32, #tpu.memory_space<vmem>>, vector<2x128xf32>
    tpu.vector_store %arg17[%c0_373, %c3840], %288 {strides = array<i32>} : memref<2x6272xf32, #tpu.memory_space<vmem>>, vector<2x128xf32>,
    %c0_374 = arith.constant 0 : index
    %c4_375 = arith.constant 4 : index
    %c6_376 = arith.constant 6 : index
    %c0_377 = arith.constant 0 : index
    %290 = vector.load %arg16[%c0_374, %c4_375, %c6_376, %c0_377] : memref<2x7x16x128xf32, #tpu.memory_space<vmem>>, vector<2x1x1x128xf32>
    %291 = vector.shape_cast %290 : vector<2x1x1x128xf32> to vector<2x128xf32>
    %c0_378 = arith.constant 0 : index
    %c4_379 = arith.constant 4 : index
    %c7_380 = arith.constant 7 : index
    %c0_381 = arith.constant 0 : index
    %292 = vector.load %arg16[%c0_378, %c4_379, %c7_380, %c0_381] : memref<2x7x16x128xf32, #tpu.memory_space<vmem>>, vector<2x1x1x128xf32>
    %293 = vector.shape_cast %292 : vector<2x1x1x128xf32> to vector<2x128xf32>
    %294 = arith.maximumf %291, %293 : vector<2x128xf32>
    %c0_382 = arith.constant 0 : index
    %c3968 = arith.constant 3968 : index
    %295 = vector.load %arg17[%c0_382, %c3968] : memref<2x6272xf32, #tpu.memory_space<vmem>>, vector<2x128xf32>
    tpu.vector_store %arg17[%c0_382, %c3968], %294 {strides = array<i32>} : memref<2x6272xf32, #tpu.memory_space<vmem>>, vector<2x128xf32>,
    %c0_383 = arith.constant 0 : index
    %c4_384 = arith.constant 4 : index
    %c8_385 = arith.constant 8 : index
    %c0_386 = arith.constant 0 : index
    %296 = vector.load %arg16[%c0_383, %c4_384, %c8_385, %c0_386] : memref<2x7x16x128xf32, #tpu.memory_space<vmem>>, vector<2x1x1x128xf32>
    %297 = vector.shape_cast %296 : vector<2x1x1x128xf32> to vector<2x128xf32>
    %c0_387 = arith.constant 0 : index
    %c4_388 = arith.constant 4 : index
    %c9_389 = arith.constant 9 : index
    %c0_390 = arith.constant 0 : index
    %298 = vector.load %arg16[%c0_387, %c4_388, %c9_389, %c0_390] : memref<2x7x16x128xf32, #tpu.memory_space<vmem>>, vector<2x1x1x128xf32>
    %299 = vector.shape_cast %298 : vector<2x1x1x128xf32> to vector<2x128xf32>
    %300 = arith.maximumf %297, %299 : vector<2x128xf32>
    %c0_391 = arith.constant 0 : index
    %c4096 = arith.constant 4096 : index
    %301 = vector.load %arg17[%c0_391, %c4096] : memref<2x6272xf32, #tpu.memory_space<vmem>>, vector<2x128xf32>
    tpu.vector_store %arg17[%c0_391, %c4096], %300 {strides = array<i32>} : memref<2x6272xf32, #tpu.memory_space<vmem>>, vector<2x128xf32>,
    %c0_392 = arith.constant 0 : index
    %c4_393 = arith.constant 4 : index
    %c10_394 = arith.constant 10 : index
    %c0_395 = arith.constant 0 : index
    %302 = vector.load %arg16[%c0_392, %c4_393, %c10_394, %c0_395] : memref<2x7x16x128xf32, #tpu.memory_space<vmem>>, vector<2x1x1x128xf32>
    %303 = vector.shape_cast %302 : vector<2x1x1x128xf32> to vector<2x128xf32>
    %c0_396 = arith.constant 0 : index
    %c4_397 = arith.constant 4 : index
    %c11_398 = arith.constant 11 : index
    %c0_399 = arith.constant 0 : index
    %304 = vector.load %arg16[%c0_396, %c4_397, %c11_398, %c0_399] : memref<2x7x16x128xf32, #tpu.memory_space<vmem>>, vector<2x1x1x128xf32>
    %305 = vector.shape_cast %304 : vector<2x1x1x128xf32> to vector<2x128xf32>
    %306 = arith.maximumf %303, %305 : vector<2x128xf32>
    %c0_400 = arith.constant 0 : index
    %c4224 = arith.constant 4224 : index
    %307 = vector.load %arg17[%c0_400, %c4224] : memref<2x6272xf32, #tpu.memory_space<vmem>>, vector<2x128xf32>
    tpu.vector_store %arg17[%c0_400, %c4224], %306 {strides = array<i32>} : memref<2x6272xf32, #tpu.memory_space<vmem>>, vector<2x128xf32>,
    %c0_401 = arith.constant 0 : index
    %c4_402 = arith.constant 4 : index
    %c12_403 = arith.constant 12 : index
    %c0_404 = arith.constant 0 : index
    %308 = vector.load %arg16[%c0_401, %c4_402, %c12_403, %c0_404] : memref<2x7x16x128xf32, #tpu.memory_space<vmem>>, vector<2x1x1x128xf32>
    %309 = vector.shape_cast %308 : vector<2x1x1x128xf32> to vector<2x128xf32>
    %c0_405 = arith.constant 0 : index
    %c4_406 = arith.constant 4 : index
    %c13_407 = arith.constant 13 : index
    %c0_408 = arith.constant 0 : index
    %310 = vector.load %arg16[%c0_405, %c4_406, %c13_407, %c0_408] : memref<2x7x16x128xf32, #tpu.memory_space<vmem>>, vector<2x1x1x128xf32>
    %311 = vector.shape_cast %310 : vector<2x1x1x128xf32> to vector<2x128xf32>
    %312 = arith.maximumf %309, %311 : vector<2x128xf32>
    %c0_409 = arith.constant 0 : index
    %c4352 = arith.constant 4352 : index
    %313 = vector.load %arg17[%c0_409, %c4352] : memref<2x6272xf32, #tpu.memory_space<vmem>>, vector<2x128xf32>
    tpu.vector_store %arg17[%c0_409, %c4352], %312 {strides = array<i32>} : memref<2x6272xf32, #tpu.memory_space<vmem>>, vector<2x128xf32>,
    %c0_410 = arith.constant 0 : index
    %c5_411 = arith.constant 5 : index
    %c0_412 = arith.constant 0 : index
    %c0_413 = arith.constant 0 : index
    %314 = vector.load %arg16[%c0_410, %c5_411, %c0_412, %c0_413] : memref<2x7x16x128xf32, #tpu.memory_space<vmem>>, vector<2x1x1x128xf32>
    %315 = vector.shape_cast %314 : vector<2x1x1x128xf32> to vector<2x128xf32>
    %c0_414 = arith.constant 0 : index
    %c5_415 = arith.constant 5 : index
    %c1_416 = arith.constant 1 : index
    %c0_417 = arith.constant 0 : index
    %316 = vector.load %arg16[%c0_414, %c5_415, %c1_416, %c0_417] : memref<2x7x16x128xf32, #tpu.memory_space<vmem>>, vector<2x1x1x128xf32>
    %317 = vector.shape_cast %316 : vector<2x1x1x128xf32> to vector<2x128xf32>
    %318 = arith.maximumf %315, %317 : vector<2x128xf32>
    %c0_418 = arith.constant 0 : index
    %c4480 = arith.constant 4480 : index
    %319 = vector.load %arg17[%c0_418, %c4480] : memref<2x6272xf32, #tpu.memory_space<vmem>>, vector<2x128xf32>
    tpu.vector_store %arg17[%c0_418, %c4480], %318 {strides = array<i32>} : memref<2x6272xf32, #tpu.memory_space<vmem>>, vector<2x128xf32>,
    %c0_419 = arith.constant 0 : index
    %c5_420 = arith.constant 5 : index
    %c2_421 = arith.constant 2 : index
    %c0_422 = arith.constant 0 : index
    %320 = vector.load %arg16[%c0_419, %c5_420, %c2_421, %c0_422] : memref<2x7x16x128xf32, #tpu.memory_space<vmem>>, vector<2x1x1x128xf32>
    %321 = vector.shape_cast %320 : vector<2x1x1x128xf32> to vector<2x128xf32>
    %c0_423 = arith.constant 0 : index
    %c5_424 = arith.constant 5 : index
    %c3_425 = arith.constant 3 : index
    %c0_426 = arith.constant 0 : index
    %322 = vector.load %arg16[%c0_423, %c5_424, %c3_425, %c0_426] : memref<2x7x16x128xf32, #tpu.memory_space<vmem>>, vector<2x1x1x128xf32>
    %323 = vector.shape_cast %322 : vector<2x1x1x128xf32> to vector<2x128xf32>
    %324 = arith.maximumf %321, %323 : vector<2x128xf32>
    %c0_427 = arith.constant 0 : index
    %c4608 = arith.constant 4608 : index
    %325 = vector.load %arg17[%c0_427, %c4608] : memref<2x6272xf32, #tpu.memory_space<vmem>>, vector<2x128xf32>
    tpu.vector_store %arg17[%c0_427, %c4608], %324 {strides = array<i32>} : memref<2x6272xf32, #tpu.memory_space<vmem>>, vector<2x128xf32>,
    %c0_428 = arith.constant 0 : index
    %c5_429 = arith.constant 5 : index
    %c4_430 = arith.constant 4 : index
    %c0_431 = arith.constant 0 : index
    %326 = vector.load %arg16[%c0_428, %c5_429, %c4_430, %c0_431] : memref<2x7x16x128xf32, #tpu.memory_space<vmem>>, vector<2x1x1x128xf32>
    %327 = vector.shape_cast %326 : vector<2x1x1x128xf32> to vector<2x128xf32>
    %c0_432 = arith.constant 0 : index
    %c5_433 = arith.constant 5 : index
    %c5_434 = arith.constant 5 : index
    %c0_435 = arith.constant 0 : index
    %328 = vector.load %arg16[%c0_432, %c5_433, %c5_434, %c0_435] : memref<2x7x16x128xf32, #tpu.memory_space<vmem>>, vector<2x1x1x128xf32>
    %329 = vector.shape_cast %328 : vector<2x1x1x128xf32> to vector<2x128xf32>
    %330 = arith.maximumf %327, %329 : vector<2x128xf32>
    %c0_436 = arith.constant 0 : index
    %c4736 = arith.constant 4736 : index
    %331 = vector.load %arg17[%c0_436, %c4736] : memref<2x6272xf32, #tpu.memory_space<vmem>>, vector<2x128xf32>
    tpu.vector_store %arg17[%c0_436, %c4736], %330 {strides = array<i32>} : memref<2x6272xf32, #tpu.memory_space<vmem>>, vector<2x128xf32>,
    %c0_437 = arith.constant 0 : index
    %c5_438 = arith.constant 5 : index
    %c6_439 = arith.constant 6 : index
    %c0_440 = arith.constant 0 : index
    %332 = vector.load %arg16[%c0_437, %c5_438, %c6_439, %c0_440] : memref<2x7x16x128xf32, #tpu.memory_space<vmem>>, vector<2x1x1x128xf32>
    %333 = vector.shape_cast %332 : vector<2x1x1x128xf32> to vector<2x128xf32>
    %c0_441 = arith.constant 0 : index
    %c5_442 = arith.constant 5 : index
    %c7_443 = arith.constant 7 : index
    %c0_444 = arith.constant 0 : index
    %334 = vector.load %arg16[%c0_441, %c5_442, %c7_443, %c0_444] : memref<2x7x16x128xf32, #tpu.memory_space<vmem>>, vector<2x1x1x128xf32>
    %335 = vector.shape_cast %334 : vector<2x1x1x128xf32> to vector<2x128xf32>
    %336 = arith.maximumf %333, %335 : vector<2x128xf32>
    %c0_445 = arith.constant 0 : index
    %c4864 = arith.constant 4864 : index
    %337 = vector.load %arg17[%c0_445, %c4864] : memref<2x6272xf32, #tpu.memory_space<vmem>>, vector<2x128xf32>
    tpu.vector_store %arg17[%c0_445, %c4864], %336 {strides = array<i32>} : memref<2x6272xf32, #tpu.memory_space<vmem>>, vector<2x128xf32>,
    %c0_446 = arith.constant 0 : index
    %c5_447 = arith.constant 5 : index
    %c8_448 = arith.constant 8 : index
    %c0_449 = arith.constant 0 : index
    %338 = vector.load %arg16[%c0_446, %c5_447, %c8_448, %c0_449] : memref<2x7x16x128xf32, #tpu.memory_space<vmem>>, vector<2x1x1x128xf32>
    %339 = vector.shape_cast %338 : vector<2x1x1x128xf32> to vector<2x128xf32>
    %c0_450 = arith.constant 0 : index
    %c5_451 = arith.constant 5 : index
    %c9_452 = arith.constant 9 : index
    %c0_453 = arith.constant 0 : index
    %340 = vector.load %arg16[%c0_450, %c5_451, %c9_452, %c0_453] : memref<2x7x16x128xf32, #tpu.memory_space<vmem>>, vector<2x1x1x128xf32>
    %341 = vector.shape_cast %340 : vector<2x1x1x128xf32> to vector<2x128xf32>
    %342 = arith.maximumf %339, %341 : vector<2x128xf32>
    %c0_454 = arith.constant 0 : index
    %c4992 = arith.constant 4992 : index
    %343 = vector.load %arg17[%c0_454, %c4992] : memref<2x6272xf32, #tpu.memory_space<vmem>>, vector<2x128xf32>
    tpu.vector_store %arg17[%c0_454, %c4992], %342 {strides = array<i32>} : memref<2x6272xf32, #tpu.memory_space<vmem>>, vector<2x128xf32>,
    %c0_455 = arith.constant 0 : index
    %c5_456 = arith.constant 5 : index
    %c10_457 = arith.constant 10 : index
    %c0_458 = arith.constant 0 : index
    %344 = vector.load %arg16[%c0_455, %c5_456, %c10_457, %c0_458] : memref<2x7x16x128xf32, #tpu.memory_space<vmem>>, vector<2x1x1x128xf32>
    %345 = vector.shape_cast %344 : vector<2x1x1x128xf32> to vector<2x128xf32>
    %c0_459 = arith.constant 0 : index
    %c5_460 = arith.constant 5 : index
    %c11_461 = arith.constant 11 : index
    %c0_462 = arith.constant 0 : index
    %346 = vector.load %arg16[%c0_459, %c5_460, %c11_461, %c0_462] : memref<2x7x16x128xf32, #tpu.memory_space<vmem>>, vector<2x1x1x128xf32>
    %347 = vector.shape_cast %346 : vector<2x1x1x128xf32> to vector<2x128xf32>
    %348 = arith.maximumf %345, %347 : vector<2x128xf32>
    %c0_463 = arith.constant 0 : index
    %c5120 = arith.constant 5120 : index
    %349 = vector.load %arg17[%c0_463, %c5120] : memref<2x6272xf32, #tpu.memory_space<vmem>>, vector<2x128xf32>
    tpu.vector_store %arg17[%c0_463, %c5120], %348 {strides = array<i32>} : memref<2x6272xf32, #tpu.memory_space<vmem>>, vector<2x128xf32>,
    %c0_464 = arith.constant 0 : index
    %c5_465 = arith.constant 5 : index
    %c12_466 = arith.constant 12 : index
    %c0_467 = arith.constant 0 : index
    %350 = vector.load %arg16[%c0_464, %c5_465, %c12_466, %c0_467] : memref<2x7x16x128xf32, #tpu.memory_space<vmem>>, vector<2x1x1x128xf32>
    %351 = vector.shape_cast %350 : vector<2x1x1x128xf32> to vector<2x128xf32>
    %c0_468 = arith.constant 0 : index
    %c5_469 = arith.constant 5 : index
    %c13_470 = arith.constant 13 : index
    %c0_471 = arith.constant 0 : index
    %352 = vector.load %arg16[%c0_468, %c5_469, %c13_470, %c0_471] : memref<2x7x16x128xf32, #tpu.memory_space<vmem>>, vector<2x1x1x128xf32>
    %353 = vector.shape_cast %352 : vector<2x1x1x128xf32> to vector<2x128xf32>
    %354 = arith.maximumf %351, %353 : vector<2x128xf32>
    %c0_472 = arith.constant 0 : index
    %c5248 = arith.constant 5248 : index
    %355 = vector.load %arg17[%c0_472, %c5248] : memref<2x6272xf32, #tpu.memory_space<vmem>>, vector<2x128xf32>
    tpu.vector_store %arg17[%c0_472, %c5248], %354 {strides = array<i32>} : memref<2x6272xf32, #tpu.memory_space<vmem>>, vector<2x128xf32>,
    %c0_473 = arith.constant 0 : index
    %c6_474 = arith.constant 6 : index
    %c0_475 = arith.constant 0 : index
    %c0_476 = arith.constant 0 : index
    %356 = vector.load %arg16[%c0_473, %c6_474, %c0_475, %c0_476] : memref<2x7x16x128xf32, #tpu.memory_space<vmem>>, vector<2x1x1x128xf32>
    %357 = vector.shape_cast %356 : vector<2x1x1x128xf32> to vector<2x128xf32>
    %c0_477 = arith.constant 0 : index
    %c6_478 = arith.constant 6 : index
    %c1_479 = arith.constant 1 : index
    %c0_480 = arith.constant 0 : index
    %358 = vector.load %arg16[%c0_477, %c6_478, %c1_479, %c0_480] : memref<2x7x16x128xf32, #tpu.memory_space<vmem>>, vector<2x1x1x128xf32>
    %359 = vector.shape_cast %358 : vector<2x1x1x128xf32> to vector<2x128xf32>
    %360 = arith.maximumf %357, %359 : vector<2x128xf32>
    %c0_481 = arith.constant 0 : index
    %c5376 = arith.constant 5376 : index
    %361 = vector.load %arg17[%c0_481, %c5376] : memref<2x6272xf32, #tpu.memory_space<vmem>>, vector<2x128xf32>
    tpu.vector_store %arg17[%c0_481, %c5376], %360 {strides = array<i32>} : memref<2x6272xf32, #tpu.memory_space<vmem>>, vector<2x128xf32>,
    %c0_482 = arith.constant 0 : index
    %c6_483 = arith.constant 6 : index
    %c2_484 = arith.constant 2 : index
    %c0_485 = arith.constant 0 : index
    %362 = vector.load %arg16[%c0_482, %c6_483, %c2_484, %c0_485] : memref<2x7x16x128xf32, #tpu.memory_space<vmem>>, vector<2x1x1x128xf32>
    %363 = vector.shape_cast %362 : vector<2x1x1x128xf32> to vector<2x128xf32>
    %c0_486 = arith.constant 0 : index
    %c6_487 = arith.constant 6 : index
    %c3_488 = arith.constant 3 : index
    %c0_489 = arith.constant 0 : index
    %364 = vector.load %arg16[%c0_486, %c6_487, %c3_488, %c0_489] : memref<2x7x16x128xf32, #tpu.memory_space<vmem>>, vector<2x1x1x128xf32>
    %365 = vector.shape_cast %364 : vector<2x1x1x128xf32> to vector<2x128xf32>
    %366 = arith.maximumf %363, %365 : vector<2x128xf32>
    %c0_490 = arith.constant 0 : index
    %c5504 = arith.constant 5504 : index
    %367 = vector.load %arg17[%c0_490, %c5504] : memref<2x6272xf32, #tpu.memory_space<vmem>>, vector<2x128xf32>
    tpu.vector_store %arg17[%c0_490, %c5504], %366 {strides = array<i32>} : memref<2x6272xf32, #tpu.memory_space<vmem>>, vector<2x128xf32>,
    %c0_491 = arith.constant 0 : index
    %c6_492 = arith.constant 6 : index
    %c4_493 = arith.constant 4 : index
    %c0_494 = arith.constant 0 : index
    %368 = vector.load %arg16[%c0_491, %c6_492, %c4_493, %c0_494] : memref<2x7x16x128xf32, #tpu.memory_space<vmem>>, vector<2x1x1x128xf32>
    %369 = vector.shape_cast %368 : vector<2x1x1x128xf32> to vector<2x128xf32>
    %c0_495 = arith.constant 0 : index
    %c6_496 = arith.constant 6 : index
    %c5_497 = arith.constant 5 : index
    %c0_498 = arith.constant 0 : index
    %370 = vector.load %arg16[%c0_495, %c6_496, %c5_497, %c0_498] : memref<2x7x16x128xf32, #tpu.memory_space<vmem>>, vector<2x1x1x128xf32>
    %371 = vector.shape_cast %370 : vector<2x1x1x128xf32> to vector<2x128xf32>
    %372 = arith.maximumf %369, %371 : vector<2x128xf32>
    %c0_499 = arith.constant 0 : index
    %c5632 = arith.constant 5632 : index
    %373 = vector.load %arg17[%c0_499, %c5632] : memref<2x6272xf32, #tpu.memory_space<vmem>>, vector<2x128xf32>
    tpu.vector_store %arg17[%c0_499, %c5632], %372 {strides = array<i32>} : memref<2x6272xf32, #tpu.memory_space<vmem>>, vector<2x128xf32>,
    %c0_500 = arith.constant 0 : index
    %c6_501 = arith.constant 6 : index
    %c6_502 = arith.constant 6 : index
    %c0_503 = arith.constant 0 : index
    %374 = vector.load %arg16[%c0_500, %c6_501, %c6_502, %c0_503] : memref<2x7x16x128xf32, #tpu.memory_space<vmem>>, vector<2x1x1x128xf32>
    %375 = vector.shape_cast %374 : vector<2x1x1x128xf32> to vector<2x128xf32>
    %c0_504 = arith.constant 0 : index
    %c6_505 = arith.constant 6 : index
    %c7_506 = arith.constant 7 : index
    %c0_507 = arith.constant 0 : index
    %376 = vector.load %arg16[%c0_504, %c6_505, %c7_506, %c0_507] : memref<2x7x16x128xf32, #tpu.memory_space<vmem>>, vector<2x1x1x128xf32>
    %377 = vector.shape_cast %376 : vector<2x1x1x128xf32> to vector<2x128xf32>
    %378 = arith.maximumf %375, %377 : vector<2x128xf32>
    %c0_508 = arith.constant 0 : index
    %c5760 = arith.constant 5760 : index
    %379 = vector.load %arg17[%c0_508, %c5760] : memref<2x6272xf32, #tpu.memory_space<vmem>>, vector<2x128xf32>
    tpu.vector_store %arg17[%c0_508, %c5760], %378 {strides = array<i32>} : memref<2x6272xf32, #tpu.memory_space<vmem>>, vector<2x128xf32>,
    %c0_509 = arith.constant 0 : index
    %c6_510 = arith.constant 6 : index
    %c8_511 = arith.constant 8 : index
    %c0_512 = arith.constant 0 : index
    %380 = vector.load %arg16[%c0_509, %c6_510, %c8_511, %c0_512] : memref<2x7x16x128xf32, #tpu.memory_space<vmem>>, vector<2x1x1x128xf32>
    %381 = vector.shape_cast %380 : vector<2x1x1x128xf32> to vector<2x128xf32>
    %c0_513 = arith.constant 0 : index
    %c6_514 = arith.constant 6 : index
    %c9_515 = arith.constant 9 : index
    %c0_516 = arith.constant 0 : index
    %382 = vector.load %arg16[%c0_513, %c6_514, %c9_515, %c0_516] : memref<2x7x16x128xf32, #tpu.memory_space<vmem>>, vector<2x1x1x128xf32>
    %383 = vector.shape_cast %382 : vector<2x1x1x128xf32> to vector<2x128xf32>
    %384 = arith.maximumf %381, %383 : vector<2x128xf32>
    %c0_517 = arith.constant 0 : index
    %c5888 = arith.constant 5888 : index
    %385 = vector.load %arg17[%c0_517, %c5888] : memref<2x6272xf32, #tpu.memory_space<vmem>>, vector<2x128xf32>
    tpu.vector_store %arg17[%c0_517, %c5888], %384 {strides = array<i32>} : memref<2x6272xf32, #tpu.memory_space<vmem>>, vector<2x128xf32>,
    %c0_518 = arith.constant 0 : index
    %c6_519 = arith.constant 6 : index
    %c10_520 = arith.constant 10 : index
    %c0_521 = arith.constant 0 : index
    %386 = vector.load %arg16[%c0_518, %c6_519, %c10_520, %c0_521] : memref<2x7x16x128xf32, #tpu.memory_space<vmem>>, vector<2x1x1x128xf32>
    %387 = vector.shape_cast %386 : vector<2x1x1x128xf32> to vector<2x128xf32>
    %c0_522 = arith.constant 0 : index
    %c6_523 = arith.constant 6 : index
    %c11_524 = arith.constant 11 : index
    %c0_525 = arith.constant 0 : index
    %388 = vector.load %arg16[%c0_522, %c6_523, %c11_524, %c0_525] : memref<2x7x16x128xf32, #tpu.memory_space<vmem>>, vector<2x1x1x128xf32>
    %389 = vector.shape_cast %388 : vector<2x1x1x128xf32> to vector<2x128xf32>
    %390 = arith.maximumf %387, %389 : vector<2x128xf32>
    %c0_526 = arith.constant 0 : index
    %c6016 = arith.constant 6016 : index
    %391 = vector.load %arg17[%c0_526, %c6016] : memref<2x6272xf32, #tpu.memory_space<vmem>>, vector<2x128xf32>
    tpu.vector_store %arg17[%c0_526, %c6016], %390 {strides = array<i32>} : memref<2x6272xf32, #tpu.memory_space<vmem>>, vector<2x128xf32>,
    %c0_527 = arith.constant 0 : index
    %c6_528 = arith.constant 6 : index
    %c12_529 = arith.constant 12 : index
    %c0_530 = arith.constant 0 : index
    %392 = vector.load %arg16[%c0_527, %c6_528, %c12_529, %c0_530] : memref<2x7x16x128xf32, #tpu.memory_space<vmem>>, vector<2x1x1x128xf32>
    %393 = vector.shape_cast %392 : vector<2x1x1x128xf32> to vector<2x128xf32>
    %c0_531 = arith.constant 0 : index
    %c6_532 = arith.constant 6 : index
    %c13_533 = arith.constant 13 : index
    %c0_534 = arith.constant 0 : index
    %394 = vector.load %arg16[%c0_531, %c6_532, %c13_533, %c0_534] : memref<2x7x16x128xf32, #tpu.memory_space<vmem>>, vector<2x1x1x128xf32>
    %395 = vector.shape_cast %394 : vector<2x1x1x128xf32> to vector<2x128xf32>
    %396 = arith.maximumf %393, %395 : vector<2x128xf32>
    %c0_535 = arith.constant 0 : index
    %c6144 = arith.constant 6144 : index
    %397 = vector.load %arg17[%c0_535, %c6144] : memref<2x6272xf32, #tpu.memory_space<vmem>>, vector<2x128xf32>
    tpu.vector_store %arg17[%c0_535, %c6144], %396 {strides = array<i32>} : memref<2x6272xf32, #tpu.memory_space<vmem>>, vector<2x128xf32>,
    %c0_536 = arith.constant 0 : index
    %c0_537 = arith.constant 0 : index
    %398 = vector.load %arg17[%c0_536, %c0_537] : memref<2x6272xf32, #tpu.memory_space<vmem>>, vector<2x6272xf32>
    %399 = arith.truncf %398 : vector<2x6272xf32> to vector<2x6272xbf16>
    %c0_538 = arith.constant 0 : index
    %c0_539 = arith.constant 0 : index
    %400 = vector.load %arg6[%c0_538, %c0_539] : memref<6272x32xbf16, #tpu.memory_space<vmem>>, vector<6272x32xbf16>
    %cst_540 = arith.constant dense<0.000000e+00> : vector<2x32xf32>
    %401 = tpu.matmul %399, %400, %cst_540 {dimension_numbers = #tpu.dot_dimension_numbers<[1], [0], [0], [1], [0, 0, 1, 1], [], []>} : vector<2x6272xbf16>, vector<6272x32xbf16>, vector<2x32xf32> -> vector<2x32xf32>
    %c0_541 = arith.constant 0 : index
    %c0_542 = arith.constant 0 : index
    %402 = vector.load %arg7[%c0_541, %c0_542] : memref<1x32xf32, #tpu.memory_space<vmem>>, vector<1x32xf32>
    %403 = vector.broadcast %402 : vector<1x32xf32> to vector<2x32xf32>
    %404 = arith.addf %401, %403 : vector<2x32xf32>
    %405 = arith.truncf %404 : vector<2x32xf32> to vector<2x32xbf16>
    %c0_543 = arith.constant 0 : index
    %c0_544 = arith.constant 0 : index
    %406 = vector.load %arg8[%c0_543, %c0_544] : memref<32x6272xbf16, #tpu.memory_space<vmem>>, vector<32x6272xbf16>
    %cst_545 = arith.constant dense<0.000000e+00> : vector<2x6272xf32>
    %407 = tpu.matmul %405, %406, %cst_545 {dimension_numbers = #tpu.dot_dimension_numbers<[1], [0], [0], [1], [0, 0, 1, 1], [], []>} : vector<2x32xbf16>, vector<32x6272xbf16>, vector<2x6272xf32> -> vector<2x6272xf32>
    %c0_546 = arith.constant 0 : index
    %c0_547 = arith.constant 0 : index
    %408 = vector.load %arg9[%c0_546, %c0_547] : memref<1x6272xf32, #tpu.memory_space<vmem>>, vector<1x6272xf32>
    %409 = vector.broadcast %408 : vector<1x6272xf32> to vector<2x6272xf32>
    %410 = arith.addf %407, %409 : vector<2x6272xf32>
    %411 = vector.extract_strided_slice %410 {offsets = [0, 0], sizes = [2, 128], strides = [1, 1]} : vector<2x6272xf32> to vector<2x128xf32>
    %c0_548 = arith.constant 0 : index
    %c0_549 = arith.constant 0 : index
    %412 = vector.load %arg18[%c0_548, %c0_549] : memref<98x128xf32, #tpu.memory_space<vmem>>, vector<2x128xf32>
    tpu.vector_store %arg18[%c0_548, %c0_549], %411 {strides = array<i32>} : memref<98x128xf32, #tpu.memory_space<vmem>>, vector<2x128xf32>,
    %413 = vector.extract_strided_slice %410 {offsets = [0, 128], sizes = [2, 128], strides = [1, 1]} : vector<2x6272xf32> to vector<2x128xf32>
    %c2_550 = arith.constant 2 : index
    %c0_551 = arith.constant 0 : index
    %414 = vector.load %arg18[%c2_550, %c0_551] : memref<98x128xf32, #tpu.memory_space<vmem>>, vector<2x128xf32>
    tpu.vector_store %arg18[%c2_550, %c0_551], %413 {strides = array<i32>} : memref<98x128xf32, #tpu.memory_space<vmem>>, vector<2x128xf32>,
    %415 = vector.extract_strided_slice %410 {offsets = [0, 256], sizes = [2, 128], strides = [1, 1]} : vector<2x6272xf32> to vector<2x128xf32>
    %c4_552 = arith.constant 4 : index
    %c0_553 = arith.constant 0 : index
    %416 = vector.load %arg18[%c4_552, %c0_553] : memref<98x128xf32, #tpu.memory_space<vmem>>, vector<2x128xf32>
    tpu.vector_store %arg18[%c4_552, %c0_553], %415 {strides = array<i32>} : memref<98x128xf32, #tpu.memory_space<vmem>>, vector<2x128xf32>,
    %417 = vector.extract_strided_slice %410 {offsets = [0, 384], sizes = [2, 128], strides = [1, 1]} : vector<2x6272xf32> to vector<2x128xf32>
    %c6_554 = arith.constant 6 : index
    %c0_555 = arith.constant 0 : index
    %418 = vector.load %arg18[%c6_554, %c0_555] : memref<98x128xf32, #tpu.memory_space<vmem>>, vector<2x128xf32>
    tpu.vector_store %arg18[%c6_554, %c0_555], %417 {strides = array<i32>} : memref<98x128xf32, #tpu.memory_space<vmem>>, vector<2x128xf32>,
    %419 = vector.extract_strided_slice %410 {offsets = [0, 512], sizes = [2, 128], strides = [1, 1]} : vector<2x6272xf32> to vector<2x128xf32>
    %c8_556 = arith.constant 8 : index
    %c0_557 = arith.constant 0 : index
    %420 = vector.load %arg18[%c8_556, %c0_557] : memref<98x128xf32, #tpu.memory_space<vmem>>, vector<2x128xf32>
    tpu.vector_store %arg18[%c8_556, %c0_557], %419 {strides = array<i32>} : memref<98x128xf32, #tpu.memory_space<vmem>>, vector<2x128xf32>,
    %421 = vector.extract_strided_slice %410 {offsets = [0, 640], sizes = [2, 128], strides = [1, 1]} : vector<2x6272xf32> to vector<2x128xf32>
    %c10_558 = arith.constant 10 : index
    %c0_559 = arith.constant 0 : index
    %422 = vector.load %arg18[%c10_558, %c0_559] : memref<98x128xf32, #tpu.memory_space<vmem>>, vector<2x128xf32>
    tpu.vector_store %arg18[%c10_558, %c0_559], %421 {strides = array<i32>} : memref<98x128xf32, #tpu.memory_space<vmem>>, vector<2x128xf32>,
    %423 = vector.extract_strided_slice %410 {offsets = [0, 768], sizes = [2, 128], strides = [1, 1]} : vector<2x6272xf32> to vector<2x128xf32>
    %c12_560 = arith.constant 12 : index
    %c0_561 = arith.constant 0 : index
    %424 = vector.load %arg18[%c12_560, %c0_561] : memref<98x128xf32, #tpu.memory_space<vmem>>, vector<2x128xf32>
    tpu.vector_store %arg18[%c12_560, %c0_561], %423 {strides = array<i32>} : memref<98x128xf32, #tpu.memory_space<vmem>>, vector<2x128xf32>,
    %425 = vector.extract_strided_slice %410 {offsets = [0, 896], sizes = [2, 128], strides = [1, 1]} : vector<2x6272xf32> to vector<2x128xf32>
    %c14 = arith.constant 14 : index
    %c0_562 = arith.constant 0 : index
    %426 = vector.load %arg18[%c14, %c0_562] : memref<98x128xf32, #tpu.memory_space<vmem>>, vector<2x128xf32>
    tpu.vector_store %arg18[%c14, %c0_562], %425 {strides = array<i32>} : memref<98x128xf32, #tpu.memory_space<vmem>>, vector<2x128xf32>,
    %427 = vector.extract_strided_slice %410 {offsets = [0, 1024], sizes = [2, 128], strides = [1, 1]} : vector<2x6272xf32> to vector<2x128xf32>
    %c16 = arith.constant 16 : index
    %c0_563 = arith.constant 0 : index
    %428 = vector.load %arg18[%c16, %c0_563] : memref<98x128xf32, #tpu.memory_space<vmem>>, vector<2x128xf32>
    tpu.vector_store %arg18[%c16, %c0_563], %427 {strides = array<i32>} : memref<98x128xf32, #tpu.memory_space<vmem>>, vector<2x128xf32>,
    %429 = vector.extract_strided_slice %410 {offsets = [0, 1152], sizes = [2, 128], strides = [1, 1]} : vector<2x6272xf32> to vector<2x128xf32>
    %c18 = arith.constant 18 : index
    %c0_564 = arith.constant 0 : index
    %430 = vector.load %arg18[%c18, %c0_564] : memref<98x128xf32, #tpu.memory_space<vmem>>, vector<2x128xf32>
    tpu.vector_store %arg18[%c18, %c0_564], %429 {strides = array<i32>} : memref<98x128xf32, #tpu.memory_space<vmem>>, vector<2x128xf32>,
    %431 = vector.extract_strided_slice %410 {offsets = [0, 1280], sizes = [2, 128], strides = [1, 1]} : vector<2x6272xf32> to vector<2x128xf32>
    %c20 = arith.constant 20 : index
    %c0_565 = arith.constant 0 : index
    %432 = vector.load %arg18[%c20, %c0_565] : memref<98x128xf32, #tpu.memory_space<vmem>>, vector<2x128xf32>
    tpu.vector_store %arg18[%c20, %c0_565], %431 {strides = array<i32>} : memref<98x128xf32, #tpu.memory_space<vmem>>, vector<2x128xf32>,
    %433 = vector.extract_strided_slice %410 {offsets = [0, 1408], sizes = [2, 128], strides = [1, 1]} : vector<2x6272xf32> to vector<2x128xf32>
    %c22_566 = arith.constant 22 : index
    %c0_567 = arith.constant 0 : index
    %434 = vector.load %arg18[%c22_566, %c0_567] : memref<98x128xf32, #tpu.memory_space<vmem>>, vector<2x128xf32>
    tpu.vector_store %arg18[%c22_566, %c0_567], %433 {strides = array<i32>} : memref<98x128xf32, #tpu.memory_space<vmem>>, vector<2x128xf32>,
    %435 = vector.extract_strided_slice %410 {offsets = [0, 1536], sizes = [2, 128], strides = [1, 1]} : vector<2x6272xf32> to vector<2x128xf32>
    %c24 = arith.constant 24 : index
    %c0_568 = arith.constant 0 : index
    %436 = vector.load %arg18[%c24, %c0_568] : memref<98x128xf32, #tpu.memory_space<vmem>>, vector<2x128xf32>
    tpu.vector_store %arg18[%c24, %c0_568], %435 {strides = array<i32>} : memref<98x128xf32, #tpu.memory_space<vmem>>, vector<2x128xf32>,
    %437 = vector.extract_strided_slice %410 {offsets = [0, 1664], sizes = [2, 128], strides = [1, 1]} : vector<2x6272xf32> to vector<2x128xf32>
    %c26 = arith.constant 26 : index
    %c0_569 = arith.constant 0 : index
    %438 = vector.load %arg18[%c26, %c0_569] : memref<98x128xf32, #tpu.memory_space<vmem>>, vector<2x128xf32>
    tpu.vector_store %arg18[%c26, %c0_569], %437 {strides = array<i32>} : memref<98x128xf32, #tpu.memory_space<vmem>>, vector<2x128xf32>,
    %439 = vector.extract_strided_slice %410 {offsets = [0, 1792], sizes = [2, 128], strides = [1, 1]} : vector<2x6272xf32> to vector<2x128xf32>
    %c28 = arith.constant 28 : index
    %c0_570 = arith.constant 0 : index
    %440 = vector.load %arg18[%c28, %c0_570] : memref<98x128xf32, #tpu.memory_space<vmem>>, vector<2x128xf32>
    tpu.vector_store %arg18[%c28, %c0_570], %439 {strides = array<i32>} : memref<98x128xf32, #tpu.memory_space<vmem>>, vector<2x128xf32>,
    %441 = vector.extract_strided_slice %410 {offsets = [0, 1920], sizes = [2, 128], strides = [1, 1]} : vector<2x6272xf32> to vector<2x128xf32>
    %c30 = arith.constant 30 : index
    %c0_571 = arith.constant 0 : index
    %442 = vector.load %arg18[%c30, %c0_571] : memref<98x128xf32, #tpu.memory_space<vmem>>, vector<2x128xf32>
    tpu.vector_store %arg18[%c30, %c0_571], %441 {strides = array<i32>} : memref<98x128xf32, #tpu.memory_space<vmem>>, vector<2x128xf32>,
    %443 = vector.extract_strided_slice %410 {offsets = [0, 2048], sizes = [2, 128], strides = [1, 1]} : vector<2x6272xf32> to vector<2x128xf32>
    %c32 = arith.constant 32 : index
    %c0_572 = arith.constant 0 : index
    %444 = vector.load %arg18[%c32, %c0_572] : memref<98x128xf32, #tpu.memory_space<vmem>>, vector<2x128xf32>
    tpu.vector_store %arg18[%c32, %c0_572], %443 {strides = array<i32>} : memref<98x128xf32, #tpu.memory_space<vmem>>, vector<2x128xf32>,
    %445 = vector.extract_strided_slice %410 {offsets = [0, 2176], sizes = [2, 128], strides = [1, 1]} : vector<2x6272xf32> to vector<2x128xf32>
    %c34 = arith.constant 34 : index
    %c0_573 = arith.constant 0 : index
    %446 = vector.load %arg18[%c34, %c0_573] : memref<98x128xf32, #tpu.memory_space<vmem>>, vector<2x128xf32>
    tpu.vector_store %arg18[%c34, %c0_573], %445 {strides = array<i32>} : memref<98x128xf32, #tpu.memory_space<vmem>>, vector<2x128xf32>,
    %447 = vector.extract_strided_slice %410 {offsets = [0, 2304], sizes = [2, 128], strides = [1, 1]} : vector<2x6272xf32> to vector<2x128xf32>
    %c36 = arith.constant 36 : index
    %c0_574 = arith.constant 0 : index
    %448 = vector.load %arg18[%c36, %c0_574] : memref<98x128xf32, #tpu.memory_space<vmem>>, vector<2x128xf32>
    tpu.vector_store %arg18[%c36, %c0_574], %447 {strides = array<i32>} : memref<98x128xf32, #tpu.memory_space<vmem>>, vector<2x128xf32>,
    %449 = vector.extract_strided_slice %410 {offsets = [0, 2432], sizes = [2, 128], strides = [1, 1]} : vector<2x6272xf32> to vector<2x128xf32>
    %c38 = arith.constant 38 : index
    %c0_575 = arith.constant 0 : index
    %450 = vector.load %arg18[%c38, %c0_575] : memref<98x128xf32, #tpu.memory_space<vmem>>, vector<2x128xf32>
    tpu.vector_store %arg18[%c38, %c0_575], %449 {strides = array<i32>} : memref<98x128xf32, #tpu.memory_space<vmem>>, vector<2x128xf32>,
    %451 = vector.extract_strided_slice %410 {offsets = [0, 2560], sizes = [2, 128], strides = [1, 1]} : vector<2x6272xf32> to vector<2x128xf32>
    %c40 = arith.constant 40 : index
    %c0_576 = arith.constant 0 : index
    %452 = vector.load %arg18[%c40, %c0_576] : memref<98x128xf32, #tpu.memory_space<vmem>>, vector<2x128xf32>
    tpu.vector_store %arg18[%c40, %c0_576], %451 {strides = array<i32>} : memref<98x128xf32, #tpu.memory_space<vmem>>, vector<2x128xf32>,
    %453 = vector.extract_strided_slice %410 {offsets = [0, 2688], sizes = [2, 128], strides = [1, 1]} : vector<2x6272xf32> to vector<2x128xf32>
    %c42 = arith.constant 42 : index
    %c0_577 = arith.constant 0 : index
    %454 = vector.load %arg18[%c42, %c0_577] : memref<98x128xf32, #tpu.memory_space<vmem>>, vector<2x128xf32>
    tpu.vector_store %arg18[%c42, %c0_577], %453 {strides = array<i32>} : memref<98x128xf32, #tpu.memory_space<vmem>>, vector<2x128xf32>,
    %455 = vector.extract_strided_slice %410 {offsets = [0, 2816], sizes = [2, 128], strides = [1, 1]} : vector<2x6272xf32> to vector<2x128xf32>
    %c44 = arith.constant 44 : index
    %c0_578 = arith.constant 0 : index
    %456 = vector.load %arg18[%c44, %c0_578] : memref<98x128xf32, #tpu.memory_space<vmem>>, vector<2x128xf32>
    tpu.vector_store %arg18[%c44, %c0_578], %455 {strides = array<i32>} : memref<98x128xf32, #tpu.memory_space<vmem>>, vector<2x128xf32>,
    %457 = vector.extract_strided_slice %410 {offsets = [0, 2944], sizes = [2, 128], strides = [1, 1]} : vector<2x6272xf32> to vector<2x128xf32>
    %c46 = arith.constant 46 : index
    %c0_579 = arith.constant 0 : index
    %458 = vector.load %arg18[%c46, %c0_579] : memref<98x128xf32, #tpu.memory_space<vmem>>, vector<2x128xf32>
    tpu.vector_store %arg18[%c46, %c0_579], %457 {strides = array<i32>} : memref<98x128xf32, #tpu.memory_space<vmem>>, vector<2x128xf32>,
    %459 = vector.extract_strided_slice %410 {offsets = [0, 3072], sizes = [2, 128], strides = [1, 1]} : vector<2x6272xf32> to vector<2x128xf32>
    %c48 = arith.constant 48 : index
    %c0_580 = arith.constant 0 : index
    %460 = vector.load %arg18[%c48, %c0_580] : memref<98x128xf32, #tpu.memory_space<vmem>>, vector<2x128xf32>
    tpu.vector_store %arg18[%c48, %c0_580], %459 {strides = array<i32>} : memref<98x128xf32, #tpu.memory_space<vmem>>, vector<2x128xf32>,
    %461 = vector.extract_strided_slice %410 {offsets = [0, 3200], sizes = [2, 128], strides = [1, 1]} : vector<2x6272xf32> to vector<2x128xf32>
    %c50 = arith.constant 50 : index
    %c0_581 = arith.constant 0 : index
    %462 = vector.load %arg18[%c50, %c0_581] : memref<98x128xf32, #tpu.memory_space<vmem>>, vector<2x128xf32>
    tpu.vector_store %arg18[%c50, %c0_581], %461 {strides = array<i32>} : memref<98x128xf32, #tpu.memory_space<vmem>>, vector<2x128xf32>,
    %463 = vector.extract_strided_slice %410 {offsets = [0, 3328], sizes = [2, 128], strides = [1, 1]} : vector<2x6272xf32> to vector<2x128xf32>
    %c52 = arith.constant 52 : index
    %c0_582 = arith.constant 0 : index
    %464 = vector.load %arg18[%c52, %c0_582] : memref<98x128xf32, #tpu.memory_space<vmem>>, vector<2x128xf32>
    tpu.vector_store %arg18[%c52, %c0_582], %463 {strides = array<i32>} : memref<98x128xf32, #tpu.memory_space<vmem>>, vector<2x128xf32>,
    %465 = vector.extract_strided_slice %410 {offsets = [0, 3456], sizes = [2, 128], strides = [1, 1]} : vector<2x6272xf32> to vector<2x128xf32>
    %c54 = arith.constant 54 : index
    %c0_583 = arith.constant 0 : index
    %466 = vector.load %arg18[%c54, %c0_583] : memref<98x128xf32, #tpu.memory_space<vmem>>, vector<2x128xf32>
    tpu.vector_store %arg18[%c54, %c0_583], %465 {strides = array<i32>} : memref<98x128xf32, #tpu.memory_space<vmem>>, vector<2x128xf32>,
    %467 = vector.extract_strided_slice %410 {offsets = [0, 3584], sizes = [2, 128], strides = [1, 1]} : vector<2x6272xf32> to vector<2x128xf32>
    %c56 = arith.constant 56 : index
    %c0_584 = arith.constant 0 : index
    %468 = vector.load %arg18[%c56, %c0_584] : memref<98x128xf32, #tpu.memory_space<vmem>>, vector<2x128xf32>
    tpu.vector_store %arg18[%c56, %c0_584], %467 {strides = array<i32>} : memref<98x128xf32, #tpu.memory_space<vmem>>, vector<2x128xf32>,
    %469 = vector.extract_strided_slice %410 {offsets = [0, 3712], sizes = [2, 128], strides = [1, 1]} : vector<2x6272xf32> to vector<2x128xf32>
    %c58 = arith.constant 58 : index
    %c0_585 = arith.constant 0 : index
    %470 = vector.load %arg18[%c58, %c0_585] : memref<98x128xf32, #tpu.memory_space<vmem>>, vector<2x128xf32>
    tpu.vector_store %arg18[%c58, %c0_585], %469 {strides = array<i32>} : memref<98x128xf32, #tpu.memory_space<vmem>>, vector<2x128xf32>,
    %471 = vector.extract_strided_slice %410 {offsets = [0, 3840], sizes = [2, 128], strides = [1, 1]} : vector<2x6272xf32> to vector<2x128xf32>
    %c60 = arith.constant 60 : index
    %c0_586 = arith.constant 0 : index
    %472 = vector.load %arg18[%c60, %c0_586] : memref<98x128xf32, #tpu.memory_space<vmem>>, vector<2x128xf32>
    tpu.vector_store %arg18[%c60, %c0_586], %471 {strides = array<i32>} : memref<98x128xf32, #tpu.memory_space<vmem>>, vector<2x128xf32>,
    %473 = vector.extract_strided_slice %410 {offsets = [0, 3968], sizes = [2, 128], strides = [1, 1]} : vector<2x6272xf32> to vector<2x128xf32>
    %c62 = arith.constant 62 : index
    %c0_587 = arith.constant 0 : index
    %474 = vector.load %arg18[%c62, %c0_587] : memref<98x128xf32, #tpu.memory_space<vmem>>, vector<2x128xf32>
    tpu.vector_store %arg18[%c62, %c0_587], %473 {strides = array<i32>} : memref<98x128xf32, #tpu.memory_space<vmem>>, vector<2x128xf32>,
    %475 = vector.extract_strided_slice %410 {offsets = [0, 4096], sizes = [2, 128], strides = [1, 1]} : vector<2x6272xf32> to vector<2x128xf32>
    %c64 = arith.constant 64 : index
    %c0_588 = arith.constant 0 : index
    %476 = vector.load %arg18[%c64, %c0_588] : memref<98x128xf32, #tpu.memory_space<vmem>>, vector<2x128xf32>
    tpu.vector_store %arg18[%c64, %c0_588], %475 {strides = array<i32>} : memref<98x128xf32, #tpu.memory_space<vmem>>, vector<2x128xf32>,
    %477 = vector.extract_strided_slice %410 {offsets = [0, 4224], sizes = [2, 128], strides = [1, 1]} : vector<2x6272xf32> to vector<2x128xf32>
    %c66 = arith.constant 66 : index
    %c0_589 = arith.constant 0 : index
    %478 = vector.load %arg18[%c66, %c0_589] : memref<98x128xf32, #tpu.memory_space<vmem>>, vector<2x128xf32>
    tpu.vector_store %arg18[%c66, %c0_589], %477 {strides = array<i32>} : memref<98x128xf32, #tpu.memory_space<vmem>>, vector<2x128xf32>,
    %479 = vector.extract_strided_slice %410 {offsets = [0, 4352], sizes = [2, 128], strides = [1, 1]} : vector<2x6272xf32> to vector<2x128xf32>
    %c68 = arith.constant 68 : index
    %c0_590 = arith.constant 0 : index
    %480 = vector.load %arg18[%c68, %c0_590] : memref<98x128xf32, #tpu.memory_space<vmem>>, vector<2x128xf32>
    tpu.vector_store %arg18[%c68, %c0_590], %479 {strides = array<i32>} : memref<98x128xf32, #tpu.memory_space<vmem>>, vector<2x128xf32>,
    %481 = vector.extract_strided_slice %410 {offsets = [0, 4480], sizes = [2, 128], strides = [1, 1]} : vector<2x6272xf32> to vector<2x128xf32>
    %c70 = arith.constant 70 : index
    %c0_591 = arith.constant 0 : index
    %482 = vector.load %arg18[%c70, %c0_591] : memref<98x128xf32, #tpu.memory_space<vmem>>, vector<2x128xf32>
    tpu.vector_store %arg18[%c70, %c0_591], %481 {strides = array<i32>} : memref<98x128xf32, #tpu.memory_space<vmem>>, vector<2x128xf32>,
    %483 = vector.extract_strided_slice %410 {offsets = [0, 4608], sizes = [2, 128], strides = [1, 1]} : vector<2x6272xf32> to vector<2x128xf32>
    %c72 = arith.constant 72 : index
    %c0_592 = arith.constant 0 : index
    %484 = vector.load %arg18[%c72, %c0_592] : memref<98x128xf32, #tpu.memory_space<vmem>>, vector<2x128xf32>
    tpu.vector_store %arg18[%c72, %c0_592], %483 {strides = array<i32>} : memref<98x128xf32, #tpu.memory_space<vmem>>, vector<2x128xf32>,
    %485 = vector.extract_strided_slice %410 {offsets = [0, 4736], sizes = [2, 128], strides = [1, 1]} : vector<2x6272xf32> to vector<2x128xf32>
    %c74 = arith.constant 74 : index
    %c0_593 = arith.constant 0 : index
    %486 = vector.load %arg18[%c74, %c0_593] : memref<98x128xf32, #tpu.memory_space<vmem>>, vector<2x128xf32>
    tpu.vector_store %arg18[%c74, %c0_593], %485 {strides = array<i32>} : memref<98x128xf32, #tpu.memory_space<vmem>>, vector<2x128xf32>,
    %487 = vector.extract_strided_slice %410 {offsets = [0, 4864], sizes = [2, 128], strides = [1, 1]} : vector<2x6272xf32> to vector<2x128xf32>
    %c76 = arith.constant 76 : index
    %c0_594 = arith.constant 0 : index
    %488 = vector.load %arg18[%c76, %c0_594] : memref<98x128xf32, #tpu.memory_space<vmem>>, vector<2x128xf32>
    tpu.vector_store %arg18[%c76, %c0_594], %487 {strides = array<i32>} : memref<98x128xf32, #tpu.memory_space<vmem>>, vector<2x128xf32>,
    %489 = vector.extract_strided_slice %410 {offsets = [0, 4992], sizes = [2, 128], strides = [1, 1]} : vector<2x6272xf32> to vector<2x128xf32>
    %c78 = arith.constant 78 : index
    %c0_595 = arith.constant 0 : index
    %490 = vector.load %arg18[%c78, %c0_595] : memref<98x128xf32, #tpu.memory_space<vmem>>, vector<2x128xf32>
    tpu.vector_store %arg18[%c78, %c0_595], %489 {strides = array<i32>} : memref<98x128xf32, #tpu.memory_space<vmem>>, vector<2x128xf32>,
    %491 = vector.extract_strided_slice %410 {offsets = [0, 5120], sizes = [2, 128], strides = [1, 1]} : vector<2x6272xf32> to vector<2x128xf32>
    %c80 = arith.constant 80 : index
    %c0_596 = arith.constant 0 : index
    %492 = vector.load %arg18[%c80, %c0_596] : memref<98x128xf32, #tpu.memory_space<vmem>>, vector<2x128xf32>
    tpu.vector_store %arg18[%c80, %c0_596], %491 {strides = array<i32>} : memref<98x128xf32, #tpu.memory_space<vmem>>, vector<2x128xf32>,
    %493 = vector.extract_strided_slice %410 {offsets = [0, 5248], sizes = [2, 128], strides = [1, 1]} : vector<2x6272xf32> to vector<2x128xf32>
    %c82 = arith.constant 82 : index
    %c0_597 = arith.constant 0 : index
    %494 = vector.load %arg18[%c82, %c0_597] : memref<98x128xf32, #tpu.memory_space<vmem>>, vector<2x128xf32>
    tpu.vector_store %arg18[%c82, %c0_597], %493 {strides = array<i32>} : memref<98x128xf32, #tpu.memory_space<vmem>>, vector<2x128xf32>,
    %495 = vector.extract_strided_slice %410 {offsets = [0, 5376], sizes = [2, 128], strides = [1, 1]} : vector<2x6272xf32> to vector<2x128xf32>
    %c84 = arith.constant 84 : index
    %c0_598 = arith.constant 0 : index
    %496 = vector.load %arg18[%c84, %c0_598] : memref<98x128xf32, #tpu.memory_space<vmem>>, vector<2x128xf32>
    tpu.vector_store %arg18[%c84, %c0_598], %495 {strides = array<i32>} : memref<98x128xf32, #tpu.memory_space<vmem>>, vector<2x128xf32>,
    %497 = vector.extract_strided_slice %410 {offsets = [0, 5504], sizes = [2, 128], strides = [1, 1]} : vector<2x6272xf32> to vector<2x128xf32>
    %c86 = arith.constant 86 : index
    %c0_599 = arith.constant 0 : index
    %498 = vector.load %arg18[%c86, %c0_599] : memref<98x128xf32, #tpu.memory_space<vmem>>, vector<2x128xf32>
    tpu.vector_store %arg18[%c86, %c0_599], %497 {strides = array<i32>} : memref<98x128xf32, #tpu.memory_space<vmem>>, vector<2x128xf32>,
    %499 = vector.extract_strided_slice %410 {offsets = [0, 5632], sizes = [2, 128], strides = [1, 1]} : vector<2x6272xf32> to vector<2x128xf32>
    %c88 = arith.constant 88 : index
    %c0_600 = arith.constant 0 : index
    %500 = vector.load %arg18[%c88, %c0_600] : memref<98x128xf32, #tpu.memory_space<vmem>>, vector<2x128xf32>
    tpu.vector_store %arg18[%c88, %c0_600], %499 {strides = array<i32>} : memref<98x128xf32, #tpu.memory_space<vmem>>, vector<2x128xf32>,
    %501 = vector.extract_strided_slice %410 {offsets = [0, 5760], sizes = [2, 128], strides = [1, 1]} : vector<2x6272xf32> to vector<2x128xf32>
    %c90 = arith.constant 90 : index
    %c0_601 = arith.constant 0 : index
    %502 = vector.load %arg18[%c90, %c0_601] : memref<98x128xf32, #tpu.memory_space<vmem>>, vector<2x128xf32>
    tpu.vector_store %arg18[%c90, %c0_601], %501 {strides = array<i32>} : memref<98x128xf32, #tpu.memory_space<vmem>>, vector<2x128xf32>,
    %503 = vector.extract_strided_slice %410 {offsets = [0, 5888], sizes = [2, 128], strides = [1, 1]} : vector<2x6272xf32> to vector<2x128xf32>
    %c92 = arith.constant 92 : index
    %c0_602 = arith.constant 0 : index
    %504 = vector.load %arg18[%c92, %c0_602] : memref<98x128xf32, #tpu.memory_space<vmem>>, vector<2x128xf32>
    tpu.vector_store %arg18[%c92, %c0_602], %503 {strides = array<i32>} : memref<98x128xf32, #tpu.memory_space<vmem>>, vector<2x128xf32>,
    %505 = vector.extract_strided_slice %410 {offsets = [0, 6016], sizes = [2, 128], strides = [1, 1]} : vector<2x6272xf32> to vector<2x128xf32>
    %c94 = arith.constant 94 : index
    %c0_603 = arith.constant 0 : index
    %506 = vector.load %arg18[%c94, %c0_603] : memref<98x128xf32, #tpu.memory_space<vmem>>, vector<2x128xf32>
    tpu.vector_store %arg18[%c94, %c0_603], %505 {strides = array<i32>} : memref<98x128xf32, #tpu.memory_space<vmem>>, vector<2x128xf32>,
    %507 = vector.extract_strided_slice %410 {offsets = [0, 6144], sizes = [2, 128], strides = [1, 1]} : vector<2x6272xf32> to vector<2x128xf32>
    %c96 = arith.constant 96 : index
    %c0_604 = arith.constant 0 : index
    %508 = vector.load %arg18[%c96, %c0_604] : memref<98x128xf32, #tpu.memory_space<vmem>>, vector<2x128xf32>
    tpu.vector_store %arg18[%c96, %c0_604], %507 {strides = array<i32>} : memref<98x128xf32, #tpu.memory_space<vmem>>, vector<2x128xf32>,
    %c0_605 = arith.constant 0 : index
    %c0_606 = arith.constant 0 : index
    %509 = vector.load %arg18[%c0_605, %c0_606] : memref<98x128xf32, #tpu.memory_space<vmem>>, vector<98x128xf32>
    %510 = arith.truncf %509 : vector<98x128xf32> to vector<98x128xbf16>
    %c0_607 = arith.constant 0 : index
    %c0_608 = arith.constant 0 : index
    %511 = vector.load %arg10[%c0_607, %c0_608] : memref<128x512xbf16, #tpu.memory_space<vmem>>, vector<128x512xbf16>
    %cst_609 = arith.constant dense<0.000000e+00> : vector<98x512xf32>
    %512 = tpu.matmul %510, %511, %cst_609 {dimension_numbers = #tpu.dot_dimension_numbers<[1], [0], [0], [1], [0, 0, 1, 1], [], []>} : vector<98x128xbf16>, vector<128x512xbf16>, vector<98x512xf32> -> vector<98x512xf32>
    %c0_610 = arith.constant 0 : index
    %c0_611 = arith.constant 0 : index
    %513 = vector.load %arg11[%c0_610, %c0_611] : memref<1x512xf32, #tpu.memory_space<vmem>>, vector<1x512xf32>
    %514 = vector.broadcast %513 : vector<1x512xf32> to vector<98x512xf32>
    %515 = arith.addf %512, %514 : vector<98x512xf32>
    %cst_612 = arith.constant 0.000000e+00 : f32
    %516 = vector.broadcast %cst_612 : f32 to vector<98x512xf32>
    %517 = arith.maximumf %515, %516 : vector<98x512xf32>
    %518 = arith.truncf %517 : vector<98x512xf32> to vector<98x512xbf16>
    %c0_613 = arith.constant 0 : index
    %c0_614 = arith.constant 0 : index
    %519 = vector.load %arg12[%c0_613, %c0_614] : memref<512x16xbf16, #tpu.memory_space<vmem>>, vector<512x16xbf16>
    %cst_615 = arith.constant dense<0.000000e+00> : vector<98x16xf32>
    %520 = tpu.matmul %518, %519, %cst_615 {dimension_numbers = #tpu.dot_dimension_numbers<[1], [0], [0], [1], [0, 0, 1, 1], [], []>} : vector<98x512xbf16>, vector<512x16xbf16>, vector<98x16xf32> -> vector<98x16xf32>
    %c0_616 = arith.constant 0 : index
    %c0_617 = arith.constant 0 : index
    %521 = vector.load %arg13[%c0_616, %c0_617] : memref<1x16xf32, #tpu.memory_space<vmem>>, vector<1x16xf32>
    %522 = vector.broadcast %521 : vector<1x16xf32> to vector<98x16xf32>
    %523 = arith.addf %520, %522 : vector<98x16xf32>
    %cst_618 = arith.constant 0.000000e+00 : f32
    %524 = vector.broadcast %cst_618 : f32 to vector<98x16xf32>
    %525 = arith.maximumf %523, %524 : vector<98x16xf32>
    %c0_619 = arith.constant 0 : index
    %c0_620 = arith.constant 0 : index
    %526 = vector.load %arg14[%c0_619, %c0_620] : memref<98x16xf32, #tpu.memory_space<vmem>>, vector<98x16xf32>
    tpu.vector_store %arg14[%c0_619, %c0_620], %525 {strides = array<i32>} : memref<98x16xf32, #tpu.memory_space<vmem>>, vector<98x16xf32>,
    return
  }
  func.func @transform_0(%arg0: i32) -> (i32, i32) {
    %c0_i32 = arith.constant 0 : i32
    %c0_i32_0 = arith.constant 0 : i32
    return %arg0, %c0_i32 : i32, i32
  }
  func.func @transform_1(%arg0: i32) -> (i32, i32) {
    %c0_i32 = arith.constant 0 : i32
    %c0_i32_0 = arith.constant 0 : i32
    %c0_i32_1 = arith.constant 0 : i32
    return %c0_i32, %c0_i32_0 : i32, i32
  }
  func.func @transform_2(%arg0: i32) -> (i32, i32) {
    %c0_i32 = arith.constant 0 : i32
    %c0_i32_0 = arith.constant 0 : i32
    %c0_i32_1 = arith.constant 0 : i32
    return %c0_i32, %c0_i32_0 : i32, i32
  }
  func.func @transform_3(%arg0: i32) -> (i32, i32, i32) {
    %c0_i32 = arith.constant 0 : i32
    %c0_i32_0 = arith.constant 0 : i32
    %c0_i32_1 = arith.constant 0 : i32
    %c0_i32_2 = arith.constant 0 : i32
    return %c0_i32, %c0_i32_0, %c0_i32_1 : i32, i32, i32
  }
  func.func @transform_4(%arg0: i32) -> (i32, i32) {
    %c0_i32 = arith.constant 0 : i32
    %c0_i32_0 = arith.constant 0 : i32
    %c0_i32_1 = arith.constant 0 : i32
    return %c0_i32, %c0_i32_0 : i32, i32
  }
  func.func @transform_5(%arg0: i32) -> (i32, i32) {
    %c0_i32 = arith.constant 0 : i32
    %c0_i32_0 = arith.constant 0 : i32
    %c0_i32_1 = arith.constant 0 : i32
    return %c0_i32, %c0_i32_0 : i32, i32
  }
  func.func @transform_6(%arg0: i32) -> (i32, i32) {
    %c0_i32 = arith.constant 0 : i32
    %c0_i32_0 = arith.constant 0 : i32
    %c0_i32_1 = arith.constant 0 : i32
    return %c0_i32, %c0_i32_0 : i32, i32
  }
  func.func @transform_7(%arg0: i32) -> (i32, i32) {
    %c0_i32 = arith.constant 0 : i32
    %c0_i32_0 = arith.constant 0 : i32
    %c0_i32_1 = arith.constant 0 : i32
    return %c0_i32, %c0_i32_0 : i32, i32
  }
  func.func @transform_8(%arg0: i32) -> (i32, i32) {
    %c0_i32 = arith.constant 0 : i32
    %c0_i32_0 = arith.constant 0 : i32
    %c0_i32_1 = arith.constant 0 : i32
    return %c0_i32, %c0_i32_0 : i32, i32
  }
  func.func @transform_9(%arg0: i32) -> (i32, i32) {
    %c0_i32 = arith.constant 0 : i32
    %c0_i32_0 = arith.constant 0 : i32
    %c0_i32_1 = arith.constant 0 : i32
    return %c0_i32, %c0_i32_0 : i32, i32
  }
  func.func @transform_10(%arg0: i32) -> (i32, i32) {
    %c0_i32 = arith.constant 0 : i32
    %c0_i32_0 = arith.constant 0 : i32
    %c0_i32_1 = arith.constant 0 : i32
    return %c0_i32, %c0_i32_0 : i32, i32
  }
  func.func @transform_11(%arg0: i32) -> (i32, i32) {
    %c0_i32 = arith.constant 0 : i32
    %c0_i32_0 = arith.constant 0 : i32
    %c0_i32_1 = arith.constant 0 : i32
    return %c0_i32, %c0_i32_0 : i32, i32
  }
  func.func @transform_12(%arg0: i32) -> (i32, i32) {
    %c0_i32 = arith.constant 0 : i32
    %c0_i32_0 = arith.constant 0 : i32
    %c0_i32_1 = arith.constant 0 : i32
    return %c0_i32, %c0_i32_0 : i32, i32
  }
  func.func @transform_13(%arg0: i32) -> (i32, i32) {
    %c0_i32 = arith.constant 0 : i32
    %c0_i32_0 = arith.constant 0 : i32
    return %arg0, %c0_i32 : i32, i32
  }
}

</mosaic_0001>

<bundles_post_ra>
// kernel: autoencoder_forward.1
= control target key start
LH: loop header
LB: loop body
LE: loop exit
PB: predicated region body
PF: predicated region fallthrough
CT: control target
= control target key end

     0   :  { %vm844_vm0 = vcmask 130048   ;;  %v20058_v36 = vmov 0.0   ;;  %vm6876_vm1 = vcmask 1041409   ;;  %vm6878_vm2 = vcmask 1043459   ;;  %s24653_s1 = inlined_call_operand.vmem [shape: bf16[16,128], index: 1, kind: input, shape index: {}]   ;;  %s24654_s0 = inlined_call_operand.vmem [shape: bf16[1792,16], index: 0, kind: input, shape index: {}]   ;;  %s24655_s3 = inlined_call_operand.vmem [shape: bf16[9,128,128], index: 3, kind: input, shape index: {}]   ;;  %s24656_s2 = inlined_call_operand.vmem [shape: f32[1,128], index: 2, kind: input, shape index: {}]   ;;  %s24657_s5 = inlined_call_operand.vmem [shape: bf16[6272,32], index: 5, kind: input, shape index: {}]   ;;  %s24658_s4 = inlined_call_operand.vmem [shape: f32[1,128], index: 4, kind: input, shape index: {}]   ;;  %s24659_s6 = inlined_call_operand.vmem [shape: f32[1,32], index: 6, kind: input, shape index: {}]   ;;  %s24660_s7 = inlined_call_operand.vmem [shape: bf16[32,6272], index: 7, kind: input, shape index: {}]   ;;  %s24661_s9 = inlined_call_operand.vmem [shape: bf16[128,512], index: 9, kind: input, shape index: {}]   ;;  %s24662_s8 = inlined_call_operand.vmem [shape: f32[1,6272], index: 8, kind: input, shape index: {}]   ;;  %s24663_s11 = inlined_call_operand.vmem [shape: bf16[512,16], index: 11, kind: input, shape index: {}]   ;;  %s24664_s10 = inlined_call_operand.vmem [shape: f32[1,512], index: 10, kind: input, shape index: {}]   ;;  %s24665_s12 = inlined_call_operand.vmem [shape: f32[1,16], index: 12, kind: input, shape index: {}]   ;;  %s24666_s13 = inlined_call_operand.vmem [shape: f32[98,16], index: 13, kind: output, shape index: {}]  }
   0x1   :  { %v19230_v0 = vld [vmem:[%s24653_s1] sm:$0xff]   ;;  %v19232_v2 = vld [vmem:[%s24654_s0 + $0x8] sm:$0xff]   ;;  %v19233_v3 = vld [vmem:[%s24654_s0 + $0x10] sm:$0xff]   ;;  %2502 = vst [vmem:[#allocation2 + $0x7] sm:$0xff] %v20058_v36  ;;  %vm6880_vm3 = vcmask 1045509   ;;  %vm6882_vm4 = vcmask 1047559  }
   0x2   :  { %v19231_v1 = vld [vmem:[%s24654_s0] sm:$0xff]   ;;  %17876 = vmatprep.subr.bf16.mxu0 %v19230_v0  ;;  %v19234_v4 = vld [vmem:[%s24654_s0 + $0x18] sm:$0xff]   ;;  %v19236_v6 = vld [vmem:[%s24654_s0 + $0x28] sm:$0xff]   ;;  %2503 = vst [vmem:[#allocation2 + $0xf] sm:$0xff] %v20058_v36  ;;  %vm20060_vm5 = vmmov 0   ;;  %vm13710_vm6 = vcmask 261120  }
   0x3   :  { %17877 = vmatpush3.bf16.msra.mxu0 %v19230_v0  ;;  %17878 = vmatprep.mubr.msk.bf16.mxu0 %vm844_vm0, %v19231_v1  ;;  %v19235_v5 = vld [vmem:[%s24654_s0 + $0x20] sm:$0xff]   ;;  %v19237_v7 = vld [vmem:[%s24654_s0 + $0x30] sm:$0xff]   ;;  %v19238_v8 = vld [vmem:[%s24654_s0 + $0x38] sm:$0xff]   ;;  %2504 = vst [vmem:[#allocation2 + $0x17] sm:$0x3] %v20058_v36  ;;  %vm15767_vm7 = vcmask 123904  }
   0x4   :  { %v19239_v9 = vld [vmem:[%s24654_s0 + $0x40] sm:$0xff]   ;;  %v19240_v10 = vld [vmem:[%s24654_s0 + $0x48] sm:$0xff]   ;;  %v19241_v11 = vld [vmem:[%s24654_s0 + $0x50] sm:$0xff]   ;;  %2505 = vst [vmem:[#allocation2 + $0x207] sm:$0xff] %v20058_v36 }
   0x5   :  { %v19242_v12 = vld [vmem:[%s24654_s0 + $0x58] sm:$0xff]   ;;  %v19243_v13 = vld [vmem:[%s24654_s0 + $0x60] sm:$0xff]   ;;  %v19244_v14 = vld [vmem:[%s24654_s0 + $0x68] sm:$0xff]   ;;  %2506 = vst [vmem:[#allocation2 + $0x20f] sm:$0xff] %v20058_v36 }
   0x6   :  { %17879 = vmatmul.mubr.msk.bf16.vlgmr.msra.gmra.mrb[0].mxu0 %vm844_vm0, %v19232_v2  ;;  %v19245_v15 = vld [vmem:[%s24654_s0 + $0x70] sm:$0xff]   ;;  %v19246_v16 = vld [vmem:[%s24654_s0 + $0x78] sm:$0xff]   ;;  %v19247_v17 = vld [vmem:[%s24654_s0 + $0x80] sm:$0xff]   ;;  %2507 = vst [vmem:[#allocation2 + $0x217] sm:$0x3] %v20058_v36 }
   0x7   :  { %17882 = vmatprep.mubr.msk.bf16.mxu0 %vm844_vm0, %v19233_v3  ;;  %v19248_v18 = vld [vmem:[%s24654_s0 + $0x88] sm:$0xff]   ;;  %v19249_v19 = vld [vmem:[%s24654_s0 + $0x90] sm:$0xff]   ;;  %v19250_v20 = vld [vmem:[%s24654_s0 + $0x98] sm:$0xff]   ;;  %2509 = vst [vmem:[#allocation2 + $0x1e7] sm:$0xff] %v20058_v36 }
   0x8   :  { %v19251_v21 = vld [vmem:[%s24654_s0 + $0xa0] sm:$0xff]   ;;  %v19252_v22 = vld [vmem:[%s24654_s0 + $0xa8] sm:$0xff]   ;;  %v19253_v23 = vld [vmem:[%s24654_s0 + $0xb0] sm:$0xff]   ;;  %2510 = vst [vmem:[#allocation2 + $0x1ef] sm:$0xff] %v20058_v36 }
   0x9   :  { %v19285_v24 = vld [vmem:[%s24655_s3 + $0x40] sm:$0xff]   ;;  %v19254_v25 = vld [vmem:[%s24654_s0 + $0xb8] sm:$0xff]   ;;  %v19286_v26 = vld [vmem:[%s24655_s3 + $0x48] sm:$0xff]   ;;  %2511 = vst [vmem:[#allocation2 + $0x1f7] sm:$0x3] %v20058_v36 }
   0xa   :  { %18102 = vmatprep.subr.bf16.mxu1 %v19285_v24  ;;  %v19255_v27 = vld [vmem:[%s24654_s0 + $0xc0] sm:$0xff]   ;;  %v19289_v28 = vld [vmem:[%s24655_s3 + $0x50] sm:$0xff]   ;;  %v19256_v29 = vld [vmem:[%s24654_s0 + $0xc8] sm:$0xff]   ;;  %2512 = vst [vmem:[#allocation2 + $0x3e7] sm:$0xff] %v20058_v36 }
   0xb   :  { %18103 = vmatpush3.bf16.msra.mxu1 %v19285_v24  ;;  %v19290_v30 = vld [vmem:[%s24655_s3 + $0x58] sm:$0xff]   ;;  %v19257_v31 = vld [vmem:[%s24654_s0 + $0xd0] sm:$0xff]   ;;  %v19293_v32 = vld [vmem:[%s24655_s3 + $0x60] sm:$0xff]   ;;  %2513 = vst [vmem:[#allocation2 + $0x3ef] sm:$0xff] %v20058_v36 }
   0xc   :  { %18104 = vmatprep.subr.bf16.mxu1 %v19286_v26  ;;  %v20261_v33 = vld [vmem:[%s24655_s3 + $0x68] sm:$0xff]   ;;  %v20266_v34 = vld [vmem:[%s24654_s0 + $0xd8] sm:$0xff]   ;;  %v20271_v35 = vld [vmem:[%s24654_s0 + $0xe0] sm:$0xff]   ;;  %2514 = vst [vmem:[#allocation2 + $0x3f7] sm:$0x3] %v20058_v36 }
   0xd   :  { %2516 = vst [vmem:[#allocation2 + $0x27] sm:$0x1] %v20058_v36  ;;  %2517 = vst [vmem:[#allocation2 + $0x47] sm:$0x1] %v20058_v36  ;;  %v19297_v37 = vld [vmem:[%s24655_s3 + $0x70] sm:$0xff]   ;;  %v19260_v38 = vld [vmem:[%s24654_s0 + $0xe8] sm:$0xff]  }
   0xe   :  { %17883 = vmatmul.mubr.msk.bf16.gmra.mrb[4].mxu0 %vm844_vm0, %v19234_v4  ;;  %2518 = vst [vmem:[#allocation2 + $0x67] sm:$0x1] %v20058_v36  ;;  %2519 = vst [vmem:[#allocation2 + $0x87] sm:$0x1] %v20058_v36  ;;  %v19298_v39 = vld [vmem:[%s24655_s3 + $0x78] sm:$0xff]   ;;  %v19261_v40 = vld [vmem:[%s24654_s0 + $0xf0] sm:$0xff]  }
   0xf   :  { %17886 = vmatprep.mubr.msk.bf16.mxu0 %vm844_vm0, %v19235_v5  ;;  %18105 = vmatpush3.bf16.msra.mxu1 %v19286_v26  ;;  %2520 = vst [vmem:[#allocation2 + $0xa7] sm:$0x1] %v20058_v36  ;;  %2521 = vst [vmem:[#allocation2 + $0xc7] sm:$0x1] %v20058_v36  ;;  %v2728_v41 = vld [vmem:[#allocation2 + $0x8] sm:$0xff]  ;;  %v2729_v42 = vld [vmem:[#allocation2 + $0x10] sm:$0xff] }
  0x10   :  { %18106 = vmatprep.subr.bf16.mxu1 %v19289_v28  ;;  %2522 = vst [vmem:[#allocation2 + $0xe7] sm:$0x1] %v20058_v36  ;;  %2523 = vst [vmem:[#allocation2 + $0x107] sm:$0x1] %v20058_v36  ;;  %v2784_v43 = vpack.c.bf16 %v2729_v42, %v2728_v41  ;;  %v19262_v44 = vld [vmem:[%s24654_s0 + $0xf8] sm:$0xff]   ;;  %v19263_v45 = vld [vmem:[%s24654_s0 + $0x100] sm:$0xff]  }
  0x11   :  { %2524 = vst [vmem:[#allocation2 + $0x127] sm:$0x1] %v20058_v36  ;;  %2525 = vst [vmem:[#allocation2 + $0x147] sm:$0x1] %v20058_v36  ;;  %v19264_v46 = vld [vmem:[%s24654_s0 + $0x108] sm:$0xff]   ;;  %v19265_v47 = vld [vmem:[%s24654_s0 + $0x110] sm:$0xff]  }
  0x12   :  { %2526 = vst [vmem:[#allocation2 + $0x167] sm:$0x1] %v20058_v36  ;;  %2527 = vst [vmem:[#allocation2 + $0x187] sm:$0x1] %v20058_v36  ;;  %18118 = vmatprep.mubr.bf16.mxu1 %v2784_v43  ;;  %v19266_v48 = vld [vmem:[%s24654_s0 + $0x118] sm:$0xff]   ;;  %v19267_v49 = vld [vmem:[%s24654_s0 + $0x120] sm:$0xff]  }
  0x13   :  { %18107 = vmatpush3.bf16.msra.mxu1 %v19289_v28  ;;  %2528 = vst [vmem:[#allocation2 + $0x1a7] sm:$0x1] %v20058_v36  ;;  %2529 = vst [vmem:[#allocation2 + $0x1c7] sm:$0x1] %v20058_v36  ;;  %v19268_v50 = vld [vmem:[%s24654_s0 + $0x128] sm:$0xff]   ;;  %v19269_v51 = vld [vmem:[%s24654_s0 + $0x130] sm:$0xff]  }
  0x14   :  { %18108 = vmatprep.subr.bf16.mxu1 %v19290_v30  ;;  %2530 = vst [vmem:[#allocation2 + $0x227] sm:$0x1] %v20058_v36  ;;  %2531 = vst [vmem:[#allocation2 + $0x247] sm:$0x1] %v20058_v36  ;;  %v19270_v52 = vld [vmem:[%s24654_s0 + $0x138] sm:$0xff]   ;;  %v19271_v53 = vld [vmem:[%s24654_s0 + $0x140] sm:$0xff]  }
  0x15   :  { %2532 = vst [vmem:[#allocation2 + $0x267] sm:$0x1] %v20058_v36  ;;  %2533 = vst [vmem:[#allocation2 + $0x287] sm:$0x1] %v20058_v36  ;;  %v19272_v54 = vld [vmem:[%s24654_s0 + $0x148] sm:$0xff]   ;;  %v19273_v55 = vld [vmem:[%s24654_s0 + $0x150] sm:$0xff]  }
  0x16   :  { %17887 = vmatmul.mubr.msk.bf16.gmra.mrb[8].mxu0 %vm844_vm0, %v19236_v6  ;;  %2534 = vst [vmem:[#allocation2 + $0x2a7] sm:$0x1] %v20058_v36  ;;  %2535 = vst [vmem:[#allocation2 + $0x2c7] sm:$0x1] %v20058_v36  ;;  %v19274_v56 = vld [vmem:[%s24654_s0 + $0x158] sm:$0xff]   ;;  %v19275_v57 = vld [vmem:[%s24654_s0 + $0x160] sm:$0xff]  }
  0x17   :  { %17890 = vmatprep.mubr.msk.bf16.mxu0 %vm844_vm0, %v19237_v7  ;;  %18109 = vmatpush3.bf16.msra.mxu1 %v19290_v30  ;;  %2536 = vst [vmem:[#allocation2 + $0x2e7] sm:$0x1] %v20058_v36  ;;  %2537 = vst [vmem:[#allocation2 + $0x307] sm:$0x1] %v20058_v36  ;;  %v19276_v58 = vld [vmem:[%s24654_s0 + $0x168] sm:$0xff]   ;;  %v19277_v59 = vld [vmem:[%s24654_s0 + $0x170] sm:$0xff]  }
  0x18   :  { %18110 = vmatprep.subr.bf16.mxu1 %v19293_v32  ;;  %2538 = vst [vmem:[#allocation2 + $0x327] sm:$0x1] %v20058_v36  ;;  %2539 = vst [vmem:[#allocation2 + $0x347] sm:$0x1] %v20058_v36  ;;  %v19278_v60 = vld [vmem:[%s24654_s0 + $0x178] sm:$0xff]   ;;  %v19279_v61 = vld [vmem:[%s24654_s0 + $0x180] sm:$0xff]  }
  0x19   :  { %2540 = vst [vmem:[#allocation2 + $0x367] sm:$0x1] %v20058_v36  ;;  %2541 = vst [vmem:[#allocation2 + $0x387] sm:$0x1] %v20058_v36  ;;  %v19280_v62 = vld [vmem:[%s24654_s0 + $0x188] sm:$0xff]   ;;  %v19281_v63 = vld [vmem:[%s24654_s0 + $0x190] sm:$0xff]  }
  0x1a   :  { %2542 = vst [vmem:[#allocation2 + $0x3a7] sm:$0x1] %v20058_v36  ;;  %2543 = vst [vmem:[#allocation2 + $0x3c7] sm:$0x1] %v20058_v36  ;;  %v19282_v0 = vld [vmem:[%s24654_s0 + $0x198] sm:$0xff]   ;;  %v19283_v1 = vld [vmem:[%s24654_s0 + $0x1a0] sm:$0xff]  }
  0x1b   :  { %18111 = vmatpush3.bf16.msra.mxu1 %v19293_v32  ;;  %2544 = vst [vmem:[#allocation2 + $0x36] sm:$0x7] %v20058_v36  ;;  %2545 = vst [vmem:[#allocation2 + $0x56] sm:$0x7] %v20058_v36  ;;  %v19284_v2 = vld [vmem:[%s24654_s0 + $0x1a8] sm:$0xff]   ;;  %v19287_v3 = vld [vmem:[%s24654_s0 + $0x1b0] sm:$0xff]  }
  0x1c   :  { %18112 = vmatprep.subr.bf16.mxu1 %v20261_v33  ;;  %2546 = vst [vmem:[#allocation2 + $0x76] sm:$0x7] %v20058_v36  ;;  %2547 = vst [vmem:[#allocation2 + $0x96] sm:$0x7] %v20058_v36  ;;  %v20459_v4 = vld [vmem:[%s24656_s2] ss:$0 sm:$0xff] }
  0x1d   :  { %2548 = vst [vmem:[#allocation2 + $0xb6] sm:$0x7] %v20058_v36  ;;  %2549 = vst [vmem:[#allocation2 + $0xd6] sm:$0x7] %v20058_v36  ;;  %v19292_v24 = vld [vmem:[%s24654_s0 + $0x1c8] sm:$0xff]   ;;  %v19296_v41 = vld [vmem:[%s24654_s0 + $0x1d8] sm:$0xff]  }
  0x1e   :  { %17891 = vmatmul.mubr.msk.bf16.gmra.mrb[12].mxu0 %vm844_vm0, %v19238_v8  ;;  %2550 = vst [vmem:[#allocation2 + $0xf6] sm:$0x7] %v20058_v36  ;;  %2551 = vst [vmem:[#allocation2 + $0x116] sm:$0x7] %v20058_v36  ;;  %v19288_v8 = vld [vmem:[%s24654_s0 + $0x1b8] sm:$0xff]  }
  0x1f   :  { %17894 = vmatprep.mubr.msk.bf16.mxu0 %vm844_vm0, %v19239_v9  ;;  %2552 = vst [vmem:[#allocation2 + $0x136] sm:$0x7] %v20058_v36  ;;  %2553 = vst [vmem:[#allocation2 + $0x156] sm:$0x7] %v20058_v36  ;;  %18113 = vmatpush3.bf16.msra.mxu1 %v20261_v33 }
  0x20   :  { %2554 = vst [vmem:[#allocation2 + $0x176] sm:$0x7] %v20058_v36  ;;  %2555 = vst [vmem:[#allocation2 + $0x196] sm:$0x7] %v20058_v36  ;;  %18114 = vmatprep.subr.bf16.mxu1 %v19297_v37 }
  0x21   :  { %2556 = vst [vmem:[#allocation2 + $0x1b6] sm:$0x7] %v20058_v36  ;;  %2557 = vst [vmem:[#allocation2 + $0x1d6] sm:$0x7] %v20058_v36 }
  0x22   :  { %2558 = vst [vmem:[#allocation2 + $0x236] sm:$0x7] %v20058_v36  ;;  %2559 = vst [vmem:[#allocation2 + $0x256] sm:$0x7] %v20058_v36 }
  0x23   :  { %2560 = vst [vmem:[#allocation2 + $0x276] sm:$0x7] %v20058_v36  ;;  %2561 = vst [vmem:[#allocation2 + $0x296] sm:$0x7] %v20058_v36  ;;  %18115 = vmatpush3.bf16.msra.mxu1 %v19297_v37 }
  0x24   :  { %2562 = vst [vmem:[#allocation2 + $0x2b6] sm:$0x7] %v20058_v36  ;;  %2563 = vst [vmem:[#allocation2 + $0x2d6] sm:$0x7] %v20058_v36  ;;  %18116 = vmatprep.subr.bf16.mxu1 %v19298_v39 }
  0x25   :  { %2564 = vst [vmem:[#allocation2 + $0x2f6] sm:$0x7] %v20058_v36  ;;  %2565 = vst [vmem:[#allocation2 + $0x316] sm:$0x7] %v20058_v36 }
  0x26   :  { %17895 = vmatmul.mubr.msk.bf16.gmra.mrb[16].mxu0 %vm844_vm0, %v19240_v10  ;;  %2566 = vst [vmem:[#allocation2 + $0x336] sm:$0x7] %v20058_v36  ;;  %2567 = vst [vmem:[#allocation2 + $0x356] sm:$0x7] %v20058_v36 }
  0x27   :  { %17898 = vmatprep.mubr.msk.bf16.mxu0 %vm844_vm0, %v19241_v11  ;;  %2568 = vst [vmem:[#allocation2 + $0x376] sm:$0x7] %v20058_v36  ;;  %2569 = vst [vmem:[#allocation2 + $0x396] sm:$0x7] %v20058_v36  ;;  %18117 = vmatpush3.bf16.msra.mxu1 %v19298_v39  ;;  %v19291_v11 = vld [vmem:[%s24654_s0 + $0x1c0] sm:$0xff]  }
  0x28   :  { %2570 = vst [vmem:[#allocation2 + $0x3b6] sm:$0x7] %v20058_v36  ;;  %2571 = vst [vmem:[#allocation2 + $0x3d6] sm:$0x7] %v20058_v36 }
  0x2e   :  { %17899 = vmatmul.mubr.msk.bf16.gmra.mrb[20].mxu0 %vm844_vm0, %v19242_v12 }
  0x2f   :  { %17902 = vmatprep.mubr.msk.bf16.mxu0 %vm844_vm0, %v19243_v13 }
  0x36   :  { %17903 = vmatmul.mubr.msk.bf16.gmra.mrb[24].mxu0 %vm844_vm0, %v19244_v14 }
  0x37   :  { %17906 = vmatprep.mubr.msk.bf16.mxu0 %vm844_vm0, %v19245_v15 }
  0x3e   :  { %17907 = vmatmul.mubr.msk.bf16.gmra.mrb[28].mxu0 %vm844_vm0, %v19246_v16 }
  0x3f   :  { %17910 = vmatprep.mubr.msk.bf16.mxu0 %vm844_vm0, %v19247_v17 }
  0x46   :  { %17911 = vmatmul.mubr.msk.bf16.gmra.mrb[32].mxu0 %vm844_vm0, %v19248_v18 }
  0x47   :  { %17914 = vmatprep.mubr.msk.bf16.mxu0 %vm844_vm0, %v19249_v19 }
  0x4e   :  { %17915 = vmatmul.mubr.msk.bf16.gmra.mrb[36].mxu0 %vm844_vm0, %v19250_v20 }
  0x4f   :  { %17918 = vmatprep.mubr.msk.bf16.mxu0 %vm844_vm0, %v19251_v21 }
  0x56   :  { %17919 = vmatmul.mubr.msk.bf16.gmra.mrb[40].mxu0 %vm844_vm0, %v19252_v22 }
  0x57   :  { %17922 = vmatprep.mubr.msk.bf16.mxu0 %vm844_vm0, %v19253_v23 }
  0x5e   :  { %17923 = vmatmul.mubr.msk.bf16.gmra.mrb[44].mxu0 %vm844_vm0, %v19254_v25 }
  0x5f   :  { %17926 = vmatprep.mubr.msk.bf16.mxu0 %vm844_vm0, %v19255_v27  ;;  %v19295_v27 = vld [vmem:[%s24654_s0 + $0x1d0] sm:$0xff]  }
  0x66   :  { %17927 = vmatmul.mubr.msk.bf16.gmra.mrb[48].mxu0 %vm844_vm0, %v19256_v29 }
  0x67   :  { %17930 = vmatprep.mubr.msk.bf16.mxu0 %vm844_vm0, %v19257_v31 }
  0x6e   :  { %17931 = vmatmul.mubr.msk.bf16.gmra.mrb[52].mxu0 %vm844_vm0, %v20266_v34 }
  0x6f   :  { %17934 = vmatprep.mubr.msk.bf16.mxu0 %vm844_vm0, %v20271_v35 }
  0x76   :  { %17935 = vmatmul.mubr.msk.bf16.gmra.mrb[56].mxu0 %vm844_vm0, %v19260_v38 }
  0x77   :  { %17938 = vmatprep.mubr.msk.bf16.mxu0 %vm844_vm0, %v19261_v40 }
  0x7e   :  { %17939 = vmatmul.mubr.msk.bf16.gmra.mrb[60].mxu0 %vm844_vm0, %v19262_v44 }
  0x7f   :  { %17942 = vmatprep.mubr.msk.bf16.mxu0 %vm844_vm0, %v19263_v45  ;;  %v19299_v45 = vld [vmem:[%s24654_s0 + $0x1e0] sm:$0xff]  }
  0x86   :  { %17943 = vmatmul.mubr.msk.bf16.gmra.mrb[64].mxu0 %vm844_vm0, %v19264_v46 }
  0x87   :  { %17946 = vmatprep.mubr.msk.bf16.mxu0 %vm844_vm0, %v19265_v47 }
  0x8e   :  { %17947 = vmatmul.mubr.msk.bf16.gmra.mrb[68].mxu0 %vm844_vm0, %v19266_v48 }
  0x8f   :  { %17950 = vmatprep.mubr.msk.bf16.mxu0 %vm844_vm0, %v19267_v49 }
  0x96   :  { %17951 = vmatmul.mubr.msk.bf16.gmra.mrb[72].mxu0 %vm844_vm0, %v19268_v50 }
  0x97   :  { %17954 = vmatprep.mubr.msk.bf16.mxu0 %vm844_vm0, %v19269_v51 }
  0x9e   :  { %17955 = vmatmul.mubr.msk.bf16.gmra.mrb[76].mxu0 %vm844_vm0, %v19270_v52 }
  0x9f   :  { %17958 = vmatprep.mubr.msk.bf16.mxu0 %vm844_vm0, %v19271_v53 }
  0xa6   :  { %17959 = vmatmul.mubr.msk.bf16.gmra.mrb[80].mxu0 %vm844_vm0, %v19272_v54 }
  0xa7   :  { %17962 = vmatprep.mubr.msk.bf16.mxu0 %vm844_vm0, %v19273_v55 }
  0xae   :  { %17963 = vmatmul.mubr.msk.bf16.gmra.mrb[84].mxu0 %vm844_vm0, %v19274_v56 }
  0xaf   :  { %17966 = vmatprep.mubr.msk.bf16.mxu0 %vm844_vm0, %v19275_v57 }
  0xb6   :  { %17967 = vmatmul.mubr.msk.bf16.gmra.mrb[88].mxu0 %vm844_vm0, %v19276_v58  ;;  %v19300_v58 = vld [vmem:[%s24654_s0 + $0x1e8] sm:$0xff]  }
  0xb7   :  { %17970 = vmatprep.mubr.msk.bf16.mxu0 %vm844_vm0, %v19277_v59 }
  0xbe   :  { %17971 = vmatmul.mubr.msk.bf16.gmra.mrb[92].mxu0 %vm844_vm0, %v19278_v60 }
  0xbf   :  { %17974 = vmatprep.mubr.msk.bf16.mxu0 %vm844_vm0, %v19279_v61  ;;  %v19301_v61 = vld [vmem:[%s24654_s0 + $0x1f0] sm:$0xff]  }
  0xc6   :  { %17975 = vmatmul.mubr.msk.bf16.gmra.mrb[96].mxu0 %vm844_vm0, %v19280_v62 }
  0xc7   :  { %17978 = vmatprep.mubr.msk.bf16.mxu0 %vm844_vm0, %v19281_v63 }
  0xce   :  { %17979 = vmatmul.mubr.msk.bf16.gmra.mrb[100].mxu0 %vm844_vm0, %v19282_v0 }
  0xcf   :  { %17982 = vmatprep.mubr.msk.bf16.mxu0 %vm844_vm0, %v19283_v1 }
  0xd6   :  { %17983 = vmatmul.mubr.msk.bf16.gmra.mrb[104].mxu0 %vm844_vm0, %v19284_v2 }
  0xd7   :  { %17986 = vmatprep.mubr.msk.bf16.mxu0 %vm844_vm0, %v19287_v3 }
  0xd9   :  { %v17880_v5 = vpop.f32.mrb[0].mxu0 }
  0xda   :  { %v1224_v6 = vadd.f32 %v17880_v5, %v20459_v4  ;;  %v1215_v7 = vpop.f32.mrb[1].mxu0 }
  0xdb   :  { %v1216_v9 = vadd.f32 %v20459_v4, %v1215_v7  ;;  %v17881_v10 = vpop.f32.mrb[2].mxu0 }
  0xdc   :  { %v2112_v12 = vmax.f32 %v1224_v6, 0.0  ;;  %v1227_v13 = vadd.f32 %v17881_v10, %v20459_v4  ;;  %v1218_v14 = vpop.f32.mrb[3].mxu0 }
  0xdd   :  { %v2110_v15 = vmax.f32 %v1216_v9, 0.0  ;;  %v1219_v16 = vadd.f32 %v20459_v4, %v1218_v14  ;;  %v19302_v14 = vld [vmem:[%s24654_s0 + $0x1f8] sm:$0xff]  }
  0xde   :  { %v2113_v17 = vmax.f32 %v1227_v13, 0.0  ;;  %17987 = vmatmul.mubr.msk.bf16.gmra.mrb[108].mxu0 %vm844_vm0, %v19288_v8 }
  0xdf   :  { %v2334_v18 = vmax.f32 %v2110_v15, %v2112_v12  ;;  %v2111_v19 = vmax.f32 %v1219_v16, 0.0  ;;  %17990 = vmatprep.mubr.msk.bf16.mxu0 %vm844_vm0, %v19291_v11 }
  0xe1   :  { %v2335_v20 = vmax.f32 %v2111_v19, %v2113_v17  ;;  %v17884_v21 = vpop.f32.mrb[4].mxu0 }
  0xe2   :  { %v1240_v22 = vadd.f32 %v17884_v21, %v20459_v4  ;;  %v1231_v23 = vpop.f32.mrb[5].mxu0 }
  0xe3   :  { %v1232_v25 = vadd.f32 %v20459_v4, %v1231_v23  ;;  %v17885_v26 = vpop.f32.mrb[6].mxu0 }
  0xe4   :  { %v2116_v28 = vmax.f32 %v1240_v22, 0.0  ;;  %v1243_v29 = vadd.f32 %v17885_v26, %v20459_v4  ;;  %v1234_v30 = vpop.f32.mrb[7].mxu0 }
  0xe5   :  { %v2114_v31 = vmax.f32 %v1232_v25, 0.0  ;;  %v1235_v32 = vadd.f32 %v20459_v4, %v1234_v30 }
  0xe6   :  { %v2117_v33 = vmax.f32 %v1243_v29, 0.0  ;;  %17991 = vmatmul.mubr.msk.bf16.gmra.mrb[112].mxu0 %vm844_vm0, %v19292_v24 }
  0xe7   :  { %v2336_v34 = vmax.f32 %v2114_v31, %v2116_v28  ;;  %v2115_v35 = vmax.f32 %v1235_v32, 0.0  ;;  %17994 = vmatprep.mubr.msk.bf16.mxu0 %vm844_vm0, %v19295_v27  ;;  %v19304_v31 = vld [vmem:[%s24654_s0 + $0x208] sm:$0xff]  }
  0xe9   :  { %v2446_v36 = vmax.f32 %v2334_v18, %v2336_v34  ;;  %v2337_v37 = vmax.f32 %v2115_v35, %v2117_v33  ;;  %v17888_v38 = vpop.f32.mrb[8].mxu0  ;;  %v19303_v18 = vld [vmem:[%s24654_s0 + $0x200] sm:$0xff]   ;;  %v19305_v34 = vld [vmem:[%s24654_s0 + $0x210] sm:$0xff]  }
  0xea   :  { %v1256_v39 = vadd.f32 %v17888_v38, %v20459_v4  ;;  %v1247_v40 = vpop.f32.mrb[9].mxu0 }
  0xeb   :  { %2572 = vst [vmem:[#allocation2 + $0x28] sm:$0xff] %v2446_v36  ;;  %v2447_v42 = vmax.f32 %v2335_v20, %v2337_v37  ;;  %v1248_v43 = vadd.f32 %v20459_v4, %v1247_v40  ;;  %v17889_v44 = vpop.f32.mrb[10].mxu0 }
  0xec   :  { %v2120_v46 = vmax.f32 %v1256_v39, 0.0  ;;  %v1259_v47 = vadd.f32 %v17889_v44, %v20459_v4  ;;  %v1250_v48 = vpop.f32.mrb[11].mxu0 }
  0xed   :  { %2573 = vst [vmem:[#allocation2 + $0x30] sm:$0x3f] %v2447_v42  ;;  %v2118_v49 = vmax.f32 %v1248_v43, 0.0  ;;  %v1251_v50 = vadd.f32 %v20459_v4, %v1250_v48 }
  0xee   :  { %v2121_v51 = vmax.f32 %v1259_v47, 0.0  ;;  %17995 = vmatmul.mubr.msk.bf16.gmra.mrb[116].mxu0 %vm844_vm0, %v19296_v41 }
  0xef   :  { %v2338_v52 = vmax.f32 %v2118_v49, %v2120_v46  ;;  %v2119_v53 = vmax.f32 %v1251_v50, 0.0  ;;  %17998 = vmatprep.mubr.msk.bf16.mxu0 %vm844_vm0, %v19299_v45  ;;  %v19306_v50 = vld [vmem:[%s24654_s0 + $0x218] sm:$0xff]  }
  0xf1   :  { %v2339_v54 = vmax.f32 %v2119_v53, %v2121_v51  ;;  %v17892_v55 = vpop.f32.mrb[12].mxu0 }
  0xf2   :  { %v1272_v56 = vadd.f32 %v17892_v55, %v20459_v4  ;;  %v1263_v57 = vpop.f32.mrb[13].mxu0 }
  0xf3   :  { %v1264_v59 = vadd.f32 %v20459_v4, %v1263_v57  ;;  %v17893_v60 = vpop.f32.mrb[14].mxu0 }
  0xf4   :  { %v2124_v62 = vmax.f32 %v1272_v56, 0.0  ;;  %v1275_v63 = vadd.f32 %v17893_v60, %v20459_v4  ;;  %v1266_v0 = vpop.f32.mrb[15].mxu0  ;;  %v2731_v1 = vld [vmem:[#allocation2 + $0x30] sm:$0xff] }
  0xf5   :  { %v2122_v2 = vmax.f32 %v1264_v59, 0.0  ;;  %v1267_v3 = vadd.f32 %v20459_v4, %v1266_v0  ;;  %v2785_v5 = vpack.c.bf16 %v2731_v1, %v2446_v36 }
  0xf6   :  { %v2125_v6 = vmax.f32 %v1275_v63, 0.0  ;;  %17999 = vmatmul.mubr.msk.bf16.gmra.mrb[120].mxu0 %vm844_vm0, %v19300_v58 }
  0xf7   :  { %v2340_v7 = vmax.f32 %v2122_v2, %v2124_v62  ;;  %v2123_v8 = vmax.f32 %v1267_v3, 0.0  ;;  %18119 = vmatmul.mubr.bf16.vlgmr.msra.gmra.mrb[0].mxu1 %v2785_v5  ;;  %18002 = vmatprep.mubr.msk.bf16.mxu0 %vm844_vm0, %v19301_v61  ;;  %v19308_v3 = vld [vmem:[%s24654_s0 + $0x228] sm:$0xff]  }
  0xf9   :  { %v2448_v9 = vmax.f32 %v2338_v52, %v2340_v7  ;;  %v2341_v10 = vmax.f32 %v2123_v8, %v2125_v6  ;;  %v17896_v11 = vpop.f32.mrb[16].mxu0  ;;  %v19309_v7 = vld [vmem:[%s24654_s0 + $0x230] sm:$0xff]  }
  0xfa   :  { %v1288_v12 = vadd.f32 %v17896_v11, %v20459_v4  ;;  %v1279_v13 = vpop.f32.mrb[17].mxu0 }
  0xfb   :  { %2574 = vst [vmem:[#allocation2 + $0x48] sm:$0xff] %v2448_v9  ;;  %v2449_v15 = vmax.f32 %v2339_v54, %v2341_v10  ;;  %v1280_v16 = vadd.f32 %v20459_v4, %v1279_v13  ;;  %v17897_v17 = vpop.f32.mrb[18].mxu0  ;;  %v19307_v54 = vld [vmem:[%s24654_s0 + $0x220] sm:$0xff]  }
  0xfc   :  { %v2128_v19 = vmax.f32 %v1288_v12, 0.0  ;;  %v1291_v20 = vadd.f32 %v17897_v17, %v20459_v4  ;;  %v1282_v21 = vpop.f32.mrb[19].mxu0 }
  0xfd   :  { %2575 = vst [vmem:[#allocation2 + $0x50] sm:$0x3f] %v2449_v15  ;;  %v2126_v22 = vmax.f32 %v1280_v16, 0.0  ;;  %v1283_v23 = vadd.f32 %v20459_v4, %v1282_v21 }
  0xfe   :  { %v2129_v24 = vmax.f32 %v1291_v20, 0.0  ;;  %18003 = vmatmul.mubr.msk.bf16.gmra.mrb[124].mxu0 %vm844_vm0, %v19302_v14 }
  0xff   :  { %v2342_v25 = vmax.f32 %v2126_v22, %v2128_v19  ;;  %v2127_v26 = vmax.f32 %v1283_v23, 0.0  ;;  %18006 = vmatprep.mubr.msk.bf16.mxu0 %vm844_vm0, %v19303_v18  ;;  %v19310_v23 = vld [vmem:[%s24654_s0 + $0x238] sm:$0xff]  }
 0x101   :  { %v2343_v27 = vmax.f32 %v2127_v26, %v2129_v24  ;;  %v17900_v28 = vpop.f32.mrb[20].mxu0 }
 0x102   :  { %v1304_v29 = vadd.f32 %v17900_v28, %v20459_v4  ;;  %v1295_v30 = vpop.f32.mrb[21].mxu0 }
 0x103   :  { %v1296_v32 = vadd.f32 %v20459_v4, %v1295_v30  ;;  %v17901_v33 = vpop.f32.mrb[22].mxu0 }
 0x104   :  { %v2132_v35 = vmax.f32 %v1304_v29, 0.0  ;;  %v1307_v36 = vadd.f32 %v17901_v33, %v20459_v4  ;;  %v1298_v37 = vpop.f32.mrb[23].mxu0  ;;  %v2733_v38 = vld [vmem:[#allocation2 + $0x50] sm:$0xff] }
 0x105   :  { %v2130_v39 = vmax.f32 %v1296_v32, 0.0  ;;  %v1299_v40 = vadd.f32 %v20459_v4, %v1298_v37  ;;  %v2786_v41 = vpack.c.bf16 %v2733_v38, %v2448_v9 }
 0x106   :  { %v2133_v42 = vmax.f32 %v1307_v36, 0.0  ;;  %18007 = vmatmul.mubr.msk.bf16.gmra.mrb[128].mxu0 %vm844_vm0, %v19304_v31 }
 0x107   :  { %v2344_v43 = vmax.f32 %v2130_v39, %v2132_v35  ;;  %v2131_v44 = vmax.f32 %v1299_v40, 0.0  ;;  %18122 = vmatprep.mubr.bf16.mxu1 %v2786_v41  ;;  %18010 = vmatprep.mubr.msk.bf16.mxu0 %vm844_vm0, %v19305_v34  ;;  %v19312_v40 = vld [vmem:[%s24654_s0 + $0x248] sm:$0xff]  }
 0x109   :  { %v2450_v45 = vmax.f32 %v2342_v25, %v2344_v43  ;;  %v2345_v46 = vmax.f32 %v2131_v44, %v2133_v42  ;;  %v17904_v47 = vpop.f32.mrb[24].mxu0  ;;  %v19313_v43 = vld [vmem:[%s24654_s0 + $0x250] sm:$0xff]  }
 0x10a   :  { %v1320_v48 = vadd.f32 %v17904_v47, %v20459_v4  ;;  %v1311_v49 = vpop.f32.mrb[25].mxu0 }
 0x10b   :  { %2576 = vst [vmem:[#allocation2 + $0x68] sm:$0xff] %v2450_v45  ;;  %v2451_v51 = vmax.f32 %v2343_v27, %v2345_v46  ;;  %v1312_v52 = vadd.f32 %v20459_v4, %v1311_v49  ;;  %v17905_v53 = vpop.f32.mrb[26].mxu0  ;;  %v19311_v27 = vld [vmem:[%s24654_s0 + $0x240] sm:$0xff]  }
 0x10c   :  { %v2136_v55 = vmax.f32 %v1320_v48, 0.0  ;;  %v1323_v56 = vadd.f32 %v17905_v53, %v20459_v4  ;;  %v1314_v57 = vpop.f32.mrb[27].mxu0 }
 0x10d   :  { %2577 = vst [vmem:[#allocation2 + $0x70] sm:$0x3f] %v2451_v51  ;;  %v2134_v58 = vmax.f32 %v1312_v52, 0.0  ;;  %v1315_v59 = vadd.f32 %v20459_v4, %v1314_v57 }
 0x10e   :  { %v2137_v60 = vmax.f32 %v1323_v56, 0.0  ;;  %18011 = vmatmul.mubr.msk.bf16.gmra.mrb[132].mxu0 %vm844_vm0, %v19306_v50 }
 0x10f   :  { %v2346_v61 = vmax.f32 %v2134_v58, %v2136_v55  ;;  %v2135_v62 = vmax.f32 %v1315_v59, 0.0  ;;  %18014 = vmatprep.mubr.msk.bf16.mxu0 %vm844_vm0, %v19307_v54  ;;  %v19314_v59 = vld [vmem:[%s24654_s0 + $0x258] sm:$0xff]  }
 0x111   :  { %v2347_v63 = vmax.f32 %v2135_v62, %v2137_v60  ;;  %v17908_v0 = vpop.f32.mrb[28].mxu0 }
 0x112   :  { %v1336_v1 = vadd.f32 %v17908_v0, %v20459_v4  ;;  %v1327_v2 = vpop.f32.mrb[29].mxu0 }
 0x113   :  { %v1328_v5 = vadd.f32 %v20459_v4, %v1327_v2  ;;  %v17909_v6 = vpop.f32.mrb[30].mxu0 }
 0x114   :  { %v2140_v8 = vmax.f32 %v1336_v1, 0.0  ;;  %v1339_v9 = vadd.f32 %v17909_v6, %v20459_v4  ;;  %v1330_v10 = vpop.f32.mrb[31].mxu0  ;;  %v2735_v11 = vld [vmem:[#allocation2 + $0x70] sm:$0xff] }
 0x115   :  { %v2138_v12 = vmax.f32 %v1328_v5, 0.0  ;;  %v1331_v13 = vadd.f32 %v20459_v4, %v1330_v10  ;;  %v2787_v14 = vpack.c.bf16 %v2735_v11, %v2450_v45 }
 0x116   :  { %v2141_v15 = vmax.f32 %v1339_v9, 0.0  ;;  %18015 = vmatmul.mubr.msk.bf16.gmra.mrb[136].mxu0 %vm844_vm0, %v19308_v3 }
 0x117   :  { %v2348_v16 = vmax.f32 %v2138_v12, %v2140_v8  ;;  %v2139_v17 = vmax.f32 %v1331_v13, 0.0  ;;  %18123 = vmatmul.mubr.bf16.gmra.mrb[4].mxu1 %v2787_v14  ;;  %18018 = vmatprep.mubr.msk.bf16.mxu0 %vm844_vm0, %v19309_v7  ;;  %v19316_v13 = vld [vmem:[%s24654_s0 + $0x268] sm:$0xff]  }
 0x119   :  { %v2452_v18 = vmax.f32 %v2346_v61, %v2348_v16  ;;  %v2349_v19 = vmax.f32 %v2139_v17, %v2141_v15  ;;  %v17912_v20 = vpop.f32.mrb[32].mxu0  ;;  %v19317_v16 = vld [vmem:[%s24654_s0 + $0x270] sm:$0xff]  }
 0x11a   :  { %v1352_v21 = vadd.f32 %v17912_v20, %v20459_v4  ;;  %v1343_v22 = vpop.f32.mrb[33].mxu0 }
 0x11b   :  { %2578 = vst [vmem:[#allocation2 + $0x88] sm:$0xff] %v2452_v18  ;;  %v2453_v24 = vmax.f32 %v2347_v63, %v2349_v19  ;;  %v1344_v25 = vadd.f32 %v20459_v4, %v1343_v22  ;;  %v17913_v26 = vpop.f32.mrb[34].mxu0  ;;  %v19315_v63 = vld [vmem:[%s24654_s0 + $0x260] sm:$0xff]  }
 0x11c   :  { %v2144_v28 = vmax.f32 %v1352_v21, 0.0  ;;  %v1355_v29 = vadd.f32 %v17913_v26, %v20459_v4  ;;  %v1346_v30 = vpop.f32.mrb[35].mxu0 }
 0x11d   :  { %2579 = vst [vmem:[#allocation2 + $0x90] sm:$0x3f] %v2453_v24  ;;  %v2142_v31 = vmax.f32 %v1344_v25, 0.0  ;;  %v1347_v32 = vadd.f32 %v20459_v4, %v1346_v30 }
 0x11e   :  { %v2145_v33 = vmax.f32 %v1355_v29, 0.0  ;;  %18019 = vmatmul.mubr.msk.bf16.gmra.mrb[140].mxu0 %vm844_vm0, %v19310_v23 }
 0x11f   :  { %v2350_v34 = vmax.f32 %v2142_v31, %v2144_v28  ;;  %v2143_v35 = vmax.f32 %v1347_v32, 0.0  ;;  %18022 = vmatprep.mubr.msk.bf16.mxu0 %vm844_vm0, %v19311_v27  ;;  %v19318_v32 = vld [vmem:[%s24654_s0 + $0x278] sm:$0xff]  }
 0x121   :  { %v2351_v36 = vmax.f32 %v2143_v35, %v2145_v33  ;;  %v17916_v37 = vpop.f32.mrb[36].mxu0 }
 0x122   :  { %v1368_v38 = vadd.f32 %v17916_v37, %v20459_v4  ;;  %v1359_v39 = vpop.f32.mrb[37].mxu0 }
 0x123   :  { %v1360_v41 = vadd.f32 %v20459_v4, %v1359_v39  ;;  %v17917_v42 = vpop.f32.mrb[38].mxu0 }
 0x124   :  { %v2148_v44 = vmax.f32 %v1368_v38, 0.0  ;;  %v1371_v45 = vadd.f32 %v17917_v42, %v20459_v4  ;;  %v1362_v46 = vpop.f32.mrb[39].mxu0  ;;  %v2737_v47 = vld [vmem:[#allocation2 + $0x90] sm:$0xff] }
 0x125   :  { %v2146_v48 = vmax.f32 %v1360_v41, 0.0  ;;  %v1363_v49 = vadd.f32 %v20459_v4, %v1362_v46  ;;  %v2788_v50 = vpack.c.bf16 %v2737_v47, %v2452_v18 }
 0x126   :  { %v2149_v51 = vmax.f32 %v1371_v45, 0.0  ;;  %18023 = vmatmul.mubr.msk.bf16.gmra.mrb[144].mxu0 %vm844_vm0, %v19312_v40 }
 0x127   :  { %v2352_v52 = vmax.f32 %v2146_v48, %v2148_v44  ;;  %v2147_v53 = vmax.f32 %v1363_v49, 0.0  ;;  %18126 = vmatprep.mubr.bf16.mxu1 %v2788_v50  ;;  %18026 = vmatprep.mubr.msk.bf16.mxu0 %vm844_vm0, %v19313_v43  ;;  %v19320_v49 = vld [vmem:[%s24654_s0 + $0x288] sm:$0xff]  }
 0x129   :  { %v2454_v54 = vmax.f32 %v2350_v34, %v2352_v52  ;;  %v2353_v55 = vmax.f32 %v2147_v53, %v2149_v51  ;;  %v17920_v56 = vpop.f32.mrb[40].mxu0  ;;  %v19321_v52 = vld [vmem:[%s24654_s0 + $0x290] sm:$0xff]  }
 0x12a   :  { %v1384_v57 = vadd.f32 %v17920_v56, %v20459_v4  ;;  %v1375_v58 = vpop.f32.mrb[41].mxu0 }
 0x12b   :  { %2580 = vst [vmem:[#allocation2 + $0xa8] sm:$0xff] %v2454_v54  ;;  %v2455_v60 = vmax.f32 %v2351_v36, %v2353_v55  ;;  %v1376_v61 = vadd.f32 %v20459_v4, %v1375_v58  ;;  %v17921_v62 = vpop.f32.mrb[42].mxu0  ;;  %v19319_v36 = vld [vmem:[%s24654_s0 + $0x280] sm:$0xff]  }
 0x12c   :  { %v2152_v0 = vmax.f32 %v1384_v57, 0.0  ;;  %v1387_v1 = vadd.f32 %v17921_v62, %v20459_v4  ;;  %v1378_v2 = vpop.f32.mrb[43].mxu0 }
 0x12d   :  { %2581 = vst [vmem:[#allocation2 + $0xb0] sm:$0x3f] %v2455_v60  ;;  %v2150_v3 = vmax.f32 %v1376_v61, 0.0  ;;  %v1379_v5 = vadd.f32 %v20459_v4, %v1378_v2 }
 0x12e   :  { %v2153_v6 = vmax.f32 %v1387_v1, 0.0  ;;  %18027 = vmatmul.mubr.msk.bf16.gmra.mrb[148].mxu0 %vm844_vm0, %v19314_v59 }
 0x12f   :  { %v2354_v7 = vmax.f32 %v2150_v3, %v2152_v0  ;;  %v2151_v8 = vmax.f32 %v1379_v5, 0.0  ;;  %18030 = vmatprep.mubr.msk.bf16.mxu0 %vm844_vm0, %v19315_v63  ;;  %v19322_v5 = vld [vmem:[%s24654_s0 + $0x298] sm:$0xff]  }
 0x131   :  { %v2355_v9 = vmax.f32 %v2151_v8, %v2153_v6  ;;  %v17924_v10 = vpop.f32.mrb[44].mxu0 }
 0x132   :  { %v1400_v11 = vadd.f32 %v17924_v10, %v20459_v4  ;;  %v1391_v12 = vpop.f32.mrb[45].mxu0 }
 0x133   :  { %v1392_v14 = vadd.f32 %v20459_v4, %v1391_v12  ;;  %v17925_v15 = vpop.f32.mrb[46].mxu0 }
 0x134   :  { %v2156_v17 = vmax.f32 %v1400_v11, 0.0  ;;  %v1403_v18 = vadd.f32 %v17925_v15, %v20459_v4  ;;  %v1394_v19 = vpop.f32.mrb[47].mxu0  ;;  %v2739_v20 = vld [vmem:[#allocation2 + $0xb0] sm:$0xff] }
 0x135   :  { %v2154_v21 = vmax.f32 %v1392_v14, 0.0  ;;  %v1395_v22 = vadd.f32 %v20459_v4, %v1394_v19  ;;  %v2789_v23 = vpack.c.bf16 %v2739_v20, %v2454_v54 }
 0x136   :  { %v2157_v24 = vmax.f32 %v1403_v18, 0.0  ;;  %18031 = vmatmul.mubr.msk.bf16.gmra.mrb[152].mxu0 %vm844_vm0, %v19316_v13 }
 0x137   :  { %v2356_v25 = vmax.f32 %v2154_v21, %v2156_v17  ;;  %v2155_v26 = vmax.f32 %v1395_v22, 0.0  ;;  %18127 = vmatmul.mubr.bf16.gmra.mrb[8].mxu1 %v2789_v23  ;;  %18034 = vmatprep.mubr.msk.bf16.mxu0 %vm844_vm0, %v19317_v16  ;;  %v19324_v22 = vld [vmem:[%s24654_s0 + $0x2a8] sm:$0xff]  }
 0x139   :  { %v2456_v27 = vmax.f32 %v2354_v7, %v2356_v25  ;;  %v2357_v28 = vmax.f32 %v2155_v26, %v2157_v24  ;;  %v17928_v29 = vpop.f32.mrb[48].mxu0  ;;  %v19325_v25 = vld [vmem:[%s24654_s0 + $0x2b0] sm:$0xff]  }
 0x13a   :  { %v1416_v30 = vadd.f32 %v17928_v29, %v20459_v4  ;;  %v1407_v31 = vpop.f32.mrb[49].mxu0 }
 0x13b   :  { %2582 = vst [vmem:[#allocation2 + $0xc8] sm:$0xff] %v2456_v27  ;;  %v2457_v33 = vmax.f32 %v2355_v9, %v2357_v28  ;;  %v1408_v34 = vadd.f32 %v20459_v4, %v1407_v31  ;;  %v17929_v35 = vpop.f32.mrb[50].mxu0  ;;  %v19323_v9 = vld [vmem:[%s24654_s0 + $0x2a0] sm:$0xff]  }
 0x13c   :  { %v2160_v37 = vmax.f32 %v1416_v30, 0.0  ;;  %v1419_v38 = vadd.f32 %v17929_v35, %v20459_v4  ;;  %v1410_v39 = vpop.f32.mrb[51].mxu0 }
 0x13d   :  { %2583 = vst [vmem:[#allocation2 + $0xd0] sm:$0x3f] %v2457_v33  ;;  %v2158_v40 = vmax.f32 %v1408_v34, 0.0  ;;  %v1411_v41 = vadd.f32 %v20459_v4, %v1410_v39 }
 0x13e   :  { %v2161_v42 = vmax.f32 %v1419_v38, 0.0  ;;  %18035 = vmatmul.mubr.msk.bf16.gmra.mrb[156].mxu0 %vm844_vm0, %v19318_v32 }
 0x13f   :  { %v2358_v43 = vmax.f32 %v2158_v40, %v2160_v37  ;;  %v2159_v44 = vmax.f32 %v1411_v41, 0.0  ;;  %18038 = vmatprep.mubr.msk.bf16.mxu0 %vm844_vm0, %v19319_v36  ;;  %v19326_v41 = vld [vmem:[%s24654_s0 + $0x2b8] sm:$0xff]  }
 0x141   :  { %v2359_v45 = vmax.f32 %v2159_v44, %v2161_v42  ;;  %v17932_v46 = vpop.f32.mrb[52].mxu0 }
 0x142   :  { %v1432_v47 = vadd.f32 %v17932_v46, %v20459_v4  ;;  %v1423_v48 = vpop.f32.mrb[53].mxu0 }
 0x143   :  { %v1424_v50 = vadd.f32 %v20459_v4, %v1423_v48  ;;  %v17933_v51 = vpop.f32.mrb[54].mxu0 }
 0x144   :  { %v2164_v53 = vmax.f32 %v1432_v47, 0.0  ;;  %v1435_v54 = vadd.f32 %v17933_v51, %v20459_v4  ;;  %v1426_v55 = vpop.f32.mrb[55].mxu0  ;;  %v2741_v56 = vld [vmem:[#allocation2 + $0xd0] sm:$0xff] }
 0x145   :  { %v2162_v57 = vmax.f32 %v1424_v50, 0.0  ;;  %v1427_v58 = vadd.f32 %v20459_v4, %v1426_v55  ;;  %v2790_v59 = vpack.c.bf16 %v2741_v56, %v2456_v27 }
 0x146   :  { %v2165_v60 = vmax.f32 %v1435_v54, 0.0  ;;  %18039 = vmatmul.mubr.msk.bf16.gmra.mrb[160].mxu0 %vm844_vm0, %v19320_v49 }
 0x147   :  { %v2360_v61 = vmax.f32 %v2162_v57, %v2164_v53  ;;  %v2163_v62 = vmax.f32 %v1427_v58, 0.0  ;;  %18130 = vmatprep.mubr.bf16.mxu1 %v2790_v59  ;;  %18042 = vmatprep.mubr.msk.bf16.mxu0 %vm844_vm0, %v19321_v52  ;;  %v19328_v58 = vld [vmem:[%s24654_s0 + $0x2c8] sm:$0xff]  }
 0x149   :  { %v2458_v63 = vmax.f32 %v2358_v43, %v2360_v61  ;;  %v2361_v0 = vmax.f32 %v2163_v62, %v2165_v60  ;;  %v17936_v1 = vpop.f32.mrb[56].mxu0  ;;  %v19329_v61 = vld [vmem:[%s24654_s0 + $0x2d0] sm:$0xff]  }
 0x14a   :  { %v1448_v2 = vadd.f32 %v17936_v1, %v20459_v4  ;;  %v1439_v3 = vpop.f32.mrb[57].mxu0 }
 0x14b   :  { %2584 = vst [vmem:[#allocation2 + $0xe8] sm:$0xff] %v2458_v63  ;;  %v2459_v6 = vmax.f32 %v2359_v45, %v2361_v0  ;;  %v1440_v7 = vadd.f32 %v20459_v4, %v1439_v3  ;;  %v17937_v8 = vpop.f32.mrb[58].mxu0  ;;  %v19327_v45 = vld [vmem:[%s24654_s0 + $0x2c0] sm:$0xff]  }
 0x14c   :  { %v2168_v10 = vmax.f32 %v1448_v2, 0.0  ;;  %v1451_v11 = vadd.f32 %v17937_v8, %v20459_v4  ;;  %v1442_v12 = vpop.f32.mrb[59].mxu0 }
 0x14d   :  { %2585 = vst [vmem:[#allocation2 + $0xf0] sm:$0x3f] %v2459_v6  ;;  %v2166_v13 = vmax.f32 %v1440_v7, 0.0  ;;  %v1443_v14 = vadd.f32 %v20459_v4, %v1442_v12 }
 0x14e   :  { %v2169_v15 = vmax.f32 %v1451_v11, 0.0  ;;  %18043 = vmatmul.mubr.msk.bf16.gmra.mrb[164].mxu0 %vm844_vm0, %v19322_v5 }
 0x14f   :  { %v2362_v16 = vmax.f32 %v2166_v13, %v2168_v10  ;;  %v2167_v17 = vmax.f32 %v1443_v14, 0.0  ;;  %18046 = vmatprep.mubr.msk.bf16.mxu0 %vm844_vm0, %v19323_v9  ;;  %v19330_v14 = vld [vmem:[%s24654_s0 + $0x2d8] sm:$0xff]  }
 0x151   :  { %v2363_v18 = vmax.f32 %v2167_v17, %v2169_v15  ;;  %v17940_v19 = vpop.f32.mrb[60].mxu0 }
 0x152   :  { %v1464_v20 = vadd.f32 %v17940_v19, %v20459_v4  ;;  %v1455_v21 = vpop.f32.mrb[61].mxu0 }
 0x153   :  { %v1456_v23 = vadd.f32 %v20459_v4, %v1455_v21  ;;  %v17941_v24 = vpop.f32.mrb[62].mxu0 }
 0x154   :  { %v2172_v26 = vmax.f32 %v1464_v20, 0.0  ;;  %v1467_v27 = vadd.f32 %v17941_v24, %v20459_v4  ;;  %v1458_v28 = vpop.f32.mrb[63].mxu0  ;;  %v2743_v29 = vld [vmem:[#allocation2 + $0xf0] sm:$0xff] }
 0x155   :  { %v2170_v30 = vmax.f32 %v1456_v23, 0.0  ;;  %v1459_v31 = vadd.f32 %v20459_v4, %v1458_v28  ;;  %v2791_v32 = vpack.c.bf16 %v2743_v29, %v2458_v63 }
 0x156   :  { %v2173_v33 = vmax.f32 %v1467_v27, 0.0  ;;  %18047 = vmatmul.mubr.msk.bf16.gmra.mrb[168].mxu0 %vm844_vm0, %v19324_v22 }
 0x157   :  { %v2364_v34 = vmax.f32 %v2170_v30, %v2172_v26  ;;  %v2171_v35 = vmax.f32 %v1459_v31, 0.0  ;;  %18131 = vmatmul.mubr.bf16.gmra.mrb[12].mxu1 %v2791_v32  ;;  %18050 = vmatprep.mubr.msk.bf16.mxu0 %vm844_vm0, %v19325_v25  ;;  %v19332_v31 = vld [vmem:[%s24654_s0 + $0x2e8] sm:$0xff]  }
 0x159   :  { %v2460_v36 = vmax.f32 %v2362_v16, %v2364_v34  ;;  %v2365_v37 = vmax.f32 %v2171_v35, %v2173_v33  ;;  %v17944_v38 = vpop.f32.mrb[64].mxu0  ;;  %v19333_v34 = vld [vmem:[%s24654_s0 + $0x2f0] sm:$0xff]  }
 0x15a   :  { %v1480_v39 = vadd.f32 %v17944_v38, %v20459_v4  ;;  %v1471_v40 = vpop.f32.mrb[65].mxu0 }
 0x15b   :  { %2586 = vst [vmem:[#allocation2 + $0x108] sm:$0xff] %v2460_v36  ;;  %v2461_v42 = vmax.f32 %v2363_v18, %v2365_v37  ;;  %v1472_v43 = vadd.f32 %v20459_v4, %v1471_v40  ;;  %v17945_v44 = vpop.f32.mrb[66].mxu0  ;;  %v19331_v18 = vld [vmem:[%s24654_s0 + $0x2e0] sm:$0xff]  }
 0x15c   :  { %v2176_v46 = vmax.f32 %v1480_v39, 0.0  ;;  %v1483_v47 = vadd.f32 %v17945_v44, %v20459_v4  ;;  %v1474_v48 = vpop.f32.mrb[67].mxu0 }
 0x15d   :  { %2587 = vst [vmem:[#allocation2 + $0x110] sm:$0x3f] %v2461_v42  ;;  %v2174_v49 = vmax.f32 %v1472_v43, 0.0  ;;  %v1475_v50 = vadd.f32 %v20459_v4, %v1474_v48 }
 0x15e   :  { %v2177_v51 = vmax.f32 %v1483_v47, 0.0  ;;  %18051 = vmatmul.mubr.msk.bf16.gmra.mrb[172].mxu0 %vm844_vm0, %v19326_v41 }
 0x15f   :  { %v2366_v52 = vmax.f32 %v2174_v49, %v2176_v46  ;;  %v2175_v53 = vmax.f32 %v1475_v50, 0.0  ;;  %18054 = vmatprep.mubr.msk.bf16.mxu0 %vm844_vm0, %v19327_v45  ;;  %v19334_v50 = vld [vmem:[%s24654_s0 + $0x2f8] sm:$0xff]  }
 0x161   :  { %v2367_v54 = vmax.f32 %v2175_v53, %v2177_v51  ;;  %v17948_v55 = vpop.f32.mrb[68].mxu0 }
 0x162   :  { %v1496_v56 = vadd.f32 %v17948_v55, %v20459_v4  ;;  %v1487_v57 = vpop.f32.mrb[69].mxu0 }
 0x163   :  { %v1488_v59 = vadd.f32 %v20459_v4, %v1487_v57  ;;  %v17949_v60 = vpop.f32.mrb[70].mxu0 }
 0x164   :  { %v2180_v62 = vmax.f32 %v1496_v56, 0.0  ;;  %v1499_v63 = vadd.f32 %v17949_v60, %v20459_v4  ;;  %v1490_v0 = vpop.f32.mrb[71].mxu0  ;;  %v2745_v1 = vld [vmem:[#allocation2 + $0x110] sm:$0xff] }
 0x165   :  { %v2178_v2 = vmax.f32 %v1488_v59, 0.0  ;;  %v1491_v3 = vadd.f32 %v20459_v4, %v1490_v0  ;;  %v2792_v5 = vpack.c.bf16 %v2745_v1, %v2460_v36 }
 0x166   :  { %v2181_v6 = vmax.f32 %v1499_v63, 0.0  ;;  %18055 = vmatmul.mubr.msk.bf16.gmra.mrb[176].mxu0 %vm844_vm0, %v19328_v58 }
 0x167   :  { %v2368_v7 = vmax.f32 %v2178_v2, %v2180_v62  ;;  %v2179_v8 = vmax.f32 %v1491_v3, 0.0  ;;  %18134 = vmatprep.mubr.bf16.mxu1 %v2792_v5  ;;  %18058 = vmatprep.mubr.msk.bf16.mxu0 %vm844_vm0, %v19329_v61  ;;  %v19336_v3 = vld [vmem:[%s24654_s0 + $0x308] sm:$0xff]  }
 0x169   :  { %v2462_v9 = vmax.f32 %v2366_v52, %v2368_v7  ;;  %v2369_v10 = vmax.f32 %v2179_v8, %v2181_v6  ;;  %v17952_v11 = vpop.f32.mrb[72].mxu0  ;;  %v19337_v7 = vld [vmem:[%s24654_s0 + $0x310] sm:$0xff]  }
 0x16a   :  { %v1512_v12 = vadd.f32 %v17952_v11, %v20459_v4  ;;  %v1503_v13 = vpop.f32.mrb[73].mxu0 }
 0x16b   :  { %2588 = vst [vmem:[#allocation2 + $0x128] sm:$0xff] %v2462_v9  ;;  %v2463_v15 = vmax.f32 %v2367_v54, %v2369_v10  ;;  %v1504_v16 = vadd.f32 %v20459_v4, %v1503_v13  ;;  %v17953_v17 = vpop.f32.mrb[74].mxu0  ;;  %v19335_v54 = vld [vmem:[%s24654_s0 + $0x300] sm:$0xff]  }
 0x16c   :  { %v2184_v19 = vmax.f32 %v1512_v12, 0.0  ;;  %v1515_v20 = vadd.f32 %v17953_v17, %v20459_v4  ;;  %v1506_v21 = vpop.f32.mrb[75].mxu0 }
 0x16d   :  { %2589 = vst [vmem:[#allocation2 + $0x130] sm:$0x3f] %v2463_v15  ;;  %v2182_v22 = vmax.f32 %v1504_v16, 0.0  ;;  %v1507_v23 = vadd.f32 %v20459_v4, %v1506_v21 }
 0x16e   :  { %v2185_v24 = vmax.f32 %v1515_v20, 0.0  ;;  %18059 = vmatmul.mubr.msk.bf16.gmra.mrb[180].mxu0 %vm844_vm0, %v19330_v14 }
 0x16f   :  { %v2370_v25 = vmax.f32 %v2182_v22, %v2184_v19  ;;  %v2183_v26 = vmax.f32 %v1507_v23, 0.0  ;;  %18062 = vmatprep.mubr.msk.bf16.mxu0 %vm844_vm0, %v19331_v18  ;;  %v19338_v23 = vld [vmem:[%s24654_s0 + $0x318] sm:$0xff]  }
 0x171   :  { %v2371_v27 = vmax.f32 %v2183_v26, %v2185_v24  ;;  %v17956_v28 = vpop.f32.mrb[76].mxu0 }
 0x172   :  { %v1528_v29 = vadd.f32 %v17956_v28, %v20459_v4  ;;  %v1519_v30 = vpop.f32.mrb[77].mxu0 }
 0x173   :  { %v1520_v32 = vadd.f32 %v20459_v4, %v1519_v30  ;;  %v17957_v33 = vpop.f32.mrb[78].mxu0 }
 0x174   :  { %v2188_v35 = vmax.f32 %v1528_v29, 0.0  ;;  %v1531_v36 = vadd.f32 %v17957_v33, %v20459_v4  ;;  %v1522_v37 = vpop.f32.mrb[79].mxu0  ;;  %v2747_v38 = vld [vmem:[#allocation2 + $0x130] sm:$0xff] }
 0x175   :  { %v2186_v39 = vmax.f32 %v1520_v32, 0.0  ;;  %v1523_v40 = vadd.f32 %v20459_v4, %v1522_v37  ;;  %v2793_v41 = vpack.c.bf16 %v2747_v38, %v2462_v9 }
 0x176   :  { %v2189_v42 = vmax.f32 %v1531_v36, 0.0  ;;  %18063 = vmatmul.mubr.msk.bf16.gmra.mrb[184].mxu0 %vm844_vm0, %v19332_v31 }
 0x177   :  { %v2372_v43 = vmax.f32 %v2186_v39, %v2188_v35  ;;  %v2187_v44 = vmax.f32 %v1523_v40, 0.0  ;;  %18135 = vmatmul.mubr.bf16.gmra.mrb[16].mxu1 %v2793_v41  ;;  %18066 = vmatprep.mubr.msk.bf16.mxu0 %vm844_vm0, %v19333_v34  ;;  %v19340_v40 = vld [vmem:[%s24654_s0 + $0x328] sm:$0xff]  }
 0x179   :  { %v2464_v45 = vmax.f32 %v2370_v25, %v2372_v43  ;;  %v2373_v46 = vmax.f32 %v2187_v44, %v2189_v42  ;;  %v17960_v47 = vpop.f32.mrb[80].mxu0  ;;  %v19341_v43 = vld [vmem:[%s24654_s0 + $0x330] sm:$0xff]  }
 0x17a   :  { %v1544_v48 = vadd.f32 %v17960_v47, %v20459_v4  ;;  %v1535_v49 = vpop.f32.mrb[81].mxu0 }
 0x17b   :  { %2590 = vst [vmem:[#allocation2 + $0x148] sm:$0xff] %v2464_v45  ;;  %v2465_v51 = vmax.f32 %v2371_v27, %v2373_v46  ;;  %v1536_v52 = vadd.f32 %v20459_v4, %v1535_v49  ;;  %v17961_v53 = vpop.f32.mrb[82].mxu0  ;;  %v19339_v27 = vld [vmem:[%s24654_s0 + $0x320] sm:$0xff]  }
 0x17c   :  { %v2192_v55 = vmax.f32 %v1544_v48, 0.0  ;;  %v1547_v56 = vadd.f32 %v17961_v53, %v20459_v4  ;;  %v1538_v57 = vpop.f32.mrb[83].mxu0 }
 0x17d   :  { %2591 = vst [vmem:[#allocation2 + $0x150] sm:$0x3f] %v2465_v51  ;;  %v2190_v58 = vmax.f32 %v1536_v52, 0.0  ;;  %v1539_v59 = vadd.f32 %v20459_v4, %v1538_v57  ;;  %v20753_v57 = vld [vmem:[%s24656_s2] ss:$0 sm:$0xff] }
 0x17e   :  { %v2193_v60 = vmax.f32 %v1547_v56, 0.0  ;;  %18067 = vmatmul.mubr.msk.bf16.gmra.mrb[188].mxu0 %vm844_vm0, %v19334_v50 }
 0x17f   :  { %v2374_v61 = vmax.f32 %v2190_v58, %v2192_v55  ;;  %v2191_v62 = vmax.f32 %v1539_v59, 0.0  ;;  %18070 = vmatprep.mubr.msk.bf16.mxu0 %vm844_vm0, %v19335_v54  ;;  %v19342_v59 = vld [vmem:[%s24654_s0 + $0x338] sm:$0xff]  }
 0x181   :  { %v2375_v63 = vmax.f32 %v2191_v62, %v2193_v60  ;;  %v17964_v0 = vpop.f32.mrb[84].mxu0 }
 0x182   :  { %v1560_v1 = vadd.f32 %v17964_v0, %v20459_v4  ;;  %v1551_v2 = vpop.f32.mrb[85].mxu0 }
 0x183   :  { %v1552_v5 = vadd.f32 %v20459_v4, %v1551_v2  ;;  %v17965_v6 = vpop.f32.mrb[86].mxu0 }
 0x184   :  { %v2196_v8 = vmax.f32 %v1560_v1, 0.0  ;;  %v1563_v9 = vadd.f32 %v17965_v6, %v20459_v4  ;;  %v1554_v10 = vpop.f32.mrb[87].mxu0  ;;  %v2749_v11 = vld [vmem:[#allocation2 + $0x150] sm:$0xff] }
 0x185   :  { %v2194_v12 = vmax.f32 %v1552_v5, 0.0  ;;  %v1555_v13 = vadd.f32 %v20459_v4, %v1554_v10  ;;  %v2794_v14 = vpack.c.bf16 %v2749_v11, %v2464_v45 }
 0x186   :  { %v2197_v15 = vmax.f32 %v1563_v9, 0.0  ;;  %18071 = vmatmul.mubr.msk.bf16.gmra.mrb[192].mxu0 %vm844_vm0, %v19336_v3 }
 0x187   :  { %v2376_v16 = vmax.f32 %v2194_v12, %v2196_v8  ;;  %v2195_v17 = vmax.f32 %v1555_v13, 0.0  ;;  %18138 = vmatprep.mubr.bf16.mxu1 %v2794_v14  ;;  %18074 = vmatprep.mubr.msk.bf16.mxu0 %vm844_vm0, %v19337_v7  ;;  %v19344_v13 = vld [vmem:[%s24654_s0 + $0x348] sm:$0xff]  }
 0x189   :  { %v2466_v18 = vmax.f32 %v2374_v61, %v2376_v16  ;;  %v2377_v19 = vmax.f32 %v2195_v17, %v2197_v15  ;;  %v17968_v20 = vpop.f32.mrb[88].mxu0  ;;  %v19345_v16 = vld [vmem:[%s24654_s0 + $0x350] sm:$0xff]  }
 0x18a   :  { %v1576_v21 = vadd.f32 %v17968_v20, %v20459_v4  ;;  %v1567_v22 = vpop.f32.mrb[89].mxu0 }
 0x18b   :  { %2592 = vst [vmem:[#allocation2 + $0x168] sm:$0xff] %v2466_v18  ;;  %v2467_v24 = vmax.f32 %v2375_v63, %v2377_v19  ;;  %v1568_v25 = vadd.f32 %v20459_v4, %v1567_v22  ;;  %v17969_v26 = vpop.f32.mrb[90].mxu0  ;;  %v19343_v63 = vld [vmem:[%s24654_s0 + $0x340] sm:$0xff]  }
 0x18c   :  { %v2200_v28 = vmax.f32 %v1576_v21, 0.0  ;;  %v1579_v29 = vadd.f32 %v17969_v26, %v20459_v4  ;;  %v1570_v30 = vpop.f32.mrb[91].mxu0 }
 0x18d   :  { %2593 = vst [vmem:[#allocation2 + $0x170] sm:$0x3f] %v2467_v24  ;;  %v2198_v31 = vmax.f32 %v1568_v25, 0.0  ;;  %v1571_v32 = vadd.f32 %v20459_v4, %v1570_v30 }
 0x18e   :  { %v2201_v33 = vmax.f32 %v1579_v29, 0.0  ;;  %18075 = vmatmul.mubr.msk.bf16.gmra.mrb[196].mxu0 %vm844_vm0, %v19338_v23 }
 0x18f   :  { %v2378_v34 = vmax.f32 %v2198_v31, %v2200_v28  ;;  %v2199_v35 = vmax.f32 %v1571_v32, 0.0  ;;  %18078 = vmatprep.mubr.msk.bf16.mxu0 %vm844_vm0, %v19339_v27  ;;  %v19346_v32 = vld [vmem:[%s24654_s0 + $0x358] sm:$0xff]  }
 0x191   :  { %v2379_v36 = vmax.f32 %v2199_v35, %v2201_v33  ;;  %v17972_v37 = vpop.f32.mrb[92].mxu0 }
 0x192   :  { %v1592_v38 = vadd.f32 %v17972_v37, %v20459_v4  ;;  %v1583_v39 = vpop.f32.mrb[93].mxu0 }
 0x193   :  { %v1584_v41 = vadd.f32 %v20459_v4, %v1583_v39  ;;  %v17973_v42 = vpop.f32.mrb[94].mxu0 }
 0x194   :  { %v2204_v44 = vmax.f32 %v1592_v38, 0.0  ;;  %v1595_v45 = vadd.f32 %v17973_v42, %v20459_v4  ;;  %v1586_v46 = vpop.f32.mrb[95].mxu0  ;;  %v2751_v47 = vld [vmem:[#allocation2 + $0x170] sm:$0xff] }
 0x195   :  { %v2202_v48 = vmax.f32 %v1584_v41, 0.0  ;;  %v1587_v49 = vadd.f32 %v20459_v4, %v1586_v46  ;;  %v2795_v50 = vpack.c.bf16 %v2751_v47, %v2466_v18  ;;  %v2756_v46 = vld [vmem:[#allocation2 + $0x208] sm:$0xff]  ;;  %v2757_v47 = vld [vmem:[#allocation2 + $0x210] sm:$0xff] }
 0x196   :  { %v2205_v51 = vmax.f32 %v1595_v45, 0.0  ;;  %18079 = vmatmul.mubr.msk.bf16.gmra.mrb[200].mxu0 %vm844_vm0, %v19340_v40 }
 0x197   :  { %v2380_v52 = vmax.f32 %v2202_v48, %v2204_v44  ;;  %v2203_v53 = vmax.f32 %v1587_v49, 0.0  ;;  %18139 = vmatmul.mubr.bf16.gmra.mrb[20].mxu1 %v2795_v50  ;;  %18082 = vmatprep.mubr.msk.bf16.mxu0 %vm844_vm0, %v19341_v43  ;;  %v19347_v48 = vld [vmem:[%s24655_s3] sm:$0xff]  }
 0x198   :  { %18174 = vmatprep.subr.bf16.mxu1 %v19347_v48 }
 0x199   :  { %v2468_v54 = vmax.f32 %v2378_v34, %v2380_v52  ;;  %v2381_v55 = vmax.f32 %v2203_v53, %v2205_v51  ;;  %v17976_v56 = vpop.f32.mrb[96].mxu0  ;;  %18175 = vmatpush3.bf16.msra.mxu1 %v19347_v48  ;;  %v19349_v48 = vld [vmem:[%s24655_s3 + $0x10] sm:$0xff]  }
 0x19a   :  { %v1608_v58 = vadd.f32 %v20753_v57, %v17976_v56  ;;  %v1599_v4 = vpop.f32.mrb[97].mxu0 }
 0x19b   :  { %2594 = vst [vmem:[#allocation2 + $0x188] sm:$0xff] %v2468_v54  ;;  %v2469_v60 = vmax.f32 %v2379_v36, %v2381_v55  ;;  %v1600_v61 = vadd.f32 %v20753_v57, %v1599_v4  ;;  %v17977_v62 = vpop.f32.mrb[98].mxu0 }
 0x19c   :  { %v2208_v0 = vmax.f32 %v1608_v58, 0.0  ;;  %v1611_v1 = vadd.f32 %v20753_v57, %v17977_v62  ;;  %v1602_v2 = vpop.f32.mrb[99].mxu0  ;;  %v2798_v58 = vpack.c.bf16 %v2757_v47, %v2756_v46 }
 0x19d   :  { %2595 = vst [vmem:[#allocation2 + $0x190] sm:$0x3f] %v2469_v60  ;;  %v2206_v3 = vmax.f32 %v1600_v61, 0.0  ;;  %v1603_v5 = vadd.f32 %v20753_v57, %v1602_v2 }
 0x19e   :  { %v2209_v6 = vmax.f32 %v1611_v1, 0.0  ;;  %18083 = vmatmul.mubr.msk.bf16.gmra.mrb[204].mxu0 %vm844_vm0, %v19342_v59 }
 0x19f   :  { %v2382_v7 = vmax.f32 %v2206_v3, %v2208_v0  ;;  %v2207_v8 = vmax.f32 %v1603_v5, 0.0  ;;  %18086 = vmatprep.mubr.msk.bf16.mxu0 %vm844_vm0, %v19343_v63 }
 0x1a1   :  { %v2383_v9 = vmax.f32 %v2207_v8, %v2209_v6  ;;  %v17980_v10 = vpop.f32.mrb[100].mxu0 }
 0x1a2   :  { %v1624_v11 = vadd.f32 %v20753_v57, %v17980_v10  ;;  %v1615_v12 = vpop.f32.mrb[101].mxu0 }
 0x1a3   :  { %v1616_v14 = vadd.f32 %v20753_v57, %v1615_v12  ;;  %v17981_v15 = vpop.f32.mrb[102].mxu0 }
 0x1a4   :  { %v2212_v17 = vmax.f32 %v1624_v11, 0.0  ;;  %v1627_v18 = vadd.f32 %v20753_v57, %v17981_v15  ;;  %v1618_v19 = vpop.f32.mrb[103].mxu0  ;;  %v2753_v20 = vld [vmem:[#allocation2 + $0x190] sm:$0xff] }
 0x1a5   :  { %v2210_v21 = vmax.f32 %v1616_v14, 0.0  ;;  %v1619_v22 = vadd.f32 %v20753_v57, %v1618_v19  ;;  %v2796_v23 = vpack.c.bf16 %v2753_v20, %v2468_v54  ;;  %v19348_v19 = vld [vmem:[%s24655_s3 + $0x8] sm:$0xff]  }
 0x1a6   :  { %v2213_v24 = vmax.f32 %v1627_v18, 0.0  ;;  %18087 = vmatmul.mubr.msk.bf16.gmra.mrb[208].mxu0 %vm844_vm0, %v19344_v13  ;;  %18176 = vmatprep.subr.bf16.mxu1 %v19348_v19 }
 0x1a7   :  { %v2384_v25 = vmax.f32 %v2210_v21, %v2212_v17  ;;  %v2211_v26 = vmax.f32 %v1619_v22, 0.0  ;;  %18142 = vmatprep.mubr.bf16.mxu1 %v2796_v23  ;;  %18090 = vmatprep.mubr.msk.bf16.mxu0 %vm844_vm0, %v19345_v16 }
 0x1a8   :  { %18177 = vmatpush3.bf16.msra.mxu1 %v19348_v19 }
 0x1a9   :  { %v2470_v27 = vmax.f32 %v2382_v7, %v2384_v25  ;;  %v2385_v28 = vmax.f32 %v2211_v26, %v2213_v24  ;;  %v17984_v29 = vpop.f32.mrb[104].mxu0  ;;  %18178 = vmatprep.subr.bf16.mxu1 %v19349_v48 }
 0x1aa   :  { %v1640_v30 = vadd.f32 %v20753_v57, %v17984_v29  ;;  %v1631_v31 = vpop.f32.mrb[105].mxu0 }
 0x1ab   :  { %2596 = vst [vmem:[#allocation2 + $0x1a8] sm:$0xff] %v2470_v27  ;;  %v2471_v33 = vmax.f32 %v2383_v9, %v2385_v28  ;;  %v1632_v34 = vadd.f32 %v20753_v57, %v1631_v31  ;;  %v17985_v35 = vpop.f32.mrb[106].mxu0 }
 0x1ac   :  { %v2216_v36 = vmax.f32 %v1640_v30, 0.0  ;;  %v1643_v37 = vadd.f32 %v20753_v57, %v17985_v35  ;;  %v1634_v38 = vpop.f32.mrb[107].mxu0  ;;  %18179 = vmatpush3.bf16.msra.mxu1 %v19349_v48  ;;  %v19351_v48 = vld [vmem:[%s24655_s3 + $0x20] sm:$0xff]  }
 0x1ad   :  { %2597 = vst [vmem:[#allocation2 + $0x1b0] sm:$0x3f] %v2471_v33  ;;  %v2214_v39 = vmax.f32 %v1632_v34, 0.0  ;;  %v1635_v40 = vadd.f32 %v20753_v57, %v1634_v38 }
 0x1ae   :  { %v2217_v41 = vmax.f32 %v1643_v37, 0.0  ;;  %18091 = vmatmul.mubr.msk.bf16.gmra.mrb[212].mxu0 %vm844_vm0, %v19346_v32 }
 0x1af   :  { %v2386_v42 = vmax.f32 %v2214_v39, %v2216_v36  ;;  %v2215_v43 = vmax.f32 %v1635_v40, 0.0 }
 0x1b1   :  { %v2387_v44 = vmax.f32 %v2215_v43, %v2217_v41  ;;  %v17988_v45 = vpop.f32.mrb[108].mxu0 }
 0x1b2   :  { %v1656_v49 = vadd.f32 %v20753_v57, %v17988_v45  ;;  %v1647_v50 = vpop.f32.mrb[109].mxu0 }
 0x1b3   :  { %v1648_v51 = vadd.f32 %v20753_v57, %v1647_v50  ;;  %v17989_v52 = vpop.f32.mrb[110].mxu0 }
 0x1b4   :  { %v2220_v53 = vmax.f32 %v1656_v49, 0.0  ;;  %v1659_v54 = vadd.f32 %v20753_v57, %v17989_v52  ;;  %v1650_v55 = vpop.f32.mrb[111].mxu0  ;;  %v2755_v56 = vld [vmem:[#allocation2 + $0x1b0] sm:$0xff] }
 0x1b5   :  { %v2218_v4 = vmax.f32 %v1648_v51, 0.0  ;;  %v1651_v59 = vadd.f32 %v20753_v57, %v1650_v55  ;;  %v2797_v60 = vpack.c.bf16 %v2755_v56, %v2470_v27 }
 0x1b6   :  { %v2221_v61 = vmax.f32 %v1659_v54, 0.0 }
 0x1b7   :  { %v2388_v62 = vmax.f32 %v2218_v4, %v2220_v53  ;;  %v2219_v63 = vmax.f32 %v1651_v59, 0.0  ;;  %18143 = vmatmul.mubr.bf16.gmra.mrb[24].mxu1 %v2797_v60 }
 0x1b8   :  { %18146 = vmatprep.mubr.bf16.mxu1 %v2798_v58 }
 0x1b9   :  { %v2472_v0 = vmax.f32 %v2386_v42, %v2388_v62  ;;  %v2389_v1 = vmax.f32 %v2219_v63, %v2221_v61  ;;  %v17992_v2 = vpop.f32.mrb[112].mxu0 }
 0x1ba   :  { %v1672_v3 = vadd.f32 %v20753_v57, %v17992_v2  ;;  %v1663_v5 = vpop.f32.mrb[113].mxu0 }
 0x1bb   :  { %2598 = vst [vmem:[#allocation2 + $0x1c8] sm:$0xff] %v2472_v0  ;;  %v2473_v6 = vmax.f32 %v2387_v44, %v2389_v1  ;;  %v1664_v7 = vadd.f32 %v20753_v57, %v1663_v5  ;;  %v17993_v8 = vpop.f32.mrb[114].mxu0 }
 0x1bc   :  { %v2224_v9 = vmax.f32 %v1672_v3, 0.0  ;;  %v1675_v10 = vadd.f32 %v20753_v57, %v17993_v8  ;;  %v1666_v11 = vpop.f32.mrb[115].mxu0 }
 0x1bd   :  { %2599 = vst [vmem:[#allocation2 + $0x1d0] sm:$0x3f] %v2473_v6  ;;  %v2222_v12 = vmax.f32 %v1664_v7, 0.0  ;;  %v1667_v13 = vadd.f32 %v20753_v57, %v1666_v11 }
 0x1be   :  { %v2225_v14 = vmax.f32 %v1675_v10, 0.0 }
 0x1bf   :  { %v2390_v15 = vmax.f32 %v2222_v12, %v2224_v9  ;;  %v2223_v16 = vmax.f32 %v1667_v13, 0.0 }
 0x1c1   :  { %v2391_v17 = vmax.f32 %v2223_v16, %v2225_v14  ;;  %v17996_v18 = vpop.f32.mrb[116].mxu0 }
 0x1c2   :  { %v1688_v20 = vadd.f32 %v20753_v57, %v17996_v18  ;;  %v1679_v21 = vpop.f32.mrb[117].mxu0 }
 0x1c3   :  { %v1680_v22 = vadd.f32 %v20753_v57, %v1679_v21  ;;  %v17997_v23 = vpop.f32.mrb[118].mxu0 }
 0x1c4   :  { %v2228_v24 = vmax.f32 %v1688_v20, 0.0  ;;  %v1691_v25 = vadd.f32 %v20753_v57, %v17997_v23  ;;  %v1682_v26 = vpop.f32.mrb[119].mxu0 }
 0x1c5   :  { %v2226_v27 = vmax.f32 %v1680_v22, 0.0  ;;  %v1683_v28 = vadd.f32 %v20753_v57, %v1682_v26 }
 0x1c6   :  { %v2229_v29 = vmax.f32 %v1691_v25, 0.0 }
 0x1c7   :  { %v2392_v30 = vmax.f32 %v2226_v27, %v2228_v24  ;;  %v2227_v31 = vmax.f32 %v1683_v28, 0.0 }
 0x1c9   :  { %v2474_v32 = vmax.f32 %v2390_v15, %v2392_v30  ;;  %v2393_v33 = vmax.f32 %v2227_v31, %v2229_v29  ;;  %v18000_v34 = vpop.f32.mrb[120].mxu0  ;;  %v19350_v15 = vld [vmem:[%s24655_s3 + $0x18] sm:$0xff]  }
 0x1ca   :  { %v1704_v35 = vadd.f32 %v20753_v57, %v18000_v34  ;;  %v1695_v36 = vpop.f32.mrb[121].mxu0  ;;  %18180 = vmatprep.subr.bf16.mxu1 %v19350_v15 }
 0x1cb   :  { %2600 = vst [vmem:[#allocation2 + $0x228] sm:$0xff] %v2474_v32  ;;  %v2475_v37 = vmax.f32 %v2391_v17, %v2393_v33  ;;  %v1696_v38 = vadd.f32 %v20753_v57, %v1695_v36  ;;  %v18001_v39 = vpop.f32.mrb[122].mxu0  ;;  %18181 = vmatpush3.bf16.msra.mxu1 %v19350_v15 }
 0x1cc   :  { %v2232_v40 = vmax.f32 %v1704_v35, 0.0  ;;  %v1707_v41 = vadd.f32 %v20753_v57, %v18001_v39  ;;  %v1698_v42 = vpop.f32.mrb[123].mxu0  ;;  %18182 = vmatprep.subr.bf16.mxu1 %v19351_v48 }
 0x1cd   :  { %2601 = vst [vmem:[#allocation2 + $0x230] sm:$0x3f] %v2475_v37  ;;  %v2230_v43 = vmax.f32 %v1696_v38, 0.0  ;;  %v1699_v44 = vadd.f32 %v20753_v57, %v1698_v42 }
 0x1ce   :  { %v2233_v45 = vmax.f32 %v1707_v41, 0.0 }
 0x1cf   :  { %v2394_v46 = vmax.f32 %v2230_v43, %v2232_v40  ;;  %v2231_v47 = vmax.f32 %v1699_v44, 0.0  ;;  %18183 = vmatpush3.bf16.msra.mxu1 %v19351_v48 }
 0x1d1   :  { %v2395_v49 = vmax.f32 %v2231_v47, %v2233_v45  ;;  %v18004_v50 = vpop.f32.mrb[124].mxu0 }
 0x1d2   :  { %v1720_v51 = vadd.f32 %v20753_v57, %v18004_v50  ;;  %v1711_v52 = vpop.f32.mrb[125].mxu0 }
 0x1d3   :  { %v1712_v53 = vadd.f32 %v20753_v57, %v1711_v52  ;;  %v18005_v54 = vpop.f32.mrb[126].mxu0 }
 0x1d4   :  { %v2236_v55 = vmax.f32 %v1720_v51, 0.0  ;;  %v1723_v56 = vadd.f32 %v20753_v57, %v18005_v54  ;;  %v1714_v58 = vpop.f32.mrb[127].mxu0  ;;  %v2759_v4 = vld [vmem:[#allocation2 + $0x230] sm:$0xff] }
 0x1d5   :  { %v2234_v59 = vmax.f32 %v1712_v53, 0.0  ;;  %v1715_v60 = vadd.f32 %v20753_v57, %v1714_v58  ;;  %v2799_v61 = vpack.c.bf16 %v2759_v4, %v2474_v32 }
 0x1d6   :  { %v2237_v62 = vmax.f32 %v1723_v56, 0.0 }
 0x1d7   :  { %v2396_v63 = vmax.f32 %v2234_v59, %v2236_v55  ;;  %v2235_v0 = vmax.f32 %v1715_v60, 0.0  ;;  %18147 = vmatmul.mubr.bf16.gmra.mrb[28].mxu1 %v2799_v61 }
 0x1d9   :  { %v2476_v1 = vmax.f32 %v2394_v46, %v2396_v63  ;;  %v2397_v2 = vmax.f32 %v2235_v0, %v2237_v62  ;;  %v18008_v3 = vpop.f32.mrb[128].mxu0 }
 0x1da   :  { %v1736_v5 = vadd.f32 %v20753_v57, %v18008_v3  ;;  %v1727_v6 = vpop.f32.mrb[129].mxu0 }
 0x1db   :  { %2602 = vst [vmem:[#allocation2 + $0x248] sm:$0xff] %v2476_v1  ;;  %v2477_v7 = vmax.f32 %v2395_v49, %v2397_v2  ;;  %v1728_v8 = vadd.f32 %v20753_v57, %v1727_v6  ;;  %v18009_v9 = vpop.f32.mrb[130].mxu0 }
 0x1dc   :  { %v2240_v10 = vmax.f32 %v1736_v5, 0.0  ;;  %v1739_v11 = vadd.f32 %v20753_v57, %v18009_v9  ;;  %v1730_v12 = vpop.f32.mrb[131].mxu0 }
 0x1dd   :  { %2603 = vst [vmem:[#allocation2 + $0x250] sm:$0x3f] %v2477_v7  ;;  %v2238_v13 = vmax.f32 %v1728_v8, 0.0  ;;  %v1731_v14 = vadd.f32 %v20753_v57, %v1730_v12 }
 0x1de   :  { %v2241_v16 = vmax.f32 %v1739_v11, 0.0 }
 0x1df   :  { %v2398_v17 = vmax.f32 %v2238_v13, %v2240_v10  ;;  %v2239_v18 = vmax.f32 %v1731_v14, 0.0 }
 0x1e1   :  { %v2399_v19 = vmax.f32 %v2239_v18, %v2241_v16  ;;  %v18012_v20 = vpop.f32.mrb[132].mxu0  ;;  %v19352_v18 = vld [vmem:[%s24655_s3 + $0x28] sm:$0xff]  }
 0x1e2   :  { %v1752_v21 = vadd.f32 %v20753_v57, %v18012_v20  ;;  %v1743_v22 = vpop.f32.mrb[133].mxu0  ;;  %18184 = vmatprep.subr.bf16.mxu1 %v19352_v18 }
 0x1e3   :  { %v1744_v23 = vadd.f32 %v20753_v57, %v1743_v22  ;;  %v18013_v24 = vpop.f32.mrb[134].mxu0  ;;  %18185 = vmatpush3.bf16.msra.mxu1 %v19352_v18 }
 0x1e4   :  { %v2244_v25 = vmax.f32 %v1752_v21, 0.0  ;;  %v1755_v26 = vadd.f32 %v20753_v57, %v18013_v24  ;;  %v1746_v27 = vpop.f32.mrb[135].mxu0  ;;  %v2761_v28 = vld [vmem:[#allocation2 + $0x250] sm:$0xff] }
 0x1e5   :  { %v2242_v29 = vmax.f32 %v1744_v23, 0.0  ;;  %v1747_v30 = vadd.f32 %v20753_v57, %v1746_v27  ;;  %v2800_v31 = vpack.c.bf16 %v2761_v28, %v2476_v1 }
 0x1e6   :  { %v2245_v32 = vmax.f32 %v1755_v26, 0.0 }
 0x1e7   :  { %v2400_v33 = vmax.f32 %v2242_v29, %v2244_v25  ;;  %v2243_v34 = vmax.f32 %v1747_v30, 0.0  ;;  %18150 = vmatprep.mubr.bf16.mxu1 %v2800_v31 }
 0x1e9   :  { %v2478_v35 = vmax.f32 %v2398_v17, %v2400_v33  ;;  %v2401_v36 = vmax.f32 %v2243_v34, %v2245_v32  ;;  %v18016_v37 = vpop.f32.mrb[136].mxu0 }
 0x1ea   :  { %v1768_v38 = vadd.f32 %v20753_v57, %v18016_v37  ;;  %v1759_v39 = vpop.f32.mrb[137].mxu0 }
 0x1eb   :  { %2604 = vst [vmem:[#allocation2 + $0x268] sm:$0xff] %v2478_v35  ;;  %v2479_v40 = vmax.f32 %v2399_v19, %v2401_v36  ;;  %v1760_v41 = vadd.f32 %v20753_v57, %v1759_v39  ;;  %v18017_v42 = vpop.f32.mrb[138].mxu0 }
 0x1ec   :  { %v2248_v43 = vmax.f32 %v1768_v38, 0.0  ;;  %v1771_v44 = vadd.f32 %v20753_v57, %v18017_v42  ;;  %v1762_v45 = vpop.f32.mrb[139].mxu0 }
 0x1ed   :  { %2605 = vst [vmem:[#allocation2 + $0x270] sm:$0x3f] %v2479_v40  ;;  %v2246_v46 = vmax.f32 %v1760_v41, 0.0  ;;  %v1763_v47 = vadd.f32 %v20753_v57, %v1762_v45 }
 0x1ee   :  { %v2249_v49 = vmax.f32 %v1771_v44, 0.0 }
 0x1ef   :  { %v2402_v50 = vmax.f32 %v2246_v46, %v2248_v43  ;;  %v2247_v51 = vmax.f32 %v1763_v47, 0.0  ;;  %v19353_v46 = vld [vmem:[%s24655_s3 + $0x30] sm:$0xff]  }
 0x1f0   :  { %18186 = vmatprep.subr.bf16.mxu1 %v19353_v46 }
 0x1f1   :  { %v2403_v52 = vmax.f32 %v2247_v51, %v2249_v49  ;;  %v18020_v53 = vpop.f32.mrb[140].mxu0  ;;  %18187 = vmatpush3.bf16.msra.mxu1 %v19353_v46 }
 0x1f2   :  { %v1784_v54 = vadd.f32 %v20753_v57, %v18020_v53  ;;  %v1775_v55 = vpop.f32.mrb[141].mxu0 }
 0x1f3   :  { %v1776_v56 = vadd.f32 %v20753_v57, %v1775_v55  ;;  %v18021_v58 = vpop.f32.mrb[142].mxu0 }
 0x1f4   :  { %v2252_v4 = vmax.f32 %v1784_v54, 0.0  ;;  %v1787_v59 = vadd.f32 %v20753_v57, %v18021_v58  ;;  %v1778_v60 = vpop.f32.mrb[143].mxu0  ;;  %v2763_v61 = vld [vmem:[#allocation2 + $0x270] sm:$0xff] }
 0x1f5   :  { %v2250_v62 = vmax.f32 %v1776_v56, 0.0  ;;  %v1779_v63 = vadd.f32 %v20753_v57, %v1778_v60  ;;  %v2801_v0 = vpack.c.bf16 %v2763_v61, %v2478_v35 }
 0x1f6   :  { %v2253_v1 = vmax.f32 %v1787_v59, 0.0 }
 0x1f7   :  { %v2404_v2 = vmax.f32 %v2250_v62, %v2252_v4  ;;  %v2251_v3 = vmax.f32 %v1779_v63, 0.0  ;;  %18151 = vmatmul.mubr.bf16.gmra.mrb[32].mxu1 %v2801_v0 }
 0x1f9   :  { %v2480_v5 = vmax.f32 %v2402_v50, %v2404_v2  ;;  %v2405_v6 = vmax.f32 %v2251_v3, %v2253_v1  ;;  %v18024_v7 = vpop.f32.mrb[144].mxu0 }
 0x1fa   :  { %v1800_v8 = vadd.f32 %v20753_v57, %v18024_v7  ;;  %v1791_v9 = vpop.f32.mrb[145].mxu0 }
 0x1fb   :  { %2606 = vst [vmem:[#allocation2 + $0x288] sm:$0xff] %v2480_v5  ;;  %v2481_v10 = vmax.f32 %v2403_v52, %v2405_v6  ;;  %v1792_v11 = vadd.f32 %v20753_v57, %v1791_v9  ;;  %v18025_v12 = vpop.f32.mrb[146].mxu0  ;;  %v19354_v52 = vld [vmem:[%s24655_s3 + $0x38] sm:$0xff]   ;;  %v20866_v9 = vld [vmem:[%s24655_s3 + $0x80] sm:$0xff]  }
 0x1fc   :  { %v2256_v13 = vmax.f32 %v1800_v8, 0.0  ;;  %v1803_v14 = vadd.f32 %v20753_v57, %v18025_v12  ;;  %v1794_v15 = vpop.f32.mrb[147].mxu0  ;;  %18188 = vmatprep.subr.bf16.mxu1 %v19354_v52 }
 0x1fd   :  { %2607 = vst [vmem:[#allocation2 + $0x290] sm:$0x3f] %v2481_v10  ;;  %v2254_v16 = vmax.f32 %v1792_v11, 0.0  ;;  %v1795_v17 = vadd.f32 %v20753_v57, %v1794_v15  ;;  %18189 = vmatpush3.bf16.msra.mxu1 %v19354_v52 }
 0x1fe   :  { %v2257_v19 = vmax.f32 %v1803_v14, 0.0  ;;  %18246 = vmatprep.subr.bf16.mxu1 %v20866_v9 }
 0x1ff   :  { %v2406_v20 = vmax.f32 %v2254_v16, %v2256_v13  ;;  %v2255_v21 = vmax.f32 %v1795_v17, 0.0 }
 0x201   :  { %v2407_v22 = vmax.f32 %v2255_v21, %v2257_v19  ;;  %v18028_v23 = vpop.f32.mrb[148].mxu0 }
 0x202   :  { %v1816_v24 = vadd.f32 %v20753_v57, %v18028_v23  ;;  %v1807_v25 = vpop.f32.mrb[149].mxu0 }
 0x203   :  { %v1808_v26 = vadd.f32 %v20753_v57, %v1807_v25  ;;  %v18029_v27 = vpop.f32.mrb[150].mxu0 }
 0x204   :  { %v2260_v28 = vmax.f32 %v1816_v24, 0.0  ;;  %v1819_v29 = vadd.f32 %v20753_v57, %v18029_v27  ;;  %v1810_v30 = vpop.f32.mrb[151].mxu0  ;;  %v2765_v31 = vld [vmem:[#allocation2 + $0x290] sm:$0xff] }
 0x205   :  { %v2258_v32 = vmax.f32 %v1808_v26, 0.0  ;;  %v1811_v33 = vadd.f32 %v20753_v57, %v1810_v30  ;;  %v2802_v34 = vpack.c.bf16 %v2765_v31, %v2480_v5 }
 0x206   :  { %v2261_v35 = vmax.f32 %v1819_v29, 0.0 }
 0x207   :  { %v2408_v36 = vmax.f32 %v2258_v32, %v2260_v28  ;;  %v2259_v37 = vmax.f32 %v1811_v33, 0.0  ;;  %18154 = vmatprep.mubr.bf16.mxu1 %v2802_v34 }
 0x209   :  { %v2482_v38 = vmax.f32 %v2406_v20, %v2408_v36  ;;  %v2409_v39 = vmax.f32 %v2259_v37, %v2261_v35  ;;  %v18032_v40 = vpop.f32.mrb[152].mxu0 }
 0x20a   :  { %v1832_v41 = vadd.f32 %v20753_v57, %v18032_v40  ;;  %v1823_v42 = vpop.f32.mrb[153].mxu0 }
 0x20b   :  { %2608 = vst [vmem:[#allocation2 + $0x2a8] sm:$0xff] %v2482_v38  ;;  %v2483_v43 = vmax.f32 %v2407_v22, %v2409_v39  ;;  %v1824_v44 = vadd.f32 %v20753_v57, %v1823_v42  ;;  %v18033_v45 = vpop.f32.mrb[154].mxu0 }
 0x20c   :  { %v2264_v47 = vmax.f32 %v1832_v41, 0.0  ;;  %v1835_v48 = vadd.f32 %v20753_v57, %v18033_v45  ;;  %v1826_v49 = vpop.f32.mrb[155].mxu0 }
 0x20d   :  { %2609 = vst [vmem:[#allocation2 + $0x2b0] sm:$0x3f] %v2483_v43  ;;  %v2262_v50 = vmax.f32 %v1824_v44, 0.0  ;;  %v1827_v51 = vadd.f32 %v20753_v57, %v1826_v49 }
 0x20e   :  { %v2265_v53 = vmax.f32 %v1835_v48, 0.0 }
 0x20f   :  { %v2410_v54 = vmax.f32 %v2262_v50, %v2264_v47  ;;  %v2263_v55 = vmax.f32 %v1827_v51, 0.0 }
 0x211   :  { %v2411_v56 = vmax.f32 %v2263_v55, %v2265_v53  ;;  %v18036_v58 = vpop.f32.mrb[156].mxu0 }
 0x212   :  { %v1848_v4 = vadd.f32 %v20753_v57, %v18036_v58  ;;  %v1839_v59 = vpop.f32.mrb[157].mxu0 }
 0x213   :  { %v1840_v60 = vadd.f32 %v20753_v57, %v1839_v59  ;;  %v18037_v61 = vpop.f32.mrb[158].mxu0 }
 0x214   :  { %v2268_v62 = vmax.f32 %v1848_v4, 0.0  ;;  %v1851_v63 = vadd.f32 %v20753_v57, %v18037_v61  ;;  %v1842_v0 = vpop.f32.mrb[159].mxu0  ;;  %v2767_v1 = vld [vmem:[#allocation2 + $0x2b0] sm:$0xff] }
 0x215   :  { %v2266_v2 = vmax.f32 %v1840_v60, 0.0  ;;  %v1843_v3 = vadd.f32 %v20753_v57, %v1842_v0  ;;  %v2803_v5 = vpack.c.bf16 %v2767_v1, %v2482_v38 }
 0x216   :  { %v2269_v6 = vmax.f32 %v1851_v63, 0.0 }
 0x217   :  { %v2412_v7 = vmax.f32 %v2266_v2, %v2268_v62  ;;  %v2267_v8 = vmax.f32 %v1843_v3, 0.0  ;;  %18155 = vmatmul.mubr.bf16.gmra.mrb[36].mxu1 %v2803_v5 }
 0x219   :  { %v2484_v10 = vmax.f32 %v2410_v54, %v2412_v7  ;;  %v2413_v11 = vmax.f32 %v2267_v8, %v2269_v6  ;;  %v18040_v12 = vpop.f32.mrb[160].mxu0 }
 0x21a   :  { %v1864_v13 = vadd.f32 %v20753_v57, %v18040_v12  ;;  %v1855_v14 = vpop.f32.mrb[161].mxu0 }
 0x21b   :  { %2610 = vst [vmem:[#allocation2 + $0x2c8] sm:$0xff] %v2484_v10  ;;  %v2485_v15 = vmax.f32 %v2411_v56, %v2413_v11  ;;  %v1856_v16 = vadd.f32 %v20753_v57, %v1855_v14  ;;  %v18041_v17 = vpop.f32.mrb[162].mxu0 }
 0x21c   :  { %v2272_v18 = vmax.f32 %v1864_v13, 0.0  ;;  %v1867_v19 = vadd.f32 %v20753_v57, %v18041_v17  ;;  %v1858_v20 = vpop.f32.mrb[163].mxu0 }
 0x21d   :  { %2611 = vst [vmem:[#allocation2 + $0x2d0] sm:$0x3f] %v2485_v15  ;;  %v2270_v21 = vmax.f32 %v1856_v16, 0.0  ;;  %v1859_v22 = vadd.f32 %v20753_v57, %v1858_v20 }
 0x21e   :  { %v2273_v23 = vmax.f32 %v1867_v19, 0.0 }
 0x21f   :  { %v2414_v24 = vmax.f32 %v2270_v21, %v2272_v18  ;;  %v2271_v25 = vmax.f32 %v1859_v22, 0.0 }
 0x221   :  { %v2415_v26 = vmax.f32 %v2271_v25, %v2273_v23  ;;  %v18044_v27 = vpop.f32.mrb[164].mxu0 }
 0x222   :  { %v1880_v28 = vadd.f32 %v20753_v57, %v18044_v27  ;;  %v1871_v29 = vpop.f32.mrb[165].mxu0 }
 0x223   :  { %v1872_v30 = vadd.f32 %v20753_v57, %v1871_v29  ;;  %v18045_v31 = vpop.f32.mrb[166].mxu0 }
 0x224   :  { %v2276_v32 = vmax.f32 %v1880_v28, 0.0  ;;  %v1883_v33 = vadd.f32 %v20753_v57, %v18045_v31  ;;  %v1874_v34 = vpop.f32.mrb[167].mxu0  ;;  %v2769_v35 = vld [vmem:[#allocation2 + $0x2d0] sm:$0xff] }
 0x225   :  { %v2274_v36 = vmax.f32 %v1872_v30, 0.0  ;;  %v1875_v37 = vadd.f32 %v20753_v57, %v1874_v34  ;;  %v2804_v38 = vpack.c.bf16 %v2769_v35, %v2484_v10 }
 0x226   :  { %v2277_v39 = vmax.f32 %v1883_v33, 0.0 }
 0x227   :  { %v2416_v40 = vmax.f32 %v2274_v36, %v2276_v32  ;;  %v2275_v41 = vmax.f32 %v1875_v37, 0.0  ;;  %18158 = vmatprep.mubr.bf16.mxu1 %v2804_v38 }
 0x229   :  { %v2486_v42 = vmax.f32 %v2414_v24, %v2416_v40  ;;  %v2417_v43 = vmax.f32 %v2275_v41, %v2277_v39  ;;  %v18048_v44 = vpop.f32.mrb[168].mxu0 }
 0x22a   :  { %v1896_v45 = vadd.f32 %v20753_v57, %v18048_v44  ;;  %v1887_v46 = vpop.f32.mrb[169].mxu0 }
 0x22b   :  { %2612 = vst [vmem:[#allocation2 + $0x2e8] sm:$0xff] %v2486_v42  ;;  %v2487_v47 = vmax.f32 %v2415_v26, %v2417_v43  ;;  %v1888_v48 = vadd.f32 %v20753_v57, %v1887_v46  ;;  %v18049_v49 = vpop.f32.mrb[170].mxu0 }
 0x22c   :  { %v2280_v50 = vmax.f32 %v1896_v45, 0.0  ;;  %v1899_v51 = vadd.f32 %v20753_v57, %v18049_v49  ;;  %v1890_v52 = vpop.f32.mrb[171].mxu0 }
 0x22d   :  { %2613 = vst [vmem:[#allocation2 + $0x2f0] sm:$0x3f] %v2487_v47  ;;  %v2278_v53 = vmax.f32 %v1888_v48, 0.0  ;;  %v1891_v54 = vadd.f32 %v20753_v57, %v1890_v52 }
 0x22e   :  { %v2281_v55 = vmax.f32 %v1899_v51, 0.0 }
 0x22f   :  { %v2418_v56 = vmax.f32 %v2278_v53, %v2280_v50  ;;  %v2279_v58 = vmax.f32 %v1891_v54, 0.0 }
 0x231   :  { %v2419_v4 = vmax.f32 %v2279_v58, %v2281_v55  ;;  %v18052_v59 = vpop.f32.mrb[172].mxu0 }
 0x232   :  { %v1912_v60 = vadd.f32 %v20753_v57, %v18052_v59  ;;  %v1903_v61 = vpop.f32.mrb[173].mxu0 }
 0x233   :  { %v1904_v62 = vadd.f32 %v20753_v57, %v1903_v61  ;;  %v18053_v63 = vpop.f32.mrb[174].mxu0 }
 0x234   :  { %v2284_v0 = vmax.f32 %v1912_v60, 0.0  ;;  %v1915_v1 = vadd.f32 %v20753_v57, %v18053_v63  ;;  %v1906_v2 = vpop.f32.mrb[175].mxu0  ;;  %v2771_v3 = vld [vmem:[#allocation2 + $0x2f0] sm:$0xff] }
 0x235   :  { %v2282_v5 = vmax.f32 %v1904_v62, 0.0  ;;  %v1907_v6 = vadd.f32 %v20753_v57, %v1906_v2  ;;  %v2805_v7 = vpack.c.bf16 %v2771_v3, %v2486_v42 }
 0x236   :  { %v2285_v8 = vmax.f32 %v1915_v1, 0.0 }
 0x237   :  { %v2420_v10 = vmax.f32 %v2282_v5, %v2284_v0  ;;  %v2283_v11 = vmax.f32 %v1907_v6, 0.0  ;;  %18159 = vmatmul.mubr.bf16.gmra.mrb[40].mxu1 %v2805_v7 }
 0x239   :  { %v2488_v12 = vmax.f32 %v2418_v56, %v2420_v10  ;;  %v2421_v13 = vmax.f32 %v2283_v11, %v2285_v8  ;;  %v18056_v14 = vpop.f32.mrb[176].mxu0 }
 0x23a   :  { %v1928_v15 = vadd.f32 %v20753_v57, %v18056_v14  ;;  %v1919_v16 = vpop.f32.mrb[177].mxu0 }
 0x23b   :  { %2614 = vst [vmem:[#allocation2 + $0x308] sm:$0xff] %v2488_v12  ;;  %v2489_v17 = vmax.f32 %v2419_v4, %v2421_v13  ;;  %v1920_v18 = vadd.f32 %v20753_v57, %v1919_v16  ;;  %v18057_v19 = vpop.f32.mrb[178].mxu0 }
 0x23c   :  { %v2288_v20 = vmax.f32 %v1928_v15, 0.0  ;;  %v1931_v21 = vadd.f32 %v20753_v57, %v18057_v19  ;;  %v1922_v22 = vpop.f32.mrb[179].mxu0 }
 0x23d   :  { %2615 = vst [vmem:[#allocation2 + $0x310] sm:$0x3f] %v2489_v17  ;;  %v2286_v23 = vmax.f32 %v1920_v18, 0.0  ;;  %v1923_v24 = vadd.f32 %v20753_v57, %v1922_v22 }
 0x23e   :  { %v2289_v25 = vmax.f32 %v1931_v21, 0.0 }
 0x23f   :  { %v2422_v26 = vmax.f32 %v2286_v23, %v2288_v20  ;;  %v2287_v27 = vmax.f32 %v1923_v24, 0.0 }
 0x241   :  { %v2423_v28 = vmax.f32 %v2287_v27, %v2289_v25  ;;  %v18060_v29 = vpop.f32.mrb[180].mxu0 }
 0x242   :  { %v1944_v30 = vadd.f32 %v20753_v57, %v18060_v29  ;;  %v1935_v31 = vpop.f32.mrb[181].mxu0 }
 0x243   :  { %v1936_v32 = vadd.f32 %v20753_v57, %v1935_v31  ;;  %v18061_v33 = vpop.f32.mrb[182].mxu0 }
 0x244   :  { %v2292_v34 = vmax.f32 %v1944_v30, 0.0  ;;  %v1947_v35 = vadd.f32 %v20753_v57, %v18061_v33  ;;  %v1938_v36 = vpop.f32.mrb[183].mxu0  ;;  %v2773_v37 = vld [vmem:[#allocation2 + $0x310] sm:$0xff]  ;;  %v19361_v30 = vld [vmem:[%s24654_s0 + $0x360] sm:$0xff]   ;;  %v19362_v33 = vld [vmem:[%s24654_s0 + $0x368] sm:$0xff]  }
 0x245   :  { %v2290_v38 = vmax.f32 %v1936_v32, 0.0  ;;  %v1939_v39 = vadd.f32 %v20753_v57, %v1938_v36  ;;  %v2806_v40 = vpack.c.bf16 %v2773_v37, %v2488_v12  ;;  %18094 = vmatprep.mubr.msk.bf16.mxu0 %vm844_vm0, %v19361_v30 }
 0x246   :  { %v2293_v41 = vmax.f32 %v1947_v35, 0.0  ;;  %18095 = vmatmul.mubr.msk.bf16.gmra.mrb[216].mxu0 %vm844_vm0, %v19362_v33 }
 0x247   :  { %v2424_v42 = vmax.f32 %v2290_v38, %v2292_v34  ;;  %v2291_v43 = vmax.f32 %v1939_v39, 0.0  ;;  %18162 = vmatprep.mubr.bf16.mxu1 %v2806_v40 }
 0x249   :  { %v2490_v44 = vmax.f32 %v2422_v26, %v2424_v42  ;;  %v2425_v45 = vmax.f32 %v2291_v43, %v2293_v41  ;;  %v18064_v46 = vpop.f32.mrb[184].mxu0 }
 0x24a   :  { %v1960_v47 = vadd.f32 %v20753_v57, %v18064_v46  ;;  %v1951_v48 = vpop.f32.mrb[185].mxu0 }
 0x24b   :  { %2616 = vst [vmem:[#allocation2 + $0x328] sm:$0xff] %v2490_v44  ;;  %v2491_v49 = vmax.f32 %v2423_v28, %v2425_v45  ;;  %v1952_v50 = vadd.f32 %v20753_v57, %v1951_v48  ;;  %v18065_v51 = vpop.f32.mrb[186].mxu0  ;;  %v19363_v48 = vld [vmem:[%s24654_s0 + $0x370] sm:$0xff]  }
 0x24c   :  { %v2296_v52 = vmax.f32 %v1960_v47, 0.0  ;;  %v1963_v53 = vadd.f32 %v20753_v57, %v18065_v51  ;;  %v1954_v54 = vpop.f32.mrb[187].mxu0  ;;  %18098 = vmatprep.mubr.msk.bf16.mxu0 %vm844_vm0, %v19363_v48 }
 0x24d   :  { %2617 = vst [vmem:[#allocation2 + $0x330] sm:$0x3f] %v2491_v49  ;;  %v2294_v55 = vmax.f32 %v1952_v50, 0.0  ;;  %v1955_v56 = vadd.f32 %v20753_v57, %v1954_v54 }
 0x24e   :  { %v2297_v58 = vmax.f32 %v1963_v53, 0.0 }
 0x24f   :  { %v2426_v4 = vmax.f32 %v2294_v55, %v2296_v52  ;;  %v2295_v59 = vmax.f32 %v1955_v56, 0.0  ;;  %v19365_v52 = vld [vmem:[%s24654_s0 + $0x378] sm:$0xff]  }
 0x250   :  { %18099 = vmatmul.mubr.msk.bf16.gmra.mrb[220].mxu0 %vm844_vm0, %v19365_v52 }
 0x251   :  { %v2427_v60 = vmax.f32 %v2295_v59, %v2297_v58  ;;  %v18068_v61 = vpop.f32.mrb[188].mxu0 }
 0x252   :  { %v1976_v62 = vadd.f32 %v20753_v57, %v18068_v61  ;;  %v1967_v63 = vpop.f32.mrb[189].mxu0 }
 0x253   :  { %v1968_v0 = vadd.f32 %v20753_v57, %v1967_v63  ;;  %v18069_v1 = vpop.f32.mrb[190].mxu0 }
 0x254   :  { %v2300_v2 = vmax.f32 %v1976_v62, 0.0  ;;  %v1979_v3 = vadd.f32 %v20753_v57, %v18069_v1  ;;  %v1970_v5 = vpop.f32.mrb[191].mxu0  ;;  %v2775_v6 = vld [vmem:[#allocation2 + $0x330] sm:$0xff] }
 0x255   :  { %v2298_v7 = vmax.f32 %v1968_v0, 0.0  ;;  %v1971_v8 = vadd.f32 %v20753_v57, %v1970_v5  ;;  %v2807_v10 = vpack.c.bf16 %v2775_v6, %v2490_v44  ;;  %v20932_v5 = vld [vmem:[%s24656_s2] ss:$0 sm:$0xff] }
 0x256   :  { %v2301_v11 = vmax.f32 %v1979_v3, 0.0 }
 0x257   :  { %v2428_v12 = vmax.f32 %v2298_v7, %v2300_v2  ;;  %v2299_v13 = vmax.f32 %v1971_v8, 0.0  ;;  %18163 = vmatmul.mubr.bf16.gmra.mrb[44].mxu1 %v2807_v10 }
 0x259   :  { %v2492_v14 = vmax.f32 %v2426_v4, %v2428_v12  ;;  %v2429_v15 = vmax.f32 %v2299_v13, %v2301_v11  ;;  %v18072_v16 = vpop.f32.mrb[192].mxu0 }
 0x25a   :  { %v1992_v17 = vadd.f32 %v20753_v57, %v18072_v16  ;;  %v1983_v18 = vpop.f32.mrb[193].mxu0 }
 0x25b   :  { %2618 = vst [vmem:[#allocation2 + $0x348] sm:$0xff] %v2492_v14  ;;  %v2493_v19 = vmax.f32 %v2427_v60, %v2429_v15  ;;  %v1984_v20 = vadd.f32 %v20753_v57, %v1983_v18  ;;  %v18073_v21 = vpop.f32.mrb[194].mxu0 }
 0x25c   :  { %v2304_v22 = vmax.f32 %v1992_v17, 0.0  ;;  %v1995_v23 = vadd.f32 %v20753_v57, %v18073_v21  ;;  %v1986_v24 = vpop.f32.mrb[195].mxu0 }
 0x25d   :  { %2619 = vst [vmem:[#allocation2 + $0x350] sm:$0x3f] %v2493_v19  ;;  %v2302_v25 = vmax.f32 %v1984_v20, 0.0  ;;  %v1987_v26 = vadd.f32 %v20753_v57, %v1986_v24 }
 0x25e   :  { %v2305_v27 = vmax.f32 %v1995_v23, 0.0 }
 0x25f   :  { %v2430_v28 = vmax.f32 %v2302_v25, %v2304_v22  ;;  %v2303_v29 = vmax.f32 %v1987_v26, 0.0 }
 0x261   :  { %v2431_v31 = vmax.f32 %v2303_v29, %v2305_v27  ;;  %v18076_v32 = vpop.f32.mrb[196].mxu0 }
 0x262   :  { %v2008_v34 = vadd.f32 %v20753_v57, %v18076_v32  ;;  %v1999_v35 = vpop.f32.mrb[197].mxu0 }
 0x263   :  { %v2000_v36 = vadd.f32 %v20753_v57, %v1999_v35  ;;  %v18077_v37 = vpop.f32.mrb[198].mxu0 }
 0x264   :  { %v2308_v38 = vmax.f32 %v2008_v34, 0.0  ;;  %v2011_v39 = vadd.f32 %v20753_v57, %v18077_v37  ;;  %v2002_v40 = vpop.f32.mrb[199].mxu0  ;;  %v2777_v41 = vld [vmem:[#allocation2 + $0x350] sm:$0xff] }
 0x265   :  { %v2306_v42 = vmax.f32 %v2000_v36, 0.0  ;;  %v2003_v43 = vadd.f32 %v20753_v57, %v2002_v40  ;;  %v2808_v44 = vpack.c.bf16 %v2777_v41, %v2492_v14 }
 0x266   :  { %v2309_v45 = vmax.f32 %v2011_v39, 0.0 }
 0x267   :  { %v2432_v46 = vmax.f32 %v2306_v42, %v2308_v38  ;;  %v2307_v47 = vmax.f32 %v2003_v43, 0.0  ;;  %18166 = vmatprep.mubr.bf16.mxu1 %v2808_v44 }
 0x269   :  { %v2494_v49 = vmax.f32 %v2430_v28, %v2432_v46  ;;  %v2433_v50 = vmax.f32 %v2307_v47, %v2309_v45  ;;  %v18080_v51 = vpop.f32.mrb[200].mxu0 }
 0x26a   :  { %v2024_v53 = vadd.f32 %v20753_v57, %v18080_v51  ;;  %v2015_v54 = vpop.f32.mrb[201].mxu0 }
 0x26b   :  { %2620 = vst [vmem:[#allocation2 + $0x368] sm:$0xff] %v2494_v49  ;;  %v2495_v55 = vmax.f32 %v2431_v31, %v2433_v50  ;;  %v2016_v56 = vadd.f32 %v20753_v57, %v2015_v54  ;;  %v18081_v58 = vpop.f32.mrb[202].mxu0 }
 0x26c   :  { %v2312_v4 = vmax.f32 %v2024_v53, 0.0  ;;  %v2027_v59 = vadd.f32 %v20753_v57, %v18081_v58  ;;  %v2018_v60 = vpop.f32.mrb[203].mxu0 }
 0x26d   :  { %2621 = vst [vmem:[#allocation2 + $0x370] sm:$0x3f] %v2495_v55  ;;  %v2310_v61 = vmax.f32 %v2016_v56, 0.0  ;;  %v2019_v62 = vadd.f32 %v20753_v57, %v2018_v60  ;;  %v20047_v56 = vld [vmem:[#allocation2 + $0x7] sm:$0xff]  ;;  %v2633_v60 = vld [vmem:[#allocation2 + $0x4f] sm:$0xff] }
 0x26e   :  { %v2313_v63 = vmax.f32 %v2027_v59, 0.0  ;;  %v20946_v58 = vpack.c.bf16 %v20047_v56, %v20047_v56  ;;  %v2631_v59 = vld [vmem:[#allocation2 + $0x2f] sm:$0xff] }
 0x26f   :  { %v2434_v0 = vmax.f32 %v2310_v61, %v2312_v4  ;;  %v2311_v1 = vmax.f32 %v2019_v62, 0.0  ;;  %v2630_v61 = vld [vmem:[#allocation2 + $0x27] sm:$0xff]  ;;  %v2669_v56 = vld [vmem:[#allocation2 + $0x2cf] sm:$0xff] }
 0x270   :  { %v20949_v62 = vpack.c.bf16 %v2631_v59, %v2630_v61  ;;  %v2668_v59 = vld [vmem:[#allocation2 + $0x2c7] sm:$0xff]  ;;  %v2671_v61 = vld [vmem:[#allocation2 + $0x2ef] sm:$0xff] }
 0x271   :  { %v2435_v2 = vmax.f32 %v2311_v1, %v2313_v63  ;;  %v18084_v3 = vpop.f32.mrb[204].mxu0  ;;  %v2632_v63 = vld [vmem:[#allocation2 + $0x47] sm:$0xff] }
 0x272   :  { %v2040_v6 = vadd.f32 %v20932_v5, %v18084_v3  ;;  %v2031_v7 = vpop.f32.mrb[205].mxu0  ;;  %v20954_v1 = vpack.c.bf16 %v2633_v60, %v2632_v63  ;;  %v2635_v3 = vld [vmem:[#allocation2 + $0x6f] sm:$0xff]  ;;  %v21031_v60 = vpack.c.bf16 %v2669_v56, %v2668_v59 }
 0x273   :  { %v2032_v8 = vadd.f32 %v20932_v5, %v2031_v7  ;;  %v18085_v10 = vpop.f32.mrb[206].mxu0  ;;  %v2634_v7 = vld [vmem:[#allocation2 + $0x67] sm:$0xff]  ;;  %v2673_v63 = vld [vmem:[#allocation2 + $0x30f] sm:$0xff] }
 0x274   :  { %v2316_v11 = vmax.f32 %v2040_v6, 0.0  ;;  %v2043_v12 = vadd.f32 %v20932_v5, %v18085_v10  ;;  %v2034_v57 = vpop.f32.mrb[207].mxu0  ;;  %v2779_v13 = vld [vmem:[#allocation2 + $0x370] sm:$0xff]  ;;  %v2636_v10 = vld [vmem:[#allocation2 + $0x87] sm:$0xff] }
 0x275   :  { %v2314_v14 = vmax.f32 %v2032_v8, 0.0  ;;  %v2035_v15 = vadd.f32 %v20932_v5, %v2034_v57  ;;  %v2809_v16 = vpack.c.bf16 %v2779_v13, %v2494_v49  ;;  %v2637_v6 = vld [vmem:[#allocation2 + $0x8f] sm:$0xff]  ;;  %v20962_v8 = vpack.c.bf16 %v2635_v3, %v2634_v7  ;;  %v2672_v3 = vld [vmem:[#allocation2 + $0x307] sm:$0xff] }
 0x276   :  { %v2317_v17 = vmax.f32 %v2043_v12, 0.0  ;;  %v19359_v12 = vld [vmem:[%s24655_s3 + $0xa0] sm:$0xff]   ;;  %v2639_v57 = vld [vmem:[#allocation2 + $0xaf] sm:$0xff] }
 0x277   :  { %v2436_v18 = vmax.f32 %v2314_v14, %v2316_v11  ;;  %v2315_v19 = vmax.f32 %v2035_v15, 0.0  ;;  %18167 = vmatmul.mubr.bf16.gmra.mrb[48].mxu1 %v2809_v16  ;;  %v19358_v11 = vld [vmem:[%s24655_s3 + $0x98] sm:$0xff]   ;;  %v2641_v13 = vld [vmem:[#allocation2 + $0xcf] sm:$0xff]  ;;  %v2638_v14 = vld [vmem:[#allocation2 + $0xa7] sm:$0xff] }
 0x278   :  { %v20974_v15 = vpack.c.bf16 %v2639_v57, %v2638_v14  ;;  %v2640_v16 = vld [vmem:[#allocation2 + $0xc7] sm:$0xff]  ;;  %v2675_v7 = vld [vmem:[#allocation2 + $0x32f] sm:$0xff] }
 0x279   :  { %v2496_v20 = vmax.f32 %v2434_v0, %v2436_v18  ;;  %v2437_v21 = vmax.f32 %v2315_v19, %v2317_v17  ;;  %v18088_v22 = vpop.f32.mrb[208].mxu0  ;;  %v19356_v0 = vld [vmem:[%s24655_s3 + $0x88] sm:$0xff]   ;;  %v20979_v18 = vpack.c.bf16 %v2641_v13, %v2640_v16  ;;  %v19364_v19 = vld [vmem:[%s24655_s3 + $0xb0] sm:$0xff]  }
 0x27a   :  { %v2056_v23 = vadd.f32 %v20932_v5, %v18088_v22  ;;  %v2047_v24 = vpop.f32.mrb[209].mxu0  ;;  %v19360_v17 = vld [vmem:[%s24655_s3 + $0xa8] sm:$0xff]   ;;  %v3450_v56 = vld [vmem:[#allocation2 + $0xb1] sm:$0xff] }
 0x27b   :  { %2622 = vst [vmem:[#allocation2 + $0x388] sm:$0xff] %v2496_v20  ;;  %v2497_v25 = vmax.f32 %v2435_v2, %v2437_v21  ;;  %v2048_v26 = vadd.f32 %v20932_v5, %v2047_v24  ;;  %v18089_v27 = vpop.f32.mrb[210].mxu0  ;;  %v19357_v2 = vld [vmem:[%s24655_s3 + $0x90] sm:$0xff]   ;;  %v2642_v22 = vld [vmem:[#allocation2 + $0xe7] sm:$0xff] }
 0x27c   :  { %v2320_v28 = vmax.f32 %v2056_v23, 0.0  ;;  %v2059_v29 = vadd.f32 %v20932_v5, %v18089_v27  ;;  %v2050_v30 = vpop.f32.mrb[211].mxu0  ;;  %v2645_v21 = vld [vmem:[#allocation2 + $0x10f] sm:$0xff]  ;;  %v2644_v24 = vld [vmem:[#allocation2 + $0x107] sm:$0xff] }
 0x27d   :  { %2623 = vst [vmem:[#allocation2 + $0x390] sm:$0x3f] %v2497_v25  ;;  %v2318_v31 = vmax.f32 %v2048_v26, 0.0  ;;  %v2051_v32 = vadd.f32 %v20932_v5, %v2050_v30  ;;  %v19366_v25 = vld [vmem:[%s24655_s3 + $0xb8] sm:$0xff]   ;;  %v20991_v26 = vpack.c.bf16 %v2645_v21, %v2644_v24  ;;  %v20998_v27 = vld [vmem:[%s24655_s3 + $0xc0] sm:$0xff]   ;;  %v2679_v14 = vld [vmem:[#allocation2 + $0x36f] sm:$0xff] }
 0x27e   :  { %v2321_v33 = vmax.f32 %v2059_v29, 0.0  ;;  %v2649_v29 = vld [vmem:[#allocation2 + $0x14f] sm:$0xff]  ;;  %v2646_v30 = vld [vmem:[#allocation2 + $0x127] sm:$0xff] }
 0x27f   :  { %v2438_v34 = vmax.f32 %v2318_v31, %v2320_v28  ;;  %v2319_v35 = vmax.f32 %v2051_v32, 0.0  ;;  %v2647_v28 = vld [vmem:[#allocation2 + $0x12f] sm:$0xff]  ;;  %v2648_v32 = vld [vmem:[#allocation2 + $0x147] sm:$0xff] }
 0x280   :  { %v21000_v31 = vpack.c.bf16 %v2647_v28, %v2646_v30  ;;  %v2676_v57 = vld [vmem:[#allocation2 + $0x347] sm:$0xff]  ;;  %v3440_v24 = vld [vmem:[#allocation2 + $0x11] sm:$0xff] }
 0x281   :  { %v2439_v36 = vmax.f32 %v2319_v35, %v2321_v33  ;;  %v18092_v37 = vpop.f32.mrb[212].mxu0  ;;  %v21003_v33 = vpack.c.bf16 %v2649_v29, %v2648_v32  ;;  %v2653_v35 = vld [vmem:[#allocation2 + $0x18f] sm:$0xff] }
 0x282   :  { %v2072_v38 = vadd.f32 %v20932_v5, %v18092_v37  ;;  %v2063_v39 = vpop.f32.mrb[213].mxu0  ;;  %v3441_v32 = vld [vmem:[#allocation2 + $0x29] sm:$0xff]  ;;  %v3452_v59 = vld [vmem:[#allocation2 + $0xd1] sm:$0xff] }
 0x283   :  { %v2064_v40 = vadd.f32 %v20932_v5, %v2063_v39  ;;  %v18093_v41 = vpop.f32.mrb[214].mxu0 }
 0x284   :  { %v2324_v42 = vmax.f32 %v2072_v38, 0.0  ;;  %v2075_v43 = vadd.f32 %v20932_v5, %v18093_v41  ;;  %v2066_v44 = vpop.f32.mrb[215].mxu0  ;;  %v2781_v45 = vld [vmem:[#allocation2 + $0x390] sm:$0xff]  ;;  %v2652_v38 = vld [vmem:[#allocation2 + $0x187] sm:$0xff] }
 0x285   :  { %v2322_v46 = vmax.f32 %v2064_v40, 0.0  ;;  %v2067_v47 = vadd.f32 %v20932_v5, %v2066_v44  ;;  %v2810_v48 = vpack.c.bf16 %v2781_v45, %v2496_v20  ;;  %v2643_v20 = vld [vmem:[#allocation2 + $0xef] sm:$0xff]  ;;  %v21009_v39 = vpack.c.bf16 %v2653_v35, %v2652_v38  ;;  %v2654_v41 = vld [vmem:[#allocation2 + $0x1a7] sm:$0xff] }
 0x286   :  { %v2325_v49 = vmax.f32 %v2075_v43, 0.0  ;;  %v20986_v23 = vpack.c.bf16 %v2643_v20, %v2642_v22  ;;  %v2655_v40 = vld [vmem:[#allocation2 + $0x1af] sm:$0xff]  ;;  %v2658_v45 = vld [vmem:[#allocation2 + $0x227] sm:$0xff] }
 0x287   :  { %v2440_v50 = vmax.f32 %v2322_v46, %v2324_v42  ;;  %v2323_v51 = vmax.f32 %v2067_v47, 0.0  ;;  %18170 = vmatprep.mubr.bf16.mxu1 %v2810_v48  ;;  %v21013_v42 = vpack.c.bf16 %v2655_v40, %v2654_v41  ;;  %v2659_v43 = vld [vmem:[#allocation2 + $0x22f] sm:$0xff]  ;;  %v2660_v47 = vld [vmem:[#allocation2 + $0x247] sm:$0xff] }
 0x288   :  { %v2661_v44 = vld [vmem:[#allocation2 + $0x24f] sm:$0xff]  ;;  %v21017_v46 = vpack.c.bf16 %v2659_v43, %v2658_v45  ;;  %v2680_v20 = vld [vmem:[#allocation2 + $0x387] sm:$0xff] }
 0x289   :  { %v2498_v52 = vmax.f32 %v2438_v34, %v2440_v50  ;;  %v2441_v53 = vmax.f32 %v2323_v51, %v2325_v49  ;;  %v2651_v34 = vld [vmem:[#allocation2 + $0x16f] sm:$0xff]  ;;  %v21019_v48 = vpack.c.bf16 %v2661_v44, %v2660_v47  ;;  %v2662_v51 = vld [vmem:[#allocation2 + $0x267] sm:$0xff] }
 0x28a   :  { %v2663_v49 = vld [vmem:[#allocation2 + $0x26f] sm:$0xff] }
 0x28b   :  { %2624 = vst [vmem:[#allocation2 + $0x3a8] sm:$0xff] %v2498_v52  ;;  %v2499_v54 = vmax.f32 %v2439_v36, %v2441_v53  ;;  %v2650_v36 = vld [vmem:[#allocation2 + $0x167] sm:$0xff]  ;;  %v2665_v50 = vld [vmem:[#allocation2 + $0x28f] sm:$0xff] }
 0x28c   :  { %v21007_v37 = vpack.c.bf16 %v2651_v34, %v2650_v36  ;;  %v2664_v53 = vld [vmem:[#allocation2 + $0x287] sm:$0xff]  ;;  %v2681_v16 = vld [vmem:[#allocation2 + $0x38f] sm:$0xff] }
 0x28d   :  { %2625 = vst [vmem:[#allocation2 + $0x3b0] sm:$0x3f] %v2499_v54  ;;  %v21025_v54 = vpack.c.bf16 %v2665_v50, %v2664_v53  ;;  %v21049_v21 = vpack.c.bf16 %v2681_v16, %v2680_v20  ;;  %v3439_v22 = vld [vmem:[#allocation2 + $0x9] sm:$0xff]  ;;  %v3442_v34 = vld [vmem:[#allocation2 + $0x31] sm:$0xff]  ;;  %v19371_v53 = vld [vmem:[%s24655_s3 + $0xe0] sm:$0xff]  }
 0x28e   :  { %v3495_v29 = vpack.c.bf16 %v3440_v24, %v3439_v22  ;;  %v3443_v35 = vld [vmem:[#allocation2 + $0x49] sm:$0xff]  ;;  %v3444_v36 = vld [vmem:[#allocation2 + $0x51] sm:$0xff]  ;;  %v21056_v38 = vpack.c.bf16 %v3442_v34, %v3441_v32  ;;  %v21105_v20 = vld [vmem:[%s24655_s3 + $0x100] sm:$0xff]  }
 0x28f   :  { %v19368_v40 = vld [vmem:[%s24655_s3 + $0xc8] sm:$0xff]   ;;  %v21061_v41 = vpack.c.bf16 %v3444_v36, %v3443_v35  ;;  %v19369_v43 = vld [vmem:[%s24655_s3 + $0xd0] sm:$0xff]   ;;  %v19374_v16 = vld [vmem:[%s24655_s3 + $0xf8] sm:$0xff]  }
 0x290   :  { %v3445_v44 = vld [vmem:[#allocation2 + $0x69] sm:$0xff]  ;;  %v3446_v45 = vld [vmem:[#allocation2 + $0x71] sm:$0xff] }
 0x291   :  { %v3447_v47 = vld [vmem:[#allocation2 + $0x89] sm:$0xff]  ;;  %v21069_v50 = vpack.c.bf16 %v3446_v45, %v3445_v44  ;;  %v3458_v24 = vld [vmem:[#allocation2 + $0x131] sm:$0xff] }
 0x292   :  { %v2682_v28 = vld [vmem:[#allocation2 + $0x3a7] sm:$0xff]  ;;  %v3462_v35 = vld [vmem:[#allocation2 + $0x171] sm:$0xff] }
 0x293   :  { %v3457_v22 = vld [vmem:[#allocation2 + $0x129] sm:$0xff] }
 0x294   :  { %v2783_v55 = vld [vmem:[#allocation2 + $0x3b0] sm:$0xff] }
 0x295   :  { %v2811_v4 = vpack.c.bf16 %v2783_v55, %v2498_v52  ;;  %v21023_v52 = vpack.c.bf16 %v2663_v49, %v2662_v51  ;;  %v2667_v55 = vld [vmem:[#allocation2 + $0x2af] sm:$0xff]  ;;  %v19370_v51 = vld [vmem:[%s24655_s3 + $0xd8] sm:$0xff]  }
 0x296   :  { %v3448_v49 = vld [vmem:[#allocation2 + $0x91] sm:$0xff]  ;;  %v3461_v34 = vld [vmem:[#allocation2 + $0x169] sm:$0xff] }
 0x297   :  { %18171 = vmatmul.mubr.bf16.gmra.mrb[52].mxu1 %v2811_v4  ;;  %v3463_v36 = vld [vmem:[#allocation2 + $0x189] sm:$0xff] }
 0x298   :  { %18190 = vmatprep.mubr.bf16.mxu1 %v20946_v58  ;;  %v3467_v45 = vld [vmem:[#allocation2 + $0x209] sm:$0xff] }
 0x29f   :  { %18191 = vmatmul.mubr.bf16.vlgmr.msra.gmra.mrb[0].mxu1 %v20949_v62 }
 0x2a0   :  { %18247 = vmatpush3.bf16.msra.mxu1 %v20866_v9  ;;  %18194 = vmatprep.mubr.bf16.mxu1 %v20954_v1  ;;  %v20967_v9 = vpack.c.bf16 %v2637_v6, %v2636_v10  ;;  %v21037_v6 = vpack.c.bf16 %v2673_v63, %v2672_v3  ;;  %v2677_v10 = vld [vmem:[#allocation2 + $0x34f] sm:$0xff] }
 0x2a1   :  { %18248 = vmatprep.subr.bf16.mxu1 %v19356_v0  ;;  %v21043_v13 = vpack.c.bf16 %v2677_v10, %v2676_v57  ;;  %v19372_v63 = vld [vmem:[%s24655_s3 + $0xe8] sm:$0xff]   ;;  %v19373_v3 = vld [vmem:[%s24655_s3 + $0xf0] sm:$0xff]  }
 0x2a2   :  { %v3454_v10 = vld [vmem:[#allocation2 + $0xf1] sm:$0xff] }
 0x2a3   :  { %v3456_v57 = vld [vmem:[#allocation2 + $0x111] sm:$0xff] }
 0x2a4   :  { %18249 = vmatpush3.bf16.msra.mxu1 %v19356_v0  ;;  %v2670_v0 = vld [vmem:[#allocation2 + $0x2e7] sm:$0xff] }
 0x2a5   :  { %18250 = vmatprep.subr.bf16.mxu1 %v19357_v2 }
 0x2a7   :  { %18195 = vmatmul.mubr.bf16.gmra.mrb[4].mxu1 %v20962_v8 }
 0x2a8   :  { %18198 = vmatprep.mubr.bf16.mxu1 %v20967_v9  ;;  %18251 = vmatpush3.bf16.msra.mxu1 %v19357_v2  ;;  %v21035_v2 = vpack.c.bf16 %v2671_v61, %v2670_v0 }
 0x2a9   :  { %18252 = vmatprep.subr.bf16.mxu1 %v19358_v11 }
 0x2ac   :  { %18253 = vmatpush3.bf16.msra.mxu1 %v19358_v11  ;;  %v2674_v11 = vld [vmem:[#allocation2 + $0x327] sm:$0xff] }
 0x2ad   :  { %18254 = vmatprep.subr.bf16.mxu1 %v19359_v12 }
 0x2af   :  { %18199 = vmatmul.mubr.bf16.gmra.mrb[8].mxu1 %v20974_v15 }
 0x2b0   :  { %18202 = vmatprep.mubr.bf16.mxu1 %v20979_v18  ;;  %18255 = vmatpush3.bf16.msra.mxu1 %v19359_v12  ;;  %v21041_v12 = vpack.c.bf16 %v2675_v7, %v2674_v11  ;;  %v3453_v7 = vld [vmem:[#allocation2 + $0xe9] sm:$0xff] }
 0x2b1   :  { %18256 = vmatprep.subr.bf16.mxu1 %v19360_v17  ;;  %v3455_v11 = vld [vmem:[#allocation2 + $0x109] sm:$0xff] }
 0x2b4   :  { %18257 = vmatpush3.bf16.msra.mxu1 %v19360_v17  ;;  %v2678_v17 = vld [vmem:[#allocation2 + $0x367] sm:$0xff] }
 0x2b5   :  { %18258 = vmatprep.subr.bf16.mxu1 %v19364_v19 }
 0x2b7   :  { %18203 = vmatmul.mubr.bf16.gmra.mrb[12].mxu1 %v20986_v23 }
 0x2b8   :  { %18206 = vmatprep.mubr.bf16.mxu1 %v20991_v26  ;;  %18259 = vmatpush3.bf16.msra.mxu1 %v19364_v19  ;;  %v21047_v19 = vpack.c.bf16 %v2679_v14, %v2678_v17  ;;  %v21093_v14 = vpack.c.bf16 %v3454_v10, %v3453_v7  ;;  %v21098_v17 = vpack.c.bf16 %v3456_v57, %v3455_v11 }
 0x2b9   :  { %18260 = vmatprep.subr.bf16.mxu1 %v19366_v25 }
 0x2bc   :  { %18261 = vmatpush3.bf16.msra.mxu1 %v19366_v25  ;;  %v2683_v25 = vld [vmem:[#allocation2 + $0x3af] sm:$0xff] }
 0x2bd   :  { %18318 = vmatprep.subr.bf16.mxu1 %v20998_v27  ;;  %v21053_v30 = vpack.c.bf16 %v2683_v25, %v2682_v28  ;;  %v3459_v25 = vld [vmem:[#allocation2 + $0x149] sm:$0xff]  ;;  %v3460_v28 = vld [vmem:[#allocation2 + $0x151] sm:$0xff] }
 0x2be   :  { %v21110_v32 = vpack.c.bf16 %v3460_v28, %v3459_v25 }
 0x2bf   :  { %18207 = vmatmul.mubr.bf16.gmra.mrb[16].mxu1 %v21000_v31 }
 0x2c0   :  { %18210 = vmatprep.mubr.bf16.mxu1 %v21003_v33 }
 0x2c7   :  { %18211 = vmatmul.mubr.bf16.gmra.mrb[20].mxu1 %v21007_v37 }
 0x2c8   :  { %18214 = vmatprep.mubr.bf16.mxu1 %v21009_v39 }
 0x2cf   :  { %18215 = vmatmul.mubr.bf16.gmra.mrb[24].mxu1 %v21013_v42 }
 0x2d0   :  { %18218 = vmatprep.mubr.bf16.mxu1 %v20946_v58  ;;  %v2666_v58 = vld [vmem:[#allocation2 + $0x2a7] sm:$0xff] }
 0x2d1   :  { %v21029_v4 = vpack.c.bf16 %v2667_v55, %v2666_v58  ;;  %v3449_v55 = vld [vmem:[#allocation2 + $0xa9] sm:$0xff] }
 0x2d2   :  { %v3451_v58 = vld [vmem:[#allocation2 + $0xc9] sm:$0xff]  ;;  %v21081_v61 = vpack.c.bf16 %v3450_v56, %v3449_v55 }
 0x2d3   :  { %v21086_v0 = vpack.c.bf16 %v3452_v59, %v3451_v58 }
 0x2d7   :  { %18219 = vmatmul.mubr.bf16.gmra.mrb[28].mxu1 %v21017_v46 }
 0x2d8   :  { %18222 = vmatprep.mubr.bf16.mxu1 %v21019_v48 }
 0x2df   :  { %18223 = vmatmul.mubr.bf16.gmra.mrb[32].mxu1 %v21023_v52 }
 0x2e0   :  { %18226 = vmatprep.mubr.bf16.mxu1 %v21025_v54 }
 0x2e7   :  { %18227 = vmatmul.mubr.bf16.gmra.mrb[36].mxu1 %v21029_v4 }
 0x2e8   :  { %18230 = vmatprep.mubr.bf16.mxu1 %v21031_v60 }
 0x2ef   :  { %18231 = vmatmul.mubr.bf16.gmra.mrb[40].mxu1 %v21035_v2 }
 0x2f0   :  { %18234 = vmatprep.mubr.bf16.mxu1 %v21037_v6 }
 0x2f7   :  { %18235 = vmatmul.mubr.bf16.gmra.mrb[44].mxu1 %v21041_v12 }
 0x2f8   :  { %18238 = vmatprep.mubr.bf16.mxu1 %v21043_v13 }
 0x2ff   :  { %18239 = vmatmul.mubr.bf16.gmra.mrb[48].mxu1 %v21047_v19 }
 0x300   :  { %18242 = vmatprep.mubr.bf16.mxu1 %v21049_v21 }
 0x307   :  { %18243 = vmatmul.mubr.bf16.gmra.mrb[52].mxu1 %v21053_v30 }
 0x308   :  { %18262 = vmatprep.mubr.bf16.mxu1 %v3495_v29  ;;  %v21107_v29 = vpack.c.bf16 %v3458_v24, %v3457_v22  ;;  %v3469_v22 = vld [vmem:[#allocation2 + $0x229] sm:$0xff] }
 0x30f   :  { %18263 = vmatmul.mubr.bf16.vlgmr.msra.gmra.mrb[0].mxu1 %v21056_v38 }
 0x310   :  { %18319 = vmatpush3.bf16.msra.mxu1 %v20998_v27  ;;  %18266 = vmatprep.mubr.bf16.mxu1 %v21061_v41  ;;  %v21074_v27 = vpack.c.bf16 %v3448_v49, %v3447_v47  ;;  %v3468_v47 = vld [vmem:[#allocation2 + $0x211] sm:$0xff]  ;;  %v3465_v49 = vld [vmem:[#allocation2 + $0x1a9] sm:$0xff] }
 0x311   :  { %18320 = vmatprep.subr.bf16.mxu1 %v19368_v40  ;;  %v3509_v55 = vpack.c.bf16 %v3468_v47, %v3467_v45 }
 0x314   :  { %18321 = vmatpush3.bf16.msra.mxu1 %v19368_v40  ;;  %v3464_v40 = vld [vmem:[#allocation2 + $0x191] sm:$0xff] }
 0x315   :  { %18322 = vmatprep.subr.bf16.mxu1 %v19369_v43  ;;  %v21116_v44 = vpack.c.bf16 %v3464_v40, %v3463_v36 }
 0x317   :  { %18267 = vmatmul.mubr.bf16.gmra.mrb[4].mxu1 %v21069_v50  ;;  %24683 = vst [vmem:[#allocation7_spill] sm:$0xff] %v21116_v44 }
 0x318   :  { %18270 = vmatprep.mubr.bf16.mxu1 %v21074_v27  ;;  %18323 = vmatpush3.bf16.msra.mxu1 %v19369_v43  ;;  %v21114_v43 = vpack.c.bf16 %v3462_v35, %v3461_v34  ;;  %v3470_v34 = vld [vmem:[#allocation2 + $0x231] sm:$0xff] }
 0x319   :  { %18324 = vmatprep.subr.bf16.mxu1 %v19370_v51 }
 0x31a   :  { %24682 = vst [vmem:[#allocation6_spill] sm:$0xff] %v21114_v43 }
 0x31c   :  { %18325 = vmatpush3.bf16.msra.mxu1 %v19370_v51  ;;  %v3466_v51 = vld [vmem:[#allocation2 + $0x1b1] sm:$0xff] }
 0x31d   :  { %18326 = vmatprep.subr.bf16.mxu1 %v19371_v53  ;;  %v21120_v58 = vpack.c.bf16 %v3466_v51, %v3465_v49  ;;  %v3471_v49 = vld [vmem:[#allocation2 + $0x249] sm:$0xff]  ;;  %v3472_v51 = vld [vmem:[#allocation2 + $0x251] sm:$0xff] }
 0x31f   :  { %18271 = vmatmul.mubr.bf16.gmra.mrb[8].mxu1 %v21081_v61  ;;  %24684 = vst [vmem:[#allocation8_spill] sm:$0xff] %v21120_v58 }
 0x320   :  { %18274 = vmatprep.mubr.bf16.mxu1 %v21086_v0  ;;  %18327 = vmatpush3.bf16.msra.mxu1 %v19371_v53  ;;  %v18096_v53 = vpop.f32.mrb[216].mxu0 }
 0x321   :  { %18328 = vmatprep.subr.bf16.mxu1 %v19372_v63  ;;  %v2079_v56 = vpop.f32.mrb[217].mxu0  ;;  %v2088_v7 = vadd.f32 %v20932_v5, %v18096_v53 }
 0x322   :  { %v18097_v59 = vpop.f32.mrb[218].mxu0  ;;  %v2080_v10 = vadd.f32 %v20932_v5, %v2079_v56 }
 0x323   :  { %v2091_v11 = vadd.f32 %v20932_v5, %v18097_v59  ;;  %v2328_v35 = vmax.f32 %v2088_v7, 0.0  ;;  %v21133_v7 = vpack.c.bf16 %v3472_v51, %v3471_v49  ;;  %v3483_v49 = vld [vmem:[#allocation2 + $0x309] sm:$0xff]  ;;  %v3484_v51 = vld [vmem:[#allocation2 + $0x311] sm:$0xff] }
 0x324   :  { %18329 = vmatpush3.bf16.msra.mxu1 %v19372_v63  ;;  %v2082_v63 = vpop.f32.mrb[219].mxu0  ;;  %v2326_v36 = vmax.f32 %v2080_v10, 0.0 }
 0x325   :  { %18330 = vmatprep.subr.bf16.mxu1 %v19373_v3  ;;  %v2083_v57 = vadd.f32 %v20932_v5, %v2082_v63  ;;  %v2329_v40 = vmax.f32 %v2091_v11, 0.0 }
 0x326   :  { %v2442_v63 = vmax.f32 %v2326_v36, %v2328_v35  ;;  %v3477_v35 = vld [vmem:[#allocation2 + $0x2a9] sm:$0xff]  ;;  %v3480_v36 = vld [vmem:[#allocation2 + $0x2d1] sm:$0xff] }
 0x327   :  { %18275 = vmatmul.mubr.bf16.gmra.mrb[12].mxu1 %v21093_v14  ;;  %v2327_v45 = vmax.f32 %v2083_v57, 0.0 }
 0x328   :  { %18278 = vmatprep.mubr.bf16.mxu1 %v21098_v17  ;;  %18331 = vmatpush3.bf16.msra.mxu1 %v19373_v3  ;;  %v18100_v3 = vpop.f32.mrb[220].mxu0 }
 0x329   :  { %18332 = vmatprep.subr.bf16.mxu1 %v19374_v16  ;;  %v2104_v24 = vadd.f32 %v20932_v5, %v18100_v3  ;;  %v21131_v3 = vpack.c.bf16 %v3470_v34, %v3469_v22  ;;  %v3476_v22 = vld [vmem:[#allocation2 + $0x291] sm:$0xff] }
 0x32b   :  { %v2332_v53 = vmax.f32 %v2104_v24, 0.0  ;;  %v3474_v24 = vld [vmem:[#allocation2 + $0x271] sm:$0xff] }
 0x32c   :  { %18333 = vmatpush3.bf16.msra.mxu1 %v19374_v16  ;;  %v2095_v16 = vpop.f32.mrb[221].mxu0 }
 0x32d   :  { %18390 = vmatprep.subr.bf16.mxu1 %v21105_v20  ;;  %v2096_v25 = vadd.f32 %v20932_v5, %v2095_v16  ;;  %v18101_v28 = vpop.f32.mrb[222].mxu0 }
 0x32e   :  { %v2098_v47 = vpop.f32.mrb[223].mxu0  ;;  %v2107_v56 = vadd.f32 %v20932_v5, %v18101_v28 }
 0x32f   :  { %18279 = vmatmul.mubr.bf16.gmra.mrb[16].mxu1 %v21107_v29  ;;  %v2099_v59 = vadd.f32 %v20932_v5, %v2098_v47  ;;  %v3473_v5 = vld [vmem:[#allocation2 + $0x269] sm:$0xff]  ;;  %v3482_v47 = vld [vmem:[#allocation2 + $0x2f1] sm:$0xff] }
 0x330   :  { %18282 = vmatprep.mubr.bf16.mxu1 %v21110_v32  ;;  %v21140_v28 = vpack.c.bf16 %v3474_v24, %v3473_v5  ;;  %v3489_v5 = vld [vmem:[#allocation2 + $0x369] sm:$0xff]  ;;  %v3490_v24 = vld [vmem:[#allocation2 + $0x371] sm:$0xff] }
 0x337   :  { %18283 = vmatmul.mubr.bf16.gmra.mrb[20].mxu1 %v21114_v43  ;;  %v2331_v43 = vmax.f32 %v2099_v59, 0.0  ;;  %v3486_v59 = vld [vmem:[#allocation2 + $0x331] sm:$0xff] }
 0x338   :  { %18286 = vmatprep.mubr.bf16.mxu1 %v21116_v44  ;;  %v2333_v44 = vmax.f32 %v2107_v56, 0.0  ;;  %v3485_v56 = vld [vmem:[#allocation2 + $0x329] sm:$0xff] }
 0x33a   :  { %v2445_v11 = vmax.f32 %v2331_v43, %v2333_v44  ;;  %v3478_v43 = vld [vmem:[#allocation2 + $0x2b1] sm:$0xff]  ;;  %v3479_v44 = vld [vmem:[#allocation2 + $0x2c9] sm:$0xff] }
 0x33f   :  { %18287 = vmatmul.mubr.bf16.gmra.mrb[24].mxu1 %v21120_v58  ;;  %v2443_v58 = vmax.f32 %v2327_v45, %v2329_v40  ;;  %v21146_v40 = vpack.c.bf16 %v3478_v43, %v3477_v35  ;;  %v3481_v45 = vld [vmem:[#allocation2 + $0x2e9] sm:$0xff]  ;;  %v21164_v35 = vpack.c.bf16 %v3490_v24, %v3489_v5 }
 0x340   :  { %18290 = vmatprep.mubr.bf16.mxu1 %v3509_v55  ;;  %v2330_v55 = vmax.f32 %v2096_v25, 0.0  ;;  %v3475_v25 = vld [vmem:[#allocation2 + $0x289] sm:$0xff] }
 0x341   :  { %v2501_v57 = vmax.f32 %v2443_v58, %v2445_v11  ;;  %v21142_v34 = vpack.c.bf16 %v3476_v22, %v3475_v25  ;;  %v21148_v58 = vpack.c.bf16 %v3480_v36, %v3479_v44  ;;  %v21158_v11 = vpack.c.bf16 %v3486_v59, %v3485_v56  ;;  %v3491_v25 = vld [vmem:[#allocation2 + $0x389] sm:$0xff]  ;;  %v3492_v22 = vld [vmem:[#allocation2 + $0x391] sm:$0xff] }
 0x342   :  { %v2444_v16 = vmax.f32 %v2330_v55, %v2332_v53  ;;  %v21152_v53 = vpack.c.bf16 %v3482_v47, %v3481_v45  ;;  %v21154_v55 = vpack.c.bf16 %v3484_v51, %v3483_v49  ;;  %v21166_v43 = vpack.c.bf16 %v3492_v22, %v3491_v25  ;;  %v3493_v44 = vld [vmem:[#allocation2 + $0x3a9] sm:$0xff]  ;;  %v3494_v36 = vld [vmem:[#allocation2 + $0x3b1] sm:$0xff] }
 0x343   :  { %2627 = vst [vmem:[#allocation2 + $0x3d0] sm:$0x3f] %v2501_v57  ;;  %v21170_v45 = vpack.c.bf16 %v3494_v36, %v3493_v44  ;;  %v19376_v47 = vld [vmem:[%s24655_s3 + $0x108] sm:$0xff]   ;;  %v19377_v49 = vld [vmem:[%s24655_s3 + $0x110] sm:$0xff]   ;;  %v19386_v56 = vld [vmem:[%s24655_s3 + $0x158] sm:$0xff]  }
 0x344   :  { %v21136_v10 = vmax.f32 %v2442_v63, %v2444_v16  ;;  %v3487_v63 = vld [vmem:[#allocation2 + $0x349] sm:$0xff]  ;;  %v3488_v16 = vld [vmem:[#allocation2 + $0x351] sm:$0xff] }
 0x345   :  { %v21160_v57 = vpack.c.bf16 %v3488_v16, %v3487_v63  ;;  %v4371_v51 = vld [vmem:[#allocation2 + $0xa8] sm:$0xff]  ;;  %v19387_v63 = vld [vmem:[%s24655_s3 + $0x160] sm:$0xff]   ;;  %v4374_v16 = vld [vmem:[#allocation2 + $0xd0] sm:$0xff] }
 0x346   :  { %2626 = vst [vmem:[#allocation2 + $0x3c8] sm:$0xff] %v21136_v10  ;;  %v4376_v5 = vld [vmem:[#allocation2 + $0xf0] sm:$0xff]  ;;  %v4373_v24 = vld [vmem:[#allocation2 + $0xc8] sm:$0xff] }
 0x347   :  { %18291 = vmatmul.mubr.bf16.gmra.mrb[28].mxu1 %v21131_v3  ;;  %v21254_v25 = vpack.c.bf16 %v4374_v16, %v4373_v24  ;;  %v4375_v22 = vld [vmem:[#allocation2 + $0xe8] sm:$0xff]  ;;  %v4394_v16 = vld [vmem:[#allocation2 + $0x250] sm:$0xff] }
 0x348   :  { %18294 = vmatprep.mubr.bf16.mxu1 %v21133_v7  ;;  %v19388_v44 = vld [vmem:[%s24655_s3 + $0x168] sm:$0xff]   ;;  %v21259_v36 = vpack.c.bf16 %v4376_v5, %v4375_v22  ;;  %v4396_v5 = vld [vmem:[#allocation2 + $0x270] sm:$0xff] }
 0x349   :  { %v4393_v24 = vld [vmem:[#allocation2 + $0x248] sm:$0xff] }
 0x34a   :  { %v21296_v22 = vpack.c.bf16 %v4394_v16, %v4393_v24  ;;  %v4410_v16 = vld [vmem:[#allocation2 + $0x350] sm:$0xff]  ;;  %v4409_v24 = vld [vmem:[#allocation2 + $0x348] sm:$0xff] }
 0x34f   :  { %18295 = vmatmul.mubr.bf16.gmra.mrb[32].mxu1 %v21140_v28 }
 0x350   :  { %18298 = vmatprep.mubr.bf16.mxu1 %v21142_v34 }
 0x357   :  { %18299 = vmatmul.mubr.bf16.gmra.mrb[36].mxu1 %v21146_v40 }
 0x358   :  { %18302 = vmatprep.mubr.bf16.mxu1 %v21148_v58 }
 0x35f   :  { %18303 = vmatmul.mubr.bf16.gmra.mrb[40].mxu1 %v21152_v53 }
 0x360   :  { %18306 = vmatprep.mubr.bf16.mxu1 %v21154_v55 }
 0x367   :  { %18307 = vmatmul.mubr.bf16.gmra.mrb[44].mxu1 %v21158_v11 }
 0x368   :  { %18310 = vmatprep.mubr.bf16.mxu1 %v21160_v57 }
 0x36f   :  { %18311 = vmatmul.mubr.bf16.gmra.mrb[48].mxu1 %v21164_v35 }
 0x370   :  { %18314 = vmatprep.mubr.bf16.mxu1 %v21166_v43 }
 0x377   :  { %18315 = vmatmul.mubr.bf16.gmra.mrb[52].mxu1 %v21170_v45 }
 0x378   :  { %18334 = vmatprep.mubr.bf16.mxu1 %v20949_v62  ;;  %v19378_v62 = vld [vmem:[%s24655_s3 + $0x118] sm:$0xff]  }
 0x37f   :  { %18335 = vmatmul.mubr.bf16.vlgmr.msra.gmra.mrb[0].mxu1 %v20954_v1  ;;  %v19379_v1 = vld [vmem:[%s24655_s3 + $0x120] sm:$0xff]  }
 0x380   :  { %18391 = vmatpush3.bf16.msra.mxu1 %v21105_v20  ;;  %18338 = vmatprep.mubr.bf16.mxu1 %v20962_v8  ;;  %v19380_v8 = vld [vmem:[%s24655_s3 + $0x128] sm:$0xff]  }
 0x381   :  { %18392 = vmatprep.subr.bf16.mxu1 %v19376_v47 }
 0x384   :  { %18393 = vmatpush3.bf16.msra.mxu1 %v19376_v47  ;;  %v19389_v47 = vld [vmem:[%s24655_s3 + $0x170] sm:$0xff]  }
 0x385   :  { %18394 = vmatprep.subr.bf16.mxu1 %v19377_v49 }
 0x387   :  { %18339 = vmatmul.mubr.bf16.gmra.mrb[4].mxu1 %v20967_v9  ;;  %v19381_v9 = vld [vmem:[%s24655_s3 + $0x130] sm:$0xff]  }
 0x388   :  { %18342 = vmatprep.mubr.bf16.mxu1 %v20974_v15  ;;  %18395 = vmatpush3.bf16.msra.mxu1 %v19377_v49  ;;  %v19382_v15 = vld [vmem:[%s24655_s3 + $0x138] sm:$0xff]   ;;  %v4378_v49 = vld [vmem:[#allocation2 + $0x110] sm:$0xff] }
 0x389   :  { %18396 = vmatprep.subr.bf16.mxu1 %v19378_v62 }
 0x38c   :  { %18397 = vmatpush3.bf16.msra.mxu1 %v19378_v62  ;;  %v4380_v62 = vld [vmem:[#allocation2 + $0x130] sm:$0xff] }
 0x38d   :  { %18398 = vmatprep.subr.bf16.mxu1 %v19379_v1 }
 0x38f   :  { %18343 = vmatmul.mubr.bf16.gmra.mrb[8].mxu1 %v20979_v18  ;;  %v19383_v18 = vld [vmem:[%s24655_s3 + $0x140] sm:$0xff]  }
 0x390   :  { %18346 = vmatprep.mubr.bf16.mxu1 %v20986_v23  ;;  %18399 = vmatpush3.bf16.msra.mxu1 %v19379_v1  ;;  %v3928_v23 = vld [vmem:[#allocation2 + $0x1cf] sm:$0xff] }
 0x391   :  { %18400 = vmatprep.subr.bf16.mxu1 %v19380_v8  ;;  %v4377_v1 = vld [vmem:[#allocation2 + $0x108] sm:$0xff] }
 0x394   :  { %18401 = vmatpush3.bf16.msra.mxu1 %v19380_v8  ;;  %v21266_v8 = vpack.c.bf16 %v4378_v49, %v4377_v1  ;;  %v4398_v49 = vld [vmem:[#allocation2 + $0x290] sm:$0xff]  ;;  %v4397_v1 = vld [vmem:[#allocation2 + $0x288] sm:$0xff] }
 0x395   :  { %18402 = vmatprep.subr.bf16.mxu1 %v19381_v9 }
 0x397   :  { %18347 = vmatmul.mubr.bf16.gmra.mrb[12].mxu1 %v20991_v26  ;;  %v3927_v26 = vld [vmem:[#allocation2 + $0x1c7] sm:$0xff] }
 0x398   :  { %18350 = vmatprep.mubr.bf16.mxu1 %v21000_v31  ;;  %18403 = vmatpush3.bf16.msra.mxu1 %v19381_v9  ;;  %v21211_v20 = vpack.c.bf16 %v3928_v23, %v3927_v26  ;;  %v3955_v31 = vld [vmem:[#allocation2 + $0x3c7] sm:$0xff]  ;;  %v4382_v26 = vld [vmem:[#allocation2 + $0x150] sm:$0xff] }
 0x399   :  { %18404 = vmatprep.subr.bf16.mxu1 %v19382_v15  ;;  %v4379_v9 = vld [vmem:[#allocation2 + $0x128] sm:$0xff]  ;;  %v21278_v23 = vld [vmem:[%s24655_s3 + $0x180] sm:$0xff]  }
 0x39c   :  { %18405 = vmatpush3.bf16.msra.mxu1 %v19382_v15  ;;  %v19390_v15 = vld [vmem:[%s24655_s3 + $0x178] sm:$0xff]  }
 0x39d   :  { %18462 = vmatprep.subr.bf16.mxu1 %v19383_v18 }
 0x39f   :  { %18351 = vmatmul.mubr.bf16.gmra.mrb[16].mxu1 %v21003_v33  ;;  %v3956_v33 = vld [vmem:[#allocation2 + $0x3cf] sm:$0xff] }
 0x3a0   :  { %18354 = vmatprep.mubr.bf16.mxu1 %v21007_v37  ;;  %v4364_v37 = vld [vmem:[#allocation2 + $0x30] sm:$0xff] }
 0x3a7   :  { %18355 = vmatmul.mubr.bf16.gmra.mrb[20].mxu1 %v21009_v39  ;;  %v21227_v39 = vpack.c.bf16 %v3956_v33, %v3955_v31  ;;  %v4384_v31 = vld [vmem:[#allocation2 + $0x170] sm:$0xff]  ;;  %v4381_v33 = vld [vmem:[#allocation2 + $0x148] sm:$0xff] }
 0x3a8   :  { %18358 = vmatprep.mubr.bf16.mxu1 %v21013_v42  ;;  %v4363_v42 = vld [vmem:[#allocation2 + $0x28] sm:$0xff] }
 0x3af   :  { %18359 = vmatmul.mubr.bf16.gmra.mrb[24].mxu1 %v21211_v20 }
 0x3b0   :  { %18362 = vmatprep.mubr.bf16.mxu1 %v21017_v46  ;;  %v4419_v46 = vpack.c.bf16 %v4364_v37, %v4363_v42  ;;  %v21280_v37 = vpack.c.bf16 %v4382_v26, %v4381_v33  ;;  %v4383_v42 = vld [vmem:[#allocation2 + $0x168] sm:$0xff]  ;;  %v4404_v33 = vld [vmem:[#allocation2 + $0x2f0] sm:$0xff] }
 0x3b7   :  { %18363 = vmatmul.mubr.bf16.gmra.mrb[28].mxu1 %v21019_v48  ;;  %v4366_v48 = vld [vmem:[#allocation2 + $0x50] sm:$0xff] }
 0x3b8   :  { %18366 = vmatprep.mubr.bf16.mxu1 %v21023_v52  ;;  %v4368_v52 = vld [vmem:[#allocation2 + $0x70] sm:$0xff] }
 0x3bf   :  { %18367 = vmatmul.mubr.bf16.gmra.mrb[32].mxu1 %v21025_v54  ;;  %v4365_v54 = vld [vmem:[#allocation2 + $0x48] sm:$0xff] }
 0x3c0   :  { %18370 = vmatprep.mubr.bf16.mxu1 %v21029_v4  ;;  %v21230_v4 = vpack.c.bf16 %v4366_v48, %v4365_v54  ;;  %v4386_v48 = vld [vmem:[#allocation2 + $0x190] sm:$0xff]  ;;  %v4385_v54 = vld [vmem:[#allocation2 + $0x188] sm:$0xff] }
 0x3c7   :  { %18371 = vmatmul.mubr.bf16.gmra.mrb[36].mxu1 %v21031_v60  ;;  %v4367_v60 = vld [vmem:[#allocation2 + $0x68] sm:$0xff] }
 0x3c8   :  { %18374 = vmatprep.mubr.bf16.mxu1 %v21035_v2  ;;  %v19384_v2 = vld [vmem:[%s24655_s3 + $0x148] sm:$0xff]  }
 0x3cf   :  { %18375 = vmatmul.mubr.bf16.gmra.mrb[40].mxu1 %v21037_v6  ;;  %v21235_v6 = vpack.c.bf16 %v4368_v52, %v4367_v60  ;;  %v4388_v52 = vld [vmem:[#allocation2 + $0x1b0] sm:$0xff]  ;;  %v21287_v60 = vpack.c.bf16 %v4386_v48, %v4385_v54 }
 0x3d0   :  { %18378 = vmatprep.mubr.bf16.mxu1 %v21041_v12  ;;  %v19385_v12 = vld [vmem:[%s24655_s3 + $0x150] sm:$0xff]  }
 0x3d7   :  { %18379 = vmatmul.mubr.bf16.gmra.mrb[44].mxu1 %v21043_v13  ;;  %v4370_v13 = vld [vmem:[#allocation2 + $0x90] sm:$0xff] }
 0x3d8   :  { %18382 = vmatprep.mubr.bf16.mxu1 %v21047_v19  ;;  %v4372_v19 = vld [vmem:[#allocation2 + $0xb0] sm:$0xff] }
 0x3d9   :  { %v21247_v59 = vpack.c.bf16 %v4372_v19, %v4371_v51  ;;  %v4392_v19 = vld [vmem:[#allocation2 + $0x230] sm:$0xff] }
 0x3df   :  { %18383 = vmatmul.mubr.bf16.gmra.mrb[48].mxu1 %v21049_v21  ;;  %v4369_v21 = vld [vmem:[#allocation2 + $0x88] sm:$0xff] }
 0x3e0   :  { %18386 = vmatprep.mubr.bf16.mxu1 %v21053_v30  ;;  %v21242_v30 = vpack.c.bf16 %v4370_v13, %v4369_v21  ;;  %v4390_v13 = vld [vmem:[#allocation2 + $0x1d0] sm:$0xff]  ;;  %v4389_v21 = vld [vmem:[#allocation2 + $0x1c8] sm:$0xff] }
 0x3e1   :  { %v21293_v51 = vpack.c.bf16 %v4390_v13, %v4389_v21  ;;  %v4408_v13 = vld [vmem:[#allocation2 + $0x330] sm:$0xff] }
 0x3e7   :  { %18387 = vmatmul.mubr.bf16.gmra.mrb[52].mxu1 %v21227_v39 }
 0x3e8   :  { %18406 = vmatprep.mubr.bf16.mxu1 %v4419_v46  ;;  %v21283_v46 = vpack.c.bf16 %v4384_v31, %v4383_v42  ;;  %v4402_v31 = vld [vmem:[#allocation2 + $0x2d0] sm:$0xff]  ;;  %v4401_v42 = vld [vmem:[#allocation2 + $0x2c8] sm:$0xff] }
 0x3e9   :  { %v21308_v48 = vpack.c.bf16 %v4402_v31, %v4401_v42  ;;  %v4413_v31 = vld [vmem:[#allocation2 + $0x388] sm:$0xff] }
 0x3ea   :  { %v4415_v42 = vld [vmem:[#allocation2 + $0x3a8] sm:$0xff] }
 0x3ef   :  { %18407 = vmatmul.mubr.bf16.vlgmr.msra.gmra.mrb[0].mxu1 %v21230_v4 }
 0x3f0   :  { %18463 = vmatpush3.bf16.msra.mxu1 %v19383_v18  ;;  %18410 = vmatprep.mubr.bf16.mxu1 %v21235_v6  ;;  %v21271_v18 = vpack.c.bf16 %v4380_v62, %v4379_v9  ;;  %v4400_v62 = vld [vmem:[#allocation2 + $0x2b0] sm:$0xff]  ;;  %v21302_v9 = vpack.c.bf16 %v4398_v49, %v4397_v1  ;;  %v4411_v49 = vld [vmem:[#allocation2 + $0x368] sm:$0xff] }
 0x3f1   :  { %18464 = vmatprep.subr.bf16.mxu1 %v19384_v2  ;;  %v4414_v1 = vld [vmem:[#allocation2 + $0x390] sm:$0xff] }
 0x3f4   :  { %18465 = vmatpush3.bf16.msra.mxu1 %v19384_v2  ;;  %v4387_v2 = vld [vmem:[#allocation2 + $0x1a8] sm:$0xff] }
 0x3f5   :  { %18466 = vmatprep.subr.bf16.mxu1 %v19385_v12 }
 0x3f7   :  { %18411 = vmatmul.mubr.bf16.gmra.mrb[4].mxu1 %v21242_v30 }
 0x3f8   :  { %18414 = vmatprep.mubr.bf16.mxu1 %v21247_v59  ;;  %18467 = vmatpush3.bf16.msra.mxu1 %v19385_v12  ;;  %v21289_v12 = vpack.c.bf16 %v4388_v52, %v4387_v2  ;;  %v4403_v52 = vld [vmem:[#allocation2 + $0x2e8] sm:$0xff]  ;;  %v4406_v2 = vld [vmem:[#allocation2 + $0x310] sm:$0xff] }
 0x3f9   :  { %18468 = vmatprep.subr.bf16.mxu1 %v19386_v56  ;;  %v21310_v54 = vpack.c.bf16 %v4404_v33, %v4403_v52  ;;  %v21326_v33 = vpack.c.bf16 %v4414_v1, %v4413_v31  ;;  %v5297_v1 = vld [vmem:[#allocation2 + $0xcf] sm:$0xff]  ;;  %v5296_v31 = vld [vmem:[#allocation2 + $0xc7] sm:$0xff] }
 0x3fc   :  { %18469 = vmatpush3.bf16.msra.mxu1 %v19386_v56  ;;  %v4391_v56 = vld [vmem:[#allocation2 + $0x228] sm:$0xff] }
 0x3fd   :  { %18470 = vmatprep.subr.bf16.mxu1 %v19387_v63 }
 0x3ff   :  { %18415 = vmatmul.mubr.bf16.gmra.mrb[8].mxu1 %v21254_v25 }
 0x400   :  { %18418 = vmatprep.mubr.bf16.mxu1 %v21259_v36  ;;  %18471 = vmatpush3.bf16.msra.mxu1 %v19387_v63  ;;  %v4433_v63 = vpack.c.bf16 %v4392_v19, %v4391_v56  ;;  %v4405_v19 = vld [vmem:[#allocation2 + $0x308] sm:$0xff] }
 0x401   :  { %18472 = vmatprep.subr.bf16.mxu1 %v19388_v44  ;;  %v21314_v21 = vpack.c.bf16 %v4406_v2, %v4405_v19  ;;  %v4407_v56 = vld [vmem:[#allocation2 + $0x328] sm:$0xff]  ;;  %v4418_v2 = vld [vmem:[#allocation2 + $0x3d0] sm:$0xff] }
 0x402   :  { %v19392_v19 = vld [vmem:[%s24655_s3 + $0x188] sm:$0xff]  }
 0x404   :  { %18473 = vmatpush3.bf16.msra.mxu1 %v19388_v44  ;;  %v4395_v44 = vld [vmem:[#allocation2 + $0x268] sm:$0xff] }
 0x405   :  { %18474 = vmatprep.subr.bf16.mxu1 %v19389_v47 }
 0x407   :  { %18419 = vmatmul.mubr.bf16.gmra.mrb[12].mxu1 %v21266_v8 }
 0x408   :  { %18422 = vmatprep.mubr.bf16.mxu1 %v21271_v18  ;;  %18475 = vmatpush3.bf16.msra.mxu1 %v19389_v47  ;;  %v21298_v47 = vpack.c.bf16 %v4396_v5, %v4395_v44  ;;  %v4412_v5 = vld [vmem:[#allocation2 + $0x370] sm:$0xff]  ;;  %v21320_v44 = vpack.c.bf16 %v4410_v16, %v4409_v24 }
 0x409   :  { %18476 = vmatprep.subr.bf16.mxu1 %v19390_v15  ;;  %v4851_v16 = vld [vmem:[#allocation2 + $0x1c9] sm:$0xff] }
 0x40a   :  { %v19401_v24 = vld [vmem:[%s24655_s3 + $0x1d0] sm:$0xff]  }
 0x40c   :  { %18477 = vmatpush3.bf16.msra.mxu1 %v19390_v15  ;;  %v4399_v15 = vld [vmem:[#allocation2 + $0x2a8] sm:$0xff] }
 0x40d   :  { %18534 = vmatprep.subr.bf16.mxu1 %v21278_v23  ;;  %v21304_v26 = vpack.c.bf16 %v4400_v62, %v4399_v15  ;;  %v21322_v62 = vpack.c.bf16 %v4412_v5, %v4411_v49  ;;  %v4416_v15 = vld [vmem:[#allocation2 + $0x3b0] sm:$0xff] }
 0x40e   :  { %v21328_v52 = vpack.c.bf16 %v4416_v15, %v4415_v42  ;;  %v5295_v49 = vld [vmem:[#allocation2 + $0xaf] sm:$0xff]  ;;  %v5294_v15 = vld [vmem:[#allocation2 + $0xa7] sm:$0xff]  ;;  %v19402_v42 = vld [vmem:[%s24655_s3 + $0x1d8] sm:$0xff]  }
 0x40f   :  { %18423 = vmatmul.mubr.bf16.gmra.mrb[16].mxu1 %v21280_v37 }
 0x410   :  { %18426 = vmatprep.mubr.bf16.mxu1 %v21283_v46 }
 0x417   :  { %18427 = vmatmul.mubr.bf16.gmra.mrb[20].mxu1 %v21287_v60 }
 0x418   :  { %18430 = vmatprep.mubr.bf16.mxu1 %v21289_v12 }
 0x41f   :  { %18431 = vmatmul.mubr.bf16.gmra.mrb[24].mxu1 %v21293_v51 }
 0x420   :  { %18434 = vmatprep.mubr.bf16.mxu1 %v4433_v63  ;;  %v21316_v63 = vpack.c.bf16 %v4408_v13, %v4407_v56  ;;  %v4446_v13 = vpack.c.bf16 %v4418_v2, %v21136_v10  ;;  %v19393_v56 = vld [vmem:[%s24655_s3 + $0x190] sm:$0xff]   ;;  %v5347_v2 = vpack.c.bf16 %v5295_v49, %v5294_v15 }
 0x421   :  { %v24686_v10 = vld [vmem:[#allocation7_spill] sm:$0xff] }
 0x422   :  { %v5317_v49 = vld [vmem:[#allocation2 + $0x24f] sm:$0xff] }
 0x427   :  { %18435 = vmatmul.mubr.bf16.gmra.mrb[28].mxu1 %v21296_v22 }
 0x428   :  { %18438 = vmatprep.mubr.bf16.mxu1 %v21298_v47 }
 0x42f   :  { %18439 = vmatmul.mubr.bf16.gmra.mrb[32].mxu1 %v21302_v9 }
 0x430   :  { %18442 = vmatprep.mubr.bf16.mxu1 %v21304_v26 }
 0x437   :  { %18443 = vmatmul.mubr.bf16.gmra.mrb[36].mxu1 %v21308_v48 }
 0x438   :  { %18446 = vmatprep.mubr.bf16.mxu1 %v21310_v54 }
 0x43f   :  { %18447 = vmatmul.mubr.bf16.gmra.mrb[40].mxu1 %v21314_v21 }
 0x440   :  { %18450 = vmatprep.mubr.bf16.mxu1 %v21316_v63 }
 0x447   :  { %18451 = vmatmul.mubr.bf16.gmra.mrb[44].mxu1 %v21320_v44 }
 0x448   :  { %18454 = vmatprep.mubr.bf16.mxu1 %v21322_v62 }
 0x44f   :  { %18455 = vmatmul.mubr.bf16.gmra.mrb[48].mxu1 %v21326_v33 }
 0x450   :  { %18458 = vmatprep.mubr.bf16.mxu1 %v21328_v52 }
 0x457   :  { %18459 = vmatmul.mubr.bf16.gmra.mrb[52].mxu1 %v4446_v13  ;;  %v5348_v13 = vpack.c.bf16 %v5297_v1, %v5296_v31  ;;  %v20048_v1 = vld [vmem:[#allocation2 + $0x7] sm:$0xff] }
 0x458   :  { %18478 = vmatprep.mubr.bf16.mxu1 %v21056_v38  ;;  %v19394_v38 = vld [vmem:[%s24655_s3 + $0x198] sm:$0xff]   ;;  %v5357_v15 = vpack.c.bf16 %v20048_v1, %v20048_v1  ;;  %v5316_v31 = vld [vmem:[#allocation2 + $0x247] sm:$0xff] }
 0x45f   :  { %18479 = vmatmul.mubr.bf16.vlgmr.msra.gmra.mrb[0].mxu1 %v21061_v41  ;;  %v19395_v41 = vld [vmem:[%s24655_s3 + $0x1a0] sm:$0xff]  }
 0x460   :  { %18535 = vmatpush3.bf16.msra.mxu1 %v21278_v23  ;;  %18482 = vmatprep.mubr.bf16.mxu1 %v21069_v50  ;;  %v19396_v50 = vld [vmem:[%s24655_s3 + $0x1a8] sm:$0xff]   ;;  %v24687_v23 = vld [vmem:[#allocation8_spill] sm:$0xff] }
 0x461   :  { %18536 = vmatprep.subr.bf16.mxu1 %v19392_v19 }
 0x464   :  { %18537 = vmatpush3.bf16.msra.mxu1 %v19392_v19  ;;  %v5299_v19 = vld [vmem:[#allocation2 + $0xef] sm:$0xff] }
 0x465   :  { %18538 = vmatprep.subr.bf16.mxu1 %v19393_v56 }
 0x467   :  { %18483 = vmatmul.mubr.bf16.gmra.mrb[4].mxu1 %v21074_v27  ;;  %v19397_v27 = vld [vmem:[%s24655_s3 + $0x1b0] sm:$0xff]  }
 0x468   :  { %18486 = vmatprep.mubr.bf16.mxu1 %v21081_v61  ;;  %18539 = vmatpush3.bf16.msra.mxu1 %v19393_v56  ;;  %v19398_v61 = vld [vmem:[%s24655_s3 + $0x1b8] sm:$0xff]   ;;  %v19403_v56 = vld [vmem:[%s24655_s3 + $0x1e0] sm:$0xff]  }
 0x469   :  { %18540 = vmatprep.subr.bf16.mxu1 %v19394_v38 }
 0x46c   :  { %18541 = vmatpush3.bf16.msra.mxu1 %v19394_v38  ;;  %v19412_v38 = vld [vmem:[%s24657_s5 + $0x48] sm:$0xff]  }
 0x46d   :  { %18542 = vmatprep.subr.bf16.mxu1 %v19395_v41 }
 0x46f   :  { %18487 = vmatmul.mubr.bf16.gmra.mrb[8].mxu1 %v21086_v0  ;;  %v19399_v0 = vld [vmem:[%s24655_s3 + $0x1c0] sm:$0xff]  }
 0x470   :  { %18490 = vmatprep.mubr.bf16.mxu1 %v21093_v14  ;;  %18543 = vmatpush3.bf16.msra.mxu1 %v19395_v41  ;;  %v24685_v14 = vld [vmem:[#allocation6_spill] sm:$0xff] }
 0x471   :  { %18544 = vmatprep.subr.bf16.mxu1 %v19396_v50  ;;  %v19413_v41 = vld [vmem:[%s24657_s5 + $0x8] sm:$0xff]  }
 0x474   :  { %18545 = vmatpush3.bf16.msra.mxu1 %v19396_v50  ;;  %v5301_v50 = vld [vmem:[#allocation2 + $0x10f] sm:$0xff] }
 0x475   :  { %18546 = vmatprep.subr.bf16.mxu1 %v19397_v27 }
 0x477   :  { %18491 = vmatmul.mubr.bf16.gmra.mrb[12].mxu1 %v21098_v17  ;;  %v4852_v17 = vld [vmem:[#allocation2 + $0x1d1] sm:$0xff] }
 0x478   :  { %18494 = vmatprep.mubr.bf16.mxu1 %v21107_v29  ;;  %18547 = vmatpush3.bf16.msra.mxu1 %v19397_v27  ;;  %v21371_v5 = vpack.c.bf16 %v4852_v17, %v4851_v16  ;;  %v19406_v29 = vld [vmem:[%s24657_s5 + $0x40] sm:$0xff]   ;;  %v5303_v16 = vld [vmem:[#allocation2 + $0x12f] sm:$0xff] }
 0x479   :  { %18548 = vmatprep.subr.bf16.mxu1 %v19398_v61  ;;  %17220 = vmatprep.subr.bf16.mxu0 %v19406_v29  ;;  %v5298_v27 = vld [vmem:[#allocation2 + $0xe7] sm:$0xff]  ;;  %v5305_v17 = vld [vmem:[#allocation2 + $0x14f] sm:$0xff] }
 0x47a   :  { %v5302_v29 = vld [vmem:[#allocation2 + $0x127] sm:$0xff] }
 0x47c   :  { %18549 = vmatpush3.bf16.msra.mxu1 %v19398_v61  ;;  %v5300_v61 = vld [vmem:[#allocation2 + $0x107] sm:$0xff] }
 0x47d   :  { %18606 = vmatprep.subr.bf16.mxu1 %v19399_v0 }
 0x47f   :  { %18495 = vmatmul.mubr.bf16.gmra.mrb[16].mxu1 %v21110_v32  ;;  %v19407_v32 = vld [vmem:[%s24657_s5] sm:$0xff]  }
 0x480   :  { %18498 = vmatprep.mubr.bf16.mxu1 %v24685_v14  ;;  %17221 = vmatpush3.bf16.msra.mxu0 %v19407_v32  ;;  %v5349_v14 = vpack.c.bf16 %v5299_v19, %v5298_v27  ;;  %v5304_v32 = vld [vmem:[#allocation2 + $0x147] sm:$0xff]  ;;  %v5325_v27 = vld [vmem:[#allocation2 + $0x2cf] sm:$0xff] }
 0x481   :  { %17222 = vmatprep.subr.bf16.mxu0 %v19412_v38  ;;  %v5318_v19 = vld [vmem:[#allocation2 + $0x267] sm:$0xff] }
 0x484   :  { %17223 = vmatpush3.bf16.msra.mxu0 %v19413_v41 }
 0x487   :  { %18499 = vmatmul.mubr.bf16.gmra.mrb[20].mxu1 %v24686_v10  ;;  %v5350_v10 = vpack.c.bf16 %v5301_v50, %v5300_v61  ;;  %v5323_v50 = vld [vmem:[#allocation2 + $0x2af] sm:$0xff]  ;;  %v5322_v61 = vld [vmem:[#allocation2 + $0x2a7] sm:$0xff] }
 0x488   :  { %18502 = vmatprep.mubr.bf16.mxu1 %v24687_v23  ;;  %v19405_v23 = vld [vmem:[%s24655_s3 + $0x1f0] sm:$0xff]  }
 0x48f   :  { %18503 = vmatmul.mubr.bf16.gmra.mrb[24].mxu1 %v21371_v5 }
 0x490   :  { %18506 = vmatprep.mubr.bf16.mxu1 %v21131_v3  ;;  %v4879_v3 = vld [vmem:[#allocation2 + $0x3c9] sm:$0xff] }
 0x497   :  { %18507 = vmatmul.mubr.bf16.gmra.mrb[28].mxu1 %v21133_v7  ;;  %v4880_v7 = vld [vmem:[#allocation2 + $0x3d1] sm:$0xff] }
 0x498   :  { %18510 = vmatprep.mubr.bf16.mxu1 %v21140_v28  ;;  %v5289_v28 = vld [vmem:[#allocation2 + $0x4f] sm:$0xff] }
 0x49f   :  { %18511 = vmatmul.mubr.bf16.gmra.mrb[32].mxu1 %v21142_v34  ;;  %v5288_v34 = vld [vmem:[#allocation2 + $0x47] sm:$0xff] }
 0x4a0   :  { %18514 = vmatprep.mubr.bf16.mxu1 %v21146_v40  ;;  %v21393_v40 = vpack.c.bf16 %v4880_v7, %v4879_v3  ;;  %v19408_v3 = vld [vmem:[%s24655_s3 + $0x1f8] sm:$0xff]   ;;  %v5351_v7 = vpack.c.bf16 %v5303_v16, %v5302_v29  ;;  %v19419_v16 = vld [vmem:[%s24657_s5 + $0x10] sm:$0xff]   ;;  %v5326_v29 = vld [vmem:[#allocation2 + $0x2e7] sm:$0xff] }
 0x4a7   :  { %18515 = vmatmul.mubr.bf16.gmra.mrb[36].mxu1 %v21148_v58  ;;  %v5344_v58 = vpack.c.bf16 %v5289_v28, %v5288_v34  ;;  %v5352_v28 = vpack.c.bf16 %v5305_v17, %v5304_v32  ;;  %v5307_v34 = vld [vmem:[#allocation2 + $0x16f] sm:$0xff]  ;;  %v5328_v32 = vld [vmem:[#allocation2 + $0x307] sm:$0xff] }
 0x4a8   :  { %18518 = vmatprep.mubr.bf16.mxu1 %v21152_v53  ;;  %v5291_v53 = vld [vmem:[#allocation2 + $0x6f] sm:$0xff] }
 0x4a9   :  { %v5329_v17 = vld [vmem:[#allocation2 + $0x30f] sm:$0xff] }
 0x4af   :  { %18519 = vmatmul.mubr.bf16.gmra.mrb[40].mxu1 %v21154_v55  ;;  %v5293_v55 = vld [vmem:[#allocation2 + $0x8f] sm:$0xff] }
 0x4b0   :  { %18522 = vmatprep.mubr.bf16.mxu1 %v21158_v11  ;;  %v5290_v11 = vld [vmem:[#allocation2 + $0x67] sm:$0xff] }
 0x4b7   :  { %18523 = vmatmul.mubr.bf16.gmra.mrb[44].mxu1 %v21160_v57  ;;  %v5292_v57 = vld [vmem:[#allocation2 + $0x87] sm:$0xff] }
 0x4b8   :  { %18526 = vmatprep.mubr.bf16.mxu1 %v21164_v35  ;;  %v19400_v35 = vld [vmem:[%s24655_s3 + $0x1c8] sm:$0xff]  }
 0x4bf   :  { %18527 = vmatmul.mubr.bf16.gmra.mrb[48].mxu1 %v21166_v43  ;;  %v5345_v43 = vpack.c.bf16 %v5291_v53, %v5290_v11  ;;  %v5309_v53 = vld [vmem:[#allocation2 + $0x18f] sm:$0xff]  ;;  %v5308_v11 = vld [vmem:[#allocation2 + $0x187] sm:$0xff] }
 0x4c0   :  { %18530 = vmatprep.mubr.bf16.mxu1 %v21170_v45  ;;  %v5346_v45 = vpack.c.bf16 %v5293_v55, %v5292_v57  ;;  %v5306_v55 = vld [vmem:[#allocation2 + $0x167] sm:$0xff] }
 0x4c1   :  { %v5353_v57 = vpack.c.bf16 %v5307_v34, %v5306_v55  ;;  %v5333_v34 = vld [vmem:[#allocation2 + $0x34f] sm:$0xff]  ;;  %v5332_v55 = vld [vmem:[#allocation2 + $0x347] sm:$0xff] }
 0x4c7   :  { %18531 = vmatmul.mubr.bf16.gmra.mrb[52].mxu1 %v21393_v40 }
 0x4c8   :  { %18550 = vmatprep.mubr.bf16.mxu1 %v5344_v58  ;;  %v21426_v58 = vld [vmem:[%s24655_s3 + $0x200] sm:$0xff]  }
 0x4cf   :  { %18551 = vmatmul.mubr.bf16.vlgmr.msra.gmra.mrb[0].mxu1 %v5345_v43  ;;  %v5311_v43 = vld [vmem:[#allocation2 + $0x1af] sm:$0xff] }
 0x4d0   :  { %18607 = vmatpush3.bf16.msra.mxu1 %v19399_v0  ;;  %18554 = vmatprep.mubr.bf16.mxu1 %v5346_v45  ;;  %v19404_v0 = vld [vmem:[%s24655_s3 + $0x1e8] sm:$0xff]  }
 0x4d1   :  { %18608 = vmatprep.subr.bf16.mxu1 %v19400_v35  ;;  %v5310_v45 = vld [vmem:[#allocation2 + $0x1a7] sm:$0xff] }
 0x4d4   :  { %18609 = vmatpush3.bf16.msra.mxu1 %v19400_v35  ;;  %v5354_v35 = vpack.c.bf16 %v5309_v53, %v5308_v11  ;;  %v5330_v53 = vld [vmem:[#allocation2 + $0x327] sm:$0xff] }
 0x4d5   :  { %18610 = vmatprep.subr.bf16.mxu1 %v19401_v24 }
 0x4d7   :  { %18555 = vmatmul.mubr.bf16.gmra.mrb[4].mxu1 %v5347_v2  ;;  %v5319_v2 = vld [vmem:[#allocation2 + $0x26f] sm:$0xff] }
 0x4d8   :  { %18558 = vmatprep.mubr.bf16.mxu1 %v5348_v13  ;;  %18611 = vmatpush3.bf16.msra.mxu1 %v19401_v24  ;;  %v5355_v24 = vpack.c.bf16 %v5311_v43, %v5310_v45  ;;  %v5321_v13 = vld [vmem:[#allocation2 + $0x28f] sm:$0xff]  ;;  %v5359_v38 = vpack.c.bf16 %v5319_v2, %v5318_v19  ;;  %v5334_v45 = vld [vmem:[#allocation2 + $0x367] sm:$0xff] }
 0x4d9   :  { %18612 = vmatprep.subr.bf16.mxu1 %v19402_v42  ;;  %v5337_v43 = vld [vmem:[#allocation2 + $0x38f] sm:$0xff] }
 0x4da   :  { %v19411_v19 = vld [vmem:[%s24655_s3 + $0x210] sm:$0xff]  }
 0x4dc   :  { %18613 = vmatpush3.bf16.msra.mxu1 %v19402_v42  ;;  %v5358_v42 = vpack.c.bf16 %v5317_v49, %v5316_v31  ;;  %v5339_v31 = vld [vmem:[#allocation2 + $0x3af] sm:$0xff] }
 0x4dd   :  { %18614 = vmatprep.subr.bf16.mxu1 %v19403_v56 }
 0x4df   :  { %18559 = vmatmul.mubr.bf16.gmra.mrb[8].mxu1 %v5349_v14 }
 0x4e0   :  { %18562 = vmatprep.mubr.bf16.mxu1 %v5350_v10  ;;  %18615 = vmatpush3.bf16.msra.mxu1 %v19403_v56  ;;  %v5320_v56 = vld [vmem:[#allocation2 + $0x287] sm:$0xff]  ;;  %v5327_v10 = vld [vmem:[#allocation2 + $0x2ef] sm:$0xff] }
 0x4e1   :  { %18616 = vmatprep.subr.bf16.mxu1 %v19404_v0  ;;  %v5360_v41 = vpack.c.bf16 %v5321_v13, %v5320_v56  ;;  %v19410_v13 = vld [vmem:[%s24655_s3 + $0x208] sm:$0xff]  }
 0x4e2   :  { %v6216_v56 = vld [vmem:[#allocation2 + $0x89] sm:$0xff] }
 0x4e4   :  { %18617 = vmatpush3.bf16.msra.mxu1 %v19404_v0  ;;  %v5324_v0 = vld [vmem:[#allocation2 + $0x2c7] sm:$0xff] }
 0x4e5   :  { %18618 = vmatprep.subr.bf16.mxu1 %v19405_v23  ;;  %v5362_v14 = vpack.c.bf16 %v5325_v27, %v5324_v0  ;;  %v6218_v27 = vld [vmem:[#allocation2 + $0xa9] sm:$0xff] }
 0x4e6   :  { %v6220_v0 = vld [vmem:[#allocation2 + $0xc9] sm:$0xff] }
 0x4e7   :  { %18563 = vmatmul.mubr.bf16.gmra.mrb[12].mxu1 %v5351_v7  ;;  %v5364_v7 = vpack.c.bf16 %v5329_v17, %v5328_v32  ;;  %v6225_v17 = vld [vmem:[#allocation2 + $0x111] sm:$0xff] }
 0x4e8   :  { %18566 = vmatprep.mubr.bf16.mxu1 %v5352_v28  ;;  %18619 = vmatpush3.bf16.msra.mxu1 %v19405_v23  ;;  %v19418_v23 = vld [vmem:[%s24657_s5 + $0x50] sm:$0xff]  }
 0x4e9   :  { %18620 = vmatprep.subr.bf16.mxu1 %v19408_v3  ;;  %17224 = vmatprep.subr.bf16.mxu0 %v19418_v23  ;;  %v5331_v28 = vld [vmem:[#allocation2 + $0x32f] sm:$0xff] }
 0x4ea   :  { %17225 = vmatpush3.bf16.msra.mxu0 %v19419_v16  ;;  %v5365_v11 = vpack.c.bf16 %v5331_v28, %v5330_v53  ;;  %v6223_v23 = vld [vmem:[#allocation2 + $0xf1] sm:$0xff]  ;;  %v6224_v16 = vld [vmem:[#allocation2 + $0x109] sm:$0xff] }
 0x4eb   :  { %v6274_v32 = vpack.c.bf16 %v6225_v17, %v6224_v16  ;;  %v6228_v28 = vld [vmem:[#allocation2 + $0x149] sm:$0xff]  ;;  %v19431_v16 = vld [vmem:[%s24657_s5 + $0xc0] sm:$0xff]  }
 0x4ec   :  { %18621 = vmatpush3.bf16.msra.mxu1 %v19408_v3  ;;  %v5363_v3 = vpack.c.bf16 %v5327_v10, %v5326_v29  ;;  %v6222_v10 = vld [vmem:[#allocation2 + $0xe9] sm:$0xff] }
 0x4ed   :  { %18678 = vmatprep.subr.bf16.mxu1 %v21426_v58  ;;  %v6273_v29 = vpack.c.bf16 %v6223_v23, %v6222_v10  ;;  %v19429_v10 = vld [vmem:[%s24657_s5 + $0x78] sm:$0xff]  }
 0x4ee   :  { %v19430_v23 = vld [vmem:[%s24657_s5 + $0x38] sm:$0xff]  }
 0x4ef   :  { %18567 = vmatmul.mubr.bf16.gmra.mrb[16].mxu1 %v5353_v57  ;;  %v5366_v57 = vpack.c.bf16 %v5333_v34, %v5332_v55  ;;  %v6229_v34 = vld [vmem:[#allocation2 + $0x151] sm:$0xff] }
 0x4f0   :  { %18570 = vmatprep.mubr.bf16.mxu1 %v5354_v35  ;;  %v5335_v35 = vld [vmem:[#allocation2 + $0x36f] sm:$0xff]  ;;  %v6276_v55 = vpack.c.bf16 %v6229_v34, %v6228_v28 }
 0x4f1   :  { %v5367_v49 = vpack.c.bf16 %v5335_v35, %v5334_v45  ;;  %v6232_v35 = vld [vmem:[#allocation2 + $0x189] sm:$0xff] }
 0x4f7   :  { %18571 = vmatmul.mubr.bf16.gmra.mrb[20].mxu1 %v5355_v24  ;;  %v5336_v24 = vld [vmem:[#allocation2 + $0x387] sm:$0xff] }
 0x4f8   :  { %18574 = vmatprep.mubr.bf16.mxu1 %v21211_v20  ;;  %v5361_v20 = vpack.c.bf16 %v5323_v50, %v5322_v61  ;;  %v5368_v1 = vpack.c.bf16 %v5337_v43, %v5336_v24  ;;  %v6219_v61 = vld [vmem:[#allocation2 + $0xb1] sm:$0xff] }
 0x4f9   :  { %v6233_v43 = vld [vmem:[#allocation2 + $0x191] sm:$0xff] }
 0x4fa   :  { %v6278_v24 = vpack.c.bf16 %v6233_v43, %v6232_v35 }
 0x4ff   :  { %18575 = vmatmul.mubr.bf16.gmra.mrb[24].mxu1 %v5357_v15 }
 0x500   :  { %18578 = vmatprep.mubr.bf16.mxu1 %v5358_v42  ;;  %v5338_v42 = vld [vmem:[#allocation2 + $0x3a7] sm:$0xff] }
 0x501   :  { %v5369_v2 = vpack.c.bf16 %v5339_v31, %v5338_v42  ;;  %v6238_v42 = vld [vmem:[#allocation2 + $0x1e9] sm:$0xff] }
 0x507   :  { %18579 = vmatmul.mubr.bf16.gmra.mrb[28].mxu1 %v5359_v38  ;;  %v6217_v38 = vld [vmem:[#allocation2 + $0x91] sm:$0xff] }
 0x508   :  { %18582 = vmatprep.mubr.bf16.mxu1 %v5360_v41  ;;  %v6270_v50 = vpack.c.bf16 %v6217_v38, %v6216_v56  ;;  %v6260_v56 = vld [vmem:[#allocation2 + $0x389] sm:$0xff]  ;;  %v6261_v38 = vld [vmem:[#allocation2 + $0x391] sm:$0xff] }
 0x50f   :  { %18583 = vmatmul.mubr.bf16.gmra.mrb[32].mxu1 %v5361_v20  ;;  %v6221_v20 = vld [vmem:[#allocation2 + $0xd1] sm:$0xff] }
 0x510   :  { %18586 = vmatprep.mubr.bf16.mxu1 %v5362_v14  ;;  %v6272_v14 = vpack.c.bf16 %v6221_v20, %v6220_v0  ;;  %v6266_v20 = vld [vmem:[#allocation2 + $0x3e9] sm:$0xff] }
 0x517   :  { %18587 = vmatmul.mubr.bf16.gmra.mrb[36].mxu1 %v5363_v3  ;;  %v6226_v3 = vld [vmem:[#allocation2 + $0x129] sm:$0xff] }
 0x518   :  { %18590 = vmatprep.mubr.bf16.mxu1 %v5364_v7  ;;  %v6227_v7 = vld [vmem:[#allocation2 + $0x131] sm:$0xff] }
 0x519   :  { %v6275_v53 = vpack.c.bf16 %v6227_v7, %v6226_v3 }
 0x51f   :  { %18591 = vmatmul.mubr.bf16.gmra.mrb[40].mxu1 %v5365_v11  ;;  %v6230_v11 = vld [vmem:[#allocation2 + $0x169] sm:$0xff] }
 0x520   :  { %18594 = vmatprep.mubr.bf16.mxu1 %v5366_v57  ;;  %v6231_v57 = vld [vmem:[#allocation2 + $0x171] sm:$0xff] }
 0x521   :  { %v6277_v45 = vpack.c.bf16 %v6231_v57, %v6230_v11 }
 0x527   :  { %18595 = vmatmul.mubr.bf16.gmra.mrb[44].mxu1 %v5367_v49  ;;  %v6234_v49 = vld [vmem:[#allocation2 + $0x1a9] sm:$0xff] }
 0x528   :  { %18598 = vmatprep.mubr.bf16.mxu1 %v5368_v1  ;;  %v6235_v1 = vld [vmem:[#allocation2 + $0x1b1] sm:$0xff] }
 0x529   :  { %v6279_v31 = vpack.c.bf16 %v6235_v1, %v6234_v49  ;;  %v19439_v49 = vld [vmem:[%s24657_s5 + $0x9c0] sm:$0xff]  }
 0x52f   :  { %18599 = vmatmul.mubr.bf16.gmra.mrb[48].mxu1 %v5369_v2  ;;  %v6239_v2 = vld [vmem:[#allocation2 + $0x1f1] sm:$0xff] }
 0x530   :  { %18602 = vmatprep.mubr.bf16.mxu1 %v21227_v39  ;;  %v19414_v39 = vld [vmem:[%s24655_s3 + $0x218] sm:$0xff]  }
 0x537   :  { %18603 = vmatmul.mubr.bf16.gmra.mrb[52].mxu1 %v5357_v15 }
 0x538   :  { %18622 = vmatprep.mubr.bf16.mxu1 %v21230_v4  ;;  %v19415_v4 = vld [vmem:[%s24655_s3 + $0x220] sm:$0xff]  }
 0x53f   :  { %18623 = vmatmul.mubr.bf16.vlgmr.msra.gmra.mrb[0].mxu1 %v21235_v6  ;;  %v19421_v6 = vld [vmem:[%s24657_s5 + $0x58] sm:$0xff]  }
 0x540   :  { %18679 = vmatpush3.bf16.msra.mxu1 %v21426_v58  ;;  %18626 = vmatprep.mubr.bf16.mxu1 %v21242_v30  ;;  %v19422_v30 = vld [vmem:[%s24657_s5 + $0x18] sm:$0xff]  }
 0x541   :  { %18680 = vmatprep.subr.bf16.mxu1 %v19410_v13  ;;  %17226 = vmatprep.subr.bf16.mxu0 %v19421_v6  ;;  %v19420_v58 = vld [vmem:[%s24655_s3 + $0x238] sm:$0xff]   ;;  %v6242_v6 = vld [vmem:[#allocation2 + $0x269] sm:$0xff] }
 0x542   :  { %17227 = vmatpush3.bf16.msra.mxu0 %v19422_v30  ;;  %v6243_v30 = vld [vmem:[#allocation2 + $0x271] sm:$0xff] }
 0x544   :  { %18681 = vmatpush3.bf16.msra.mxu1 %v19410_v13  ;;  %v6281_v13 = vpack.c.bf16 %v6239_v2, %v6238_v42  ;;  %v19441_v42 = vld [vmem:[%s24657_s5 + $0x980] sm:$0xff]  }
 0x545   :  { %18682 = vmatprep.subr.bf16.mxu1 %v19411_v19 }
 0x547   :  { %18627 = vmatmul.mubr.bf16.gmra.mrb[4].mxu1 %v21247_v59  ;;  %v19416_v59 = vld [vmem:[%s24655_s3 + $0x228] sm:$0xff]  }
 0x548   :  { %18630 = vmatprep.mubr.bf16.mxu1 %v21254_v25  ;;  %18683 = vmatpush3.bf16.msra.mxu1 %v19411_v19  ;;  %v19417_v25 = vld [vmem:[%s24655_s3 + $0x230] sm:$0xff]  }
 0x549   :  { %18684 = vmatprep.subr.bf16.mxu1 %v19414_v39  ;;  %v6240_v19 = vld [vmem:[#allocation2 + $0x249] sm:$0xff] }
 0x54c   :  { %18685 = vmatpush3.bf16.msra.mxu1 %v19414_v39  ;;  %v6241_v39 = vld [vmem:[#allocation2 + $0x251] sm:$0xff] }
 0x54d   :  { %18686 = vmatprep.subr.bf16.mxu1 %v19415_v4 }
 0x54f   :  { %18631 = vmatmul.mubr.bf16.gmra.mrb[8].mxu1 %v21259_v36  ;;  %v5776_v36 = vld [vmem:[#allocation2 + $0x1e8] sm:$0xff] }
 0x550   :  { %18634 = vmatprep.mubr.bf16.mxu1 %v21266_v8  ;;  %18687 = vmatpush3.bf16.msra.mxu1 %v19415_v4  ;;  %v5777_v8 = vld [vmem:[#allocation2 + $0x1f0] sm:$0xff]  ;;  %v6282_v4 = vpack.c.bf16 %v6241_v39, %v6240_v19 }
 0x551   :  { %18688 = vmatprep.subr.bf16.mxu1 %v19416_v59  ;;  %v5819_v15 = vpack.c.bf16 %v5777_v8, %v5776_v36  ;;  %v6246_v8 = vld [vmem:[#allocation2 + $0x2a9] sm:$0xff] }
 0x554   :  { %18689 = vmatpush3.bf16.msra.mxu1 %v19416_v59  ;;  %v6244_v59 = vld [vmem:[#allocation2 + $0x289] sm:$0xff] }
 0x555   :  { %18690 = vmatprep.subr.bf16.mxu1 %v19417_v25 }
 0x557   :  { %18635 = vmatmul.mubr.bf16.gmra.mrb[12].mxu1 %v21271_v18  ;;  %v19423_v18 = vld [vmem:[%s24657_s5 + $0x60] sm:$0xff]  }
 0x558   :  { %18638 = vmatprep.mubr.bf16.mxu1 %v21280_v37  ;;  %18691 = vmatpush3.bf16.msra.mxu1 %v19417_v25  ;;  %v19424_v37 = vld [vmem:[%s24657_s5 + $0x20] sm:$0xff]   ;;  %v6245_v25 = vld [vmem:[#allocation2 + $0x291] sm:$0xff] }
 0x559   :  { %18692 = vmatprep.subr.bf16.mxu1 %v19420_v58  ;;  %17228 = vmatprep.subr.bf16.mxu0 %v19423_v18  ;;  %v6284_v36 = vpack.c.bf16 %v6245_v25, %v6244_v59  ;;  %v6248_v18 = vld [vmem:[#allocation2 + $0x2c9] sm:$0xff] }
 0x55a   :  { %17229 = vmatpush3.bf16.msra.mxu0 %v19424_v37  ;;  %v19443_v59 = vld [vmem:[%s24657_s5 + $0x9c8] sm:$0xff]  }
 0x55c   :  { %18693 = vmatpush3.bf16.msra.mxu1 %v19420_v58  ;;  %v6283_v58 = vpack.c.bf16 %v6243_v30, %v6242_v6 }
 0x55d   :  { %17638 = vmatprep.subr.bf16.mxu1 %v19439_v49 }
 0x55f   :  { %18639 = vmatmul.mubr.bf16.gmra.mrb[16].mxu1 %v21283_v46  ;;  %v19425_v46 = vld [vmem:[%s24657_s5 + $0x68] sm:$0xff]  }
 0x560   :  { %18642 = vmatprep.mubr.bf16.mxu1 %v21287_v60  ;;  %v19426_v60 = vld [vmem:[%s24657_s5 + $0x28] sm:$0xff]   ;;  %17230 = vmatprep.subr.bf16.mxu0 %v19425_v46 }
 0x561   :  { %17231 = vmatpush3.bf16.msra.mxu0 %v19426_v60  ;;  %v6250_v60 = vld [vmem:[#allocation2 + $0x2e9] sm:$0xff] }
 0x567   :  { %18643 = vmatmul.mubr.bf16.gmra.mrb[20].mxu1 %v21289_v12  ;;  %v19427_v12 = vld [vmem:[%s24657_s5 + $0x70] sm:$0xff]  }
 0x568   :  { %18646 = vmatprep.mubr.bf16.mxu1 %v21293_v51  ;;  %v19428_v51 = vld [vmem:[%s24657_s5 + $0x30] sm:$0xff]   ;;  %17232 = vmatprep.subr.bf16.mxu0 %v19427_v12 }
 0x569   :  { %17233 = vmatpush3.bf16.msra.mxu0 %v19428_v51  ;;  %v6251_v12 = vld [vmem:[#allocation2 + $0x2f1] sm:$0xff]  ;;  %v6252_v51 = vld [vmem:[#allocation2 + $0x309] sm:$0xff] }
 0x56a   :  { %17234 = vmatprep.subr.bf16.mxu0 %v19429_v10 }
 0x56d   :  { %17235 = vmatpush3.bf16.msra.mxu0 %v19430_v23 }
 0x56e   :  { %17242 = vmatprep.subr.bf16.mxu0 %v19431_v16  ;;  %v19461_v16 = vld [vmem:[%s24657_s5 + $0x9a8] sm:$0xff]  }
 0x56f   :  { %18647 = vmatmul.mubr.bf16.gmra.mrb[24].mxu1 %v5819_v15  ;;  %v6247_v15 = vld [vmem:[#allocation2 + $0x2b1] sm:$0xff] }
 0x570   :  { %18650 = vmatprep.mubr.bf16.mxu1 %v21296_v22  ;;  %v5802_v22 = vld [vmem:[#allocation2 + $0x3c8] sm:$0xff]  ;;  %v6285_v37 = vpack.c.bf16 %v6247_v15, %v6246_v8 }
 0x577   :  { %18651 = vmatmul.mubr.bf16.gmra.mrb[28].mxu1 %v21298_v47  ;;  %v20049_v47 = vld [vmem:[#allocation2 + $0x3d0] sm:$0xff] }
 0x578   :  { %18654 = vmatprep.mubr.bf16.mxu1 %v21302_v9  ;;  %v5832_v9 = vpack.c.bf16 %v20049_v47, %v5802_v22  ;;  %v6253_v22 = vld [vmem:[#allocation2 + $0x311] sm:$0xff]  ;;  %v6287_v47 = vpack.c.bf16 %v6251_v12, %v6250_v60 }
 0x579   :  { %v19451_v12 = vld [vmem:[%s24657_s5 + $0x9d8] sm:$0xff]  }
 0x57f   :  { %18655 = vmatmul.mubr.bf16.gmra.mrb[32].mxu1 %v21304_v26  ;;  %v5804_v26 = vld [vmem:[#allocation2 + $0x3e8] sm:$0xff] }
 0x580   :  { %18658 = vmatprep.mubr.bf16.mxu1 %v21308_v48  ;;  %v5805_v48 = vld [vmem:[#allocation2 + $0x3f0] sm:$0xff] }
 0x587   :  { %18659 = vmatmul.mubr.bf16.gmra.mrb[36].mxu1 %v21310_v54  ;;  %v6212_v54 = vld [vmem:[#allocation2 + $0x49] sm:$0xff] }
 0x588   :  { %18662 = vmatprep.mubr.bf16.mxu1 %v21314_v21  ;;  %v6213_v21 = vld [vmem:[#allocation2 + $0x51] sm:$0xff] }
 0x58f   :  { %18663 = vmatmul.mubr.bf16.gmra.mrb[40].mxu1 %v21316_v63  ;;  %v5833_v63 = vpack.c.bf16 %v5805_v48, %v5804_v26  ;;  %v6254_v26 = vld [vmem:[#allocation2 + $0x329] sm:$0xff]  ;;  %v6255_v48 = vld [vmem:[#allocation2 + $0x331] sm:$0xff] }
 0x590   :  { %18666 = vmatprep.mubr.bf16.mxu1 %v21320_v44  ;;  %v6268_v44 = vpack.c.bf16 %v6213_v21, %v6212_v54  ;;  %v6256_v54 = vld [vmem:[#allocation2 + $0x349] sm:$0xff]  ;;  %v6257_v21 = vld [vmem:[#allocation2 + $0x351] sm:$0xff] }
 0x597   :  { %18667 = vmatmul.mubr.bf16.gmra.mrb[44].mxu1 %v21322_v62  ;;  %v6214_v62 = vld [vmem:[#allocation2 + $0x69] sm:$0xff] }
 0x598   :  { %18670 = vmatprep.mubr.bf16.mxu1 %v21326_v33  ;;  %v6215_v33 = vld [vmem:[#allocation2 + $0x71] sm:$0xff] }
 0x599   :  { %v6269_v41 = vpack.c.bf16 %v6215_v33, %v6214_v62  ;;  %v6258_v62 = vld [vmem:[#allocation2 + $0x369] sm:$0xff]  ;;  %v6259_v33 = vld [vmem:[#allocation2 + $0x371] sm:$0xff] }
 0x59f   :  { %18671 = vmatmul.mubr.bf16.gmra.mrb[48].mxu1 %v21328_v52  ;;  %v6271_v52 = vpack.c.bf16 %v6219_v61, %v6218_v27  ;;  %v6262_v27 = vld [vmem:[#allocation2 + $0x3a9] sm:$0xff]  ;;  %v6263_v61 = vld [vmem:[#allocation2 + $0x3b1] sm:$0xff] }
 0x5a0   :  { %18674 = vmatprep.mubr.bf16.mxu1 %v5832_v9  ;;  %v6288_v9 = vpack.c.bf16 %v6253_v22, %v6252_v51  ;;  %v6293_v0 = vpack.c.bf16 %v6263_v61, %v6262_v27  ;;  %v19459_v27 = vld [vmem:[%s24657_s5 + $0x9e8] sm:$0xff]  }
 0x5a7   :  { %18675 = vmatmul.mubr.bf16.gmra.mrb[52].mxu1 %v5833_v63  ;;  %v6289_v63 = vpack.c.bf16 %v6255_v48, %v6254_v26 }
 0x5a8   :  { %18694 = vmatprep.mubr.bf16.mxu1 %v6268_v44  ;;  %v6290_v44 = vpack.c.bf16 %v6257_v21, %v6256_v54 }
 0x5af   :  { %18695 = vmatmul.mubr.bf16.vlgmr.msra.gmra.mrb[0].mxu1 %v6269_v41  ;;  %v6291_v41 = vpack.c.bf16 %v6259_v33, %v6258_v62  ;;  %v19455_v33 = vld [vmem:[%s24657_s5 + $0x9e0] sm:$0xff]  }
 0x5b0   :  { %18698 = vmatprep.mubr.bf16.mxu1 %v6270_v50  ;;  %v6292_v50 = vpack.c.bf16 %v6261_v38, %v6260_v56  ;;  %17639 = vmatpush3.bf16.msra.mxu1 %v19441_v42  ;;  %v19457_v56 = vld [vmem:[%s24657_s5 + $0x9a0] sm:$0xff]  }
 0x5b1   :  { %17640 = vmatprep.subr.bf16.mxu1 %v19443_v59 }
 0x5b7   :  { %18699 = vmatmul.mubr.bf16.gmra.mrb[4].mxu1 %v6271_v52  ;;  %v6267_v52 = vld [vmem:[#allocation2 + $0x3f1] sm:$0xff] }
 0x5b8   :  { %18702 = vmatprep.mubr.bf16.mxu1 %v6272_v14  ;;  %v6295_v14 = vpack.c.bf16 %v6267_v52, %v6266_v20 }
 0x5bf   :  { %18703 = vmatmul.mubr.bf16.gmra.mrb[8].mxu1 %v6273_v29 }
 0x5c0   :  { %18706 = vmatprep.mubr.bf16.mxu1 %v6274_v32 }
 0x5c7   :  { %18707 = vmatmul.mubr.bf16.gmra.mrb[12].mxu1 %v6275_v53 }
 0x5c8   :  { %18710 = vmatprep.mubr.bf16.mxu1 %v6276_v55 }
 0x5cf   :  { %18711 = vmatmul.mubr.bf16.gmra.mrb[16].mxu1 %v6277_v45 }
 0x5d0   :  { %18714 = vmatprep.mubr.bf16.mxu1 %v6278_v24 }
 0x5d7   :  { %18715 = vmatmul.mubr.bf16.gmra.mrb[20].mxu1 %v6279_v31 }
 0x5d8   :  { %18718 = vmatprep.mubr.bf16.mxu1 %v21371_v5  ;;  %v6249_v5 = vld [vmem:[#allocation2 + $0x2d1] sm:$0xff] }
 0x5d9   :  { %v6286_v46 = vpack.c.bf16 %v6249_v5, %v6248_v18 }
 0x5df   :  { %18719 = vmatmul.mubr.bf16.gmra.mrb[24].mxu1 %v6281_v13 }
 0x5e0   :  { %18722 = vmatprep.mubr.bf16.mxu1 %v6282_v4 }
 0x5e7   :  { %18723 = vmatmul.mubr.bf16.gmra.mrb[28].mxu1 %v6283_v58  ;;  %v19445_v58 = vld [vmem:[%s24657_s5 + $0x988] sm:$0xff]  }
 0x5e8   :  { %18726 = vmatprep.mubr.bf16.mxu1 %v6284_v36  ;;  %17641 = vmatpush3.bf16.msra.mxu1 %v19445_v58 }
 0x5ef   :  { %18727 = vmatmul.mubr.bf16.gmra.mrb[32].mxu1 %v6285_v37  ;;  %v19447_v37 = vld [vmem:[%s24657_s5 + $0x9d0] sm:$0xff]  }
 0x5f0   :  { %18730 = vmatprep.mubr.bf16.mxu1 %v6286_v46  ;;  %v19449_v46 = vld [vmem:[%s24657_s5 + $0x990] sm:$0xff]   ;;  %17642 = vmatprep.subr.bf16.mxu1 %v19447_v37 }
 0x5f1   :  { %17643 = vmatpush3.bf16.msra.mxu1 %v19449_v46 }
 0x5f2   :  { %17644 = vmatprep.subr.bf16.mxu1 %v19451_v12 }
 0x5f7   :  { %18731 = vmatmul.mubr.bf16.gmra.mrb[36].mxu1 %v6287_v47  ;;  %v19453_v47 = vld [vmem:[%s24657_s5 + $0x998] sm:$0xff]  }
 0x5f8   :  { %18734 = vmatprep.mubr.bf16.mxu1 %v6288_v9  ;;  %17645 = vmatpush3.bf16.msra.mxu1 %v19453_v47 }
 0x5f9   :  { %17646 = vmatprep.subr.bf16.mxu1 %v19455_v33 }
 0x5fc   :  { %17647 = vmatpush3.bf16.msra.mxu1 %v19457_v56 }
 0x5fd   :  { %17648 = vmatprep.subr.bf16.mxu1 %v19459_v27 }
 0x5ff   :  { %18735 = vmatmul.mubr.bf16.gmra.mrb[40].mxu1 %v6289_v63 }
 0x600   :  { %18738 = vmatprep.mubr.bf16.mxu1 %v6290_v44  ;;  %17649 = vmatpush3.bf16.msra.mxu1 %v19461_v16 }
 0x607   :  { %18739 = vmatmul.mubr.bf16.gmra.mrb[44].mxu1 %v6291_v41 }
 0x608   :  { %18742 = vmatprep.mubr.bf16.mxu1 %v6292_v50 }
 0x60f   :  { %18743 = vmatmul.mubr.bf16.gmra.mrb[48].mxu1 %v6293_v0 }
 0x610   :  { %18746 = vmatprep.mubr.bf16.mxu1 %v21393_v40  ;;  %v21522_v40 = vld [vmem:[%s24658_s4] ss:$0 sm:$0xff] }
 0x617   :  { %18747 = vmatmul.mubr.bf16.gmra.mrb[52].mxu1 %v6295_v14 }
 0x682   :  { %v18696_v17 = vpop.f32.mrb[0].mxu1 }
 0x683   :  { %v6683_v29 = vadd.f32 %v18696_v17, %v21522_v40  ;;  %v6395_v32 = vpop.f32.mrb[1].mxu1 }
 0x684   :  { %v6681_v3 = vadd.f32 %v21522_v40, %v6395_v32  ;;  %v18697_v7 = vpop.f32.mrb[2].mxu1 }
 0x685   :  { %v6739_v28 = vmax.f32 %v6683_v29, 0.0  ;;  %v6684_v34 = vadd.f32 %v18697_v7, %v21522_v40  ;;  %v6398_v53 = vpop.f32.mrb[3].mxu1 }
 0x686   :  { %v6737_v55 = vmax.f32 %v6681_v3, 0.0  ;;  %v6682_v11 = vadd.f32 %v21522_v40, %v6398_v53  ;;  %v19463_v3 = vld [vmem:[%s24657_s5 + $0x9f0] sm:$0xff]  }
 0x687   :  { %v6740_v57 = vmax.f32 %v6684_v34, 0.0  ;;  %17650 = vmatprep.subr.bf16.mxu1 %v19463_v3 }
 0x688   :  { %v6793_v35 = vmax.f32 %v6737_v55, %v6739_v28  ;;  %v6738_v43 = vmax.f32 %v6682_v11, 0.0 }
 0x68a   :  { %6821 = vst [vmem:[#allocation3] sm:$0xff] %v6793_v35  ;;  %v6794_v45 = vmax.f32 %v6738_v43, %v6740_v57  ;;  %v18700_v24 = vpop.f32.mrb[4].mxu1 }
 0x68b   :  { %v6687_v1 = vadd.f32 %v18700_v24, %v21522_v40  ;;  %v6411_v31 = vpop.f32.mrb[5].mxu1  ;;  %v19465_v24 = vld [vmem:[%s24657_s5 + $0x9b0] sm:$0xff]  }
 0x68c   :  { %6822 = vst [vmem:[#allocation3 + $0x8] sm:$0xff] %v6794_v45  ;;  %v6685_v2 = vadd.f32 %v21522_v40, %v6411_v31  ;;  %v18701_v13 = vpop.f32.mrb[6].mxu1  ;;  %v19467_v31 = vld [vmem:[%s24657_s5 + $0x9f8] sm:$0xff]   ;;  %17651 = vmatpush3.bf16.msra.mxu1 %v19465_v24 }
 0x68d   :  { %v6743_v19 = vmax.f32 %v6687_v1, 0.0  ;;  %v6688_v39 = vadd.f32 %v18701_v13, %v21522_v40  ;;  %v6414_v4 = vpop.f32.mrb[7].mxu1  ;;  %17652 = vmatprep.subr.bf16.mxu1 %v19467_v31 }
 0x68e   :  { %v6741_v6 = vmax.f32 %v6685_v2, 0.0  ;;  %v6686_v30 = vadd.f32 %v21522_v40, %v6414_v4  ;;  %v6860_v4 = vlaneseq }
 0x68f   :  { %v6744_v25 = vmax.f32 %v6688_v39, 0.0 }
 0x690   :  { %v6795_v36 = vmax.f32 %v6741_v6, %v6743_v19  ;;  %v6742_v8 = vmax.f32 %v6686_v30, 0.0  ;;  %v19469_v19 = vld [vmem:[%s24657_s5 + $0x9b8] sm:$0xff]   ;;  %v20059_v6 = vmov 1983009808  }
 0x691   :  { %17653 = vmatpush3.bf16.msra.mxu1 %v19469_v19  ;;  %v6858_v30 = vunpack.c.l.s4 %v20059_v6  ;;  %v21602_v12 = vld [vmem:[#allocation3 + $0x1] sm:$0x1]  ;;  %v21617_v27 = vld [vmem:[#allocation3 + $0x7] sm:$0x1] }
 0x692   :  { %6823 = vst [vmem:[#allocation3 + $0x10] sm:$0xff] %v6795_v36  ;;  %v6796_v15 = vmax.f32 %v6742_v8, %v6744_v25  ;;  %v18704_v18 = vpop.f32.mrb[8].mxu1  ;;  %v19472_v25 = vld [vmem:[%s24657_s5 + $0xac0] sm:$0xff]  }
 0x693   :  { %v6427_v5 = vpop.f32.mrb[9].mxu1  ;;  %v6691_v51 = vadd.f32 %v18704_v18, %v21522_v40  ;;  %17682 = vmatprep.subr.bf16.mxu1 %v19472_v25  ;;  %v21597_v18 = vshrl.u32 %v6860_v4, 7 }
 0x694   :  { %6824 = vst [vmem:[#allocation3 + $0x18] sm:$0xff] %v6796_v15  ;;  %v18705_v60 = vpop.f32.mrb[10].mxu1  ;;  %v6689_v9 = vadd.f32 %v21522_v40, %v6427_v5 }
 0x695   :  { %v6430_v22 = vpop.f32.mrb[11].mxu1  ;;  %v6692_v26 = vadd.f32 %v18705_v60, %v21522_v40  ;;  %v6747_v54 = vmax.f32 %v6691_v51, 0.0  ;;  %24688 = vst [vmem:[#allocation6_spill] sm:$0xff] %v21597_v18  ;;  %v21600_v60 = vld [vmem:[#allocation3] sm:$0x1]  ;;  %v6859_v51 = vunpack.c.0.s8 %v6858_v30 }
 0x696   :  { %v6690_v48 = vadd.f32 %v21522_v40, %v6430_v22  ;;  %v6745_v63 = vmax.f32 %v6689_v9, 0.0 }
 0x697   :  { %v6748_v44 = vmax.f32 %v6692_v26, 0.0  ;;  %v21605_v26 = vld [vmem:[#allocation3 + $0x2] sm:$0x1] }
 0x698   :  { %v6746_v38 = vmax.f32 %v6690_v48, 0.0  ;;  %v6797_v61 = vmax.f32 %v6745_v63, %v6747_v54  ;;  %v21607_v48 = vld [vmem:[#allocation3 + $0x3] sm:$0x1] }
 0x699   :  { %v6890_v3 = vmax.f32 %v21605_v26, %v21607_v48  ;;  %v21649_v6 = vld [vmem:[#allocation3 + $0x12] sm:$0x1]  ;;  %v21651_v30 = vld [vmem:[#allocation3 + $0x13] sm:$0x1]  ;;  %v21655_v25 = vld [vmem:[#allocation3 + $0x15] sm:$0x1] }
 0x69a   :  { %v18708_v21 = vpop.f32.mrb[12].mxu1  ;;  %v6798_v14 = vmax.f32 %v6746_v38, %v6748_v44  ;;  %6825 = vst [vmem:[#allocation3 + $0x20] sm:$0xff] %v6797_v61  ;;  %v21610_v44 = vld [vmem:[#allocation3 + $0x4] sm:$0x1] }
 0x69b   :  { %v6443_v62 = vpop.f32.mrb[13].mxu1  ;;  %v6695_v41 = vadd.f32 %v18708_v21, %v21522_v40 }
 0x69c   :  { %v18709_v50 = vpop.f32.mrb[14].mxu1  ;;  %v6693_v0 = vadd.f32 %v21522_v40, %v6443_v62  ;;  %6826 = vst [vmem:[#allocation3 + $0x28] sm:$0xff] %v6798_v14  ;;  %v21612_v62 = vld [vmem:[#allocation3 + $0x5] sm:$0x1]  ;;  %v21623_v14 = vld [vmem:[#allocation3 + $0x8] sm:$0x1] }
 0x69d   :  { %v6696_v20 = vadd.f32 %v18709_v50, %v21522_v40  ;;  %v6446_v52 = vpop.f32.mrb[15].mxu1  ;;  %v6751_v10 = vmax.f32 %v6695_v41, 0.0  ;;  %v21615_v50 = vld [vmem:[#allocation3 + $0x6] sm:$0x1] }
 0x69e   :  { %v6694_v23 = vadd.f32 %v21522_v40, %v6446_v52  ;;  %v6749_v17 = vmax.f32 %v6693_v0, 0.0  ;;  %v21621_v52 = vsub.s32 %v6859_v51, %v21597_v18  ;;  %v21670_v51 = vld [vmem:[#allocation3 + $0x1b] sm:$0x1] }
 0x69f   :  { %v6752_v29 = vmax.f32 %v6696_v20, 0.0 }
 0x6a0   :  { %v6750_v7 = vmax.f32 %v6694_v23, 0.0  ;;  %v6799_v53 = vmax.f32 %v6749_v17, %v6751_v10  ;;  %v21625_v10 = vld [vmem:[#allocation3 + $0x9] sm:$0x1] }
 0x6a1   :  { %v6983_v31 = vmax.f32 %v21623_v14, %v21625_v10  ;;  %v21678_v26 = vld [vmem:[#allocation3 + $0x21] sm:$0x1]  ;;  %v21680_v48 = vld [vmem:[#allocation3 + $0x22] sm:$0x1]  ;;  %v7386_v14 = vld [vmem:[#allocation3 + $0x27] sm:$0x1] }
 0x6a2   :  { %v18712_v32 = vpop.f32.mrb[16].mxu1  ;;  %v6800_v57 = vmax.f32 %v6750_v7, %v6752_v29  ;;  %6827 = vst [vmem:[#allocation3 + $0x30] sm:$0xff] %v6799_v53  ;;  %v7010_v7 = vld [vmem:[#allocation3 + $0xa] sm:$0x1] }
 0x6a3   :  { %v6699_v28 = vadd.f32 %v18712_v32, %v21522_v40  ;;  %v6459_v34 = vpop.f32.mrb[17].mxu1  ;;  %v6853_v32 = vmax.f32 %v21600_v60, %v21602_v12  ;;  %v21668_v12 = vld [vmem:[#allocation3 + $0x1a] sm:$0x1]  ;;  %v7415_v10 = vld [vmem:[#allocation3 + $0x28] sm:$0x1] }
 0x6a4   :  { %v6697_v55 = vadd.f32 %v21522_v40, %v6459_v34  ;;  %v18713_v11 = vpop.f32.mrb[18].mxu1  ;;  %6828 = vst [vmem:[#allocation3 + $0x38] sm:$0xff] %v6800_v57  ;;  %v21635_v57 = vld [vmem:[#allocation3 + $0xc] sm:$0x1] }
 0x6a5   :  { %v6755_v35 = vmax.f32 %v6699_v28, 0.0  ;;  %v6700_v43 = vadd.f32 %v18713_v11, %v21522_v40  ;;  %v6462_v45 = vpop.f32.mrb[19].mxu1  ;;  %v7012_v28 = vld [vmem:[#allocation3 + $0xb] sm:$0x1]  ;;  %v6921_v11 = vmax.f32 %v21610_v44, %v21612_v62  ;;  %v21687_v44 = vrot.slane %v6853_v32, %v21621_v52  ;;  %v21689_v62 = vld [vmem:[#allocation3 + $0x24] sm:$0x1] }
 0x6a6   :  { %v6753_v49 = vmax.f32 %v6697_v55, 0.0  ;;  %v6698_v1 = vadd.f32 %v21522_v40, %v6462_v45  ;;  %v7014_v4 = vmax.f32 %v7010_v7, %v7012_v28  ;;  %v7446_v32 = vld [vmem:[#allocation3 + $0x2a] sm:$0x1]  ;;  %v7477_v7 = vld [vmem:[#allocation3 + $0x2c] sm:$0x1] }
 0x6a7   :  { %v6756_v42 = vmax.f32 %v6700_v43, 0.0 }
 0x6a8   :  { %v6801_v2 = vmax.f32 %v6753_v49, %v6755_v35  ;;  %v6754_v13 = vmax.f32 %v6698_v1, 0.0  ;;  %v21637_v35 = vld [vmem:[#allocation3 + $0xd] sm:$0x1]  ;;  %v6952_v1 = vmax.f32 %v21615_v50, %v21617_v27  ;;  %v21694_v27 = vrot.slane %v6890_v3, %v21621_v52  ;;  %v7448_v3 = vld [vmem:[#allocation3 + $0x2b] sm:$0x1] }
 0x6aa   :  { %6829 = vst [vmem:[#allocation3 + $0x40] sm:$0xff] %v6801_v2  ;;  %v6802_v39 = vmax.f32 %v6754_v13, %v6756_v42  ;;  %v18716_v59 = vpop.f32.mrb[20].mxu1  ;;  %v21644_v42 = vld [vmem:[#allocation3 + $0x10] sm:$0x1]  ;;  %v21646_v2 = vld [vmem:[#allocation3 + $0x11] sm:$0x1] }
 0x6ab   :  { %v6703_v58 = vadd.f32 %v18716_v59, %v21522_v40  ;;  %v6475_v36 = vpop.f32.mrb[21].mxu1  ;;  %v21653_v59 = vld [vmem:[#allocation3 + $0x14] sm:$0x1] }
 0x6ac   :  { %6830 = vst [vmem:[#allocation3 + $0x48] sm:$0xff] %v6802_v39  ;;  %v6701_v8 = vadd.f32 %v21522_v40, %v6475_v36  ;;  %v18717_v15 = vpop.f32.mrb[22].mxu1  ;;  %v21659_v36 = vld [vmem:[#allocation3 + $0x17] sm:$0x1] }
 0x6ad   :  { %v6759_v5 = vmax.f32 %v6703_v58, 0.0  ;;  %v6704_v37 = vadd.f32 %v18717_v15, %v21522_v40  ;;  %v6478_v46 = vpop.f32.mrb[23].mxu1  ;;  %v21657_v58 = vld [vmem:[#allocation3 + $0x16] sm:$0x1]  ;;  %v21663_v15 = vld [vmem:[#allocation3 + $0x19] sm:$0x1] }
 0x6ae   :  { %v6757_v22 = vmax.f32 %v6701_v8, 0.0  ;;  %v6702_v47 = vadd.f32 %v21522_v40, %v6478_v46  ;;  %v21661_v8 = vld [vmem:[#allocation3 + $0x18] sm:$0x1] }
 0x6af   :  { %v6760_v54 = vmax.f32 %v6704_v37, 0.0 }
 0x6b0   :  { %v6803_v33 = vmax.f32 %v6757_v22, %v6759_v5  ;;  %v6758_v56 = vmax.f32 %v6702_v47, 0.0  ;;  %v21672_v22 = vld [vmem:[#allocation3 + $0x1c] sm:$0x1]  ;;  %v21674_v47 = vld [vmem:[#allocation3 + $0x1d] sm:$0x1] }
 0x6b2   :  { %v18720_v9 = vpop.f32.mrb[24].mxu1  ;;  %6831 = vst [vmem:[#allocation3 + $0x50] sm:$0xff] %v6803_v33  ;;  %v6804_v23 = vmax.f32 %v6758_v56, %v6760_v54  ;;  %v21682_v54 = vld [vmem:[#allocation3 + $0x23] sm:$0x1]  ;;  %v7355_v33 = vld [vmem:[#allocation3 + $0x25] sm:$0x1] }
 0x6b3   :  { %v6707_v21 = vadd.f32 %v18720_v9, %v21522_v40  ;;  %v6491_v63 = vpop.f32.mrb[25].mxu1  ;;  %v21676_v9 = vld [vmem:[#allocation3 + $0x20] sm:$0x1]  ;;  %v7384_v56 = vld [vmem:[#allocation3 + $0x26] sm:$0x1] }
 0x6b4   :  { %v6705_v38 = vadd.f32 %v21522_v40, %v6491_v63  ;;  %v18721_v41 = vpop.f32.mrb[26].mxu1  ;;  %6832 = vst [vmem:[#allocation3 + $0x58] sm:$0xff] %v6804_v23  ;;  %v7417_v23 = vld [vmem:[#allocation3 + $0x29] sm:$0x1] }
 0x6b5   :  { %v6763_v61 = vmax.f32 %v6707_v21, 0.0  ;;  %v6708_v0 = vadd.f32 %v18721_v41, %v21522_v40  ;;  %v6494_v20 = vpop.f32.mrb[27].mxu1 }
 0x6b6   :  { %v6761_v16 = vmax.f32 %v6705_v38, 0.0  ;;  %v6706_v17 = vadd.f32 %v21522_v40, %v6494_v20  ;;  %v7045_v20 = vmax.f32 %v21635_v57, %v21637_v35  ;;  %v7479_v57 = vld [vmem:[#allocation3 + $0x2d] sm:$0x1]  ;;  %v7509_v35 = vld [vmem:[#allocation3 + $0x30] sm:$0x1] }
 0x6b7   :  { %v6764_v34 = vmax.f32 %v6708_v0, 0.0  ;;  %v21700_v0 = vrot.slane %v6952_v1, %v21621_v52  ;;  %v7326_v1 = vmax.f32 %v21680_v48, %v21682_v54  ;;  %v7666_v54 = vld [vmem:[#allocation3 + $0x3b] sm:$0x1] }
 0x6b8   :  { %v6805_v43 = vmax.f32 %v6761_v16, %v6763_v61  ;;  %v6762_v45 = vmax.f32 %v6706_v17, 0.0  ;;  %v21697_v61 = vrot.slane %v6921_v11, %v21621_v52  ;;  %v21705_v16 = vrot.slane %v6983_v31, %v21621_v52 }
 0x6b9   :  { %v21708_v17 = vrot.slane %v7014_v4, %v21621_v52  ;;  %v7201_v11 = vmax.f32 %v21661_v8, %v21663_v15  ;;  %v21729_v31 = vrot.slane %v7045_v20, %v21621_v52  ;;  %v7571_v4 = vld [vmem:[#allocation3 + $0x34] sm:$0x1]  ;;  %v7604_v8 = vld [vmem:[#allocation3 + $0x37] sm:$0x1]  ;;  %v21757_v48 = vrot.slane %v7326_v1, %v21621_v52  ;;  %v7727_v20 = vld [vmem:[#allocation3 + $0x40] sm:$0x1] }
 0x6ba   :  { %v18724_v29 = vpop.f32.mrb[28].mxu1  ;;  %6833 = vst [vmem:[#allocation3 + $0x60] sm:$0xff] %v6805_v43  ;;  %v6806_v5 = vmax.f32 %v6762_v45, %v6764_v34  ;;  %v7108_v34 = vmax.f32 %v21649_v6, %v21651_v30  ;;  %v7511_v43 = vld [vmem:[#allocation3 + $0x31] sm:$0x1]  ;;  %v7232_v45 = vmax.f32 %v21668_v12, %v21670_v51  ;;  %v7450_v30 = vmax.f32 %v7446_v32, %v7448_v3  ;;  %v7633_v12 = vld [vmem:[#allocation3 + $0x38] sm:$0x1] }
 0x6bb   :  { %v6711_v53 = vadd.f32 %v18724_v29, %v21522_v40  ;;  %v6507_v55 = vpop.f32.mrb[29].mxu1  ;;  %v7077_v29 = vmax.f32 %v21644_v42, %v21646_v2  ;;  %v7357_v42 = vmax.f32 %v21689_v62, %v7355_v33  ;;  %v7388_v2 = vmax.f32 %v7384_v56, %v7386_v14  ;;  %v7635_v51 = vld [vmem:[#allocation3 + $0x39] sm:$0x1]  ;;  %24691 = vst [vmem:[#allocation9_spill] sm:$0xff] %v21757_v48  ;;  %v7697_v62 = vld [vmem:[#allocation3 + $0x3d] sm:$0x1] }
 0x6bc   :  { %v6709_v24 = vadd.f32 %v21522_v40, %v6507_v55  ;;  %v18725_v49 = vpop.f32.mrb[30].mxu1  ;;  %6834 = vst [vmem:[#allocation3 + $0x68] sm:$0xff] %v6806_v5  ;;  %v7170_v55 = vmax.f32 %v21657_v58, %v21659_v36  ;;  %v7573_v58 = vld [vmem:[#allocation3 + $0x35] sm:$0x1]  ;;  %v7602_v36 = vld [vmem:[#allocation3 + $0x36] sm:$0x1]  ;;  %v21736_v15 = vrot.slane %v7108_v34, %v21621_v52 }
 0x6bd   :  { %v6767_v13 = vmax.f32 %v6711_v53, 0.0  ;;  %v6712_v19 = vadd.f32 %v18725_v49, %v21522_v40  ;;  %v6510_v39 = vpop.f32.mrb[31].mxu1  ;;  %v7139_v53 = vmax.f32 %v21653_v59, %v21655_v25  ;;  %v7295_v49 = vmax.f32 %v21676_v9, %v21678_v26  ;;  %v7729_v14 = vld [vmem:[#allocation3 + $0x41] sm:$0x1] }
 0x6be   :  { %v6765_v37 = vmax.f32 %v6709_v24, 0.0  ;;  %v6710_v46 = vadd.f32 %v21522_v40, %v6510_v39  ;;  %v7263_v24 = vmax.f32 %v21672_v22, %v21674_v47  ;;  %v7542_v39 = vld [vmem:[#allocation3 + $0x33] sm:$0x1]  ;;  %v21733_v6 = vrot.slane %v7077_v29, %v21621_v52  ;;  %v7664_v22 = vld [vmem:[#allocation3 + $0x3a] sm:$0x1] }
 0x6bf   :  { %v6768_v21 = vmax.f32 %v6712_v19, 0.0  ;;  %v7540_v19 = vld [vmem:[#allocation3 + $0x32] sm:$0x1]  ;;  %v7481_v59 = vmax.f32 %v7477_v7, %v7479_v57  ;;  %v7513_v25 = vmax.f32 %v7509_v35, %v7511_v43  ;;  %v21739_v5 = vrot.slane %v7139_v53, %v21621_v52  ;;  %v7760_v7 = vld [vmem:[#allocation3 + $0x43] sm:$0x1] }
 0x6c0   :  { %v6807_v38 = vmax.f32 %v6765_v37, %v6767_v13  ;;  %v6766_v41 = vmax.f32 %v6710_v46, 0.0  ;;  %v7419_v13 = vmax.f32 %v7415_v10, %v7417_v23  ;;  %v21742_v37 = vrot.slane %v7170_v55, %v21621_v52  ;;  %v7758_v10 = vld [vmem:[#allocation3 + $0x42] sm:$0x1] }
 0x6c1   :  { %v21745_v46 = vrot.slane %v7201_v11, %v21621_v52  ;;  %v21748_v47 = vrot.slane %v7232_v45, %v21621_v52  ;;  %v21751_v9 = vrot.slane %v7263_v24, %v21621_v52  ;;  %v21754_v26 = vrot.slane %v7295_v49, %v21621_v52 }
 0x6c2   :  { %v21666_v60 = vpop.f32.mrb[32].mxu1  ;;  %6835 = vst [vmem:[#allocation3 + $0x70] sm:$0xff] %v6807_v38  ;;  %v6808_v28 = vmax.f32 %v6766_v41, %v6768_v21  ;;  %v7695_v21 = vld [vmem:[#allocation3 + $0x3c] sm:$0x1]  ;;  %v21760_v33 = vrot.slane %v7357_v42, %v21621_v52  ;;  %v21763_v56 = vrot.slane %v7388_v2, %v21621_v52  ;;  %v21766_v38 = vrot.slane %v7419_v13, %v21621_v52 }
 0x6c3   :  { %v21684_v63 = vpop.f32.mrb[33].mxu1  ;;  %24689 = vst [vmem:[#allocation7_spill] sm:$0xff] %v21751_v9  ;;  %24690 = vst [vmem:[#allocation8_spill] sm:$0xff] %v21754_v26  ;;  %v7544_v41 = vmax.f32 %v7540_v19, %v7542_v39  ;;  %v21769_v23 = vrot.slane %v7450_v30, %v21621_v52  ;;  %v21772_v29 = vrot.slane %v7481_v59, %v21621_v52 }
 0x6c4   :  { %v21691_v50 = vpop.f32.mrb[34].mxu1  ;;  %6836 = vst [vmem:[#allocation3 + $0x78] sm:$0xff] %v6808_v28  ;;  %24692 = vst [vmem:[#allocation10_spill] sm:$0xff] %v21760_v33  ;;  %v21775_v32 = vrot.slane %v7513_v25, %v21621_v52  ;;  %v7575_v3 = vmax.f32 %v7571_v4, %v7573_v58  ;;  %v7606_v53 = vmax.f32 %v7602_v36, %v7604_v8  ;;  %v21782_v4 = vld [vmem:[#allocation3 + $0x44] sm:$0x1] }
 0x6c5   :  { %24693 = vst [vmem:[#allocation11_spill] sm:$0xff] %v21763_v56  ;;  %24694 = vst [vmem:[#allocation12_spill] sm:$0xff] %v21766_v38  ;;  %v7637_v55 = vmax.f32 %v7633_v12, %v7635_v51  ;;  %v7668_v11 = vmax.f32 %v7664_v22, %v7666_v54  ;;  %v7699_v24 = vmax.f32 %v7695_v21, %v7697_v62  ;;  %v21790_v8 = vld [vmem:[#allocation3 + $0x45] sm:$0x1]  ;;  %v21794_v12 = vld [vmem:[#allocation3 + $0x47] sm:$0x1] }
 0x6c6   :  { %24695 = vst [vmem:[#allocation13_spill] sm:$0xff] %v21769_v23  ;;  %24696 = vst [vmem:[#allocation14_spill] sm:$0xff] %v21772_v29  ;;  %v7731_v49 = vmax.f32 %v7727_v20, %v7729_v14  ;;  %v6715_v19 = vadd.f32 %v21666_v60, %v21522_v40  ;;  %v21780_v39 = vrot.slane %v7544_v41, %v21621_v52  ;;  %v21792_v60 = vld [vmem:[#allocation3 + $0x46] sm:$0x1]  ;;  %v6526_v41 = vpop.f32.mrb[35].mxu1 }
 0x6c7   :  { %24697 = vst [vmem:[#allocation15_spill] sm:$0xff] %v21775_v32  ;;  %v6713_v25 = vadd.f32 %v21522_v40, %v21684_v63  ;;  %v21788_v58 = vrot.slane %v7575_v3, %v21621_v52  ;;  %v7762_v36 = vmax.f32 %v7758_v10, %v7760_v7  ;;  %v6716_v22 = vadd.f32 %v21691_v50, %v21522_v40 }
 0x6c8   :  { %24698 = vst [vmem:[#allocation16_spill] sm:$0xff] %v21780_v39  ;;  %v21799_v54 = vrot.slane %v7606_v53, %v21621_v52  ;;  %v21802_v63 = vrot.slane %v7637_v55, %v21621_v52  ;;  %v21805_v21 = vrot.slane %v7668_v11, %v21621_v52  ;;  %v21809_v20 = vrot.slane %v7699_v24, %v21621_v52 }
 0x6c9   :  { %v6850_v28 = vld [vmem:[#allocation3 + $0x70] sm:$0x1]  ;;  %v6852_v34 = vld [vmem:[#allocation3 + $0x71] sm:$0x1]  ;;  %v6887_v35 = vld [vmem:[#allocation3 + $0x72] sm:$0x1]  ;;  %v21812_v14 = vrot.slane %v7731_v49, %v21621_v52  ;;  %v21820_v11 = vrot.slane %v7762_v36, %v21621_v52 }
 0x6ca   :  { %v6854_v57 = vmax.f32 %v6850_v28, %v6852_v34  ;;  %v6889_v43 = vld [vmem:[#allocation3 + $0x73] sm:$0x1]  ;;  %v6918_v45 = vld [vmem:[#allocation3 + $0x74] sm:$0x1]  ;;  %v6920_v42 = vld [vmem:[#allocation3 + $0x75] sm:$0x1] }
 0x6cb   :  { %v6891_v1 = vmax.f32 %v6887_v35, %v6889_v43  ;;  %v6949_v2 = vld [vmem:[#allocation3 + $0x76] sm:$0x1]  ;;  %v6951_v13 = vld [vmem:[#allocation3 + $0x77] sm:$0x1]  ;;  %v6922_v59 = vmax.f32 %v6918_v45, %v6920_v42  ;;  %24699 = vst [vmem:[#allocation17_spill] sm:$0xff] %v21788_v58  ;;  %24700 = vst [vmem:[#allocation18_spill] sm:$0xff] %v21799_v54  ;;  %v6714_v43 = vadd.f32 %v21522_v40, %v6526_v41 }
 0x6cc   :  { %v6870_v30 = vrot.slane %v6854_v57, %v21621_v52  ;;  %v6953_v51 = vmax.f32 %v6949_v2, %v6951_v13  ;;  %24701 = vst [vmem:[#allocation19_spill] sm:$0xff] %v21802_v63  ;;  %24702 = vst [vmem:[#allocation20_spill] sm:$0xff] %v21805_v21  ;;  %v6771_v10 = vmax.f32 %v6715_v19, 0.0  ;;  %v18732_v3 = vpop.f32.mrb[36].mxu1  ;;  %v6769_v53 = vmax.f32 %v6713_v25, 0.0 }
 0x6cd   :  { %v6907_v62 = vrot.slane %v6891_v1, %v21621_v52  ;;  %24703 = vst [vmem:[#allocation21_spill] sm:$0xff] %v21809_v20  ;;  %24704 = vst [vmem:[#allocation22_spill] sm:$0xff] %v21812_v14  ;;  %v6938_v50 = vrot.slane %v6922_v59, %v21621_v52  ;;  %v6539_v55 = vpop.f32.mrb[37].mxu1  ;;  %v6772_v35 = vmax.f32 %v6716_v22, 0.0  ;;  %v6719_v1 = vadd.f32 %v18732_v3, %v21522_v40  ;;  %v21844_v28 = vld [vmem:[#allocation3 + $0x52] sm:$0x1] }
 0x6ce   :  { %v6875_v34 = vrot.slane %v6870_v30, 7  ;;  %24705 = vst [vmem:[#allocation23_spill] sm:$0xff] %v21820_v11  ;;  %v21823_v57 = vrot.slane %v6953_v51, %v21621_v52  ;;  %v18733_v45 = vpop.f32.mrb[38].mxu1  ;;  %v6809_v49 = vmax.f32 %v6769_v53, %v6771_v10  ;;  %v6717_v42 = vadd.f32 %v21522_v40, %v6539_v55  ;;  %v21888_v63 = vld [vmem:[#allocation3 + $0x5a] sm:$0x1] }
 0x6cf   :  { %v21826_v24 = vrot.slane %v6907_v62, 7  ;;  %v6542_v2 = vpop.f32.mrb[39].mxu1  ;;  %v21830_v13 = vrot.slane %v6938_v50, 7  ;;  %v6770_v19 = vmax.f32 %v6714_v43, 0.0  ;;  %v6720_v30 = vadd.f32 %v18733_v45, %v21522_v40  ;;  %v21838_v43 = vld [vmem:[#allocation3 + $0x48] sm:$0x1] }
 0x6d0   :  { %v6718_v59 = vadd.f32 %v21522_v40, %v6542_v2  ;;  %6837 = vst [vmem:[#allocation3 + $0x80] sm:$0xff] %v6809_v49  ;;  %v6775_v36 = vmax.f32 %v6719_v1, 0.0  ;;  %v6773_v51 = vmax.f32 %v6717_v42, 0.0  ;;  %v6877_v41 = vsel %vm6876_vm1, %v6875_v34, %v21687_v44  ;;  %v21840_v45 = vld [vmem:[#allocation3 + $0x49] sm:$0x1] }
 0x6d1   :  { %v6810_v10 = vmax.f32 %v6770_v19, %v6772_v35  ;;  %v6776_v3 = vmax.f32 %v6720_v30, 0.0  ;;  %v21846_v44 = vld [vmem:[#allocation3 + $0x53] sm:$0x1]  ;;  %v21848_v35 = vld [vmem:[#allocation3 + $0x54] sm:$0x1]  ;;  %v24710_v14 = vmax.f32 %v21782_v4, %v21790_v8  ;;  %v7855_v21 = vmax.f32 %v21838_v43, %v21840_v45 }
 0x6d2   :  { %v18736_v25 = vpop.f32.mrb[40].mxu1  ;;  %v6774_v53 = vmax.f32 %v6718_v59, 0.0  ;;  %v6811_v2 = vmax.f32 %v6773_v51, %v6775_v36  ;;  %v21850_v19 = vld [vmem:[#allocation3 + $0x55] sm:$0x1]  ;;  %v21899_v4 = vld [vmem:[#allocation3 + $0x5d] sm:$0x1] }
 0x6d3   :  { %v6723_v22 = vadd.f32 %v18736_v25, %v21522_v40  ;;  %v6555_v62 = vpop.f32.mrb[41].mxu1  ;;  %v6879_v25 = vsel %vm6878_vm2, %v6875_v34, %v6877_v41  ;;  %6838 = vst [vmem:[#allocation3 + $0x88] sm:$0xff] %v6810_v10  ;;  %v6911_v10 = vsel %vm6876_vm1, %v21826_v24, %v21694_v27  ;;  %v21884_v20 = vrot.slane %v24710_v14, %v21621_v52  ;;  %v21901_v8 = vld [vmem:[#allocation3 + $0x60] sm:$0x1] }
 0x6d4   :  { %v6721_v50 = vadd.f32 %v21522_v40, %v6555_v62  ;;  %v18737_v55 = vpop.f32.mrb[42].mxu1  ;;  %v6812_v30 = vmax.f32 %v6774_v53, %v6776_v3  ;;  %v6881_v51 = vsel %vm6880_vm3, %v6875_v34, %v6879_v25  ;;  %6839 = vst [vmem:[#allocation3 + $0x90] sm:$0xff] %v6811_v2  ;;  %v21865_v3 = vld [vmem:[#allocation3 + $0x4a] sm:$0x1]  ;;  %v21867_v53 = vld [vmem:[#allocation3 + $0x4b] sm:$0x1]  ;;  %v6912_v27 = vsel %vm6878_vm2, %v21826_v24, %v6911_v10 }
 0x6d5   :  { %v6779_v49 = vmax.f32 %v6723_v22, 0.0  ;;  %v6724_v1 = vadd.f32 %v18737_v55, %v21522_v40  ;;  %v6558_v42 = vpop.f32.mrb[43].mxu1  ;;  %v21854_v22 = vld [vmem:[#allocation3 + $0x56] sm:$0x1]  ;;  %v21856_v55 = vld [vmem:[#allocation3 + $0x57] sm:$0x1]  ;;  %v6883_v11 = vsel %vm6882_vm4, %v6875_v34, %v6881_v51  ;;  %v24712_v10 = vmax.f32 %v21792_v60, %v21794_v12 }
 0x6d6   :  { %v6777_v59 = vmax.f32 %v6721_v50, 0.0  ;;  %v6722_v62 = vadd.f32 %v21522_v40, %v6558_v42  ;;  %24706 = vst [vmem:[#allocation24_spill] sm:$0xff] %v21865_v3  ;;  %24707 = vst [vmem:[#allocation25_spill] sm:$0xff] %v21867_v53  ;;  %v21869_v50 = vld [vmem:[#allocation3 + $0x4c] sm:$0x1]  ;;  %v8042_v60 = vmax.f32 %v21854_v22, %v21856_v55 }
 0x6d7   :  { %v6780_v41 = vmax.f32 %v6724_v1, 0.0  ;;  %24708 = vst [vmem:[#allocation26_spill] sm:$0xff] %v21869_v50  ;;  %v21871_v42 = vld [vmem:[#allocation3 + $0x4d] sm:$0x1]  ;;  %v21873_v2 = vld [vmem:[#allocation3 + $0x58] sm:$0x1] }
 0x6d8   :  { %24709 = vst [vmem:[#allocation27_spill] sm:$0xff] %v21871_v42  ;;  %v21875_v1 = vld [vmem:[#allocation3 + $0x59] sm:$0x1]  ;;  %6840 = vst [vmem:[#allocation3 + $0x98] sm:$0xff] %v6812_v30  ;;  %v6813_v25 = vmax.f32 %v6777_v59, %v6779_v49  ;;  %v21890_v49 = vld [vmem:[#allocation3 + $0x5b] sm:$0x1]  ;;  %v6942_v59 = vsel %vm6876_vm1, %v21830_v13, %v21697_v61  ;;  %v7980_v61 = vmax.f32 %v21844_v28, %v21846_v44 }
 0x6d9   :  { %6885 = vst [vmem:[#allocation4] sm:$0x3] %v6883_v11  ;;  %24711 = vst [vmem:[#allocation28_spill] sm:$0xff] %v21884_v20  ;;  %v21892_v30 = vld [vmem:[#allocation3 + $0x5c] sm:$0x1]  ;;  %v6913_v11 = vsel %vm6880_vm3, %v21826_v24, %v6912_v27  ;;  %v21912_v27 = vrot.slane %v24712_v10, %v21621_v52  ;;  %v21933_v44 = vrot.slane %v21823_v57, 7  ;;  %v8073_v22 = vmax.f32 %v21873_v2, %v21875_v1 }
 0x6da   :  { %v18740_v36 = vpop.f32.mrb[44].mxu1  ;;  %6841 = vst [vmem:[#allocation3 + $0xa0] sm:$0xff] %v6813_v25  ;;  %v6914_v45 = vsel %vm6882_vm4, %v21826_v24, %v6913_v11  ;;  %v8165_v25 = vld [vmem:[#allocation3 + $0x61] sm:$0x1]  ;;  %v21926_v12 = vld [vmem:[#allocation3 + $0x64] sm:$0x1]  ;;  %v21968_v3 = vrot.slane %v8042_v60, %v21621_v52 }
 0x6db   :  { %v21859_v7 = vadd.f32 %v18740_v36, %v21522_v40  ;;  %v6571_v18 = vpop.f32.mrb[45].mxu1  ;;  %v6778_v36 = vmax.f32 %v6722_v62, 0.0  ;;  %v6943_v62 = vsel %vm6878_vm2, %v21830_v13, %v6942_v59  ;;  %24713 = vst [vmem:[#allocation29_spill] sm:$0xff] %v21912_v27  ;;  %6916 = vst [vmem:[#allocation4 + $0x2] sm:$0x3] %v6914_v45 }
 0x6dc   :  { %v6725_v34 = vadd.f32 %v21522_v40, %v6571_v18  ;;  %v18741_v51 = vpop.f32.mrb[46].mxu1  ;;  %v6944_v24 = vsel %vm6880_vm3, %v21830_v13, %v6943_v62  ;;  %v21928_v11 = vld [vmem:[#allocation3 + $0x65] sm:$0x1]  ;;  %v21930_v28 = vld [vmem:[#allocation3 + $0x66] sm:$0x1] }
 0x6dd   :  { %v6574_v18 = vpop.f32.mrb[47].mxu1  ;;  %v6814_v14 = vmax.f32 %v6778_v36, %v6780_v41  ;;  %v6783_v43 = vmax.f32 %v21859_v7, 0.0  ;;  %v8011_v41 = vmax.f32 %v21848_v35, %v21850_v19  ;;  %v21918_v7 = vld [vmem:[#allocation3 + $0x62] sm:$0x1]  ;;  %v21920_v36 = vld [vmem:[#allocation3 + $0x63] sm:$0x1]  ;;  %v6728_v19 = vadd.f32 %v18741_v51, %v21522_v40 }
 0x6de   :  { %v6781_v35 = vmax.f32 %v6725_v34, 0.0  ;;  %v8258_v55 = vld [vmem:[#allocation3 + $0x67] sm:$0x1]  ;;  %v8287_v62 = vld [vmem:[#allocation3 + $0x68] sm:$0x1]  ;;  %v6945_v57 = vsel %vm6882_vm4, %v21830_v13, %v6944_v24  ;;  %v8104_v34 = vmax.f32 %v21888_v63, %v21890_v49  ;;  %v8135_v51 = vmax.f32 %v21892_v30, %v21899_v4 }
 0x6df   :  { %6842 = vst [vmem:[#allocation3 + $0xa8] sm:$0xff] %v6814_v14  ;;  %v8289_v10 = vld [vmem:[#allocation3 + $0x69] sm:$0x1]  ;;  %v21948_v14 = vld [vmem:[#allocation3 + $0x6a] sm:$0x1]  ;;  %v6726_v27 = vadd.f32 %v21522_v40, %v6574_v18  ;;  %v21958_v13 = vrot.slane %v7855_v21, %v21621_v52  ;;  %v21961_v63 = vrot.slane %v7980_v61, %v21621_v52  ;;  %v21964_v49 = vrot.slane %v8011_v41, %v21621_v52 }
 0x6e0   :  { %v21950_v59 = vld [vmem:[#allocation3 + $0x6b] sm:$0x1]  ;;  %v21952_v45 = vld [vmem:[#allocation3 + $0x6c] sm:$0x1]  ;;  %v21954_v42 = vld [vmem:[#allocation3 + $0x6d] sm:$0x1]  ;;  %v6815_v50 = vmax.f32 %v6781_v35, %v6783_v43  ;;  %v8167_v30 = vmax.f32 %v21901_v8, %v8165_v25  ;;  %v8198_v18 = vmax.f32 %v21918_v7, %v21920_v36  ;;  %v6973_v61 = vsel %vm6876_vm1, %v21933_v44, %v21700_v0 }
 0x6e1   :  { %v6980_v2 = vld [vmem:[#allocation3 + $0x78] sm:$0x1]  ;;  %v6982_v1 = vld [vmem:[#allocation3 + $0x79] sm:$0x1]  ;;  %6947 = vst [vmem:[#allocation4 + $0x4] sm:$0x3] %v6945_v57  ;;  %v21976_v41 = vrot.slane %v8073_v22, %v21621_v52  ;;  %v8229_v8 = vmax.f32 %v21926_v12, %v21928_v11  ;;  %v8260_v25 = vmax.f32 %v21930_v28, %v8258_v55  ;;  %v8291_v60 = vmax.f32 %v8287_v62, %v8289_v10 }
 0x6e2   :  { %24714 = vst [vmem:[#allocation30_spill] sm:$0xff] %v21958_v13  ;;  %v7011_v4 = vld [vmem:[#allocation3 + $0x7a] sm:$0x1]  ;;  %v7013_v24 = vld [vmem:[#allocation3 + $0x7b] sm:$0x1]  ;;  %v18744_v53 = vpop.f32.mrb[48].mxu1  ;;  %v6984_v0 = vmax.f32 %v6980_v2, %v6982_v1  ;;  %v21990_v12 = vrot.slane %v8167_v30, %v21621_v52  ;;  %v8322_v11 = vmax.f32 %v21948_v14, %v21950_v59  ;;  %v8353_v28 = vmax.f32 %v21952_v45, %v21954_v42 }
 0x6e3   :  { %v7042_v43 = vld [vmem:[#allocation3 + $0x7c] sm:$0x1]  ;;  %v7044_v21 = vld [vmem:[#allocation3 + $0x7d] sm:$0x1]  ;;  %6843 = vst [vmem:[#allocation3 + $0xb0] sm:$0xff] %v6815_v50  ;;  %v6784_v35 = vmax.f32 %v6728_v19, 0.0  ;;  %v21984_v50 = vrot.slane %v8104_v34, %v21621_v52  ;;  %v21987_v19 = vrot.slane %v8135_v51, %v21621_v52  ;;  %v6974_v34 = vsel %vm6878_vm2, %v21933_v44, %v6973_v61 }
 0x6e4   :  { %v21981_v57 = vld [vmem:[#allocation3 + $0x80] sm:$0x1]  ;;  %v7076_v7 = vld [vmem:[#allocation3 + $0x81] sm:$0x1]  ;;  %v7105_v36 = vld [vmem:[#allocation3 + $0x82] sm:$0x1]  ;;  %v21999_v51 = vrot.slane %v8198_v18, %v21621_v52  ;;  %v7015_v2 = vmax.f32 %v7011_v4, %v7013_v24  ;;  %v22004_v59 = vrot.slane %v8229_v8, %v21621_v52  ;;  %v22007_v42 = vrot.slane %v8260_v25, %v21621_v52 }
 0x6e5   :  { %v6587_v13 = vpop.f32.mrb[49].mxu1  ;;  %v7107_v22 = vld [vmem:[#allocation3 + $0x83] sm:$0x1]  ;;  %v7136_v20 = vld [vmem:[#allocation3 + $0x84] sm:$0x1]  ;;  %v6782_v54 = vmax.f32 %v6726_v27, 0.0  ;;  %v7046_v27 = vmax.f32 %v7042_v43, %v7044_v21  ;;  %v22010_v45 = vrot.slane %v8291_v60, %v21621_v52  ;;  %v6731_v18 = vadd.f32 %v18744_v53, %v21522_v40 }
 0x6e6   :  { %v7138_v55 = vld [vmem:[#allocation3 + $0x85] sm:$0x1]  ;;  %v7167_v62 = vld [vmem:[#allocation3 + $0x86] sm:$0x1]  ;;  %v7169_v10 = vld [vmem:[#allocation3 + $0x87] sm:$0x1]  ;;  %v7000_v24 = vrot.slane %v6984_v0, %v21621_v52  ;;  %v7109_v43 = vmax.f32 %v7105_v36, %v7107_v22  ;;  %v6975_v8 = vsel %vm6880_vm3, %v21933_v44, %v6974_v34  ;;  %v22022_v60 = vrot.slane %v8322_v11, %v21621_v52 }
 0x6e7   :  { %v7198_v1 = vld [vmem:[#allocation3 + $0x88] sm:$0x1]  ;;  %v7200_v30 = vld [vmem:[#allocation3 + $0x89] sm:$0x1]  ;;  %v6816_v58 = vmax.f32 %v6782_v54, %v6784_v35  ;;  %v22001_v39 = vpop.f32.mrb[50].mxu1  ;;  %v7078_v54 = vmax.f32 %v21981_v57, %v7076_v7  ;;  %v22025_v40 = vrot.slane %v8353_v28, %v21621_v52  ;;  %v7140_v53 = vmax.f32 %v7136_v20, %v7138_v55 }
 0x6e8   :  { %v7229_v14 = vld [vmem:[#allocation3 + $0x8a] sm:$0x1]  ;;  %v7231_v61 = vld [vmem:[#allocation3 + $0x8b] sm:$0x1]  ;;  %v22013_v4 = vpop.f32.mrb[51].mxu1  ;;  %v7171_v32 = vmax.f32 %v7167_v62, %v7169_v10  ;;  %v7031_v57 = vrot.slane %v7015_v2, %v21621_v52  ;;  %v7062_v7 = vrot.slane %v7046_v27, %v21621_v52  ;;  %v6976_v34 = vsel %vm6882_vm4, %v21933_v44, %v6975_v8 }
 0x6e9   :  { %v7260_v21 = vld [vmem:[#allocation3 + $0x8c] sm:$0x1]  ;;  %v7262_v35 = vld [vmem:[#allocation3 + $0x8d] sm:$0x1]  ;;  %6844 = vst [vmem:[#allocation3 + $0xb8] sm:$0xff] %v6816_v58  ;;  %v7202_v58 = vmax.f32 %v7198_v1, %v7200_v30  ;;  %v7233_v11 = vmax.f32 %v7229_v14, %v7231_v61  ;;  %v6787_v20 = vmax.f32 %v6731_v18, 0.0  ;;  %v7094_v44 = vrot.slane %v7078_v54, %v21621_v52 }
 0x6ea   :  { %v22019_v25 = vpop.f32.mrb[52].mxu1  ;;  %v7292_v0 = vld [vmem:[#allocation3 + $0x90] sm:$0x1]  ;;  %v7294_v29 = vld [vmem:[#allocation3 + $0x91] sm:$0x1]  ;;  %v7264_v38 = vmax.f32 %v7260_v21, %v7262_v35  ;;  %v22041_v2 = vrot.slane %v7000_v24, 7  ;;  %v7125_v27 = vrot.slane %v7109_v43, %v21621_v52  ;;  %v7156_v18 = vrot.slane %v7140_v53, %v21621_v52 }
 0x6eb   :  { %v7323_v36 = vld [vmem:[#allocation3 + $0x92] sm:$0x1]  ;;  %v7325_v22 = vld [vmem:[#allocation3 + $0x93] sm:$0x1]  ;;  %v22031_v23 = vpop.f32.mrb[53].mxu1  ;;  %v7296_v1 = vmax.f32 %v7292_v0, %v7294_v29  ;;  %v7187_v21 = vrot.slane %v7171_v32, %v21621_v52  ;;  %v22049_v33 = vrot.slane %v7031_v57, 7  ;;  %v7218_v54 = vrot.slane %v7202_v58, %v21621_v52 }
 0x6ec   :  { %v7354_v28 = vld [vmem:[#allocation3 + $0x94] sm:$0x1]  ;;  %v7356_v56 = vld [vmem:[#allocation3 + $0x95] sm:$0x1]  ;;  %6978 = vst [vmem:[#allocation4 + $0x6] sm:$0x3] %v6976_v34  ;;  %v7327_v35 = vmax.f32 %v7323_v36, %v7325_v22  ;;  %v7249_v29 = vrot.slane %v7233_v11, %v21621_v52  ;;  %v7280_v0 = vrot.slane %v7264_v38, %v21621_v52  ;;  %v22062_v57 = vsel %vm6876_vm1, %v22041_v2, %v21705_v16 }
 0x6ed   :  { %v22036_v55 = vld [vmem:[%s24658_s4] ss:$0 sm:$0xff]  ;;  %v22039_v10 = vpop.f32.mrb[54].mxu1  ;;  %v7385_v30 = vld [vmem:[#allocation3 + $0x96] sm:$0x1]  ;;  %v22051_v24 = vrot.slane %v7062_v7, 7  ;;  %v7358_v43 = vmax.f32 %v7354_v28, %v7356_v56  ;;  %v7312_v36 = vrot.slane %v7296_v1, %v21621_v52 }
 0x6ee   :  { %v6729_v62 = vadd.f32 %v22036_v55, %v6587_v13  ;;  %v7387_v14 = vld [vmem:[#allocation3 + $0x97] sm:$0x1]  ;;  %v22045_v61 = vpop.f32.mrb[55].mxu1  ;;  %v7416_v8 = vld [vmem:[#allocation3 + $0x98] sm:$0x1]  ;;  %v22056_v32 = vrot.slane %v7094_v44, 7  ;;  %v7343_v38 = vrot.slane %v7327_v35, %v21621_v52  ;;  %v6732_v16 = vadd.f32 %v22036_v55, %v22001_v39 }
 0x6ef   :  { %v7418_v13 = vld [vmem:[#allocation3 + $0x99] sm:$0x1]  ;;  %v7389_v48 = vmax.f32 %v7385_v30, %v7387_v14  ;;  %v7447_v26 = vld [vmem:[#allocation3 + $0x9a] sm:$0x1]  ;;  %v7449_v53 = vld [vmem:[#allocation3 + $0x9b] sm:$0x1]  ;;  %v7374_v28 = vrot.slane %v7358_v43, %v21621_v52  ;;  %v6735_v43 = vadd.f32 %v22036_v55, %v22019_v25 }
 0x6f0   :  { %v6785_v34 = vmax.f32 %v6729_v62, 0.0  ;;  %v7420_v22 = vmax.f32 %v7416_v8, %v7418_v13  ;;  %v22064_v7 = vrot.slane %v7125_v27, 7  ;;  %v22066_v56 = vrot.slane %v7156_v18, 7  ;;  %v7478_v62 = vld [vmem:[#allocation3 + $0x9c] sm:$0x1] }
 0x6f1   :  { %v22068_v58 = vrot.slane %v7187_v21, 7  ;;  %v22071_v11 = vrot.slane %v7218_v54, 7  ;;  %v7480_v44 = vld [vmem:[#allocation3 + $0x9d] sm:$0x1]  ;;  %v22076_v27 = vrot.slane %v7249_v29, 7  ;;  %v22078_v30 = vrot.slane %v7280_v0, 7 }
 0x6f2   :  { %v6817_v9 = vmax.f32 %v6785_v34, %v6787_v20  ;;  %v7451_v20 = vmax.f32 %v7447_v26, %v7449_v53  ;;  %v7405_v14 = vrot.slane %v7389_v48, %v21621_v52  ;;  %v7436_v21 = vrot.slane %v7420_v22, %v21621_v52  ;;  %v7510_v35 = vld [vmem:[#allocation3 + $0xa0] sm:$0x1]  ;;  %v7512_v26 = vld [vmem:[#allocation3 + $0xa1] sm:$0x1]  ;;  %v7541_v0 = vld [vmem:[#allocation3 + $0xa2] sm:$0x1] }
 0x6f3   :  { %v8380_v1 = vld [vmem:[#allocation4] sm:$0xff]  ;;  %24715 = vst [vmem:[#allocation31_spill] sm:$0xff] %v22078_v30  ;;  %v6730_v13 = vadd.f32 %v22036_v55, %v22013_v4  ;;  %v22087_v34 = vrot.slane %v7343_v38, 7  ;;  %v7482_v39 = vmax.f32 %v7478_v62, %v7480_v44  ;;  %v22091_v48 = vrot.slane %v7374_v28, 7  ;;  %v19434_v28 = vld [vmem:[%s24657_s5 + $0xc8] sm:$0xff]  }
 0x6f4   :  { %6845 = vst [vmem:[#allocation3 + $0xc0] sm:$0xff] %v6817_v9  ;;  %v8413_v18 = vrot.slane %v8380_v1, %v21621_v52  ;;  %v22082_v9 = vrot.slane %v7312_v36, 7  ;;  %v8406_v8 = vcombine.high %v8380_v1, %v8380_v1  ;;  %v7467_v29 = vrot.slane %v7451_v20, %v21621_v52  ;;  %v7543_v53 = vld [vmem:[#allocation3 + $0xa3] sm:$0x1]  ;;  %v22109_v44 = vld [vmem:[#allocation3 + $0xa4] sm:$0x1] }
 0x6f5   :  { %24717 = vst [vmem:[#allocation33_spill] sm:$0xff] %v22087_v34  ;;  %24718 = vst [vmem:[#allocation34_spill] sm:$0xff] %v22091_v48  ;;  %v6788_v36 = vmax.f32 %v6732_v16, 0.0  ;;  %v6733_v22 = vadd.f32 %v22036_v55, %v22031_v23  ;;  %v22096_v1 = vrot.slane %v7405_v14, 7  ;;  %v7514_v4 = vmax.f32 %v7510_v35, %v7512_v26  ;;  %v19432_v62 = vld [vmem:[%s24657_s5 + $0x80] sm:$0xff]  }
 0x6f6   :  { %24716 = vst [vmem:[#allocation32_spill] sm:$0xff] %v22082_v9  ;;  %v8421_v54 = vcombine.high %v8413_v18, %v8413_v18  ;;  %v22102_v25 = vrot.slane %v8406_v8, %v21621_v52  ;;  %v22107_v20 = vrot.slane %v7436_v21, 7  ;;  %v22111_v23 = vld [vmem:[#allocation3 + $0xa5] sm:$0x1]  ;;  %v8666_v16 = vpack.c.bf16 %v8413_v18, %v8413_v18 }
 0x6f7   :  { %24719 = vst [vmem:[#allocation35_spill] sm:$0xff] %v22096_v1  ;;  %v6786_v14 = vmax.f32 %v6730_v13, 0.0  ;;  %v6736_v35 = vadd.f32 %v22036_v55, %v22039_v10  ;;  %v22116_v26 = vrot.slane %v7482_v39, %v21621_v52  ;;  %v7545_v8 = vmax.f32 %v7541_v0, %v7543_v53 }
 0x6f8   :  { %v8667_v38 = vpack.c.bf16 %v8421_v54, %v8421_v54  ;;  %24720 = vst [vmem:[#allocation36_spill] sm:$0xff] %v22107_v20  ;;  %v8422_v21 = vcombine.high %v22102_v25, %v22102_v25  ;;  %v6791_v20 = vmax.f32 %v6735_v43, 0.0  ;;  %v22120_v48 = vrot.slane %v7467_v29, 7  ;;  %v19435_v43 = vld [vmem:[%s24657_s5 + $0x88] sm:$0xff]  }
 0x6f9   :  { %v6818_v13 = vmax.f32 %v6786_v14, %v6788_v36  ;;  %v6789_v30 = vmax.f32 %v6733_v22, 0.0  ;;  %v22123_v10 = vrot.slane %v7514_v4, %v21621_v52  ;;  %v6792_v29 = vmax.f32 %v6736_v35, 0.0  ;;  %v19436_v36 = vld [vmem:[%s24657_s5 + $0xd0] sm:$0xff]  }
 0x6fa   :  { %11890 = vmatprep.mubr.bf16.mxu0 %v8667_v38  ;;  %v8669_v38 = vpack.c.bf16 %v8422_v21, %v8422_v21  ;;  %v22135_v4 = vrot.slane %v7545_v8, %v21621_v52  ;;  %v7066_v8 = vsel %vm6876_vm1, %v22051_v24, %v21729_v31  ;;  %v19440_v31 = vld [vmem:[%s24657_s5 + $0x98] sm:$0xff]  }
 0x6fb   :  { %v7977_v54 = vld [vmem:[#allocation3 + $0xc2] sm:$0x1]  ;;  %v7979_v1 = vld [vmem:[#allocation3 + $0xc3] sm:$0x1]  ;;  %v8008_v9 = vld [vmem:[#allocation3 + $0xc4] sm:$0x1]  ;;  %11891 = vmatmul.mubr.bf16.vlgmr.msra.gmra.mrb[224].mxu0 %v8666_v16  ;;  %v6819_v22 = vmax.f32 %v6789_v30, %v6791_v20 }
 0x6fc   :  { %v7981_v34 = vmax.f32 %v7977_v54, %v7979_v1  ;;  %v8010_v18 = vld [vmem:[#allocation3 + $0xc5] sm:$0x1]  ;;  %v8039_v0 = vld [vmem:[#allocation3 + $0xc6] sm:$0x1]  ;;  %v8041_v53 = vld [vmem:[#allocation3 + $0xc7] sm:$0x1]  ;;  %17243 = vmatpush3.bf16.msra.mxu0 %v19432_v62  ;;  %v7576_v62 = vmax.f32 %v22109_v44, %v22111_v23  ;;  %11930 = vmatprep.mubr.bf16.mxu0 %v8669_v38 }
 0x6fd   :  { %v8012_v39 = vmax.f32 %v8008_v9, %v8010_v18  ;;  %v8043_v54 = vmax.f32 %v8039_v0, %v8041_v53  ;;  %6846 = vst [vmem:[#allocation3 + $0xc8] sm:$0xff] %v6818_v13  ;;  %17244 = vmatprep.subr.bf16.mxu0 %v19434_v28  ;;  %v6734_v9 = vadd.f32 %v22036_v55, %v22045_v61  ;;  %6847 = vst [vmem:[#allocation3 + $0xd0] sm:$0xff] %v6819_v22  ;;  %v19437_v20 = vld [vmem:[%s24657_s5 + $0x90] sm:$0xff]   ;;  %v22178_v38 = vld [vmem:[#allocation3 + $0xa6] sm:$0x1] }
 0x6fe   :  { %v7997_v1 = vrot.slane %v7981_v34, %v21621_v52  ;;  %v7005_v34 = vsel %vm6878_vm2, %v22041_v2, %v22062_v57  ;;  %v7035_v57 = vsel %vm6876_vm1, %v22049_v33, %v21708_v17  ;;  %v7067_v0 = vsel %vm6878_vm2, %v22051_v24, %v7066_v8  ;;  %v22204_v8 = vld [vmem:[#allocation3 + $0xa8] sm:$0x1] }
 0x6ff   :  { %v8028_v16 = vrot.slane %v8012_v39, %v21621_v52  ;;  %v8059_v14 = vrot.slane %v8043_v54, %v21621_v52  ;;  %v6790_v30 = vmax.f32 %v6734_v9, 0.0  ;;  %v7006_v55 = vsel %vm6880_vm3, %v22041_v2, %v7005_v34  ;;  %v19438_v39 = vld [vmem:[%s24657_s5 + $0xd8] sm:$0xff]  }
 0x700   :  { %v8000_v28 = vrot.slane %v7997_v1, 7  ;;  %17245 = vmatpush3.bf16.msra.mxu0 %v19435_v43  ;;  %v7007_v35 = vsel %vm6882_vm4, %v22041_v2, %v7006_v55  ;;  %v7036_v2 = vsel %vm6878_vm2, %v22049_v33, %v7035_v57  ;;  %v7098_v53 = vsel %vm6876_vm1, %v22056_v32, %v21733_v6  ;;  %v22180_v43 = vld [vmem:[#allocation3 + $0xa7] sm:$0x1] }
 0x701   :  { %v8031_v61 = vrot.slane %v8028_v16, 7  ;;  %v22159_v18 = vrot.slane %v8059_v14, 7  ;;  %17246 = vmatprep.subr.bf16.mxu0 %v19436_v36  ;;  %v6820_v13 = vmax.f32 %v6790_v30, %v6792_v29  ;;  %7009 = vst [vmem:[#allocation4 + $0x8] sm:$0x3] %v7007_v35  ;;  %v19442_v29 = vld [vmem:[%s24657_s5 + $0xe0] sm:$0xff]   ;;  %v7068_v54 = vsel %vm6880_vm3, %v22051_v24, %v7067_v0 }
 0x702   :  { %v8001_v21 = vsel %vm6876_vm1, %v8000_v28, %v21961_v63  ;;  %v7037_v63 = vsel %vm6880_vm3, %v22049_v33, %v7036_v2  ;;  %v7099_v6 = vsel %vm6878_vm2, %v22056_v32, %v7098_v53  ;;  %v19444_v0 = vld [vmem:[%s24657_s5 + $0xa0] sm:$0xff]   ;;  %v22215_v53 = vrot.slane %v7576_v62, %v21621_v52 }
 0x703   :  { %v8032_v17 = vsel %vm6876_vm1, %v8031_v61, %v21964_v49  ;;  %v8063_v49 = vsel %vm6876_vm1, %v22159_v18, %v21968_v3  ;;  %6848 = vst [vmem:[#allocation3 + $0xd8] sm:$0xff] %v6820_v13  ;;  %v7038_v1 = vsel %vm6882_vm4, %v22049_v33, %v7037_v63  ;;  %v7069_v3 = vsel %vm6882_vm4, %v22051_v24, %v7068_v54 }
 0x704   :  { %v8070_v36 = vld [vmem:[#allocation3 + $0xc8] sm:$0x1]  ;;  %v8072_v22 = vld [vmem:[#allocation3 + $0xc9] sm:$0x1]  ;;  %v8101_v9 = vld [vmem:[#allocation3 + $0xca] sm:$0x1]  ;;  %17247 = vmatpush3.bf16.msra.mxu0 %v19437_v20  ;;  %v7100_v16 = vsel %vm6880_vm3, %v22056_v32, %v7099_v6  ;;  %v8002_v34 = vsel %vm6878_vm2, %v8000_v28, %v8001_v21  ;;  %v8033_v33 = vsel %vm6878_vm2, %v8031_v61, %v8032_v17 }
 0x705   :  { %7040 = vst [vmem:[#allocation4 + $0xa] sm:$0x3] %v7038_v1  ;;  %v8074_v14 = vmax.f32 %v8070_v36, %v8072_v22  ;;  %v8103_v30 = vld [vmem:[#allocation3 + $0xcb] sm:$0x1]  ;;  %v8132_v55 = vld [vmem:[#allocation3 + $0xcc] sm:$0x1]  ;;  %17248 = vmatprep.subr.bf16.mxu0 %v19438_v39  ;;  %v7101_v20 = vsel %vm6882_vm4, %v22056_v32, %v7100_v16  ;;  %v8003_v57 = vsel %vm6880_vm3, %v8000_v28, %v8002_v34 }
 0x706   :  { %v8134_v35 = vld [vmem:[#allocation3 + $0xcd] sm:$0x1]  ;;  %7071 = vst [vmem:[#allocation4 + $0xc] sm:$0x3] %v7069_v3  ;;  %v8034_v24 = vsel %vm6880_vm3, %v8031_v61, %v8033_v33  ;;  %v8105_v13 = vmax.f32 %v8101_v9, %v8103_v30  ;;  %v8164_v21 = vld [vmem:[#allocation3 + $0xd0] sm:$0x1]  ;;  %v8004_v39 = vsel %vm6882_vm4, %v8000_v28, %v8003_v57  ;;  %v7607_v1 = vmax.f32 %v22178_v38, %v22180_v43 }
 0x707   :  { %v8136_v2 = vmax.f32 %v8132_v55, %v8134_v35  ;;  %v8166_v63 = vld [vmem:[#allocation3 + $0xd1] sm:$0x1]  ;;  %v8195_v17 = vld [vmem:[#allocation3 + $0xd2] sm:$0x1]  ;;  %7103 = vst [vmem:[#allocation4 + $0xe] sm:$0x3] %v7101_v20  ;;  %v8035_v32 = vsel %vm6882_vm4, %v8031_v61, %v8034_v24  ;;  %v8090_v54 = vrot.slane %v8074_v14, %v21621_v52  ;;  %v8064_v55 = vsel %vm6878_vm2, %v22159_v18, %v8063_v49 }
 0x708   :  { %v8168_v6 = vmax.f32 %v8164_v21, %v8166_v63  ;;  %v8197_v36 = vld [vmem:[#allocation3 + $0xd3] sm:$0x1]  ;;  %v8226_v22 = vld [vmem:[#allocation3 + $0xd4] sm:$0x1]  ;;  %v8228_v9 = vld [vmem:[#allocation3 + $0xd5] sm:$0x1]  ;;  %v8121_v61 = vrot.slane %v8105_v13, %v21621_v52  ;;  %17249 = vmatpush3.bf16.msra.mxu0 %v19440_v31  ;;  %v7160_v38 = vsel %vm6876_vm1, %v22066_v56, %v21739_v5  ;;  %v7191_v5 = vsel %vm6876_vm1, %v22068_v58, %v21742_v37 }
 0x709   :  { %8006 = vst [vmem:[#allocation4 + $0x48] sm:$0x3] %v8004_v39  ;;  %8037 = vst [vmem:[#allocation4 + $0x4a] sm:$0x3] %v8035_v32  ;;  %v22220_v28 = vld [vmem:[#allocation3 + $0xa9] sm:$0x1]  ;;  %v8152_v3 = vrot.slane %v8136_v2, %v21621_v52  ;;  %v8199_v44 = vmax.f32 %v8195_v17, %v8197_v36  ;;  %v8230_v23 = vmax.f32 %v8226_v22, %v8228_v9  ;;  %17250 = vmatprep.subr.bf16.mxu0 %v19442_v29 }
 0x70a   :  { %v8257_v62 = vld [vmem:[#allocation3 + $0xd6] sm:$0x1]  ;;  %v8259_v16 = vld [vmem:[#allocation3 + $0xd7] sm:$0x1]  ;;  %v8093_v34 = vrot.slane %v8090_v54, 7  ;;  %v8184_v33 = vrot.slane %v8168_v6, %v21621_v52  ;;  %v19446_v30 = vld [vmem:[%s24657_s5 + $0xe8] sm:$0xff]   ;;  %v7638_v2 = vmax.f32 %v22204_v8, %v22220_v28  ;;  %v8065_v9 = vsel %vm6880_vm3, %v22159_v18, %v8064_v55 }
 0x70b   :  { %v8261_v14 = vmax.f32 %v8257_v62, %v8259_v16  ;;  %v8124_v35 = vrot.slane %v8121_v61, 7  ;;  %v22230_v20 = vrot.slane %v8152_v3, 7  ;;  %v8215_v57 = vrot.slane %v8199_v44, %v21621_v52  ;;  %v8288_v31 = vld [vmem:[#allocation3 + $0xd8] sm:$0x1]  ;;  %v8290_v13 = vld [vmem:[#allocation3 + $0xd9] sm:$0x1] }
 0x70c   :  { %v8246_v24 = vrot.slane %v8230_v23, %v21621_v52  ;;  %v8187_v29 = vrot.slane %v8184_v33, 7  ;;  %v8292_v63 = vmax.f32 %v8288_v31, %v8290_v13  ;;  %v8319_v17 = vld [vmem:[#allocation3 + $0xda] sm:$0x1]  ;;  %v8321_v39 = vld [vmem:[#allocation3 + $0xdb] sm:$0x1]  ;;  %v19448_v49 = vld [vmem:[%s24657_s5 + $0xa8] sm:$0xff]   ;;  %v8094_v32 = vsel %vm6876_vm1, %v8093_v34, %v21976_v41  ;;  %17251 = vmatpush3.bf16.msra.mxu0 %v19444_v0 }
 0x70d   :  { %v8277_v21 = vrot.slane %v8261_v14, %v21621_v52  ;;  %v8218_v54 = vrot.slane %v8215_v57, 7  ;;  %v8350_v36 = vld [vmem:[#allocation3 + $0xdc] sm:$0x1]  ;;  %v8352_v22 = vld [vmem:[#allocation3 + $0xdd] sm:$0x1]  ;;  %v8125_v61 = vsel %vm6876_vm1, %v8124_v35, %v21984_v50  ;;  %v8323_v23 = vmax.f32 %v8319_v17, %v8321_v39  ;;  %17252 = vmatprep.subr.bf16.mxu0 %v19446_v30  ;;  %v19450_v41 = vld [vmem:[%s24657_s5 + $0xf0] sm:$0xff]  }
 0x70e   :  { %v22242_v6 = vrot.slane %v8246_v24, 7  ;;  %v8308_v44 = vrot.slane %v8292_v63, %v21621_v52  ;;  %v8156_v0 = vsel %vm6876_vm1, %v22230_v20, %v21987_v19  ;;  %v8188_v62 = vsel %vm6876_vm1, %v8187_v29, %v21990_v12  ;;  %v22259_v33 = vld [vmem:[#allocation4 + $0x8] sm:$0xff] }
 0x70f   :  { %v22248_v3 = vrot.slane %v8277_v21, 7  ;;  %v8354_v16 = vmax.f32 %v8350_v36, %v8352_v22  ;;  %v22264_v50 = vsel %vm6876_vm1, %v22064_v7, %v21736_v15  ;;  %v8219_v14 = vsel %vm6876_vm1, %v8218_v54, %v21999_v51  ;;  %v19452_v15 = vld [vmem:[%s24657_s5 + $0xb0] sm:$0xff]  }
 0x710   :  { %v22268_v30 = vrot.slane %v8308_v44, 7  ;;  %v8339_v55 = vrot.slane %v8323_v23, %v21621_v52  ;;  %v8066_v19 = vsel %vm6882_vm4, %v22159_v18, %v8065_v9  ;;  %v8250_v12 = vsel %vm6876_vm1, %v22242_v6, %v22004_v59  ;;  %17253 = vmatpush3.bf16.msra.mxu0 %v19448_v49  ;;  %v19454_v59 = vld [vmem:[%s24657_s5 + $0xf8] sm:$0xff]   ;;  %v19458_v23 = vld [vmem:[%s24657_s5 + $0x140] sm:$0xff]  }
 0x711   :  { %v8370_v57 = vrot.slane %v8354_v16, %v21621_v52  ;;  %8068 = vst [vmem:[#allocation4 + $0x4c] sm:$0x3] %v8066_v19  ;;  %v8095_v51 = vsel %vm6878_vm2, %v8093_v34, %v8094_v32  ;;  %v8126_v24 = vsel %vm6878_vm2, %v8124_v35, %v8125_v61  ;;  %v8281_v18 = vsel %vm6876_vm1, %v22248_v3, %v22007_v42 }
 0x712   :  { %17254 = vmatprep.subr.bf16.mxu0 %v19450_v41  ;;  %v22290_v31 = vrot.slane %v22259_v33, %v21621_v52  ;;  %v8096_v13 = vsel %vm6880_vm3, %v8093_v34, %v8095_v51  ;;  %v8127_v21 = vsel %vm6880_vm3, %v8124_v35, %v8126_v24  ;;  %v8342_v63 = vrot.slane %v8339_v55, 7  ;;  %v22345_v24 = vld [vmem:[#allocation3 + $0xaa] sm:$0x1] }
 0x713   :  { %v8373_v17 = vrot.slane %v8370_v57, 7  ;;  %v8097_v39 = vsel %vm6882_vm4, %v8093_v34, %v8096_v13  ;;  %v8128_v49 = vsel %vm6882_vm4, %v8124_v35, %v8127_v21  ;;  %v8312_v42 = vsel %vm6876_vm1, %v22268_v30, %v22010_v45  ;;  %v19456_v34 = vld [vmem:[%s24657_s5 + $0xb8] sm:$0xff]  }
 0x714   :  { %8099 = vst [vmem:[#allocation4 + $0x4e] sm:$0x3] %v8097_v39  ;;  %8130 = vst [vmem:[#allocation4 + $0x50] sm:$0x3] %v8128_v49  ;;  %v8157_v32 = vsel %vm6878_vm2, %v22230_v20, %v8156_v0  ;;  %v8189_v36 = vsel %vm6878_vm2, %v8187_v29, %v8188_v62  ;;  %v8220_v22 = vsel %vm6878_vm2, %v8218_v54, %v8219_v14  ;;  %17255 = vmatpush3.bf16.msra.mxu0 %v19452_v15 }
 0x715   :  { %v8374_v9 = vsel %vm6876_vm1, %v8373_v17, %v22025_v40  ;;  %v8158_v45 = vsel %vm6880_vm3, %v22230_v20, %v8157_v32  ;;  %v8190_v35 = vsel %vm6880_vm3, %v8187_v29, %v8189_v36  ;;  %v8221_v61 = vsel %vm6880_vm3, %v8218_v54, %v8220_v22  ;;  %17256 = vmatprep.subr.bf16.mxu0 %v19454_v59  ;;  %v19464_v36 = vld [vmem:[%s24657_s5 + $0x108] sm:$0xff]  }
 0x716   :  { %v8375_v44 = vsel %vm6878_vm2, %v8373_v17, %v8374_v9  ;;  %v8159_v40 = vsel %vm6882_vm4, %v22230_v20, %v8158_v45  ;;  %v8191_v41 = vsel %vm6882_vm4, %v8187_v29, %v8190_v35  ;;  %v8222_v0 = vsel %vm6882_vm4, %v8218_v54, %v8221_v61 }
 0x717   :  { %v8343_v62 = vsel %vm6876_vm1, %v8342_v63, %v22022_v60  ;;  %v8376_v16 = vsel %vm6880_vm3, %v8373_v17, %v8375_v44  ;;  %v8438_v14 = vcombine.high %v22290_v31, %v22290_v31  ;;  %8161 = vst [vmem:[#allocation4 + $0x52] sm:$0x3] %v8159_v40  ;;  %8193 = vst [vmem:[#allocation4 + $0x54] sm:$0x3] %v8191_v41  ;;  %v22376_v43 = vrot.slane %v22116_v26, 7  ;;  %v19466_v26 = vld [vmem:[%s24657_s5 + $0x150] sm:$0xff]  }
 0x718   :  { %8224 = vst [vmem:[#allocation4 + $0x56] sm:$0x3] %v8222_v0  ;;  %v8251_v55 = vsel %vm6878_vm2, %v22242_v6, %v8250_v12  ;;  %v8377_v20 = vsel %vm6882_vm4, %v8373_v17, %v8376_v16  ;;  %v8282_v54 = vsel %vm6878_vm2, %v22248_v3, %v8281_v18  ;;  %v8313_v60 = vsel %vm6878_vm2, %v22268_v30, %v8312_v42  ;;  %v19460_v12 = vld [vmem:[%s24657_s5 + $0x100] sm:$0xff]   ;;  %v22347_v18 = vld [vmem:[#allocation3 + $0xab] sm:$0x1]  ;;  %v19468_v41 = vld [vmem:[%s24657_s5 + $0x110] sm:$0xff]  }
 0x719   :  { %v8252_v29 = vsel %vm6880_vm3, %v22242_v6, %v8251_v55  ;;  %8379 = vst [vmem:[#allocation4 + $0x60] sm:$0x3] %v8377_v20  ;;  %17257 = vmatpush3.bf16.msra.mxu0 %v19456_v34  ;;  %v8668_v19 = vpack.c.bf16 %v22102_v25, %v22102_v25  ;;  %v8283_v15 = vsel %vm6880_vm3, %v22248_v3, %v8282_v54  ;;  %v19462_v25 = vld [vmem:[%s24657_s5 + $0x148] sm:$0xff]   ;;  %v19470_v0 = vld [vmem:[%s24657_s5 + $0x158] sm:$0xff]  }
 0x71a   :  { %v8253_v57 = vsel %vm6882_vm4, %v22242_v6, %v8252_v29  ;;  %v8314_v51 = vsel %vm6880_vm3, %v22268_v30, %v8313_v60  ;;  %17264 = vmatprep.subr.bf16.mxu0 %v19458_v23  ;;  %v8284_v59 = vsel %vm6882_vm4, %v22248_v3, %v8283_v15  ;;  %v8344_v13 = vsel %vm6878_vm2, %v8342_v63, %v8343_v62  ;;  %v24722_v62 = vld [vmem:[#allocation31_spill] sm:$0xff]  ;;  %v22434_v55 = vld [vmem:[#allocation3 + $0xad] sm:$0x1]  ;;  %v19474_v29 = vld [vmem:[%s24657_s5 + $0xa80] sm:$0xff]  }
 0x71b   :  { %8255 = vst [vmem:[#allocation4 + $0x58] sm:$0x3] %v8253_v57  ;;  %v8315_v6 = vsel %vm6882_vm4, %v22268_v30, %v8314_v51  ;;  %v7130_v21 = vsel %vm6878_vm2, %v22064_v7, %v22264_v50  ;;  %v22364_v17 = vrot.slane %v7607_v1, %v21621_v52  ;;  %v8671_v39 = vpack.c.bf16 %v8438_v14, %v8438_v14  ;;  %v8389_v49 = vld [vmem:[#allocation4 + $0x48] sm:$0xff]  ;;  %v24723_v54 = vld [vmem:[#allocation8_spill] sm:$0xff] }
 0x71c   :  { %8286 = vst [vmem:[#allocation4 + $0x5a] sm:$0x3] %v8284_v59  ;;  %8317 = vst [vmem:[#allocation4 + $0x5c] sm:$0x3] %v8315_v6  ;;  %v8345_v3 = vsel %vm6880_vm3, %v8342_v63, %v8344_v13  ;;  %v7131_v30 = vsel %vm6880_vm3, %v22064_v7, %v7130_v21  ;;  %11931 = vmatmul.mubr.bf16.vlgmr.msra.gmra.mrb[228].mxu0 %v8668_v19  ;;  %v8559_v42 = vcombine.high %v8389_v49, %v8389_v49  ;;  %v22432_v14 = vld [vmem:[#allocation3 + $0xac] sm:$0x1] }
 0x71d   :  { %v8346_v32 = vsel %vm6882_vm4, %v8342_v63, %v8345_v3  ;;  %v7132_v50 = vsel %vm6882_vm4, %v22064_v7, %v7131_v30  ;;  %v7669_v1 = vmax.f32 %v22345_v24, %v22347_v18  ;;  %17265 = vmatpush3.bf16.msra.mxu0 %v19460_v12  ;;  %11970 = vmatprep.mubr.bf16.mxu0 %v8671_v39  ;;  %v24724_v60 = vld [vmem:[#allocation32_spill] sm:$0xff]  ;;  %v19476_v57 = vld [vmem:[%s24657_s5 + $0xac8] sm:$0xff]   ;;  %v22455_v59 = vld [vmem:[#allocation3 + $0xb0] sm:$0x1] }
 0x71e   :  { %8348 = vst [vmem:[#allocation4 + $0x5e] sm:$0x3] %v8346_v32  ;;  %7134 = vst [vmem:[#allocation4 + $0x10] sm:$0x3] %v7132_v50  ;;  %v7161_v7 = vsel %vm6878_vm2, %v22066_v56, %v7160_v38  ;;  %17266 = vmatprep.subr.bf16.mxu0 %v19462_v25  ;;  %v8573_v63 = vrot.slane %v8559_v42, %v21621_v52  ;;  %v7192_v34 = vsel %vm6878_vm2, %v22068_v58, %v7191_v5  ;;  %v22457_v6 = vld [vmem:[#allocation3 + $0xb1] sm:$0x1] }
 0x71f   :  { %v8390_v22 = vld [vmem:[#allocation4 + $0x50] sm:$0xff]  ;;  %v7162_v9 = vsel %vm6880_vm3, %v22066_v56, %v7161_v7  ;;  %v7222_v45 = vsel %vm6876_vm1, %v22071_v11, %v21745_v46  ;;  %v7193_v61 = vsel %vm6880_vm3, %v22068_v58, %v7192_v34  ;;  %v22409_v23 = vrot.slane %v7638_v2, %v21621_v52  ;;  %v24725_v49 = vld [vmem:[#allocation9_spill] sm:$0xff] }
 0x720   :  { %v8576_v35 = vcombine.high %v8390_v22, %v8390_v22  ;;  %v7163_v37 = vsel %vm6882_vm4, %v22066_v56, %v7162_v9  ;;  %v7223_v44 = vsel %vm6878_vm2, %v22071_v11, %v7222_v45  ;;  %v8575_v40 = vcombine.high %v8573_v63, %v8573_v63  ;;  %v24721_v2 = vld [vmem:[#allocation7_spill] sm:$0xff]  ;;  %v24726_v3 = vld [vmem:[#allocation33_spill] sm:$0xff]  ;;  %v24727_v9 = vld [vmem:[#allocation10_spill] sm:$0xff] }
 0x721   :  { %7165 = vst [vmem:[#allocation4 + $0x12] sm:$0x3] %v7163_v37  ;;  %v7194_v46 = vsel %vm6882_vm4, %v22068_v58, %v7193_v61  ;;  %v7224_v56 = vsel %vm6880_vm3, %v22071_v11, %v7223_v44  ;;  %17267 = vmatpush3.bf16.msra.mxu0 %v19464_v36  ;;  %v7253_v58 = vsel %vm6876_vm1, %v22076_v27, %v21748_v47  ;;  %v22469_v42 = vrot.slane %v22123_v10, 7  ;;  %v19475_v50 = vld [vmem:[%s24657_s5 + $0x160] sm:$0xff]   ;;  %v7759_v7 = vld [vmem:[#allocation3 + $0xb2] sm:$0x1] }
 0x722   :  { %v22422_v8 = vrot.slane %v8576_v35, %v21621_v52  ;;  %7196 = vst [vmem:[#allocation4 + $0x14] sm:$0x3] %v7194_v46  ;;  %v7225_v28 = vsel %vm6882_vm4, %v22071_v11, %v7224_v56  ;;  %v7284_v16 = vsel %vm6876_vm1, %v24722_v62, %v24721_v2  ;;  %17268 = vmatprep.subr.bf16.mxu0 %v19466_v26  ;;  %v22482_v36 = vrot.slane %v22135_v4, 7  ;;  %v19478_v5 = vld [vmem:[%s24657_s5 + $0xa88] sm:$0xff]   ;;  %v19481_v26 = vld [vmem:[%s24657_s5 + $0xad0] sm:$0xff]   ;;  %v24732_v2 = vld [vmem:[#allocation36_spill] sm:$0xff] }
 0x723   :  { %v8705_v20 = vpack.c.bf16 %v8575_v40, %v8575_v40  ;;  %7227 = vst [vmem:[#allocation4 + $0x16] sm:$0x3] %v7225_v28  ;;  %v7254_v11 = vsel %vm6878_vm2, %v22076_v27, %v7253_v58  ;;  %v7285_v47 = vsel %vm6878_vm2, %v24722_v62, %v7284_v16  ;;  %v7316_v19 = vsel %vm6876_vm1, %v24724_v60, %v24723_v54  ;;  %v24728_v4 = vld [vmem:[#allocation34_spill] sm:$0xff]  ;;  %v7761_v35 = vld [vmem:[#allocation3 + $0xb3] sm:$0x1]  ;;  %v24731_v58 = vld [vmem:[#allocation12_spill] sm:$0xff] }
 0x724   :  { %v8704_v12 = vpack.c.bf16 %v8573_v63, %v8573_v63  ;;  %v8592_v15 = vcombine.high %v22422_v8, %v22422_v8  ;;  %v7255_v51 = vsel %vm6880_vm3, %v22076_v27, %v7254_v11  ;;  %v7286_v25 = vsel %vm6880_vm3, %v24722_v62, %v7285_v47  ;;  %v7790_v37 = vld [vmem:[#allocation3 + $0xb4] sm:$0x1]  ;;  %v7792_v61 = vld [vmem:[#allocation3 + $0xb5] sm:$0x1]  ;;  %v19480_v18 = vld [vmem:[%s24657_s5 + $0x168] sm:$0xff]  }
 0x725   :  { %12650 = vmatprep.mubr.bf16.mxu1 %v8705_v20  ;;  %v7256_v13 = vsel %vm6882_vm4, %v22076_v27, %v7255_v51  ;;  %v7287_v21 = vsel %vm6882_vm4, %v24722_v62, %v7286_v25  ;;  %v7317_v39 = vsel %vm6878_vm2, %v24724_v60, %v7316_v19  ;;  %v7347_v30 = vsel %vm6876_vm1, %v24726_v3, %v24725_v49  ;;  %v19473_v27 = vld [vmem:[%s24657_s5 + $0x118] sm:$0xff]   ;;  %v7823_v20 = vld [vmem:[#allocation3 + $0xb7] sm:$0x1] }
 0x726   :  { %v7700_v32 = vmax.f32 %v22432_v14, %v22434_v55  ;;  %17269 = vmatpush3.bf16.msra.mxu0 %v19468_v41  ;;  %12651 = vmatmul.mubr.bf16.vlgmr.msra.gmra.mrb[56].mxu1 %v8704_v12  ;;  %v8709_v38 = vpack.c.bf16 %v8592_v15, %v8592_v15  ;;  %7258 = vst [vmem:[#allocation4 + $0x18] sm:$0x3] %v7256_v13  ;;  %7289 = vst [vmem:[#allocation4 + $0x1a] sm:$0x3] %v7287_v21  ;;  %v24729_v41 = vld [vmem:[#allocation11_spill] sm:$0xff]  ;;  %v22514_v16 = vrot.slane %v22215_v53, 7 }
 0x727   :  { %v7318_v10 = vsel %vm6880_vm3, %v24724_v60, %v7317_v39  ;;  %17270 = vmatprep.subr.bf16.mxu0 %v19470_v0  ;;  %17683 = vmatpush3.bf16.msra.mxu1 %v19474_v29  ;;  %v7348_v22 = vsel %vm6878_vm2, %v24726_v3, %v7347_v30  ;;  %v7378_v34 = vsel %vm6876_vm1, %v24728_v4, %v24727_v9  ;;  %v24730_v0 = vld [vmem:[#allocation35_spill] sm:$0xff]  ;;  %v19477_v29 = vld [vmem:[%s24657_s5 + $0x120] sm:$0xff]   ;;  %v22528_v47 = vrot.slane %v22364_v17, 7 }
 0x728   :  { %v7319_v63 = vsel %vm6882_vm4, %v24724_v60, %v7318_v10  ;;  %v7732_v45 = vmax.f32 %v22455_v59, %v22457_v6  ;;  %17684 = vmatprep.subr.bf16.mxu1 %v19476_v57  ;;  %12730 = vmatprep.mubr.bf16.mxu1 %v8709_v38  ;;  %v7349_v44 = vsel %vm6880_vm3, %v24726_v3, %v7348_v22  ;;  %v7821_v55 = vld [vmem:[#allocation3 + $0xb6] sm:$0x1]  ;;  %v22539_v19 = vrot.slane %v22409_v23, 7  ;;  %v19485_v17 = vld [vmem:[%s24657_s5 + $0xad8] sm:$0xff]   ;;  %v24733_v15 = vld [vmem:[#allocation13_spill] sm:$0xff] }
 0x729   :  { %7321 = vst [vmem:[#allocation4 + $0x1c] sm:$0x3] %v7319_v63  ;;  %v7379_v40 = vsel %vm6878_vm2, %v24728_v4, %v7378_v34  ;;  %v7350_v46 = vsel %vm6882_vm4, %v24726_v3, %v7349_v44  ;;  %v7409_v28 = vsel %vm6876_vm1, %v24730_v0, %v24729_v41  ;;  %v7440_v62 = vsel %vm6876_vm1, %v24732_v2, %v24731_v58  ;;  %v19482_v6 = vld [vmem:[%s24657_s5 + $0x128] sm:$0xff]   ;;  %v7852_v21 = vld [vmem:[#allocation3 + $0xb8] sm:$0x1]  ;;  %v19484_v49 = vld [vmem:[%s24657_s5 + $0x170] sm:$0xff]  }
 0x72a   :  { %v7380_v56 = vsel %vm6880_vm3, %v24728_v4, %v7379_v40  ;;  %v7685_v14 = vrot.slane %v7669_v1, %v21621_v52  ;;  %17271 = vmatpush3.bf16.msra.mxu0 %v19473_v27  ;;  %7352 = vst [vmem:[#allocation4 + $0x1e] sm:$0x3] %v7350_v46  ;;  %v7410_v53 = vsel %vm6878_vm2, %v24730_v0, %v7409_v28  ;;  %v19483_v1 = vld [vmem:[%s24657_s5 + $0xa90] sm:$0xff]   ;;  %v7854_v39 = vld [vmem:[#allocation3 + $0xb9] sm:$0x1] }
 0x72b   :  { %v7381_v11 = vsel %vm6882_vm4, %v24728_v4, %v7380_v56  ;;  %v7763_v54 = vmax.f32 %v7759_v7, %v7761_v35  ;;  %v7794_v24 = vmax.f32 %v7790_v37, %v7792_v61  ;;  %17272 = vmatprep.subr.bf16.mxu0 %v19475_v50  ;;  %17685 = vmatpush3.bf16.msra.mxu1 %v19478_v5  ;;  %v24735_v50 = vld [vmem:[#allocation15_spill] sm:$0xff]  ;;  %v7885_v63 = vld [vmem:[#allocation3 + $0xbb] sm:$0x1]  ;;  %v19489_v4 = vld [vmem:[%s24657_s5 + $0xae0] sm:$0xff]  }
 0x72c   :  { %7383 = vst [vmem:[#allocation4 + $0x20] sm:$0x3] %v7381_v11  ;;  %v7411_v60 = vsel %vm6880_vm3, %v24730_v0, %v7410_v53  ;;  %17686 = vmatprep.subr.bf16.mxu1 %v19481_v26  ;;  %v7441_v57 = vsel %vm6878_vm2, %v24732_v2, %v7440_v62  ;;  %v7471_v51 = vsel %vm6876_vm1, %v22120_v48, %v24733_v15  ;;  %v22571_v10 = vrot.slane %v7685_v14, 7  ;;  %v7883_v26 = vld [vmem:[#allocation3 + $0xba] sm:$0x1]  ;;  %v19491_v62 = vld [vmem:[%s24657_s5 + $0xaa0] sm:$0xff]  }
 0x72d   :  { %v7412_v12 = vsel %vm6882_vm4, %v24730_v0, %v7411_v60  ;;  %v7716_v25 = vrot.slane %v7700_v32, %v21621_v52  ;;  %v7748_v23 = vrot.slane %v7732_v45, %v21621_v52  ;;  %v7825_v59 = vmax.f32 %v7821_v55, %v7823_v20  ;;  %v24734_v32 = vld [vmem:[#allocation14_spill] sm:$0xff]  ;;  %v19487_v22 = vld [vmem:[%s24657_s5 + $0xa98] sm:$0xff]   ;;  %v24737_v14 = vld [vmem:[#allocation17_spill] sm:$0xff] }
 0x72e   :  { %7414 = vst [vmem:[#allocation4 + $0x22] sm:$0x3] %v7412_v12  ;;  %v7442_v13 = vsel %vm6880_vm3, %v24732_v2, %v7441_v57  ;;  %17273 = vmatpush3.bf16.msra.mxu0 %v19477_v29  ;;  %v7472_v30 = vsel %vm6878_vm2, %v22120_v48, %v7471_v51  ;;  %v7502_v27 = vsel %vm6876_vm1, %v22376_v43, %v24734_v32  ;;  %v24736_v37 = vld [vmem:[#allocation16_spill] sm:$0xff]  ;;  %v19486_v0 = vld [vmem:[%s24657_s5 + $0x130] sm:$0xff]   ;;  %v19493_v53 = vld [vmem:[%s24657_s5 + $0xae8] sm:$0xff]  }
 0x72f   :  { %v7443_v3 = vsel %vm6882_vm4, %v24732_v2, %v7442_v13  ;;  %v7534_v38 = vsel %vm6876_vm1, %v22469_v42, %v24735_v50  ;;  %v7779_v7 = vrot.slane %v7763_v54, %v21621_v52  ;;  %v7810_v5 = vrot.slane %v7794_v24, %v21621_v52  ;;  %17274 = vmatprep.subr.bf16.mxu0 %v19480_v18  ;;  %v19488_v2 = vld [vmem:[%s24657_s5 + $0x178] sm:$0xff]   ;;  %v24738_v55 = vld [vmem:[#allocation18_spill] sm:$0xff] }
 0x730   :  { %17687 = vmatpush3.bf16.msra.mxu1 %v19483_v1  ;;  %v8423_v9 = vcombine.high %v22259_v33, %v22259_v33  ;;  %7445 = vst [vmem:[#allocation4 + $0x24] sm:$0x3] %v7443_v3  ;;  %v7473_v34 = vsel %vm6880_vm3, %v22120_v48, %v7472_v30  ;;  %v7503_v45 = vsel %vm6878_vm2, %v22376_v43, %v7502_v27  ;;  %v22606_v58 = vrot.slane %v7716_v25, 7  ;;  %v8391_v13 = vld [vmem:[#allocation4 + $0x58] sm:$0xff]  ;;  %v19498_v32 = vld [vmem:[%s24657_s5 + $0xaf0] sm:$0xff]  }
 0x731   :  { %17688 = vmatprep.subr.bf16.mxu1 %v19485_v17  ;;  %v7535_v35 = vsel %vm6878_vm2, %v22469_v42, %v7534_v38  ;;  %v7565_v61 = vsel %vm6876_vm1, %v22482_v36, %v24736_v37  ;;  %v7856_v33 = vmax.f32 %v7852_v21, %v7854_v39  ;;  %v7474_v44 = vsel %vm6882_vm4, %v22120_v48, %v7473_v34  ;;  %v24739_v17 = vld [vmem:[#allocation19_spill] sm:$0xff]  ;;  %v7914_v3 = vld [vmem:[#allocation3 + $0xbc] sm:$0x1] }
 0x732   :  { %v7504_v40 = vsel %vm6880_vm3, %v22376_v43, %v7503_v45  ;;  %v7536_v46 = vsel %vm6880_vm3, %v22469_v42, %v7535_v35  ;;  %v7841_v56 = vrot.slane %v7825_v59, %v21621_v52  ;;  %v7887_v41 = vmax.f32 %v7883_v26, %v7885_v63  ;;  %17275 = vmatpush3.bf16.msra.mxu0 %v19482_v6  ;;  %v19492_v59 = vld [vmem:[%s24657_s5 + $0x1c0] sm:$0xff]   ;;  %v19496_v6 = vld [vmem:[%s24657_s5 + $0xaa8] sm:$0xff]  }
 0x733   :  { %7476 = vst [vmem:[#allocation4 + $0x26] sm:$0x3] %v7474_v44  ;;  %v7505_v28 = vsel %vm6882_vm4, %v22376_v43, %v7504_v40  ;;  %v7537_v48 = vsel %vm6882_vm4, %v22469_v42, %v7536_v46  ;;  %17276 = vmatprep.subr.bf16.mxu0 %v19484_v49  ;;  %v7566_v43 = vsel %vm6878_vm2, %v22482_v36, %v7565_v61  ;;  %v22622_v29 = vrot.slane %v7748_v23, 7  ;;  %v24740_v50 = vld [vmem:[#allocation20_spill] sm:$0xff] }
 0x734   :  { %17689 = vmatpush3.bf16.msra.mxu1 %v19487_v22  ;;  %7507 = vst [vmem:[#allocation4 + $0x28] sm:$0x3] %v7505_v28  ;;  %7539 = vst [vmem:[#allocation4 + $0x2a] sm:$0x3] %v7537_v48  ;;  %v7596_v42 = vsel %vm6876_vm1, %v22514_v16, %v24737_v14  ;;  %v7627_v20 = vsel %vm6876_vm1, %v22528_v47, %v24738_v55  ;;  %v22624_v11 = vrot.slane %v7779_v7, 7  ;;  %v22643_v57 = vrot.slane %v7810_v5, 7 }
 0x735   :  { %17690 = vmatprep.subr.bf16.mxu1 %v19489_v4  ;;  %v22630_v54 = vrot.slane %v8423_v9, %v21621_v52  ;;  %v7567_v24 = vsel %vm6880_vm3, %v22482_v36, %v7566_v43  ;;  %v7597_v1 = vsel %vm6878_vm2, %v22514_v16, %v7596_v42  ;;  %v7628_v60 = vsel %vm6878_vm2, %v22528_v47, %v7627_v20  ;;  %v7916_v7 = vld [vmem:[#allocation3 + $0xbd] sm:$0x1]  ;;  %v7946_v5 = vld [vmem:[#allocation3 + $0xc0] sm:$0x1]  ;;  %v7948_v26 = vld [vmem:[#allocation3 + $0xc1] sm:$0x1] }
 0x736   :  { %v7568_v18 = vsel %vm6882_vm4, %v22482_v36, %v7567_v24  ;;  %v7658_v12 = vsel %vm6876_vm1, %v22539_v19, %v24739_v17  ;;  %v7872_v15 = vrot.slane %v7856_v33, %v21621_v52  ;;  %v22647_v51 = vrot.slane %v7887_v41, %v21621_v52  ;;  %17277 = vmatpush3.bf16.msra.mxu0 %v19486_v0  ;;  %v19490_v36 = vld [vmem:[%s24657_s5 + $0x138] sm:$0xff]   ;;  %v24741_v9 = vld [vmem:[#allocation21_spill] sm:$0xff]  ;;  %v24742_v4 = vld [vmem:[#allocation22_spill] sm:$0xff] }
 0x737   :  { %7570 = vst [vmem:[#allocation4 + $0x2c] sm:$0x3] %v7568_v18  ;;  %v7598_v25 = vsel %vm6880_vm3, %v22514_v16, %v7597_v1  ;;  %v22654_v23 = vrot.slane %v7841_v56, 7  ;;  %17278 = vmatprep.subr.bf16.mxu0 %v19488_v2  ;;  %v7629_v39 = vsel %vm6880_vm3, %v22528_v47, %v7628_v60  ;;  %v7659_v49 = vsel %vm6878_vm2, %v22539_v19, %v7658_v12  ;;  %v19494_v35 = vld [vmem:[%s24657_s5 + $0x180] sm:$0xff]   ;;  %v19497_v33 = vld [vmem:[%s24657_s5 + $0x1c8] sm:$0xff]   ;;  %v19502_v28 = vld [vmem:[%s24657_s5 + $0xaf8] sm:$0xff]  }
 0x738   :  { %17691 = vmatpush3.bf16.msra.mxu1 %v19491_v62  ;;  %v7599_v21 = vsel %vm6882_vm4, %v22514_v16, %v7598_v25  ;;  %v8439_v30 = vcombine.high %v22630_v54, %v22630_v54  ;;  %v7630_v27 = vsel %vm6882_vm4, %v22528_v47, %v7629_v39  ;;  %v7660_v16 = vsel %vm6880_vm3, %v22539_v19, %v7659_v49  ;;  %v7945_v2 = vld [vmem:[#allocation3 + $0x50] sm:$0x1]  ;;  %v24743_v14 = vld [vmem:[#allocation23_spill] sm:$0xff]  ;;  %v24744_v55 = vld [vmem:[#allocation28_spill] sm:$0xff] }
 0x739   :  { %17692 = vmatprep.subr.bf16.mxu1 %v19493_v53  ;;  %7601 = vst [vmem:[#allocation4 + $0x2e] sm:$0x3] %v7599_v21  ;;  %v7689_v38 = vsel %vm6876_vm1, %v22571_v10, %v24740_v50  ;;  %7632 = vst [vmem:[#allocation4 + $0x30] sm:$0x3] %v7630_v27  ;;  %v7661_v63 = vsel %vm6882_vm4, %v22539_v19, %v7660_v16  ;;  %v7720_v47 = vsel %vm6876_vm1, %v22606_v58, %v24741_v9  ;;  %v24745_v53 = vld [vmem:[#allocation24_spill] sm:$0xff]  ;;  %v24746_v24 = vld [vmem:[#allocation25_spill] sm:$0xff] }
 0x73a   :  { %v7690_v22 = vsel %vm6878_vm2, %v22571_v10, %v7689_v38  ;;  %v7752_v34 = vsel %vm6876_vm1, %v22622_v29, %v24742_v4  ;;  %17279 = vmatpush3.bf16.msra.mxu0 %v19490_v36  ;;  %v8670_v45 = vpack.c.bf16 %v22290_v31, %v22290_v31  ;;  %v8593_v19 = vcombine.high %v8391_v13, %v8391_v13  ;;  %v19500_v31 = vld [vmem:[%s24657_s5 + $0xab0] sm:$0xff]   ;;  %v19499_v1 = vld [vmem:[%s24657_s5 + $0x188] sm:$0xff]   ;;  %v19504_v25 = vld [vmem:[%s24657_s5 + $0xab8] sm:$0xff]  }
 0x73b   :  { %7663 = vst [vmem:[#allocation4 + $0x32] sm:$0x3] %v7661_v63  ;;  %v7691_v37 = vsel %vm6880_vm3, %v22571_v10, %v7690_v22  ;;  %v7721_v61 = vsel %vm6878_vm2, %v22606_v58, %v7720_v47  ;;  %17286 = vmatprep.subr.bf16.mxu0 %v19492_v59  ;;  %v7753_v46 = vsel %vm6878_vm2, %v22622_v29, %v7752_v34  ;;  %v7875_v62 = vrot.slane %v7872_v15, 7  ;;  %v24748_v17 = vld [vmem:[#allocation29_spill] sm:$0xff]  ;;  %v19501_v36 = vld [vmem:[%s24657_s5 + $0x1d0] sm:$0xff]  }
 0x73c   :  { %17693 = vmatpush3.bf16.msra.mxu1 %v19496_v6  ;;  %v7692_v44 = vsel %vm6882_vm4, %v22571_v10, %v7691_v37  ;;  %v7722_v40 = vsel %vm6880_vm3, %v22606_v58, %v7721_v61  ;;  %v7918_v56 = vmax.f32 %v7914_v3, %v7916_v7  ;;  %v7950_v41 = vmax.f32 %v7946_v5, %v7948_v26  ;;  %v7947_v10 = vld [vmem:[#allocation3 + $0x51] sm:$0x1]  ;;  %v19506_v49 = vld [vmem:[%s24657_s5 + $0xbc0] sm:$0xff]   ;;  %v19505_v7 = vld [vmem:[%s24657_s5 + $0x1d8] sm:$0xff]  }
 0x73d   :  { %v8673_v0 = vpack.c.bf16 %v8439_v30, %v8439_v30  ;;  %17694 = vmatprep.subr.bf16.mxu1 %v19498_v32  ;;  %7694 = vst [vmem:[#allocation4 + $0x34] sm:$0x3] %v7692_v44  ;;  %v7723_v48 = vsel %vm6882_vm4, %v22606_v58, %v7722_v40  ;;  %11971 = vmatmul.mubr.bf16.vlgmr.msra.gmra.mrb[232].mxu0 %v8670_v45  ;;  %v7906_v15 = vrot.slane %v22647_v51, 7  ;;  %v24749_v27 = vld [vmem:[#allocation30_spill] sm:$0xff]  ;;  %v19508_v5 = vld [vmem:[%s24657_s5 + $0xb80] sm:$0xff]  }
 0x73e   :  { %7725 = vst [vmem:[#allocation4 + $0x36] sm:$0x3] %v7723_v48  ;;  %v7754_v43 = vsel %vm6880_vm3, %v22622_v29, %v7753_v46  ;;  %v7783_v42 = vsel %vm6876_vm1, %v22624_v11, %v24743_v14  ;;  %v7814_v20 = vsel %vm6876_vm1, %v22643_v57, %v24744_v55  ;;  %v24747_v58 = vmax.f32 %v24745_v53, %v24746_v24  ;;  %v19503_v50 = vld [vmem:[%s24657_s5 + $0x190] sm:$0xff]   ;;  %v19511_v4 = vld [vmem:[%s24657_s5 + $0xbc8] sm:$0xff]   ;;  %v19510_v46 = vld [vmem:[%s24657_s5 + $0x1e0] sm:$0xff]  }
 0x73f   :  { %17287 = vmatpush3.bf16.msra.mxu0 %v19494_v35  ;;  %12010 = vmatprep.mubr.bf16.mxu0 %v8673_v0  ;;  %v22732_v60 = vrot.slane %v8593_v19, %v21621_v52  ;;  %v7845_v12 = vsel %vm6876_vm1, %v22654_v23, %v24748_v17  ;;  %v7755_v59 = vsel %vm6882_vm4, %v22622_v29, %v7754_v43  ;;  %v24750_v45 = vld [vmem:[#allocation26_spill] sm:$0xff]  ;;  %v24751_v35 = vld [vmem:[#allocation27_spill] sm:$0xff]  ;;  %v19523_v17 = vld [vmem:[%s24657_s5 + $0xbe0] sm:$0xff]  }
 0x740   :  { %v7896_v18 = vrot.slane %v24747_v58, %v21621_v52  ;;  %17288 = vmatprep.subr.bf16.mxu0 %v19497_v33  ;;  %17695 = vmatpush3.bf16.msra.mxu1 %v19500_v31  ;;  %v7784_v6 = vsel %vm6878_vm2, %v22624_v11, %v7783_v42  ;;  %v7815_v13 = vsel %vm6878_vm2, %v22643_v57, %v7814_v20  ;;  %v19507_v31 = vld [vmem:[%s24657_s5 + $0x198] sm:$0xff]   ;;  %v19514_v14 = vld [vmem:[%s24657_s5 + $0x1e8] sm:$0xff]   ;;  %v19517_v42 = vld [vmem:[%s24657_s5 + $0xb90] sm:$0xff]  }
 0x741   :  { %v7949_v51 = vmax.f32 %v7945_v2, %v7947_v10  ;;  %v7934_v21 = vrot.slane %v7918_v56, %v21621_v52  ;;  %v7966_v39 = vrot.slane %v7950_v41, %v21621_v52  ;;  %17696 = vmatprep.subr.bf16.mxu1 %v19502_v28  ;;  %7757 = vst [vmem:[#allocation4 + $0x38] sm:$0x3] %v7755_v59  ;;  %v19513_v56 = vld [vmem:[%s24657_s5 + $0xb88] sm:$0xff]   ;;  %v19515_v41 = vld [vmem:[%s24657_s5 + $0xbd0] sm:$0xff]   ;;  %v19512_v10 = vld [vmem:[%s24657_s5 + $0x1a0] sm:$0xff]  }
 0x742   :  { %v7785_v29 = vsel %vm6880_vm3, %v22624_v11, %v7784_v6  ;;  %v7816_v30 = vsel %vm6880_vm3, %v22643_v57, %v7815_v13  ;;  %v7846_v32 = vsel %vm6878_vm2, %v22654_v23, %v7845_v12  ;;  %v7876_v16 = vsel %vm6876_vm1, %v7875_v62, %v24749_v27  ;;  %v19519_v53 = vld [vmem:[%s24657_s5 + $0xbd8] sm:$0xff]   ;;  %v19516_v58 = vld [vmem:[%s24657_s5 + $0x1a8] sm:$0xff]   ;;  %v22843_v12 = vld [vmem:[#allocation4 + $0x10] sm:$0xff] }
 0x743   :  { %v7786_v3 = vsel %vm6882_vm4, %v22624_v11, %v7785_v29  ;;  %17289 = vmatpush3.bf16.msra.mxu0 %v19499_v1  ;;  %v8609_v38 = vcombine.high %v22732_v60, %v22732_v60  ;;  %v7817_v11 = vsel %vm6882_vm4, %v22643_v57, %v7816_v30  ;;  %v7847_v26 = vsel %vm6880_vm3, %v22654_v23, %v7846_v32  ;;  %v19521_v1 = vld [vmem:[%s24657_s5 + $0xb98] sm:$0xff]   ;;  %v19527_v59 = vld [vmem:[%s24657_s5 + $0xbe8] sm:$0xff]   ;;  %v19528_v29 = vld [vmem:[%s24657_s5 + $0x200] sm:$0xff]  }
 0x744   :  { %7788 = vst [vmem:[#allocation4 + $0x3a] sm:$0x3] %v7786_v3  ;;  %17290 = vmatprep.subr.bf16.mxu0 %v19501_v36  ;;  %17697 = vmatpush3.bf16.msra.mxu1 %v19504_v25  ;;  %7819 = vst [vmem:[#allocation4 + $0x3c] sm:$0x3] %v7817_v11  ;;  %v7877_v63 = vsel %vm6878_vm2, %v7875_v62, %v7876_v16  ;;  %v7907_v22 = vsel %vm6876_vm1, %v7906_v15, %v7896_v18  ;;  %v7937_v9 = vrot.slane %v7934_v21, 7  ;;  %v19518_v18 = vld [vmem:[%s24657_s5 + $0x1f0] sm:$0xff]  }
 0x745   :  { %v7969_v57 = vrot.slane %v7966_v39, 7  ;;  %v8708_v47 = vpack.c.bf16 %v22422_v8, %v22422_v8  ;;  %17726 = vmatprep.subr.bf16.mxu1 %v19506_v49  ;;  %v7848_v34 = vsel %vm6882_vm4, %v22654_v23, %v7847_v26  ;;  %v24752_v19 = vmax.f32 %v24750_v45, %v24751_v35  ;;  %v19522_v36 = vld [vmem:[%s24657_s5 + $0x1f8] sm:$0xff]   ;;  %v19525_v25 = vld [vmem:[%s24657_s5 + $0xba0] sm:$0xff]   ;;  %v19529_v21 = vld [vmem:[%s24657_s5 + $0xba8] sm:$0xff]  }
 0x746   :  { %v7959_v61 = vrot.slane %v7949_v51, %v21621_v52  ;;  %7850 = vst [vmem:[#allocation4 + $0x3e] sm:$0x3] %v7848_v34  ;;  %v7878_v33 = vsel %vm6880_vm3, %v7875_v62, %v7877_v63  ;;  %v7908_v8 = vsel %vm6878_vm2, %v7906_v15, %v7907_v22  ;;  %v8713_v44 = vpack.c.bf16 %v8609_v38, %v8609_v38  ;;  %v19524_v13 = vld [vmem:[%s24657_s5 + $0x1b8] sm:$0xff]   ;;  %v19526_v51 = vld [vmem:[%s24657_s5 + $0x240] sm:$0xff]   ;;  %v19531_v49 = vld [vmem:[%s24657_s5 + $0xbf0] sm:$0xff]  }
 0x747   :  { %v7927_v37 = vrot.slane %v24752_v19, %v21621_v52  ;;  %17291 = vmatpush3.bf16.msra.mxu0 %v19503_v50  ;;  %12731 = vmatmul.mubr.bf16.vlgmr.msra.gmra.mrb[60].mxu1 %v8708_v47  ;;  %v7879_v23 = vsel %vm6882_vm4, %v7875_v62, %v7878_v33  ;;  %v7909_v40 = vsel %vm6880_vm3, %v7906_v15, %v7908_v8  ;;  %v19530_v30 = vld [vmem:[%s24657_s5 + $0x248] sm:$0xff]   ;;  %v19533_v32 = vld [vmem:[%s24657_s5 + $0xbb0] sm:$0xff]   ;;  %v19535_v16 = vld [vmem:[%s24657_s5 + $0xbf8] sm:$0xff]  }
 0x748   :  { %17292 = vmatprep.subr.bf16.mxu0 %v19505_v7  ;;  %17727 = vmatpush3.bf16.msra.mxu1 %v19508_v5  ;;  %7881 = vst [vmem:[#allocation4 + $0x40] sm:$0x3] %v7879_v23  ;;  %v7910_v0 = vsel %vm6882_vm4, %v7906_v15, %v7909_v40  ;;  %v7970_v48 = vsel %vm6876_vm1, %v7969_v57, %v7959_v61  ;;  %v19520_v15 = vld [vmem:[%s24657_s5 + $0x1b0] sm:$0xff]   ;;  %v19537_v38 = vld [vmem:[%s24657_s5 + $0xbb8] sm:$0xff]   ;;  %v19540_v63 = vld [vmem:[%s24657_s5 + $0x260] sm:$0xff]  }
 0x749   :  { %12810 = vmatprep.mubr.bf16.mxu1 %v8713_v44  ;;  %17728 = vmatprep.subr.bf16.mxu1 %v19511_v4  ;;  %v7938_v28 = vsel %vm6876_vm1, %v7937_v9, %v7927_v37  ;;  %7912 = vst [vmem:[#allocation4 + $0x42] sm:$0x3] %v7910_v0  ;;  %v7971_v43 = vsel %vm6878_vm2, %v7969_v57, %v7970_v48  ;;  %v19534_v50 = vld [vmem:[%s24657_s5 + $0x250] sm:$0xff]   ;;  %v19538_v7 = vld [vmem:[%s24657_s5 + $0x258] sm:$0xff]   ;;  %v19541_v22 = vld [vmem:[%s24657_s5 + $0x220] sm:$0xff]  }
 0x74a   :  { %v7939_v2 = vsel %vm6878_vm2, %v7937_v9, %v7938_v28  ;;  %v7972_v20 = vsel %vm6880_vm3, %v7969_v57, %v7971_v43  ;;  %v22859_v6 = vrot.slane %v22843_v12, %v21621_v52  ;;  %v8672_v3 = vpack.c.bf16 %v22630_v54, %v22630_v54  ;;  %v19532_v54 = vld [vmem:[%s24657_s5 + $0x208] sm:$0xff]   ;;  %v19536_v11 = vld [vmem:[%s24657_s5 + $0x210] sm:$0xff]   ;;  %v19539_v26 = vld [vmem:[%s24657_s5 + $0x218] sm:$0xff]  }
 0x74b   :  { %17293 = vmatpush3.bf16.msra.mxu0 %v19507_v31  ;;  %v7940_v62 = vsel %vm6880_vm3, %v7937_v9, %v7939_v2  ;;  %v7973_v24 = vsel %vm6882_vm4, %v7969_v57, %v7972_v20  ;;  %v8712_v5 = vpack.c.bf16 %v22732_v60, %v22732_v60  ;;  %v19542_v60 = vld [vmem:[%s24657_s5 + $0x268] sm:$0xff]   ;;  %v19544_v57 = vld [vmem:[%s24657_s5 + $0x270] sm:$0xff]   ;;  %v8440_v47 = vcombine.high %v22843_v12, %v22843_v12  ;;  %v19546_v34 = vld [vmem:[%s24657_s5 + $0x278] sm:$0xff]  }
 0x74c   :  { %17294 = vmatprep.subr.bf16.mxu0 %v19510_v46  ;;  %17729 = vmatpush3.bf16.msra.mxu1 %v19513_v56  ;;  %v7941_v55 = vsel %vm6882_vm4, %v7937_v9, %v7940_v62  ;;  %7975 = vst [vmem:[#allocation4 + $0x46] sm:$0x3] %v7973_v24  ;;  %v8455_v39 = vcombine.high %v22859_v6, %v22859_v6  ;;  %v19543_v9 = vld [vmem:[%s24657_s5 + $0x228] sm:$0xff]   ;;  %v19545_v4 = vld [vmem:[%s24657_s5 + $0x230] sm:$0xff]   ;;  %v19547_v35 = vld [vmem:[%s24657_s5 + $0x238] sm:$0xff]  }
 0x74d   :  { %17730 = vmatprep.subr.bf16.mxu1 %v19515_v41  ;;  %7943 = vst [vmem:[#allocation4 + $0x44] sm:$0x3] %v7941_v55  ;;  %v8454_v45 = vrot.slane %v8440_v47, %v21621_v52  ;;  %v19548_v19 = vld [vmem:[%s24657_s5 + $0x2c0] sm:$0xff]   ;;  %v8674_v33 = vpack.c.bf16 %v22859_v6, %v22859_v6  ;;  %v19551_v8 = vld [vmem:[%s24657_s5 + $0x2c8] sm:$0xff]   ;;  %v19553_v23 = vld [vmem:[%s24657_s5 + $0x2d0] sm:$0xff]  }
 0x74e   :  { %v8675_v27 = vpack.c.bf16 %v8455_v39, %v8455_v39  ;;  %v19549_v61 = vld [vmem:[%s24657_s5 + $0x280] sm:$0xff]   ;;  %v19552_v44 = vld [vmem:[%s24657_s5 + $0x288] sm:$0xff]   ;;  %v19554_v40 = vld [vmem:[%s24657_s5 + $0x290] sm:$0xff]  }
 0x74f   :  { %17295 = vmatpush3.bf16.msra.mxu0 %v19512_v10  ;;  %v8456_v37 = vcombine.high %v8454_v45, %v8454_v45  ;;  %v19555_v46 = vld [vmem:[%s24657_s5 + $0x2d8] sm:$0xff]   ;;  %v19557_v41 = vld [vmem:[%s24657_s5 + $0x2e0] sm:$0xff]   ;;  %v19559_v28 = vld [vmem:[%s24657_s5 + $0x2e8] sm:$0xff]   ;;  %v8676_v24 = vpack.c.bf16 %v8454_v45, %v8454_v45 }
 0x750   :  { %17296 = vmatprep.subr.bf16.mxu0 %v19514_v14  ;;  %17731 = vmatpush3.bf16.msra.mxu1 %v19517_v42  ;;  %v19556_v56 = vld [vmem:[%s24657_s5 + $0x298] sm:$0xff]   ;;  %v19558_v0 = vld [vmem:[%s24657_s5 + $0x2a0] sm:$0xff]   ;;  %v19560_v48 = vld [vmem:[%s24657_s5 + $0x2a8] sm:$0xff]  }
 0x751   :  { %17732 = vmatprep.subr.bf16.mxu1 %v19519_v53  ;;  %v8677_v31 = vpack.c.bf16 %v8456_v37, %v8456_v37  ;;  %v19561_v2 = vld [vmem:[%s24657_s5 + $0x2f0] sm:$0xff]   ;;  %v8383_v10 = vld [vmem:[#allocation4 + $0x18] sm:$0xff]  ;;  %v19565_v55 = vld [vmem:[%s24657_s5 + $0x340] sm:$0xff]  }
 0x752   :  { %v19562_v62 = vld [vmem:[%s24657_s5 + $0x2b0] sm:$0xff]   ;;  %v19563_v43 = vld [vmem:[%s24657_s5 + $0x2f8] sm:$0xff]   ;;  %v8464_v14 = vrot.slane %v8383_v10, %v21621_v52  ;;  %v19566_v53 = vld [vmem:[%s24657_s5 + $0x300] sm:$0xff]  }
 0x753   :  { %17297 = vmatpush3.bf16.msra.mxu0 %v19516_v58  ;;  %v19564_v42 = vld [vmem:[%s24657_s5 + $0x2b8] sm:$0xff]   ;;  %v19567_v58 = vld [vmem:[%s24657_s5 + $0x348] sm:$0xff]   ;;  %v19570_v12 = vld [vmem:[%s24657_s5 + $0x310] sm:$0xff]  }
 0x754   :  { %17298 = vmatprep.subr.bf16.mxu0 %v19518_v18  ;;  %17733 = vmatpush3.bf16.msra.mxu1 %v19521_v1  ;;  %v8472_v20 = vcombine.high %v8464_v14, %v8464_v14  ;;  %v19568_v1 = vld [vmem:[%s24657_s5 + $0x308] sm:$0xff]   ;;  %v19578_v39 = vld [vmem:[%s24657_s5 + $0x330] sm:$0xff]  }
 0x755   :  { %17734 = vmatprep.subr.bf16.mxu1 %v19523_v17  ;;  %v19569_v17 = vld [vmem:[%s24657_s5 + $0x350] sm:$0xff]   ;;  %v19575_v6 = vld [vmem:[%s24657_s5 + $0x368] sm:$0xff]  }
 0x756   :  { %v8679_v18 = vpack.c.bf16 %v8472_v20, %v8472_v20 }
 0x757   :  { %17299 = vmatpush3.bf16.msra.mxu0 %v19520_v15  ;;  %v19571_v15 = vld [vmem:[%s24657_s5 + $0x358] sm:$0xff]  }
 0x758   :  { %17300 = vmatprep.subr.bf16.mxu0 %v19522_v36  ;;  %17735 = vmatpush3.bf16.msra.mxu1 %v19525_v25  ;;  %v19572_v36 = vld [vmem:[%s24657_s5 + $0x318] sm:$0xff]   ;;  %v19573_v25 = vld [vmem:[%s24657_s5 + $0x360] sm:$0xff]  }
 0x759   :  { %17736 = vmatprep.subr.bf16.mxu1 %v19527_v59  ;;  %v19574_v59 = vld [vmem:[%s24657_s5 + $0x320] sm:$0xff]  }
 0x75b   :  { %17301 = vmatpush3.bf16.msra.mxu0 %v19524_v13  ;;  %v19576_v13 = vld [vmem:[%s24657_s5 + $0x328] sm:$0xff]  }
 0x75c   :  { %17308 = vmatprep.subr.bf16.mxu0 %v19526_v51  ;;  %17737 = vmatpush3.bf16.msra.mxu1 %v19529_v21  ;;  %v19577_v51 = vld [vmem:[%s24657_s5 + $0x370] sm:$0xff]   ;;  %v8457_v21 = vcombine.high %v8383_v10, %v8383_v10  ;;  %v19606_v10 = vld [vmem:[%s24657_s5 + $0x460] sm:$0xff]  }
 0x75d   :  { %17738 = vmatprep.subr.bf16.mxu1 %v19531_v49  ;;  %v19579_v49 = vld [vmem:[%s24657_s5 + $0x378] sm:$0xff]  }
 0x75e   :  { %12011 = vmatmul.mubr.bf16.vlgmr.msra.gmra.mrb[236].mxu0 %v8672_v3  ;;  %v19580_v3 = vld [vmem:[%s24657_s5 + $0x338] sm:$0xff]  }
 0x75f   :  { %17309 = vmatpush3.bf16.msra.mxu0 %v19528_v29  ;;  %12050 = vmatprep.mubr.bf16.mxu0 %v8675_v27  ;;  %v8471_v29 = vrot.slane %v8457_v21, %v21621_v52  ;;  %v19582_v27 = vld [vmem:[%s24657_s5 + $0x380] sm:$0xff]  }
 0x760   :  { %17310 = vmatprep.subr.bf16.mxu0 %v19530_v30  ;;  %17739 = vmatpush3.bf16.msra.mxu1 %v19533_v32  ;;  %v19581_v30 = vld [vmem:[%s24657_s5 + $0x3c0] sm:$0xff]  }
 0x761   :  { %17740 = vmatprep.subr.bf16.mxu1 %v19535_v16  ;;  %v8473_v32 = vcombine.high %v8471_v29, %v8471_v29  ;;  %v8678_v16 = vpack.c.bf16 %v8464_v14, %v8464_v14  ;;  %v19609_v14 = vld [vmem:[%s24657_s5 + $0x428] sm:$0xff]   ;;  %v19615_v21 = vld [vmem:[%s24657_s5 + $0x480] sm:$0xff]  }
 0x763   :  { %17311 = vmatpush3.bf16.msra.mxu0 %v19532_v54  ;;  %v19584_v54 = vld [vmem:[%s24657_s5 + $0x3c8] sm:$0xff]  }
 0x764   :  { %17312 = vmatprep.subr.bf16.mxu0 %v19534_v50  ;;  %17741 = vmatpush3.bf16.msra.mxu1 %v19537_v38  ;;  %v8681_v50 = vpack.c.bf16 %v8473_v32, %v8473_v32  ;;  %v19585_v38 = vld [vmem:[%s24657_s5 + $0x388] sm:$0xff]  }
 0x767   :  { %17313 = vmatpush3.bf16.msra.mxu0 %v19536_v11  ;;  %12811 = vmatmul.mubr.bf16.vlgmr.msra.gmra.mrb[64].mxu1 %v8712_v5  ;;  %v19586_v11 = vld [vmem:[%s24657_s5 + $0x3d0] sm:$0xff]   ;;  %v19588_v5 = vld [vmem:[%s24657_s5 + $0x3d8] sm:$0xff]  }
 0x768   :  { %17314 = vmatprep.subr.bf16.mxu0 %v19538_v7  ;;  %v19587_v7 = vld [vmem:[%s24657_s5 + $0x390] sm:$0xff]  }
 0x76b   :  { %17315 = vmatpush3.bf16.msra.mxu0 %v19539_v26  ;;  %v19589_v26 = vld [vmem:[%s24657_s5 + $0x398] sm:$0xff]  }
 0x76c   :  { %17316 = vmatprep.subr.bf16.mxu0 %v19540_v63  ;;  %v19590_v63 = vld [vmem:[%s24657_s5 + $0x3e0] sm:$0xff]  }
 0x76f   :  { %17317 = vmatpush3.bf16.msra.mxu0 %v19541_v22  ;;  %v19591_v22 = vld [vmem:[%s24657_s5 + $0x3a0] sm:$0xff]  }
 0x770   :  { %17318 = vmatprep.subr.bf16.mxu0 %v19542_v60  ;;  %v19592_v60 = vld [vmem:[%s24657_s5 + $0x3e8] sm:$0xff]  }
 0x773   :  { %17319 = vmatpush3.bf16.msra.mxu0 %v19543_v9  ;;  %v19593_v9 = vld [vmem:[%s24657_s5 + $0x3a8] sm:$0xff]  }
 0x774   :  { %17320 = vmatprep.subr.bf16.mxu0 %v19544_v57  ;;  %v19594_v57 = vld [vmem:[%s24657_s5 + $0x3f0] sm:$0xff]  }
 0x777   :  { %17321 = vmatpush3.bf16.msra.mxu0 %v19545_v4 }
 0x778   :  { %17322 = vmatprep.subr.bf16.mxu0 %v19546_v34  ;;  %v8384_v34 = vld [vmem:[#allocation4 + $0x20] sm:$0xff] }
 0x77b   :  { %17323 = vmatpush3.bf16.msra.mxu0 %v19547_v35 }
 0x77c   :  { %17330 = vmatprep.subr.bf16.mxu0 %v19548_v19  ;;  %v19595_v19 = vld [vmem:[%s24657_s5 + $0x3b0] sm:$0xff]  }
 0x77e   :  { %12051 = vmatmul.mubr.bf16.vlgmr.msra.gmra.mrb[240].mxu0 %v8674_v33  ;;  %v23082_v33 = vrot.slane %v8384_v34, %v21621_v52 }
 0x77f   :  { %17331 = vmatpush3.bf16.msra.mxu0 %v19549_v61  ;;  %12090 = vmatprep.mubr.bf16.mxu0 %v8677_v31  ;;  %v19596_v61 = vld [vmem:[%s24657_s5 + $0x3f8] sm:$0xff]   ;;  %v19598_v31 = vld [vmem:[%s24657_s5 + $0x440] sm:$0xff]  }
 0x780   :  { %17332 = vmatprep.subr.bf16.mxu0 %v19551_v8  ;;  %v19597_v8 = vld [vmem:[%s24657_s5 + $0x3b8] sm:$0xff]  }
 0x783   :  { %17333 = vmatpush3.bf16.msra.mxu0 %v19552_v44  ;;  %v8489_v44 = vcombine.high %v23082_v33, %v23082_v33 }
 0x784   :  { %17334 = vmatprep.subr.bf16.mxu0 %v19553_v23  ;;  %v19599_v23 = vld [vmem:[%s24657_s5 + $0x400] sm:$0xff]  }
 0x787   :  { %17335 = vmatpush3.bf16.msra.mxu0 %v19554_v40  ;;  %v8680_v40 = vpack.c.bf16 %v8471_v29, %v8471_v29 }
 0x788   :  { %17336 = vmatprep.subr.bf16.mxu0 %v19555_v46  ;;  %v19600_v46 = vld [vmem:[%s24657_s5 + $0x448] sm:$0xff]  }
 0x78b   :  { %17337 = vmatpush3.bf16.msra.mxu0 %v19556_v56  ;;  %v8683_v56 = vpack.c.bf16 %v8489_v44, %v8489_v44 }
 0x78c   :  { %17338 = vmatprep.subr.bf16.mxu0 %v19557_v41  ;;  %v19601_v41 = vld [vmem:[%s24657_s5 + $0x408] sm:$0xff]  }
 0x78f   :  { %17339 = vmatpush3.bf16.msra.mxu0 %v19558_v0  ;;  %v19602_v0 = vld [vmem:[%s24657_s5 + $0x450] sm:$0xff]  }
 0x790   :  { %17340 = vmatprep.subr.bf16.mxu0 %v19559_v28  ;;  %v19603_v28 = vld [vmem:[%s24657_s5 + $0x410] sm:$0xff]  }
 0x793   :  { %17341 = vmatpush3.bf16.msra.mxu0 %v19560_v48  ;;  %v19604_v48 = vld [vmem:[%s24657_s5 + $0x458] sm:$0xff]  }
 0x794   :  { %17342 = vmatprep.subr.bf16.mxu0 %v19561_v2  ;;  %v19605_v2 = vld [vmem:[%s24657_s5 + $0x418] sm:$0xff]  }
 0x797   :  { %17343 = vmatpush3.bf16.msra.mxu0 %v19562_v62  ;;  %v19607_v62 = vld [vmem:[%s24657_s5 + $0x420] sm:$0xff]  }
 0x798   :  { %17344 = vmatprep.subr.bf16.mxu0 %v19563_v43  ;;  %v19608_v43 = vld [vmem:[%s24657_s5 + $0x468] sm:$0xff]  }
 0x79b   :  { %17345 = vmatpush3.bf16.msra.mxu0 %v19564_v42  ;;  %v16201_v42 = vld [vmem:[%s24659_s6] ss:$0 sm:$0xff] }
 0x79c   :  { %17352 = vmatprep.subr.bf16.mxu0 %v19565_v55  ;;  %v19610_v55 = vld [vmem:[%s24657_s5 + $0x470] sm:$0xff]  }
 0x79e   :  { %12091 = vmatmul.mubr.bf16.vlgmr.msra.gmra.mrb[244].mxu0 %v8676_v24 }
 0x79f   :  { %17353 = vmatpush3.bf16.msra.mxu0 %v19566_v53  ;;  %12130 = vmatprep.mubr.bf16.mxu0 %v8679_v18  ;;  %v8474_v53 = vcombine.high %v8384_v34, %v8384_v34  ;;  %v19628_v34 = vld [vmem:[%s24657_s5 + $0x4b0] sm:$0xff]  }
 0x7a0   :  { %17354 = vmatprep.subr.bf16.mxu0 %v19567_v58 }
 0x7a3   :  { %17355 = vmatpush3.bf16.msra.mxu0 %v19568_v1 }
 0x7a4   :  { %17356 = vmatprep.subr.bf16.mxu0 %v19569_v17  ;;  %v19611_v17 = vld [vmem:[%s24657_s5 + $0x430] sm:$0xff]  }
 0x7a7   :  { %17357 = vmatpush3.bf16.msra.mxu0 %v19570_v12 }
 0x7a8   :  { %17358 = vmatprep.subr.bf16.mxu0 %v19571_v15  ;;  %v19612_v15 = vld [vmem:[%s24657_s5 + $0x478] sm:$0xff]  }
 0x7ab   :  { %17359 = vmatpush3.bf16.msra.mxu0 %v19572_v36 }
 0x7ac   :  { %17360 = vmatprep.subr.bf16.mxu0 %v19573_v25  ;;  %v23138_v25 = vrot.slane %v8474_v53, %v21621_v52  ;;  %v19643_v53 = vld [vmem:[%s24657_s5 + $0x570] sm:$0xff]  }
 0x7af   :  { %17361 = vmatpush3.bf16.msra.mxu0 %v19574_v59  ;;  %v19613_v59 = vld [vmem:[%s24657_s5 + $0x438] sm:$0xff]  }
 0x7b0   :  { %17362 = vmatprep.subr.bf16.mxu0 %v19575_v6  ;;  %v19614_v6 = vld [vmem:[%s24657_s5 + $0x4c0] sm:$0xff]  }
 0x7b3   :  { %17363 = vmatpush3.bf16.msra.mxu0 %v19576_v13  ;;  %v8490_v13 = vcombine.high %v23138_v25, %v23138_v25 }
 0x7b4   :  { %17364 = vmatprep.subr.bf16.mxu0 %v19577_v51 }
 0x7b5   :  { %v8685_v32 = vpack.c.bf16 %v8490_v13, %v8490_v13  ;;  %v19647_v13 = vld [vmem:[%s24657_s5 + $0x5c0] sm:$0xff]  }
 0x7b7   :  { %17365 = vmatpush3.bf16.msra.mxu0 %v19578_v39 }
 0x7b8   :  { %17366 = vmatprep.subr.bf16.mxu0 %v19579_v49  ;;  %v8682_v49 = vpack.c.bf16 %v23082_v33, %v23082_v33  ;;  %v19631_v33 = vld [vmem:[%s24657_s5 + $0x540] sm:$0xff]  }
 0x7bb   :  { %17367 = vmatpush3.bf16.msra.mxu0 %v19580_v3 }
 0x7bc   :  { %17374 = vmatprep.subr.bf16.mxu0 %v19581_v30  ;;  %v19617_v30 = vld [vmem:[%s24657_s5 + $0x4c8] sm:$0xff]  }
 0x7be   :  { %12131 = vmatmul.mubr.bf16.vlgmr.msra.gmra.mrb[248].mxu0 %v8678_v16  ;;  %v19618_v16 = vld [vmem:[%s24657_s5 + $0x488] sm:$0xff]  }
 0x7bf   :  { %17375 = vmatpush3.bf16.msra.mxu0 %v19582_v27  ;;  %12170 = vmatprep.mubr.bf16.mxu0 %v8681_v50  ;;  %v19620_v50 = vld [vmem:[%s24657_s5 + $0x490] sm:$0xff]  }
 0x7c0   :  { %17376 = vmatprep.subr.bf16.mxu0 %v19584_v54  ;;  %v19619_v54 = vld [vmem:[%s24657_s5 + $0x4d0] sm:$0xff]  }
 0x7c3   :  { %17377 = vmatpush3.bf16.msra.mxu0 %v19585_v38  ;;  %v19621_v38 = vld [vmem:[%s24657_s5 + $0x4d8] sm:$0xff]  }
 0x7c4   :  { %17378 = vmatprep.subr.bf16.mxu0 %v19586_v11  ;;  %v19622_v11 = vld [vmem:[%s24657_s5 + $0x498] sm:$0xff]  }
 0x7c7   :  { %17379 = vmatpush3.bf16.msra.mxu0 %v19587_v7  ;;  %v19623_v7 = vld [vmem:[%s24657_s5 + $0x4e0] sm:$0xff]  }
 0x7c8   :  { %17380 = vmatprep.subr.bf16.mxu0 %v19588_v5  ;;  %v19624_v5 = vld [vmem:[%s24657_s5 + $0x4a0] sm:$0xff]  }
 0x7cb   :  { %17381 = vmatpush3.bf16.msra.mxu0 %v19589_v26  ;;  %v19625_v26 = vld [vmem:[%s24657_s5 + $0x4e8] sm:$0xff]  }
 0x7cc   :  { %17382 = vmatprep.subr.bf16.mxu0 %v19590_v63  ;;  %v19626_v63 = vld [vmem:[%s24657_s5 + $0x4a8] sm:$0xff]  }
 0x7ce   :  { %v17236_v47 = vpop.f32.mrb[224].mxu0 }
 0x7cf   :  { %17383 = vmatpush3.bf16.msra.mxu0 %v19591_v22  ;;  %v17237_v4 = vpop.f32.mrb[225].mxu0  ;;  %v19627_v22 = vld [vmem:[%s24657_s5 + $0x4f0] sm:$0xff]  }
 0x7d0   :  { %17384 = vmatprep.subr.bf16.mxu0 %v19592_v60  ;;  %v17238_v45 = vadd.f32 %v17237_v4, %v17236_v47  ;;  %v17239_v35 = vpop.f32.mrb[226].mxu0 }
 0x7d1   :  { %v17240_v37 = vpop.f32.mrb[227].mxu0  ;;  %v19629_v35 = vld [vmem:[%s24657_s5 + $0x4f8] sm:$0xff]  }
 0x7d2   :  { %v11893_v58 = vadd.f32 %v17238_v45, %v16201_v42  ;;  %v19640_v42 = vld [vmem:[%s24657_s5 + $0x520] sm:$0xff]  }
 0x7d3   :  { %17385 = vmatpush3.bf16.msra.mxu0 %v19593_v9 }
 0x7d4   :  { %17386 = vmatprep.subr.bf16.mxu0 %v19594_v57  ;;  %v8385_v57 = vld [vmem:[#allocation4 + $0x28] sm:$0xff] }
 0x7d5   :  { %v23195_v37 = vrot.slane %v8385_v57, %v21621_v52 }
 0x7d7   :  { %17387 = vmatpush3.bf16.msra.mxu0 %v19595_v19 }
 0x7d8   :  { %17388 = vmatprep.subr.bf16.mxu0 %v19596_v61  ;;  %v19630_v61 = vld [vmem:[%s24657_s5 + $0x4b8] sm:$0xff]  }
 0x7db   :  { %17389 = vmatpush3.bf16.msra.mxu0 %v19597_v8  ;;  %v8506_v8 = vcombine.high %v23195_v37, %v23195_v37 }
 0x7dc   :  { %17396 = vmatprep.subr.bf16.mxu0 %v19598_v31 }
 0x7de   :  { %12171 = vmatmul.mubr.bf16.vlgmr.msra.gmra.mrb[252].mxu0 %v8680_v40  ;;  %v8684_v40 = vpack.c.bf16 %v23138_v25, %v23138_v25 }
 0x7df   :  { %17397 = vmatpush3.bf16.msra.mxu0 %v19599_v23  ;;  %12210 = vmatprep.mubr.bf16.mxu0 %v8683_v56  ;;  %v19632_v23 = vld [vmem:[%s24657_s5 + $0x500] sm:$0xff]  }
 0x7e0   :  { %17398 = vmatprep.subr.bf16.mxu0 %v19600_v46 }
 0x7e3   :  { %17399 = vmatpush3.bf16.msra.mxu0 %v19601_v41  ;;  %v19633_v41 = vld [vmem:[%s24657_s5 + $0x548] sm:$0xff]  }
 0x7e4   :  { %17400 = vmatprep.subr.bf16.mxu0 %v19602_v0  ;;  %v8687_v0 = vpack.c.bf16 %v8506_v8, %v8506_v8  ;;  %v19663_v8 = vld [vmem:[%s24657_s5 + $0x5b8] sm:$0xff]  }
 0x7e7   :  { %17401 = vmatpush3.bf16.msra.mxu0 %v19603_v28 }
 0x7e8   :  { %17402 = vmatprep.subr.bf16.mxu0 %v19604_v48  ;;  %v19634_v48 = vld [vmem:[%s24657_s5 + $0x508] sm:$0xff]  }
 0x7eb   :  { %17403 = vmatpush3.bf16.msra.mxu0 %v19605_v2  ;;  %v19635_v2 = vld [vmem:[%s24657_s5 + $0x550] sm:$0xff]  }
 0x7ec   :  { %17404 = vmatprep.subr.bf16.mxu0 %v19606_v10  ;;  %v19636_v10 = vld [vmem:[%s24657_s5 + $0x510] sm:$0xff]  }
 0x7ef   :  { %17405 = vmatpush3.bf16.msra.mxu0 %v19607_v62  ;;  %v17258_v20 = vpop.f32.mrb[228].mxu0  ;;  %v19637_v62 = vld [vmem:[%s24657_s5 + $0x558] sm:$0xff]  }
 0x7f0   :  { %17406 = vmatprep.subr.bf16.mxu0 %v19608_v43  ;;  %v17259_v24 = vpop.f32.mrb[229].mxu0  ;;  %v19638_v43 = vld [vmem:[%s24657_s5 + $0x518] sm:$0xff]  }
 0x7f1   :  { %v17260_v18 = vadd.f32 %v17259_v24, %v17258_v20  ;;  %v17261_v1 = vpop.f32.mrb[230].mxu0  ;;  %v19642_v20 = vld [vmem:[%s24657_s5 + $0x528] sm:$0xff]  }
 0x7f2   :  { %v17262_v12 = vpop.f32.mrb[231].mxu0 }
 0x7f3   :  { %17407 = vmatpush3.bf16.msra.mxu0 %v19609_v14  ;;  %v11933_v36 = vadd.f32 %v17260_v18, %v11893_v58  ;;  %v19639_v14 = vld [vmem:[%s24657_s5 + $0x560] sm:$0xff]   ;;  %v8491_v58 = vcombine.high %v8385_v57, %v8385_v57  ;;  %v19644_v12 = vld [vmem:[%s24657_s5 + $0x530] sm:$0xff]  }
 0x7f4   :  { %17408 = vmatprep.subr.bf16.mxu0 %v19610_v55  ;;  %v19641_v55 = vld [vmem:[%s24657_s5 + $0x568] sm:$0xff]  }
 0x7f7   :  { %17409 = vmatpush3.bf16.msra.mxu0 %v19611_v17 }
 0x7f8   :  { %17410 = vmatprep.subr.bf16.mxu0 %v19612_v15 }
 0x7f9   :  { %v17654_v51 = vpop.f32.mrb[56].mxu1 }
 0x7fa   :  { %v17655_v39 = vpop.f32.mrb[57].mxu1 }
 0x7fb   :  { %17411 = vmatpush3.bf16.msra.mxu0 %v19613_v59  ;;  %v23153_v29 = vadd.f32 %v17655_v39, %v17654_v51  ;;  %v17657_v3 = vpop.f32.mrb[58].mxu1  ;;  %v8505_v59 = vrot.slane %v8491_v58, %v21621_v52 }
 0x7fc   :  { %17418 = vmatprep.subr.bf16.mxu0 %v19614_v6  ;;  %v17658_v27 = vpop.f32.mrb[59].mxu1  ;;  %v19646_v6 = vld [vmem:[%s24657_s5 + $0x538] sm:$0xff]   ;;  %v8686_v3 = vpack.c.bf16 %v23195_v37, %v23195_v37 }
 0x7fd   :  { %v8507_v51 = vcombine.high %v8505_v59, %v8505_v59  ;;  %v19650_v27 = vld [vmem:[%s24657_s5 + $0x5c8] sm:$0xff]   ;;  %v19662_v37 = vld [vmem:[%s24657_s5 + $0x5f8] sm:$0xff]  }
 0x7fe   :  { %12211 = vmatmul.mubr.bf16.vlgmr.msra.gmra.mrb[0].mxu0 %v8682_v49  ;;  %v19648_v49 = vld [vmem:[%s24657_s5 + $0x580] sm:$0xff]  }
 0x7ff   :  { %17419 = vmatpush3.bf16.msra.mxu0 %v19615_v21  ;;  %12250 = vmatprep.mubr.bf16.mxu0 %v8685_v32 }
 0x800   :  { %17420 = vmatprep.subr.bf16.mxu0 %v19617_v30 }
 0x803   :  { %17421 = vmatpush3.bf16.msra.mxu0 %v19618_v16  ;;  %v8689_v16 = vpack.c.bf16 %v8507_v51, %v8507_v51 }
 0x804   :  { %17422 = vmatprep.subr.bf16.mxu0 %v19619_v54 }
 0x807   :  { %17423 = vmatpush3.bf16.msra.mxu0 %v19620_v50  ;;  %v19651_v50 = vld [vmem:[%s24657_s5 + $0x588] sm:$0xff]  }
 0x808   :  { %17424 = vmatprep.subr.bf16.mxu0 %v19621_v38  ;;  %v19652_v38 = vld [vmem:[%s24657_s5 + $0x5d0] sm:$0xff]  }
 0x80b   :  { %17425 = vmatpush3.bf16.msra.mxu0 %v19622_v11  ;;  %v19653_v11 = vld [vmem:[%s24657_s5 + $0x590] sm:$0xff]  }
 0x80c   :  { %17426 = vmatprep.subr.bf16.mxu0 %v19623_v7  ;;  %v19654_v7 = vld [vmem:[%s24657_s5 + $0x5d8] sm:$0xff]  }
 0x80f   :  { %17427 = vmatpush3.bf16.msra.mxu0 %v19624_v5  ;;  %v19655_v5 = vld [vmem:[%s24657_s5 + $0x598] sm:$0xff]  }
 0x810   :  { %17428 = vmatprep.subr.bf16.mxu0 %v19625_v26  ;;  %v17280_v60 = vpop.f32.mrb[232].mxu0  ;;  %v19656_v26 = vld [vmem:[%s24657_s5 + $0x5e0] sm:$0xff]  }
 0x811   :  { %v17281_v9 = vpop.f32.mrb[233].mxu0 }
 0x812   :  { %v17282_v47 = vadd.f32 %v17281_v9, %v17280_v60  ;;  %v17283_v4 = vpop.f32.mrb[234].mxu0  ;;  %v19659_v60 = vld [vmem:[%s24657_s5 + $0x5a8] sm:$0xff]   ;;  %v19660_v9 = vld [vmem:[%s24657_s5 + $0x5f0] sm:$0xff]  }
 0x813   :  { %17429 = vmatpush3.bf16.msra.mxu0 %v19626_v63  ;;  %v17284_v45 = vpop.f32.mrb[235].mxu0  ;;  %v19657_v63 = vld [vmem:[%s24657_s5 + $0x5a0] sm:$0xff]   ;;  %v8386_v4 = vld [vmem:[#allocation4 + $0x30] sm:$0xff] }
 0x814   :  { %17430 = vmatprep.subr.bf16.mxu0 %v19627_v22  ;;  %v11973_v19 = vadd.f32 %v17282_v47, %v11933_v36  ;;  %v19645_v36 = vld [vmem:[%s24657_s5 + $0x578] sm:$0xff]   ;;  %v19658_v22 = vld [vmem:[%s24657_s5 + $0x5e8] sm:$0xff]  }
 0x817   :  { %17431 = vmatpush3.bf16.msra.mxu0 %v19628_v34 }
 0x818   :  { %17432 = vmatprep.subr.bf16.mxu0 %v19629_v35  ;;  %v19661_v35 = vld [vmem:[%s24657_s5 + $0x5b0] sm:$0xff]  }
 0x81a   :  { %v17698_v31 = vpop.f32.mrb[60].mxu1 }
 0x81b   :  { %17433 = vmatpush3.bf16.msra.mxu0 %v19630_v61  ;;  %v17699_v44 = vpop.f32.mrb[61].mxu1 }
 0x81c   :  { %17440 = vmatprep.subr.bf16.mxu0 %v19631_v33  ;;  %v23210_v46 = vadd.f32 %v17699_v44, %v17698_v31  ;;  %v17701_v56 = vpop.f32.mrb[62].mxu1  ;;  %v8515_v33 = vrot.slane %v8386_v4, %v21621_v52  ;;  %v19664_v31 = vld [vmem:[%s24657_s5 + $0x640] sm:$0xff]  }
 0x81d   :  { %v17702_v28 = vpop.f32.mrb[63].mxu1  ;;  %v19666_v56 = vld [vmem:[%s24657_s5 + $0x648] sm:$0xff]  }
 0x81e   :  { %12251 = vmatmul.mubr.bf16.vlgmr.msra.gmra.mrb[4].mxu0 %v8684_v40  ;;  %v8523_v44 = vcombine.high %v8515_v33, %v8515_v33  ;;  %v8688_v40 = vpack.c.bf16 %v8505_v59, %v8505_v59  ;;  %v19668_v28 = vld [vmem:[%s24657_s5 + $0x650] sm:$0xff]   ;;  %v19680_v59 = vld [vmem:[%s24657_s5 + $0x6c0] sm:$0xff]   ;;  %v8690_v51 = vpack.c.bf16 %v8515_v33, %v8515_v33  ;;  %v19699_v33 = vld [vmem:[%s24657_s5 + $0x748] sm:$0xff]  }
 0x81f   :  { %17441 = vmatpush3.bf16.msra.mxu0 %v19632_v23  ;;  %12290 = vmatprep.mubr.bf16.mxu0 %v8687_v0  ;;  %v19665_v23 = vld [vmem:[%s24657_s5 + $0x600] sm:$0xff]   ;;  %v19667_v0 = vld [vmem:[%s24657_s5 + $0x608] sm:$0xff]  }
 0x820   :  { %17442 = vmatprep.subr.bf16.mxu0 %v19633_v41  ;;  %v8691_v41 = vpack.c.bf16 %v8523_v44, %v8523_v44  ;;  %v19701_v44 = vld [vmem:[%s24657_s5 + $0x750] sm:$0xff]  }
 0x823   :  { %17443 = vmatpush3.bf16.msra.mxu0 %v19634_v48  ;;  %v19669_v48 = vld [vmem:[%s24657_s5 + $0x610] sm:$0xff]  }
 0x824   :  { %17444 = vmatprep.subr.bf16.mxu0 %v19635_v2  ;;  %v19670_v2 = vld [vmem:[%s24657_s5 + $0x658] sm:$0xff]  }
 0x827   :  { %17445 = vmatpush3.bf16.msra.mxu0 %v19636_v10  ;;  %v19671_v10 = vld [vmem:[%s24657_s5 + $0x618] sm:$0xff]  }
 0x828   :  { %17446 = vmatprep.subr.bf16.mxu0 %v19637_v62  ;;  %v19672_v62 = vld [vmem:[%s24657_s5 + $0x660] sm:$0xff]  }
 0x82b   :  { %17447 = vmatpush3.bf16.msra.mxu0 %v19638_v43  ;;  %v19673_v43 = vld [vmem:[%s24657_s5 + $0x620] sm:$0xff]  }
 0x82c   :  { %17448 = vmatprep.subr.bf16.mxu0 %v19639_v14  ;;  %v19674_v14 = vld [vmem:[%s24657_s5 + $0x668] sm:$0xff]  }
 0x82f   :  { %17449 = vmatpush3.bf16.msra.mxu0 %v19640_v42  ;;  %v19675_v42 = vld [vmem:[%s24657_s5 + $0x628] sm:$0xff]  }
 0x830   :  { %17450 = vmatprep.subr.bf16.mxu0 %v19641_v55  ;;  %v19676_v55 = vld [vmem:[%s24657_s5 + $0x670] sm:$0xff]  }
 0x831   :  { %v17302_v24 = vpop.f32.mrb[236].mxu0 }
 0x832   :  { %v17303_v18 = vpop.f32.mrb[237].mxu0 }
 0x833   :  { %v17304_v1 = vadd.f32 %v17303_v18, %v17302_v24  ;;  %v17305_v17 = vpop.f32.mrb[238].mxu0  ;;  %17451 = vmatpush3.bf16.msra.mxu0 %v19642_v20 }
 0x834   :  { %v17306_v15 = vpop.f32.mrb[239].mxu0  ;;  %17452 = vmatprep.subr.bf16.mxu0 %v19643_v53  ;;  %v8508_v53 = vcombine.high %v8386_v4, %v8386_v4 }
 0x835   :  { %v12013_v25 = vadd.f32 %v17304_v1, %v11973_v19  ;;  %v19677_v1 = vld [vmem:[%s24657_s5 + $0x630] sm:$0xff]  }
 0x837   :  { %17453 = vmatpush3.bf16.msra.mxu0 %v19644_v12  ;;  %v19678_v12 = vld [vmem:[%s24657_s5 + $0x678] sm:$0xff]  }
 0x838   :  { %17454 = vmatprep.subr.bf16.mxu0 %v19645_v36  ;;  %v8522_v36 = vrot.slane %v8508_v53, %v21621_v52  ;;  %v19711_v53 = vld [vmem:[%s24657_s5 + $0x778] sm:$0xff]  }
 0x83a   :  { %v17742_v21 = vpop.f32.mrb[64].mxu1 }
 0x83b   :  { %17455 = vmatpush3.bf16.msra.mxu0 %v19646_v6  ;;  %v17743_v39 = vpop.f32.mrb[65].mxu1  ;;  %v8524_v6 = vcombine.high %v8522_v36, %v8522_v36 }
 0x83c   :  { %17462 = vmatprep.subr.bf16.mxu0 %v19647_v13  ;;  %v23263_v30 = vadd.f32 %v17743_v39, %v17742_v21  ;;  %v17745_v32 = vpop.f32.mrb[66].mxu1  ;;  %v19681_v13 = vld [vmem:[%s24657_s5 + $0x680] sm:$0xff]   ;;  %v19683_v21 = vld [vmem:[%s24657_s5 + $0x6c8] sm:$0xff]  }
 0x83d   :  { %v17746_v54 = vpop.f32.mrb[67].mxu1  ;;  %v8693_v39 = vpack.c.bf16 %v8524_v6, %v8524_v6  ;;  %v19686_v32 = vld [vmem:[%s24657_s5 + $0x690] sm:$0xff]  }
 0x83e   :  { %12291 = vmatmul.mubr.bf16.vlgmr.msra.gmra.mrb[8].mxu0 %v8686_v3  ;;  %v19685_v3 = vld [vmem:[%s24657_s5 + $0x6d0] sm:$0xff]   ;;  %v19689_v54 = vld [vmem:[%s24657_s5 + $0x6e0] sm:$0xff]  }
 0x83f   :  { %17463 = vmatpush3.bf16.msra.mxu0 %v19648_v49  ;;  %12330 = vmatprep.mubr.bf16.mxu0 %v8689_v16  ;;  %v19684_v49 = vld [vmem:[%s24657_s5 + $0x688] sm:$0xff]   ;;  %v19688_v16 = vld [vmem:[%s24657_s5 + $0x698] sm:$0xff]   ;;  %v19718_v6 = vld [vmem:[%s24657_s5 + $0x7d0] sm:$0xff]  }
 0x840   :  { %17464 = vmatprep.subr.bf16.mxu0 %v19650_v27  ;;  %v19687_v27 = vld [vmem:[%s24657_s5 + $0x6d8] sm:$0xff]  }
 0x843   :  { %17465 = vmatpush3.bf16.msra.mxu0 %v19651_v50  ;;  %v19690_v50 = vld [vmem:[%s24657_s5 + $0x6a0] sm:$0xff]  }
 0x844   :  { %17466 = vmatprep.subr.bf16.mxu0 %v19652_v38  ;;  %v19691_v38 = vld [vmem:[%s24657_s5 + $0x6e8] sm:$0xff]  }
 0x847   :  { %17467 = vmatpush3.bf16.msra.mxu0 %v19653_v11  ;;  %v19692_v11 = vld [vmem:[%s24657_s5 + $0x6a8] sm:$0xff]  }
 0x848   :  { %17468 = vmatprep.subr.bf16.mxu0 %v19654_v7  ;;  %v19693_v7 = vld [vmem:[%s24657_s5 + $0x6f0] sm:$0xff]  }
 0x84b   :  { %17469 = vmatpush3.bf16.msra.mxu0 %v19655_v5 }
 0x84c   :  { %17470 = vmatprep.subr.bf16.mxu0 %v19656_v26 }
 0x84f   :  { %17471 = vmatpush3.bf16.msra.mxu0 %v19657_v63  ;;  %v8387_v63 = vld [vmem:[#allocation4 + $0x38] sm:$0xff] }
 0x850   :  { %17472 = vmatprep.subr.bf16.mxu0 %v19658_v22 }
 0x851   :  { %v17324_v57 = vpop.f32.mrb[240].mxu0 }
 0x852   :  { %v17325_v47 = vpop.f32.mrb[241].mxu0 }
 0x853   :  { %v17326_v34 = vadd.f32 %v17325_v47, %v17324_v57  ;;  %v17327_v45 = vpop.f32.mrb[242].mxu0  ;;  %17473 = vmatpush3.bf16.msra.mxu0 %v19659_v60  ;;  %v19695_v47 = vld [vmem:[%s24657_s5 + $0x6f8] sm:$0xff]  }
 0x854   :  { %v17328_v19 = vpop.f32.mrb[243].mxu0  ;;  %17474 = vmatprep.subr.bf16.mxu0 %v19660_v9  ;;  %v19694_v9 = vld [vmem:[%s24657_s5 + $0x6b0] sm:$0xff]   ;;  %v19696_v45 = vld [vmem:[%s24657_s5 + $0x6b8] sm:$0xff]  }
 0x855   :  { %v12053_v61 = vadd.f32 %v17326_v34, %v12013_v25  ;;  %v19679_v25 = vld [vmem:[%s24657_s5 + $0x638] sm:$0xff]   ;;  %v8532_v34 = vrot.slane %v8387_v63, %v21621_v52 }
 0x857   :  { %17475 = vmatpush3.bf16.msra.mxu0 %v19661_v35  ;;  %v19697_v35 = vld [vmem:[%s24657_s5 + $0x740] sm:$0xff]   ;;  %v8540_v19 = vcombine.high %v8532_v34, %v8532_v34 }
 0x858   :  { %17476 = vmatprep.subr.bf16.mxu0 %v19662_v37  ;;  %v19698_v37 = vld [vmem:[%s24657_s5 + $0x700] sm:$0xff]  }
 0x85b   :  { %17477 = vmatpush3.bf16.msra.mxu0 %v19663_v8  ;;  %v8695_v8 = vpack.c.bf16 %v8540_v19, %v8540_v19  ;;  %v19734_v19 = vld [vmem:[%s24657_s5 + $0x850] sm:$0xff]  }
 0x85c   :  { %17484 = vmatprep.subr.bf16.mxu0 %v19664_v31  ;;  %v19700_v31 = vld [vmem:[%s24657_s5 + $0x708] sm:$0xff]  }
 0x85e   :  { %12331 = vmatmul.mubr.bf16.vlgmr.msra.gmra.mrb[12].mxu0 %v8688_v40  ;;  %v19703_v40 = vld [vmem:[%s24657_s5 + $0x758] sm:$0xff]  }
 0x85f   :  { %17485 = vmatpush3.bf16.msra.mxu0 %v19665_v23  ;;  %12370 = vmatprep.mubr.bf16.mxu0 %v8691_v41  ;;  %v19702_v23 = vld [vmem:[%s24657_s5 + $0x710] sm:$0xff]   ;;  %v19705_v41 = vld [vmem:[%s24657_s5 + $0x760] sm:$0xff]  }
 0x860   :  { %17486 = vmatprep.subr.bf16.mxu0 %v19666_v56  ;;  %v19704_v56 = vld [vmem:[%s24657_s5 + $0x718] sm:$0xff]  }
 0x863   :  { %17487 = vmatpush3.bf16.msra.mxu0 %v19667_v0  ;;  %v19706_v0 = vld [vmem:[%s24657_s5 + $0x720] sm:$0xff]  }
 0x864   :  { %17488 = vmatprep.subr.bf16.mxu0 %v19668_v28  ;;  %v19707_v28 = vld [vmem:[%s24657_s5 + $0x768] sm:$0xff]  }
 0x867   :  { %17489 = vmatpush3.bf16.msra.mxu0 %v19669_v48  ;;  %v19708_v48 = vld [vmem:[%s24657_s5 + $0x728] sm:$0xff]  }
 0x868   :  { %17490 = vmatprep.subr.bf16.mxu0 %v19670_v2  ;;  %v19709_v2 = vld [vmem:[%s24657_s5 + $0x770] sm:$0xff]  }
 0x86b   :  { %17491 = vmatpush3.bf16.msra.mxu0 %v19671_v10 }
 0x86c   :  { %17492 = vmatprep.subr.bf16.mxu0 %v19672_v62  ;;  %v8525_v62 = vcombine.high %v8387_v63, %v8387_v63 }
 0x86f   :  { %17493 = vmatpush3.bf16.msra.mxu0 %v19673_v43 }
 0x870   :  { %17494 = vmatprep.subr.bf16.mxu0 %v19674_v14 }
 0x871   :  { %v17346_v20 = vpop.f32.mrb[244].mxu0 }
 0x872   :  { %v17347_v24 = vpop.f32.mrb[245].mxu0 }
 0x873   :  { %v17348_v58 = vadd.f32 %v17347_v24, %v17346_v20  ;;  %v17349_v18 = vpop.f32.mrb[246].mxu0  ;;  %17495 = vmatpush3.bf16.msra.mxu0 %v19675_v42 }
 0x874   :  { %v17350_v17 = vpop.f32.mrb[247].mxu0  ;;  %17496 = vmatprep.subr.bf16.mxu0 %v19676_v55  ;;  %v19710_v55 = vld [vmem:[%s24657_s5 + $0x730] sm:$0xff]   ;;  %v19712_v18 = vld [vmem:[%s24657_s5 + $0x738] sm:$0xff]  }
 0x875   :  { %v12093_v15 = vadd.f32 %v17348_v58, %v12053_v61  ;;  %v8692_v61 = vpack.c.bf16 %v8522_v36, %v8522_v36  ;;  %v8539_v58 = vrot.slane %v8525_v62, %v21621_v52  ;;  %v19716_v36 = vld [vmem:[%s24657_s5 + $0x7c8] sm:$0xff]   ;;  %v19744_v62 = vld [vmem:[%s24657_s5 + $0x878] sm:$0xff]  }
 0x877   :  { %17497 = vmatpush3.bf16.msra.mxu0 %v19677_v1  ;;  %v19713_v1 = vld [vmem:[%s24657_s5 + $0x7c0] sm:$0xff]   ;;  %v8541_v17 = vcombine.high %v8539_v58, %v8539_v58 }
 0x878   :  { %17498 = vmatprep.subr.bf16.mxu0 %v19678_v12  ;;  %v19714_v12 = vld [vmem:[%s24657_s5 + $0x780] sm:$0xff]  }
 0x87b   :  { %17499 = vmatpush3.bf16.msra.mxu0 %v19679_v25  ;;  %v8697_v25 = vpack.c.bf16 %v8541_v17, %v8541_v17  ;;  %v19752_v17 = vld [vmem:[%s24657_s5 + $0x890] sm:$0xff]  }
 0x87c   :  { %17506 = vmatprep.subr.bf16.mxu0 %v19680_v59  ;;  %v19717_v59 = vld [vmem:[%s24657_s5 + $0x788] sm:$0xff]  }
 0x87e   :  { %12371 = vmatmul.mubr.bf16.vlgmr.msra.gmra.mrb[16].mxu0 %v8690_v51  ;;  %v19720_v51 = vld [vmem:[%s24657_s5 + $0x7d8] sm:$0xff]  }
 0x87f   :  { %17507 = vmatpush3.bf16.msra.mxu0 %v19681_v13  ;;  %12410 = vmatprep.mubr.bf16.mxu0 %v8693_v39  ;;  %v19719_v13 = vld [vmem:[%s24657_s5 + $0x790] sm:$0xff]   ;;  %v19722_v39 = vld [vmem:[%s24657_s5 + $0x7e0] sm:$0xff]  }
 0x880   :  { %17508 = vmatprep.subr.bf16.mxu0 %v19683_v21  ;;  %v19721_v21 = vld [vmem:[%s24657_s5 + $0x798] sm:$0xff]  }
 0x883   :  { %17509 = vmatpush3.bf16.msra.mxu0 %v19684_v49  ;;  %v19723_v49 = vld [vmem:[%s24657_s5 + $0x7a0] sm:$0xff]  }
 0x884   :  { %17510 = vmatprep.subr.bf16.mxu0 %v19685_v3  ;;  %v19724_v3 = vld [vmem:[%s24657_s5 + $0x7e8] sm:$0xff]  }
 0x887   :  { %17511 = vmatpush3.bf16.msra.mxu0 %v19686_v32  ;;  %v19725_v32 = vld [vmem:[%s24657_s5 + $0x7a8] sm:$0xff]  }
 0x888   :  { %17512 = vmatprep.subr.bf16.mxu0 %v19687_v27  ;;  %v19726_v27 = vld [vmem:[%s24657_s5 + $0x7f0] sm:$0xff]  }
 0x88b   :  { %17513 = vmatpush3.bf16.msra.mxu0 %v19688_v16 }
 0x88c   :  { %17514 = vmatprep.subr.bf16.mxu0 %v19689_v54 }
 0x88f   :  { %17515 = vmatpush3.bf16.msra.mxu0 %v19690_v50  ;;  %v8388_v50 = vld [vmem:[#allocation4 + $0x40] sm:$0xff] }
 0x890   :  { %17516 = vmatprep.subr.bf16.mxu0 %v19691_v38 }
 0x891   :  { %v17368_v5 = vpop.f32.mrb[248].mxu0 }
 0x892   :  { %v17369_v26 = vpop.f32.mrb[249].mxu0 }
 0x893   :  { %v17370_v22 = vadd.f32 %v17369_v26, %v17368_v5  ;;  %v17371_v60 = vpop.f32.mrb[250].mxu0  ;;  %17517 = vmatpush3.bf16.msra.mxu0 %v19692_v11  ;;  %v19728_v26 = vld [vmem:[%s24657_s5 + $0x7f8] sm:$0xff]  }
 0x894   :  { %v17372_v57 = vpop.f32.mrb[251].mxu0  ;;  %17518 = vmatprep.subr.bf16.mxu0 %v19693_v7  ;;  %v19727_v7 = vld [vmem:[%s24657_s5 + $0x7b0] sm:$0xff]   ;;  %v19729_v60 = vld [vmem:[%s24657_s5 + $0x7b8] sm:$0xff]  }
 0x895   :  { %v12133_v4 = vadd.f32 %v17370_v22, %v12093_v15  ;;  %v8694_v15 = vpack.c.bf16 %v8532_v34, %v8532_v34  ;;  %v8549_v22 = vrot.slane %v8388_v50, %v21621_v52  ;;  %v19732_v34 = vld [vmem:[%s24657_s5 + $0x848] sm:$0xff]  }
 0x897   :  { %17519 = vmatpush3.bf16.msra.mxu0 %v19694_v9  ;;  %v19730_v9 = vld [vmem:[%s24657_s5 + $0x840] sm:$0xff]   ;;  %v8557_v57 = vcombine.high %v8549_v22, %v8549_v22 }
 0x898   :  { %17520 = vmatprep.subr.bf16.mxu0 %v19695_v47  ;;  %v19731_v47 = vld [vmem:[%s24657_s5 + $0x800] sm:$0xff]  }
 0x89b   :  { %17521 = vmatpush3.bf16.msra.mxu0 %v19696_v45  ;;  %v8699_v45 = vpack.c.bf16 %v8557_v57, %v8557_v57  ;;  %v19769_v57 = vld [vmem:[%s24657_s5 + $0x958] sm:$0xff]  }
 0x89c   :  { %17528 = vmatprep.subr.bf16.mxu0 %v19697_v35  ;;  %v19733_v35 = vld [vmem:[%s24657_s5 + $0x808] sm:$0xff]  }
 0x89e   :  { %12411 = vmatmul.mubr.bf16.vlgmr.msra.gmra.mrb[20].mxu0 %v8692_v61  ;;  %v19736_v61 = vld [vmem:[%s24657_s5 + $0x858] sm:$0xff]  }
 0x89f   :  { %17529 = vmatpush3.bf16.msra.mxu0 %v19698_v37  ;;  %12450 = vmatprep.mubr.bf16.mxu0 %v8695_v8  ;;  %v19735_v37 = vld [vmem:[%s24657_s5 + $0x810] sm:$0xff]   ;;  %v19738_v8 = vld [vmem:[%s24657_s5 + $0x860] sm:$0xff]  }
 0x8a0   :  { %17530 = vmatprep.subr.bf16.mxu0 %v19699_v33  ;;  %v19737_v33 = vld [vmem:[%s24657_s5 + $0x818] sm:$0xff]  }
 0x8a3   :  { %17531 = vmatpush3.bf16.msra.mxu0 %v19700_v31  ;;  %v19739_v31 = vld [vmem:[%s24657_s5 + $0x820] sm:$0xff]  }
 0x8a4   :  { %17532 = vmatprep.subr.bf16.mxu0 %v19701_v44  ;;  %v19740_v44 = vld [vmem:[%s24657_s5 + $0x868] sm:$0xff]  }
 0x8a7   :  { %17533 = vmatpush3.bf16.msra.mxu0 %v19702_v23  ;;  %v19741_v23 = vld [vmem:[%s24657_s5 + $0x828] sm:$0xff]  }
 0x8a8   :  { %17534 = vmatprep.subr.bf16.mxu0 %v19703_v40  ;;  %v19742_v40 = vld [vmem:[%s24657_s5 + $0x870] sm:$0xff]  }
 0x8ab   :  { %17535 = vmatpush3.bf16.msra.mxu0 %v19704_v56 }
 0x8ac   :  { %17536 = vmatprep.subr.bf16.mxu0 %v19705_v41  ;;  %v8542_v41 = vcombine.high %v8388_v50, %v8388_v50  ;;  %v19762_v50 = vld [vmem:[%s24657_s5 + $0x8b8] sm:$0xff]  }
 0x8af   :  { %17537 = vmatpush3.bf16.msra.mxu0 %v19706_v0 }
 0x8b0   :  { %17538 = vmatprep.subr.bf16.mxu0 %v19707_v28 }
 0x8b1   :  { %v17390_v10 = vpop.f32.mrb[252].mxu0 }
 0x8b2   :  { %v17391_v43 = vpop.f32.mrb[253].mxu0 }
 0x8b3   :  { %v17392_v14 = vadd.f32 %v17391_v43, %v17390_v10  ;;  %v17393_v42 = vpop.f32.mrb[254].mxu0  ;;  %17539 = vmatpush3.bf16.msra.mxu0 %v19708_v48 }
 0x8b4   :  { %v17394_v20 = vpop.f32.mrb[255].mxu0  ;;  %17540 = vmatprep.subr.bf16.mxu0 %v19709_v2  ;;  %v19743_v2 = vld [vmem:[%s24657_s5 + $0x830] sm:$0xff]   ;;  %v19745_v42 = vld [vmem:[%s24657_s5 + $0x838] sm:$0xff]  }
 0x8b5   :  { %v12173_v24 = vadd.f32 %v17392_v14, %v12133_v4  ;;  %v8696_v4 = vpack.c.bf16 %v8539_v58, %v8539_v58  ;;  %v8556_v14 = vrot.slane %v8542_v41, %v21621_v52  ;;  %v19749_v52 = vld [vmem:[%s24657_s5 + $0x8c8] sm:$0xff]   ;;  %v19778_v41 = vld [vmem:[%s24657_s5 + $0x938] sm:$0xff]  }
 0x8b7   :  { %17541 = vmatpush3.bf16.msra.mxu0 %v19710_v55  ;;  %v19746_v55 = vld [vmem:[%s24657_s5 + $0x8c0] sm:$0xff]   ;;  %v8558_v20 = vcombine.high %v8556_v14, %v8556_v14 }
 0x8b8   :  { %17542 = vmatprep.subr.bf16.mxu0 %v19711_v53  ;;  %v19747_v53 = vld [vmem:[%s24657_s5 + $0x880] sm:$0xff]  }
 0x8b9   :  { %v8701_v58 = vpack.c.bf16 %v8558_v20, %v8558_v20  ;;  %v19786_v20 = vld [vmem:[%s24657_s5 + $0xa18] sm:$0xff]  }
 0x8bb   :  { %17543 = vmatpush3.bf16.msra.mxu0 %v19712_v18  ;;  %v19750_v18 = vld [vmem:[%s24657_s5 + $0x888] sm:$0xff]  }
 0x8bc   :  { %17550 = vmatprep.subr.bf16.mxu0 %v19713_v1  ;;  %v19751_v1 = vld [vmem:[%s24657_s5 + $0x8d0] sm:$0xff]  }
 0x8be   :  { %12451 = vmatmul.mubr.bf16.vlgmr.msra.gmra.mrb[24].mxu0 %v8694_v15  ;;  %v19754_v15 = vld [vmem:[%s24657_s5 + $0x898] sm:$0xff]  }
 0x8bf   :  { %17551 = vmatpush3.bf16.msra.mxu0 %v19714_v12  ;;  %12490 = vmatprep.mubr.bf16.mxu0 %v8697_v25  ;;  %v19753_v12 = vld [vmem:[%s24657_s5 + $0x8d8] sm:$0xff]   ;;  %v19756_v25 = vld [vmem:[%s24657_s5 + $0x8a0] sm:$0xff]  }
 0x8c0   :  { %17552 = vmatprep.subr.bf16.mxu0 %v19716_v36  ;;  %v19755_v36 = vld [vmem:[%s24657_s5 + $0x8e0] sm:$0xff]  }
 0x8c3   :  { %17553 = vmatpush3.bf16.msra.mxu0 %v19717_v59  ;;  %v19757_v59 = vld [vmem:[%s24657_s5 + $0x8e8] sm:$0xff]  }
 0x8c4   :  { %17554 = vmatprep.subr.bf16.mxu0 %v19718_v6  ;;  %v19758_v6 = vld [vmem:[%s24657_s5 + $0x8a8] sm:$0xff]  }
 0x8c7   :  { %17555 = vmatpush3.bf16.msra.mxu0 %v19719_v13  ;;  %v19759_v13 = vld [vmem:[%s24657_s5 + $0x8f0] sm:$0xff]  }
 0x8c8   :  { %17556 = vmatprep.subr.bf16.mxu0 %v19720_v51 }
 0x8cb   :  { %17557 = vmatpush3.bf16.msra.mxu0 %v19721_v21 }
 0x8cc   :  { %17558 = vmatprep.subr.bf16.mxu0 %v19722_v39 }
 0x8cf   :  { %17559 = vmatpush3.bf16.msra.mxu0 %v19723_v49 }
 0x8d0   :  { %17560 = vmatprep.subr.bf16.mxu0 %v19724_v3  ;;  %v19760_v3 = vld [vmem:[%s24657_s5 + $0x8b0] sm:$0xff]  }
 0x8d1   :  { %v17412_v16 = vpop.f32.mrb[0].mxu0 }
 0x8d2   :  { %v17413_v54 = vpop.f32.mrb[1].mxu0 }
 0x8d3   :  { %v17414_v38 = vadd.f32 %v17413_v54, %v17412_v16  ;;  %v17415_v11 = vpop.f32.mrb[2].mxu0  ;;  %17561 = vmatpush3.bf16.msra.mxu0 %v19725_v32  ;;  %v20055_v54 = vld.sshfl [vmem:[#allocation4 + $0x48] sm:$0xff pattern:$0x76325410] }
 0x8d4   :  { %v17416_v5 = vpop.f32.mrb[3].mxu0  ;;  %17562 = vmatprep.subr.bf16.mxu0 %v19726_v27  ;;  %v19761_v27 = vld [vmem:[%s24657_s5 + $0x8f8] sm:$0xff]   ;;  %v8574_v11 = vcombine.high %v20055_v54, %v20055_v54 }
 0x8d5   :  { %v12213_v63 = vadd.f32 %v17414_v38, %v12173_v24  ;;  %v8698_v24 = vpack.c.bf16 %v8549_v22, %v8549_v22  ;;  %v19763_v38 = vld [vmem:[%s24657_s5 + $0x940] sm:$0xff]   ;;  %v8700_v5 = vpack.c.bf16 %v8556_v14, %v8556_v14  ;;  %v19766_v22 = vld [vmem:[%s24657_s5 + $0x908] sm:$0xff]   ;;  %v19783_v14 = vld [vmem:[%s24657_s5 + $0xa50] sm:$0xff]  }
 0x8d7   :  { %17563 = vmatpush3.bf16.msra.mxu0 %v19727_v7  ;;  %v19764_v7 = vld [vmem:[%s24657_s5 + $0x900] sm:$0xff]  }
 0x8d8   :  { %17564 = vmatprep.subr.bf16.mxu0 %v19728_v26  ;;  %v19765_v26 = vld [vmem:[%s24657_s5 + $0x948] sm:$0xff]  }
 0x8db   :  { %17565 = vmatpush3.bf16.msra.mxu0 %v19729_v60  ;;  %v19767_v60 = vld [vmem:[%s24657_s5 + $0x950] sm:$0xff]  }
 0x8dc   :  { %17572 = vmatprep.subr.bf16.mxu0 %v19730_v9  ;;  %v19768_v9 = vld [vmem:[%s24657_s5 + $0x910] sm:$0xff]  }
 0x8de   :  { %12491 = vmatmul.mubr.bf16.vlgmr.msra.gmra.mrb[28].mxu0 %v8696_v4  ;;  %v19771_v4 = vld [vmem:[%s24657_s5 + $0x960] sm:$0xff]  }
 0x8df   :  { %17573 = vmatpush3.bf16.msra.mxu0 %v19731_v47  ;;  %12530 = vmatprep.mubr.bf16.mxu0 %v8699_v45  ;;  %v19770_v47 = vld [vmem:[%s24657_s5 + $0x918] sm:$0xff]   ;;  %v19773_v45 = vld [vmem:[%s24657_s5 + $0x968] sm:$0xff]  }
 0x8e0   :  { %17574 = vmatprep.subr.bf16.mxu0 %v19732_v34  ;;  %v19772_v34 = vld [vmem:[%s24657_s5 + $0x920] sm:$0xff]  }
 0x8e3   :  { %17575 = vmatpush3.bf16.msra.mxu0 %v19733_v35  ;;  %v19774_v35 = vld [vmem:[%s24657_s5 + $0x928] sm:$0xff]  }
 0x8e4   :  { %17576 = vmatprep.subr.bf16.mxu0 %v19734_v19  ;;  %v19775_v19 = vld [vmem:[%s24657_s5 + $0x970] sm:$0xff]  }
 0x8e7   :  { %17577 = vmatpush3.bf16.msra.mxu0 %v19735_v37 }
 0x8e8   :  { %17578 = vmatprep.subr.bf16.mxu0 %v19736_v61 }
 0x8eb   :  { %17579 = vmatpush3.bf16.msra.mxu0 %v19737_v33 }
 0x8ec   :  { %17580 = vmatprep.subr.bf16.mxu0 %v19738_v8 }
 0x8ef   :  { %17581 = vmatpush3.bf16.msra.mxu0 %v19739_v31  ;;  %v19776_v31 = vld [vmem:[%s24657_s5 + $0x930] sm:$0xff]  }
 0x8f0   :  { %17582 = vmatprep.subr.bf16.mxu0 %v19740_v44 }
 0x8f1   :  { %v17434_v56 = vpop.f32.mrb[4].mxu0 }
 0x8f2   :  { %v17435_v0 = vpop.f32.mrb[5].mxu0 }
 0x8f3   :  { %v17436_v28 = vadd.f32 %v17435_v0, %v17434_v56  ;;  %v17437_v48 = vpop.f32.mrb[6].mxu0  ;;  %17583 = vmatpush3.bf16.msra.mxu0 %v19741_v23  ;;  %v19777_v23 = vld [vmem:[%s24657_s5 + $0x978] sm:$0xff]   ;;  %v20056_v56 = vld.sshfl [vmem:[#allocation4 + $0x50] sm:$0xff pattern:$0x76325410]  ;;  %v19779_v0 = vld [vmem:[%s24657_s5 + $0xa40] sm:$0xff]  }
 0x8f4   :  { %v17438_v10 = vpop.f32.mrb[7].mxu0  ;;  %17584 = vmatprep.subr.bf16.mxu0 %v19742_v40  ;;  %v19780_v48 = vld [vmem:[%s24657_s5 + $0xa00] sm:$0xff]  }
 0x8f5   :  { %v12253_v43 = vadd.f32 %v17436_v28, %v12213_v63  ;;  %v8703_v63 = vpack.c.bf16 %v8574_v11, %v8574_v11  ;;  %v8591_v28 = vcombine.high %v20056_v56, %v20056_v56  ;;  %v19781_v10 = vld [vmem:[%s24657_s5 + $0xa48] sm:$0xff]   ;;  %v19802_v11 = vld [vmem:[%s24657_s5 + $0xb18] sm:$0xff]  }
 0x8f7   :  { %17585 = vmatpush3.bf16.msra.mxu0 %v19743_v2  ;;  %v8702_v2 = vpack.c.bf16 %v20055_v54, %v20055_v54  ;;  %v19799_v54 = vld [vmem:[%s24657_s5 + $0xb50] sm:$0xff]  }
 0x8f8   :  { %17586 = vmatprep.subr.bf16.mxu0 %v19744_v62  ;;  %v8707_v62 = vpack.c.bf16 %v8591_v28, %v8591_v28 }
 0x8fb   :  { %17587 = vmatpush3.bf16.msra.mxu0 %v19745_v42  ;;  %v19784_v42 = vld [vmem:[%s24657_s5 + $0xa10] sm:$0xff]  }
 0x8fc   :  { %17594 = vmatprep.subr.bf16.mxu0 %v19746_v55  ;;  %v19785_v55 = vld [vmem:[%s24657_s5 + $0xa58] sm:$0xff]  }
 0x8fe   :  { %12531 = vmatmul.mubr.bf16.vlgmr.msra.gmra.mrb[32].mxu0 %v8698_v24  ;;  %v19788_v24 = vld [vmem:[%s24657_s5 + $0xa20] sm:$0xff]  }
 0x8ff   :  { %17595 = vmatpush3.bf16.msra.mxu0 %v19747_v53  ;;  %12570 = vmatprep.mubr.bf16.mxu0 %v8701_v58  ;;  %v19787_v53 = vld [vmem:[%s24657_s5 + $0xa60] sm:$0xff]   ;;  %v19790_v58 = vld [vmem:[%s24657_s5 + $0xa28] sm:$0xff]  }
 0x900   :  { %17596 = vmatprep.subr.bf16.mxu0 %v19749_v52  ;;  %v19789_v52 = vld [vmem:[%s24657_s5 + $0xa68] sm:$0xff]  }
 0x903   :  { %17597 = vmatpush3.bf16.msra.mxu0 %v19750_v18  ;;  %v19791_v18 = vld [vmem:[%s24657_s5 + $0xa70] sm:$0xff]  }
 0x904   :  { %17598 = vmatprep.subr.bf16.mxu0 %v19751_v1 }
 0x907   :  { %17599 = vmatpush3.bf16.msra.mxu0 %v19752_v17 }
 0x908   :  { %17600 = vmatprep.subr.bf16.mxu0 %v19753_v12 }
 0x90b   :  { %17601 = vmatpush3.bf16.msra.mxu0 %v19754_v15 }
 0x90c   :  { %17602 = vmatprep.subr.bf16.mxu0 %v19755_v36  ;;  %v19792_v36 = vld [vmem:[%s24657_s5 + $0xa30] sm:$0xff]  }
 0x90f   :  { %17603 = vmatpush3.bf16.msra.mxu0 %v19756_v25 }
 0x910   :  { %17604 = vmatprep.subr.bf16.mxu0 %v19757_v59  ;;  %v19793_v59 = vld [vmem:[%s24657_s5 + $0xa78] sm:$0xff]  }
 0x911   :  { %v17456_v51 = vpop.f32.mrb[8].mxu0 }
 0x912   :  { %v17457_v21 = vpop.f32.mrb[9].mxu0 }
 0x913   :  { %v17458_v39 = vadd.f32 %v17457_v21, %v17456_v51  ;;  %v17459_v49 = vpop.f32.mrb[10].mxu0  ;;  %17605 = vmatpush3.bf16.msra.mxu0 %v19758_v6  ;;  %v19794_v51 = vld [vmem:[%s24657_s5 + $0xa38] sm:$0xff]   ;;  %v19795_v21 = vld [vmem:[%s24657_s5 + $0xb40] sm:$0xff]  }
 0x914   :  { %v17460_v32 = vpop.f32.mrb[11].mxu0  ;;  %17606 = vmatprep.subr.bf16.mxu0 %v19759_v13  ;;  %v20057_v13 = vld.sshfl [vmem:[#allocation4 + $0x58] sm:$0xff pattern:$0x76325410]  ;;  %v19796_v49 = vld [vmem:[%s24657_s5 + $0xb00] sm:$0xff]  }
 0x915   :  { %v12293_v16 = vadd.f32 %v17458_v39, %v12253_v43  ;;  %v19782_v43 = vld [vmem:[%s24657_s5 + $0xa08] sm:$0xff]   ;;  %v8608_v39 = vcombine.high %v20057_v13, %v20057_v13 }
 0x916   :  { %v19797_v32 = vld [vmem:[%s24657_s5 + $0xb48] sm:$0xff]  }
 0x917   :  { %17607 = vmatpush3.bf16.msra.mxu0 %v19760_v3  ;;  %v8706_v3 = vpack.c.bf16 %v20056_v56, %v20056_v56 }
 0x918   :  { %17608 = vmatprep.subr.bf16.mxu0 %v19761_v27  ;;  %v8711_v27 = vpack.c.bf16 %v8608_v39, %v8608_v39 }
 0x91b   :  { %17609 = vmatpush3.bf16.msra.mxu0 %v19762_v50  ;;  %v19800_v50 = vld [vmem:[%s24657_s5 + $0xb10] sm:$0xff]  }
 0x91c   :  { %17616 = vmatprep.subr.bf16.mxu0 %v19763_v38  ;;  %v19801_v38 = vld [vmem:[%s24657_s5 + $0xb58] sm:$0xff]  }
 0x91e   :  { %12571 = vmatmul.mubr.bf16.vlgmr.msra.gmra.mrb[36].mxu0 %v8700_v5  ;;  %v19804_v5 = vld [vmem:[%s24657_s5 + $0xb20] sm:$0xff]  }
 0x91f   :  { %17617 = vmatpush3.bf16.msra.mxu0 %v19764_v7  ;;  %12610 = vmatprep.mubr.bf16.mxu0 %v8703_v63  ;;  %v19803_v7 = vld [vmem:[%s24657_s5 + $0xb60] sm:$0xff]   ;;  %v19806_v63 = vld [vmem:[%s24657_s5 + $0xb28] sm:$0xff]  }
 0x920   :  { %17618 = vmatprep.subr.bf16.mxu0 %v19765_v26  ;;  %v19805_v26 = vld [vmem:[%s24657_s5 + $0xb68] sm:$0xff]  }
 0x923   :  { %17619 = vmatpush3.bf16.msra.mxu0 %v19766_v22  ;;  %v19807_v22 = vld [vmem:[%s24657_s5 + $0xb70] sm:$0xff]  }
 0x924   :  { %17620 = vmatprep.subr.bf16.mxu0 %v19767_v60 }
 0x927   :  { %17621 = vmatpush3.bf16.msra.mxu0 %v19768_v9 }
 0x928   :  { %17622 = vmatprep.subr.bf16.mxu0 %v19769_v57 }
 0x92b   :  { %17623 = vmatpush3.bf16.msra.mxu0 %v19770_v47 }
 0x92c   :  { %17624 = vmatprep.subr.bf16.mxu0 %v19771_v4  ;;  %v19808_v4 = vld [vmem:[%s24657_s5 + $0xb30] sm:$0xff]  }
 0x92f   :  { %17625 = vmatpush3.bf16.msra.mxu0 %v19772_v34 }
 0x930   :  { %17626 = vmatprep.subr.bf16.mxu0 %v19773_v45  ;;  %v19809_v45 = vld [vmem:[%s24657_s5 + $0xb78] sm:$0xff]  }
 0x931   :  { %v17478_v37 = vpop.f32.mrb[12].mxu0 }
 0x932   :  { %v17479_v61 = vpop.f32.mrb[13].mxu0 }
 0x933   :  { %v17480_v33 = vadd.f32 %v17479_v61, %v17478_v37  ;;  %v17481_v8 = vpop.f32.mrb[14].mxu0  ;;  %17627 = vmatpush3.bf16.msra.mxu0 %v19774_v35  ;;  %v19811_v37 = vld [vmem:[%s24657_s5 + $0xc00] sm:$0xff]   ;;  %v8710_v61 = vpack.c.bf16 %v20057_v13, %v20057_v13 }
 0x934   :  { %v17482_v44 = vpop.f32.mrb[15].mxu0  ;;  %17628 = vmatprep.subr.bf16.mxu0 %v19775_v19  ;;  %v19810_v19 = vld [vmem:[%s24657_s5 + $0xb38] sm:$0xff]   ;;  %v19812_v8 = vld [vmem:[%s24657_s5 + $0xc08] sm:$0xff]  }
 0x935   :  { %v12333_v40 = vadd.f32 %v17480_v33, %v12293_v16  ;;  %v19798_v16 = vld [vmem:[%s24657_s5 + $0xb08] sm:$0xff]   ;;  %v19814_v44 = vld [vmem:[%s24657_s5 + $0xc18] sm:$0xff]  }
 0x936   :  { %v23748_v33 = vld [vmem:[#allocation2 + $0x7] sm:$0xff] }
 0x937   :  { %17629 = vmatpush3.bf16.msra.mxu0 %v19776_v31  ;;  %v19813_v31 = vld [vmem:[%s24657_s5 + $0xc10] sm:$0xff]  }
 0x938   :  { %17630 = vmatprep.subr.bf16.mxu0 %v19777_v23  ;;  %v19815_v23 = vld [vmem:[%s24657_s5 + $0xc20] sm:$0xff]  }
 0x93b   :  { %17631 = vmatpush3.bf16.msra.mxu0 %v19778_v41 }
 0x93c   :  { %17660 = vmatprep.subr.bf16.mxu0 %v19779_v0 }
 0x93e   :  { %12611 = vmatmul.mubr.bf16.vlgmr.msra.gmra.mrb[40].mxu0 %v8702_v2 }
 0x93f   :  { %17661 = vmatpush3.bf16.msra.mxu0 %v19780_v48  ;;  %12690 = vmatprep.mubr.bf16.mxu0 %v8707_v62  ;;  %v19817_v48 = vld [vmem:[%s24657_s5 + $0xc30] sm:$0xff]   ;;  %v19818_v62 = vld [vmem:[%s24657_s5 + $0xc38] sm:$0xff]  }
 0x940   :  { %17662 = vmatprep.subr.bf16.mxu0 %v19781_v10 }
 0x943   :  { %17663 = vmatpush3.bf16.msra.mxu0 %v19782_v43  ;;  %v16200_v43 = vld.sshfl [vmem:[#allocation4 + $0x60] sm:$0x3 pattern:$0x76325410] }
 0x944   :  { %17664 = vmatprep.subr.bf16.mxu0 %v19783_v14  ;;  %v8714_v14 = vpack.c.bf16 %v16200_v43, %v16200_v43  ;;  %v19840_v43 = vld [vmem:[%s24660_s7 + $0x1b0] ss:$196 sps:$4 sm:$0xff]  }
 0x947   :  { %17665 = vmatpush3.bf16.msra.mxu0 %v19784_v42 }
 0x948   :  { %17666 = vmatprep.subr.bf16.mxu0 %v19785_v55 }
 0x94b   :  { %17667 = vmatpush3.bf16.msra.mxu0 %v19786_v20 }
 0x94c   :  { %17668 = vmatprep.subr.bf16.mxu0 %v19787_v53 }
 0x94f   :  { %17669 = vmatpush3.bf16.msra.mxu0 %v19788_v24 }
 0x950   :  { %17670 = vmatprep.subr.bf16.mxu0 %v19789_v52 }
 0x951   :  { %v17500_v1 = vpop.f32.mrb[16].mxu0 }
 0x952   :  { %v17501_v17 = vpop.f32.mrb[17].mxu0 }
 0x953   :  { %v17502_v12 = vadd.f32 %v17501_v17, %v17500_v1  ;;  %v17503_v15 = vpop.f32.mrb[18].mxu0  ;;  %17671 = vmatpush3.bf16.msra.mxu0 %v19790_v58 }
 0x954   :  { %v17504_v25 = vpop.f32.mrb[19].mxu0  ;;  %17672 = vmatprep.subr.bf16.mxu0 %v19791_v18 }
 0x955   :  { %v12373_v6 = vadd.f32 %v17502_v12, %v12333_v40  ;;  %v19816_v40 = vld [vmem:[%s24657_s5 + $0xc28] sm:$0xff]  }
 0x956   :  { %v19821_v25 = vld [vmem:[%s24660_s7 + $0x4] ss:$196 sps:$4 sm:$0xff]  }
 0x957   :  { %17673 = vmatpush3.bf16.msra.mxu0 %v19792_v36  ;;  %v19819_v36 = vld [vmem:[%s24660_s7] ss:$196 sps:$4 sm:$0xff]   ;;  %13714 = vmatprep.subr.bf16.mxu1 %v19821_v25  ;;  %v19861_v25 = vld [vmem:[%s24660_s7 + $0x1a8] ss:$196 sps:$4 sm:$0xff]  }
 0x958   :  { %17674 = vmatprep.subr.bf16.mxu0 %v19793_v59  ;;  %v19822_v59 = vld [vmem:[%s24660_s7 + $0x18] ss:$196 sps:$4 sm:$0xff]   ;;  %13715 = vmatpush1.bf16.msra.mxu1 %v19819_v36 }
 0x959   :  { %v19866_v36 = vld [vmem:[%s24660_s7 + $0x1d4] ss:$196 sps:$4 sm:$0xff]  }
 0x95b   :  { %17675 = vmatpush3.bf16.msra.mxu0 %v19794_v51 }
 0x95c   :  { %17704 = vmatprep.subr.bf16.mxu0 %v19795_v21 }
 0x95e   :  { %12691 = vmatmul.mubr.bf16.vlgmr.msra.gmra.mrb[44].mxu0 %v8706_v3  ;;  %v19825_v3 = vld [vmem:[%s24660_s7 + $0x188] ss:$196 sps:$4 sm:$0xff]  }
 0x95f   :  { %17705 = vmatpush3.bf16.msra.mxu0 %v19796_v49  ;;  %12770 = vmatprep.mubr.bf16.mxu0 %v8711_v27 }
 0x960   :  { %17706 = vmatprep.subr.bf16.mxu0 %v19797_v32  ;;  %v19827_v32 = vld [vmem:[%s24660_s7 + $0x18c] ss:$196 sps:$4 sm:$0xff]  }
 0x961   :  { %13716 = vmatprep.subr.bf16.mxu1 %v19827_v32  ;;  %v19876_v32 = vld [vmem:[%s24660_s7 + $0x1e0] ss:$196 sps:$4 sm:$0xff]  }
 0x962   :  { %13717 = vmatpush1.bf16.msra.mxu1 %v19825_v3  ;;  %v19873_v3 = vld [vmem:[%s24660_s7 + $0x1b8] ss:$196 sps:$4 sm:$0xff]  }
 0x963   :  { %17707 = vmatpush3.bf16.msra.mxu0 %v19798_v16  ;;  %v19828_v16 = vld [vmem:[%s24660_s7 + $0x1a0] ss:$196 sps:$4 sm:$0xff]  }
 0x964   :  { %17708 = vmatprep.subr.bf16.mxu0 %v19799_v54  ;;  %v19830_v54 = vld [vmem:[%s24660_s7 + $0x1a4] ss:$196 sps:$4 sm:$0xff]  }
 0x967   :  { %17709 = vmatpush3.bf16.msra.mxu0 %v19800_v50  ;;  %v20061_v50 = vmov 0  }
 0x968   :  { %17710 = vmatprep.subr.bf16.mxu0 %v19801_v38  ;;  %13746 = vmatprep.mubr.bf16.mxu1 %v20061_v50  ;;  %v19833_v38 = vld [vmem:[%s24660_s7 + $0xc] ss:$196 sps:$4 sm:$0xff]  }
 0x969   :  { %13755 = vmatprep.subr.bf16.mxu1 %v19833_v38  ;;  %v19882_v38 = vld [vmem:[%s24660_s7 + $0x68] ss:$196 sps:$4 sm:$0xff]  }
 0x96b   :  { %17711 = vmatpush3.bf16.msra.mxu0 %v19802_v11  ;;  %v19836_v11 = vld [vmem:[%s24660_s7 + $0x2c] ss:$196 sps:$4 sm:$0xff]  }
 0x96c   :  { %17712 = vmatprep.subr.bf16.mxu0 %v19803_v7 }
 0x96f   :  { %17713 = vmatpush3.bf16.msra.mxu0 %v19804_v5 }
 0x970   :  { %17714 = vmatprep.subr.bf16.mxu0 %v19805_v26 }
 0x971   :  { %v17522_v60 = vpop.f32.mrb[20].mxu0 }
 0x972   :  { %v17523_v9 = vpop.f32.mrb[21].mxu0 }
 0x973   :  { %v17524_v57 = vadd.f32 %v17523_v9, %v17522_v60  ;;  %v17525_v47 = vpop.f32.mrb[22].mxu0  ;;  %17715 = vmatpush3.bf16.msra.mxu0 %v19806_v63 }
 0x974   :  { %v17526_v34 = vpop.f32.mrb[23].mxu0  ;;  %17716 = vmatprep.subr.bf16.mxu0 %v19807_v22 }
 0x975   :  { %v12413_v35 = vadd.f32 %v17524_v57, %v12373_v6  ;;  %v19824_v6 = vld [vmem:[%s24660_s7 + $0x1c] ss:$196 sps:$4 sm:$0xff]  }
 0x977   :  { %17717 = vmatpush3.bf16.msra.mxu0 %v19808_v4 }
 0x978   :  { %17718 = vmatprep.subr.bf16.mxu0 %v19809_v45 }
 0x97b   :  { %17719 = vmatpush3.bf16.msra.mxu0 %v19810_v19 }
 0x97c   :  { %18750 = vmatprep.subr.bf16.mxu0 %v23748_v33 }
 0x97e   :  { %12771 = vmatmul.mubr.bf16.vlgmr.msra.gmra.mrb[48].mxu0 %v8710_v61 }
 0x97f   :  { %18751 = vmatpush3.bf16.msra.mxu0 %v19811_v37  ;;  %18766 = vmatprep.mubr.msk.bf16.mxu0 %vm20060_vm5, %v23748_v33 }
 0x980   :  { %18752 = vmatprep.subr.bf16.mxu0 %v23748_v33 }
 0x983   :  { %18753 = vmatpush3.bf16.msra.mxu0 %v19812_v8 }
 0x984   :  { %18754 = vmatprep.subr.bf16.mxu0 %v23748_v33 }
 0x987   :  { %18755 = vmatpush3.bf16.msra.mxu0 %v19813_v31 }
 0x988   :  { %18756 = vmatprep.subr.bf16.mxu0 %v23748_v33 }
 0x98b   :  { %18757 = vmatpush3.bf16.msra.mxu0 %v19814_v44 }
 0x98c   :  { %18758 = vmatprep.subr.bf16.mxu0 %v23748_v33 }
 0x98f   :  { %18759 = vmatpush3.bf16.msra.mxu0 %v19815_v23 }
 0x990   :  { %18760 = vmatprep.subr.bf16.mxu0 %v23748_v33 }
 0x991   :  { %v17544_v56 = vpop.f32.mrb[24].mxu0 }
 0x992   :  { %v17545_v41 = vpop.f32.mrb[25].mxu0 }
 0x993   :  { %v17546_v0 = vadd.f32 %v17545_v41, %v17544_v56  ;;  %v17547_v28 = vpop.f32.mrb[26].mxu0  ;;  %18761 = vmatpush3.bf16.msra.mxu0 %v19816_v40 }
 0x994   :  { %v17548_v2 = vpop.f32.mrb[27].mxu0  ;;  %18762 = vmatprep.subr.bf16.mxu0 %v23748_v33  ;;  %v19831_v28 = vld [vmem:[%s24660_s7 + $0x8] ss:$196 sps:$4 sm:$0xff]  }
 0x995   :  { %v12453_v10 = vadd.f32 %v17546_v0, %v12413_v35 }
 0x997   :  { %18763 = vmatpush3.bf16.msra.mxu0 %v19817_v48 }
 0x998   :  { %18764 = vmatprep.subr.bf16.mxu0 %v23748_v33 }
 0x99b   :  { %18765 = vmatpush3.bf16.msra.mxu0 %v19818_v62  ;;  %v19837_v62 = vld [vmem:[%s24660_s7 + $0x190] ss:$196 sps:$4 sm:$0xff]  }
 0x99c   :  { %13837 = vmatprep.subr.bf16.mxu0 %v19824_v6  ;;  %v19869_v6 = vld [vmem:[%s24660_s7 + $0x34] ss:$196 sps:$4 sm:$0xff]  }
 0x99e   :  { %18767 = vmatmul.mubr.bf16.vlgmr.msra.gmra.mrb[52].mxu0 %v8714_v14  ;;  %v19845_v14 = vld [vmem:[%s24660_s7 + $0x14] ss:$196 sps:$4 sm:$0xff]  }
 0x99f   :  { %13838 = vmatpush1.bf16.msra.mxu0 %v19822_v59  ;;  %13869 = vmatprep.mubr.bf16.mxu0 %v20061_v50  ;;  %v19864_v59 = vld [vmem:[%s24660_s7 + $0x1d0] ss:$196 sps:$4 sm:$0xff]  }
 0x9a0   :  { %13839 = vmatprep.subr.bf16.mxu0 %v19830_v54  ;;  %v19879_v54 = vld [vmem:[%s24660_s7 + $0x40] ss:$196 sps:$4 sm:$0xff]  }
 0x9a3   :  { %13840 = vmatpush1.bf16.msra.mxu0 %v19828_v16  ;;  %v19884_v16 = vld [vmem:[%s24660_s7 + $0x6c] ss:$196 sps:$4 sm:$0xff]  }
 0x9a4   :  { %13919 = vmatprep.subr.bf16.mxu0 %v19836_v11  ;;  %v19887_v11 = vld [vmem:[%s24660_s7 + $0x1cc] ss:$196 sps:$4 sm:$0xff]  }
 0x9b1   :  { %v17566_v42 = vpop.f32.mrb[28].mxu0 }
 0x9b2   :  { %v17567_v55 = vpop.f32.mrb[29].mxu0 }
 0x9b3   :  { %v17568_v20 = vadd.f32 %v17567_v55, %v17566_v42  ;;  %v17569_v53 = vpop.f32.mrb[30].mxu0  ;;  %v19848_v42 = vld [vmem:[%s24660_s7 + $0x3c] ss:$196 sps:$4 sm:$0xff]   ;;  %v19843_v55 = vld [vmem:[%s24660_s7 + $0x10] ss:$196 sps:$4 sm:$0xff]  }
 0x9b4   :  { %v17570_v24 = vpop.f32.mrb[31].mxu0  ;;  %v19851_v53 = vld [vmem:[%s24660_s7 + $0x19c] ss:$196 sps:$4 sm:$0xff]  }
 0x9b5   :  { %v12493_v52 = vadd.f32 %v17568_v20, %v12453_v10  ;;  %v19842_v10 = vld [vmem:[%s24660_s7 + $0x1b4] ss:$196 sps:$4 sm:$0xff]   ;;  %v19854_v24 = vld [vmem:[%s24660_s7 + $0x1c4] ss:$196 sps:$4 sm:$0xff]  }
 0x9b6   :  { %v19846_v20 = vld [vmem:[%s24660_s7 + $0x38] ss:$196 sps:$4 sm:$0xff]  }
 0x9d1   :  { %v17588_v58 = vpop.f32.mrb[32].mxu0 }
 0x9d2   :  { %v17589_v18 = vpop.f32.mrb[33].mxu0 }
 0x9d3   :  { %v17590_v1 = vadd.f32 %v17589_v18, %v17588_v58  ;;  %v17591_v17 = vpop.f32.mrb[34].mxu0  ;;  %v19852_v58 = vld [vmem:[%s24660_s7 + $0x1c0] ss:$196 sps:$4 sm:$0xff]  }
 0x9d4   :  { %v17592_v12 = vpop.f32.mrb[35].mxu0  ;;  %v19857_v18 = vld [vmem:[%s24660_s7 + $0x24] ss:$196 sps:$4 sm:$0xff]  }
 0x9d5   :  { %v12533_v15 = vadd.f32 %v17590_v1, %v12493_v52  ;;  %v19849_v52 = vld [vmem:[%s24660_s7 + $0x198] ss:$196 sps:$4 sm:$0xff]   ;;  %v19860_v1 = vld [vmem:[%s24660_s7 + $0x4c] ss:$196 sps:$4 sm:$0xff]   ;;  %v19855_v17 = vld [vmem:[%s24660_s7 + $0x20] ss:$196 sps:$4 sm:$0xff]  }
 0x9d6   :  { %v19858_v12 = vld [vmem:[%s24660_s7 + $0x48] ss:$196 sps:$4 sm:$0xff]  }
 0x9f1   :  { %v17610_v13 = vpop.f32.mrb[36].mxu0 }
 0x9f2   :  { %v17611_v51 = vpop.f32.mrb[37].mxu0 }
 0x9f3   :  { %v17612_v21 = vadd.f32 %v17611_v51, %v17610_v13  ;;  %v17613_v39 = vpop.f32.mrb[38].mxu0  ;;  %v19872_v13 = vld [vmem:[%s24660_s7 + $0x5c] ss:$196 sps:$4 sm:$0xff]   ;;  %v19867_v51 = vld [vmem:[%s24660_s7 + $0x30] ss:$196 sps:$4 sm:$0xff]  }
 0x9f4   :  { %v17614_v49 = vpop.f32.mrb[39].mxu0  ;;  %v19875_v39 = vld [vmem:[%s24660_s7 + $0x1bc] ss:$196 sps:$4 sm:$0xff]  }
 0x9f5   :  { %v12573_v27 = vadd.f32 %v17612_v21, %v12533_v15  ;;  %v19863_v15 = vld [vmem:[%s24660_s7 + $0x1ac] ss:$196 sps:$4 sm:$0xff]   ;;  %v19870_v21 = vld [vmem:[%s24660_s7 + $0x58] ss:$196 sps:$4 sm:$0xff]   ;;  %v19878_v49 = vld [vmem:[%s24660_s7 + $0x1e4] ss:$196 sps:$4 sm:$0xff]  }
 0xa11   :  { %v17632_v7 = vpop.f32.mrb[40].mxu0 }
 0xa12   :  { %v17633_v5 = vpop.f32.mrb[41].mxu0 }
 0xa13   :  { %v17634_v26 = vadd.f32 %v17633_v5, %v17632_v7  ;;  %v17635_v63 = vpop.f32.mrb[42].mxu0  ;;  %v19890_v7 = vld [vmem:[%s24660_s7 + $0x1f4] ss:$196 sps:$4 sm:$0xff]   ;;  %v19885_v5 = vld [vmem:[%s24660_s7 + $0x1c8] ss:$196 sps:$4 sm:$0xff]  }
 0xa14   :  { %v17636_v22 = vpop.f32.mrb[43].mxu0  ;;  %v19893_v63 = vld [vmem:[%s24660_s7 + $0x54] ss:$196 sps:$4 sm:$0xff]  }
 0xa15   :  { %v12613_v60 = vadd.f32 %v17634_v26, %v12573_v27  ;;  %v19881_v27 = vld [vmem:[%s24660_s7 + $0x44] ss:$196 sps:$4 sm:$0xff]   ;;  %v19888_v26 = vld [vmem:[%s24660_s7 + $0x1f0] ss:$196 sps:$4 sm:$0xff]   ;;  %v19896_v22 = vld [vmem:[%s24660_s7 + $0x7c] ss:$196 sps:$4 sm:$0xff]  }
 0xa17   :  { %v12653_v9 = vadd.f32 %v23153_v29, %v12613_v60  ;;  %v19891_v60 = vld [vmem:[%s24660_s7 + $0x50] ss:$196 sps:$4 sm:$0xff]  }
 0xa31   :  { %v17676_v57 = vpop.f32.mrb[44].mxu0 }
 0xa32   :  { %v17677_v47 = vpop.f32.mrb[45].mxu0 }
 0xa33   :  { %v17678_v4 = vadd.f32 %v17677_v47, %v17676_v57  ;;  %v17679_v34 = vpop.f32.mrb[46].mxu0  ;;  %v19899_v57 = vld [vmem:[%s24660_s7 + $0x1dc] ss:$196 sps:$4 sm:$0xff]   ;;  %v19902_v47 = vld [vmem:[%s24660_s7 + $0x204] ss:$196 sps:$4 sm:$0xff]  }
 0xa34   :  { %v17680_v45 = vpop.f32.mrb[47].mxu0  ;;  %v19900_v34 = vld [vmem:[%s24660_s7 + $0x200] ss:$196 sps:$4 sm:$0xff]  }
 0xa35   :  { %v12693_v35 = vadd.f32 %v17678_v4, %v12653_v9  ;;  %v19894_v9 = vld [vmem:[%s24660_s7 + $0x78] ss:$196 sps:$4 sm:$0xff]   ;;  %v19905_v45 = vld [vmem:[%s24660_s7 + $0x64] ss:$196 sps:$4 sm:$0xff]  }
 0xa36   :  { %v19897_v4 = vld [vmem:[%s24660_s7 + $0x1d8] ss:$196 sps:$4 sm:$0xff]  }
 0xa37   :  { %v12733_v19 = vadd.f32 %v23210_v46, %v12693_v35  ;;  %v19834_v46 = vld [vmem:[%s24660_s7 + $0x28] ss:$196 sps:$4 sm:$0xff]  }
 0xa38   :  { %v19908_v35 = vld [vmem:[%s24660_s7 + $0x8c] ss:$196 sps:$4 sm:$0xff]  }
 0xa51   :  { %v17720_v37 = vpop.f32.mrb[48].mxu0 }
 0xa52   :  { %v17721_v61 = vpop.f32.mrb[49].mxu0 }
 0xa53   :  { %v17722_v8 = vadd.f32 %v17721_v61, %v17720_v37  ;;  %v17723_v31 = vpop.f32.mrb[50].mxu0  ;;  %v19906_v37 = vld [vmem:[%s24660_s7 + $0x88] ss:$196 sps:$4 sm:$0xff]  }
 0xa54   :  { %v17724_v44 = vpop.f32.mrb[51].mxu0  ;;  %v19911_v61 = vld [vmem:[%s24660_s7 + $0x1ec] ss:$196 sps:$4 sm:$0xff]  }
 0xa55   :  { %v12773_v23 = vadd.f32 %v17722_v8, %v12733_v19  ;;  %v19903_v19 = vld [vmem:[%s24660_s7 + $0x60] ss:$196 sps:$4 sm:$0xff]   ;;  %v19914_v8 = vld [vmem:[%s24660_s7 + $0x214] ss:$196 sps:$4 sm:$0xff]   ;;  %v19909_v31 = vld [vmem:[%s24660_s7 + $0x1e8] ss:$196 sps:$4 sm:$0xff]  }
 0xa56   :  { %v19912_v44 = vld [vmem:[%s24660_s7 + $0x210] ss:$196 sps:$4 sm:$0xff]  }
 0xa57   :  { %v12813_v40 = vadd.f32 %v23263_v30, %v12773_v23  ;;  %v19839_v30 = vld [vmem:[%s24660_s7 + $0x194] ss:$196 sps:$4 sm:$0xff]  }
 0xa58   :  { %v19917_v23 = vld [vmem:[%s24660_s7 + $0x74] ss:$196 sps:$4 sm:$0xff]  }
 0xa71   :  { %v12852_v56 = vpop.f32.mrb[52].mxu0 }
 0xa72   :  { %v12853_v41 = vadd.f32 %v12852_v56, %v12813_v40  ;;  %v18768_v0 = vpop.f32.mrb[53].mxu0  ;;  %v19920_v40 = vld [vmem:[%s24660_s7 + $0x9c] ss:$196 sps:$4 sm:$0xff]   ;;  %v19915_v56 = vld [vmem:[%s24660_s7 + $0x70] ss:$196 sps:$4 sm:$0xff]  }
 0xa73   :  { %v12855_v29 = vpop.f32.mrb[54].mxu0  ;;  %v19923_v0 = vld [vmem:[%s24660_s7 + $0x1fc] ss:$196 sps:$4 sm:$0xff]  }
 0xa74   :  { %v23822_v48 = vpack.c.bf16 %v12853_v41, %v12853_v41  ;;  %v18769_v2 = vpop.f32.mrb[55].mxu0  ;;  %v19918_v41 = vld [vmem:[%s24660_s7 + $0x98] ss:$196 sps:$4 sm:$0xff]   ;;  %v19926_v29 = vld [vmem:[%s24660_s7 + $0x224] ss:$196 sps:$4 sm:$0xff]  }
 0xa75   :  { %v19929_v2 = vld [vmem:[%s24660_s7 + $0x84] ss:$196 sps:$4 sm:$0xff]  }
 0xa76   :  { %16693 = vmatmul.mubr.msk.bf16.vlgmr.msra.gmra.mrb[68].mxu1 %vm13710_vm6, %v23822_v48  ;;  %16696 = vmatmul.mubr.msk.bf16.vlgmr.msra.gmra.mrb[56].mxu0 %vm13710_vm6, %v23822_v48 }
 0xa77   :  { %13756 = vmatpush1.bf16.msra.mxu1 %v19831_v28  ;;  %13920 = vmatpush1.bf16.msra.mxu0 %v19834_v46  ;;  %v19921_v28 = vld [vmem:[%s24660_s7 + $0x1f8] ss:$196 sps:$4 sm:$0xff]   ;;  %v19924_v46 = vld [vmem:[%s24660_s7 + $0x220] ss:$196 sps:$4 sm:$0xff]  }
 0xa78   :  { %13757 = vmatprep.subr.bf16.mxu1 %v19839_v30  ;;  %13921 = vmatprep.subr.bf16.mxu0 %v19842_v10  ;;  %v19932_v30 = vld [vmem:[%s24660_s7 + $0xac] ss:$196 sps:$4 sm:$0xff]   ;;  %v19927_v10 = vld [vmem:[%s24660_s7 + $0x80] ss:$196 sps:$4 sm:$0xff]  }
 0xa79   :  { %13787 = vmatprep.mubr.bf16.mxu1 %v20061_v50  ;;  %13951 = vmatprep.mubr.bf16.mxu0 %v20061_v50 }
 0xa7b   :  { %13758 = vmatpush1.bf16.msra.mxu1 %v19837_v62  ;;  %13922 = vmatpush1.bf16.msra.mxu0 %v19840_v43  ;;  %v19930_v62 = vld [vmem:[%s24660_s7 + $0xa8] ss:$196 sps:$4 sm:$0xff]  }
 0xa7c   :  { %13796 = vmatprep.subr.bf16.mxu1 %v19845_v14  ;;  %14001 = vmatprep.subr.bf16.mxu0 %v19848_v42  ;;  %v19935_v43 = vld [vmem:[%s24660_s7 + $0x20c] ss:$196 sps:$4 sm:$0xff]   ;;  %v19938_v14 = vld [vmem:[%s24660_s7 + $0x234] ss:$196 sps:$4 sm:$0xff]  }
 0xa7d   :  { %v19933_v42 = vld [vmem:[%s24660_s7 + $0x208] ss:$196 sps:$4 sm:$0xff]  }
 0xa7e   :  { %16694 = vmatmul.mubr.msk.bf16.vlgmr.msra.gmra.mrb[72].mxu1 %vm13710_vm6, %v23822_v48  ;;  %16698 = vmatmul.mubr.msk.bf16.vlgmr.msra.gmra.mrb[60].mxu0 %vm13710_vm6, %v23822_v48 }
 0xa7f   :  { %13797 = vmatpush1.bf16.msra.mxu1 %v19843_v55  ;;  %14002 = vmatpush1.bf16.msra.mxu0 %v19846_v20  ;;  %v19936_v55 = vld [vmem:[%s24660_s7 + $0x230] ss:$196 sps:$4 sm:$0xff]  }
 0xa80   :  { %13798 = vmatprep.subr.bf16.mxu1 %v19851_v53  ;;  %14003 = vmatprep.subr.bf16.mxu0 %v19854_v24  ;;  %v19941_v20 = vld [vmem:[%s24660_s7 + $0x94] ss:$196 sps:$4 sm:$0xff]   ;;  %v19944_v53 = vld [vmem:[%s24660_s7 + $0xbc] ss:$196 sps:$4 sm:$0xff]  }
 0xa81   :  { %13828 = vmatprep.mubr.bf16.mxu1 %v20061_v50  ;;  %14033 = vmatprep.mubr.bf16.mxu0 %v20061_v50  ;;  %v19939_v24 = vld [vmem:[%s24660_s7 + $0x90] ss:$196 sps:$4 sm:$0xff]  }
 0xa83   :  { %13799 = vmatpush1.bf16.msra.mxu1 %v19849_v52  ;;  %14004 = vmatpush1.bf16.msra.mxu0 %v19852_v58  ;;  %v19942_v52 = vld [vmem:[%s24660_s7 + $0xb8] ss:$196 sps:$4 sm:$0xff]  }
 0xa84   :  { %13878 = vmatprep.subr.bf16.mxu1 %v19857_v18  ;;  %14083 = vmatprep.subr.bf16.mxu0 %v19860_v1  ;;  %v19947_v58 = vld [vmem:[%s24660_s7 + $0x21c] ss:$196 sps:$4 sm:$0xff]   ;;  %v19950_v18 = vld [vmem:[%s24660_s7 + $0x244] ss:$196 sps:$4 sm:$0xff]  }
 0xa85   :  { %v19945_v1 = vld [vmem:[%s24660_s7 + $0x218] ss:$196 sps:$4 sm:$0xff]  }
 0xa86   :  { %16695 = vmatmul.mubr.msk.bf16.vlgmr.msra.gmra.mrb[76].mxu1 %vm13710_vm6, %v23822_v48  ;;  %16700 = vmatmul.mubr.msk.bf16.vlgmr.msra.gmra.mrb[64].mxu0 %vm13710_vm6, %v23822_v48 }
 0xa87   :  { %13879 = vmatpush1.bf16.msra.mxu1 %v19855_v17  ;;  %14084 = vmatpush1.bf16.msra.mxu0 %v19858_v12  ;;  %v19948_v17 = vld [vmem:[%s24660_s7 + $0x240] ss:$196 sps:$4 sm:$0xff]  }
 0xa88   :  { %13880 = vmatprep.subr.bf16.mxu1 %v19863_v15  ;;  %14085 = vmatprep.subr.bf16.mxu0 %v19866_v36  ;;  %v19953_v12 = vld [vmem:[%s24660_s7 + $0xa4] ss:$196 sps:$4 sm:$0xff]  }
 0xa89   :  { %13910 = vmatprep.mubr.bf16.mxu1 %v20061_v50  ;;  %14115 = vmatprep.mubr.bf16.mxu0 %v20061_v50  ;;  %v19967_v15 = vld [vmem:[%s24661_s9 + $0x4] ss:$16 sps:$4 sm:$0xff]  }
 0xa8a   :  { %v19951_v36 = vld [vmem:[%s24660_s7 + $0xa0] ss:$196 sps:$4 sm:$0xff]  }
 0xa8b   :  { %13881 = vmatpush1.bf16.msra.mxu1 %v19861_v25  ;;  %14086 = vmatpush1.bf16.msra.mxu0 %v19864_v59  ;;  %v19956_v25 = vld [vmem:[%s24660_s7 + $0x22c] ss:$196 sps:$4 sm:$0xff]  }
 0xa8c   :  { %13960 = vmatprep.subr.bf16.mxu1 %v19869_v6  ;;  %14165 = vmatprep.subr.bf16.mxu0 %v19872_v13  ;;  %v19965_v59 = vld [vmem:[%s24661_s9] ss:$16 sps:$4 sm:$0xff]   ;;  %v19954_v6 = vld [vmem:[%s24660_s7 + $0x228] ss:$196 sps:$4 sm:$0xff]   ;;  %v19959_v13 = vld [vmem:[%s24660_s7 + $0xb4] ss:$196 sps:$4 sm:$0xff]  }
 0xa8e   :  { %16697 = vmatmul.mubr.msk.bf16.vlgmr.msra.gmra.mrb[80].mxu1 %vm13710_vm6, %v23822_v48  ;;  %16702 = vmatmul.mubr.msk.bf16.vlgmr.msra.gmra.mrb[68].mxu0 %vm13710_vm6, %v23822_v48 }
 0xa8f   :  { %13961 = vmatpush1.bf16.msra.mxu1 %v19867_v51  ;;  %14166 = vmatpush1.bf16.msra.mxu0 %v19870_v21  ;;  %v19957_v51 = vld [vmem:[%s24660_s7 + $0xb0] ss:$196 sps:$4 sm:$0xff]   ;;  %v19962_v21 = vld [vmem:[%s24660_s7 + $0x23c] ss:$196 sps:$4 sm:$0xff]  }
 0xa90   :  { %13962 = vmatprep.subr.bf16.mxu1 %v19875_v39  ;;  %14167 = vmatprep.subr.bf16.mxu0 %v19878_v49  ;;  %v19971_v39 = vld [vmem:[%s24661_s9 + $0x20] ss:$16 sps:$4 sm:$0xff]   ;;  %v19973_v49 = vld [vmem:[%s24661_s9 + $0x24] ss:$16 sps:$4 sm:$0xff]  }
 0xa91   :  { %13992 = vmatprep.mubr.bf16.mxu1 %v20061_v50  ;;  %14197 = vmatprep.mubr.bf16.mxu0 %v20061_v50 }
 0xa93   :  { %13963 = vmatpush1.bf16.msra.mxu1 %v19873_v3  ;;  %14168 = vmatpush1.bf16.msra.mxu0 %v19876_v32  ;;  %v19960_v3 = vld [vmem:[%s24660_s7 + $0x238] ss:$196 sps:$4 sm:$0xff]   ;;  %v19979_v32 = vld [vmem:[%s24661_s9 + $0x44] ss:$16 sps:$4 sm:$0xff]  }
 0xa94   :  { %14042 = vmatprep.subr.bf16.mxu1 %v19881_v27  ;;  %14247 = vmatprep.subr.bf16.mxu0 %v19884_v16  ;;  %v19977_v27 = vld [vmem:[%s24661_s9 + $0x40] ss:$16 sps:$4 sm:$0xff]  }
 0xa95   :  { %v19963_v16 = vld [vmem:[%s24660_s7 + $0xc0] ss:$196 sps:$4 sm:$0xff]  }
 0xa96   :  { %16699 = vmatmul.mubr.msk.bf16.vlgmr.msra.gmra.mrb[84].mxu1 %vm13710_vm6, %v23822_v48  ;;  %16704 = vmatmul.mubr.msk.bf16.vlgmr.msra.gmra.mrb[72].mxu0 %vm13710_vm6, %v23822_v48 }
 0xa97   :  { %14043 = vmatpush1.bf16.msra.mxu1 %v19879_v54  ;;  %14248 = vmatpush1.bf16.msra.mxu0 %v19882_v38  ;;  %v19983_v54 = vld [vmem:[%s24661_s9 + $0x60] ss:$16 sps:$4 sm:$0xff]   ;;  %v19985_v38 = vld [vmem:[%s24661_s9 + $0x64] ss:$16 sps:$4 sm:$0xff]  }
 0xa98   :  { %14044 = vmatprep.subr.bf16.mxu1 %v19887_v11  ;;  %14249 = vmatprep.subr.bf16.mxu0 %v19890_v7  ;;  %v19991_v11 = vld [vmem:[%s24661_s9 + $0x84] ss:$16 sps:$4 sm:$0xff]   ;;  %v19964_v7 = vld [vmem:[%s24660_s7 + $0x248] ss:$196 sps:$4 sm:$0xff]  }
 0xa99   :  { %14074 = vmatprep.mubr.bf16.mxu1 %v20061_v50  ;;  %14279 = vmatprep.mubr.bf16.mxu0 %v20061_v50 }
 0xa9b   :  { %14045 = vmatpush1.bf16.msra.mxu1 %v19885_v5  ;;  %14250 = vmatpush1.bf16.msra.mxu0 %v19888_v26  ;;  %v19970_v5 = vld [vmem:[%s24661_s9 + $0xc] ss:$16 sps:$4 sm:$0xff]   ;;  %v19989_v26 = vld [vmem:[%s24661_s9 + $0x80] ss:$16 sps:$4 sm:$0xff]  }
 0xa9c   :  { %14124 = vmatprep.subr.bf16.mxu1 %v19893_v63  ;;  %14329 = vmatprep.subr.bf16.mxu0 %v19896_v22  ;;  %v19968_v63 = vld [vmem:[%s24661_s9 + $0x8] ss:$16 sps:$4 sm:$0xff]   ;;  %v19995_v22 = vld [vmem:[%s24661_s9 + $0xa0] ss:$16 sps:$4 sm:$0xff]  }
 0xa9e   :  { %16701 = vmatmul.mubr.msk.bf16.vlgmr.msra.gmra.mrb[88].mxu1 %vm13710_vm6, %v23822_v48  ;;  %16706 = vmatmul.mubr.msk.bf16.vlgmr.msra.gmra.mrb[76].mxu0 %vm13710_vm6, %v23822_v48 }
 0xa9f   :  { %14125 = vmatpush1.bf16.msra.mxu1 %v19891_v60  ;;  %14330 = vmatpush1.bf16.msra.mxu0 %v19894_v9  ;;  %v19997_v60 = vld [vmem:[%s24661_s9 + $0xa4] ss:$16 sps:$4 sm:$0xff]  }
 0xaa0   :  { %14126 = vmatprep.subr.bf16.mxu1 %v19899_v57  ;;  %14331 = vmatprep.subr.bf16.mxu0 %v19902_v47  ;;  %v20003_v9 = vld [vmem:[%s24661_s9 + $0xc4] ss:$16 sps:$4 sm:$0xff]   ;;  %v19974_v57 = vld [vmem:[%s24661_s9 + $0x28] ss:$16 sps:$4 sm:$0xff]   ;;  %v19982_v47 = vld [vmem:[%s24661_s9 + $0x4c] ss:$16 sps:$4 sm:$0xff]  }
 0xaa1   :  { %14156 = vmatprep.mubr.bf16.mxu1 %v20061_v50  ;;  %14361 = vmatprep.mubr.bf16.mxu0 %v20061_v50 }
 0xaa3   :  { %14127 = vmatpush1.bf16.msra.mxu1 %v19897_v4  ;;  %14332 = vmatpush1.bf16.msra.mxu0 %v19900_v34  ;;  %v19980_v4 = vld [vmem:[%s24661_s9 + $0x48] ss:$16 sps:$4 sm:$0xff]   ;;  %v19988_v34 = vld [vmem:[%s24661_s9 + $0x6c] ss:$16 sps:$4 sm:$0xff]  }
 0xaa4   :  { %14206 = vmatprep.subr.bf16.mxu1 %v19905_v45  ;;  %14411 = vmatprep.subr.bf16.mxu0 %v19908_v35  ;;  %v20007_v45 = vld [vmem:[%s24661_s9 + $0xe0] ss:$16 sps:$4 sm:$0xff]   ;;  %v20009_v35 = vld [vmem:[%s24661_s9 + $0xe4] ss:$16 sps:$4 sm:$0xff]  }
 0xaa6   :  { %16703 = vmatmul.mubr.msk.bf16.vlgmr.msra.gmra.mrb[92].mxu1 %vm13710_vm6, %v23822_v48  ;;  %16708 = vmatmul.mubr.msk.bf16.vlgmr.msra.gmra.mrb[80].mxu0 %vm13710_vm6, %v23822_v48 }
 0xaa7   :  { %14207 = vmatpush1.bf16.msra.mxu1 %v19903_v19  ;;  %14412 = vmatpush1.bf16.msra.mxu0 %v19906_v37  ;;  %v19986_v19 = vld [vmem:[%s24661_s9 + $0x68] ss:$16 sps:$4 sm:$0xff]   ;;  %v19994_v37 = vld [vmem:[%s24661_s9 + $0x8c] ss:$16 sps:$4 sm:$0xff]  }
 0xaa8   :  { %14208 = vmatprep.subr.bf16.mxu1 %v19911_v61  ;;  %14413 = vmatprep.subr.bf16.mxu0 %v19914_v8  ;;  %v19992_v61 = vld [vmem:[%s24661_s9 + $0x88] ss:$16 sps:$4 sm:$0xff]   ;;  %v20000_v8 = vld [vmem:[%s24661_s9 + $0xac] ss:$16 sps:$4 sm:$0xff]  }
 0xaa9   :  { %14238 = vmatprep.mubr.bf16.mxu1 %v20061_v50  ;;  %14443 = vmatprep.mubr.bf16.mxu0 %v20061_v50 }
 0xaab   :  { %14209 = vmatpush1.bf16.msra.mxu1 %v19909_v31  ;;  %14414 = vmatpush1.bf16.msra.mxu0 %v19912_v44  ;;  %v19998_v31 = vld [vmem:[%s24661_s9 + $0xa8] ss:$16 sps:$4 sm:$0xff]   ;;  %v20006_v44 = vld [vmem:[%s24661_s9 + $0xcc] ss:$16 sps:$4 sm:$0xff]  }
 0xaac   :  { %14288 = vmatprep.subr.bf16.mxu1 %v19917_v23  ;;  %14493 = vmatprep.subr.bf16.mxu0 %v19920_v40  ;;  %v20004_v23 = vld [vmem:[%s24661_s9 + $0xc8] ss:$16 sps:$4 sm:$0xff]   ;;  %v20012_v40 = vld [vmem:[%s24661_s9 + $0xec] ss:$16 sps:$4 sm:$0xff]  }
 0xaae   :  { %16705 = vmatmul.mubr.msk.bf16.vlgmr.msra.gmra.mrb[96].mxu1 %vm13710_vm6, %v23822_v48  ;;  %16710 = vmatmul.mubr.msk.bf16.vlgmr.msra.gmra.mrb[84].mxu0 %vm13710_vm6, %v23822_v48 }
 0xaaf   :  { %14289 = vmatpush1.bf16.msra.mxu1 %v19915_v56  ;;  %14494 = vmatpush1.bf16.msra.mxu0 %v19918_v41  ;;  %v20010_v56 = vld [vmem:[%s24661_s9 + $0xe8] ss:$16 sps:$4 sm:$0xff]   ;;  %v20013_v41 = vld [vmem:[%s24663_s11 + $0x40] sm:$0xff]  }
 0xab0   :  { %14290 = vmatprep.subr.bf16.mxu1 %v19923_v0  ;;  %14495 = vmatprep.subr.bf16.mxu0 %v19926_v29  ;;  %v24753_v0 = vld [vmem:[#allocation6_spill] sm:$0xff] }
 0xab1   :  { %14320 = vmatprep.mubr.bf16.mxu1 %v20061_v50  ;;  %14525 = vmatprep.mubr.bf16.mxu0 %v20061_v50  ;;  %v24260_v29 = vsub.s32 0, %v24753_v0 }
 0xab3   :  { %14291 = vmatpush1.bf16.msra.mxu1 %v19921_v28  ;;  %14496 = vmatpush1.bf16.msra.mxu0 %v19924_v46  ;;  %v20014_v28 = vld [vmem:[%s24663_s11 + $0xc0] sm:$0xff]  }
 0xab4   :  { %14370 = vmatprep.subr.bf16.mxu1 %v19929_v2  ;;  %14575 = vmatprep.subr.bf16.mxu0 %v19932_v30  ;;  %v24268_v46 = vld [vmem:[%s24662_s8] sm:$0xff]  ;;  %v24271_v2 = vsub.s32 6, %v24753_v0  ;;  %v24274_v30 = vsub.s32 1, %v24753_v0 }
 0xab6   :  { %16707 = vmatmul.mubr.msk.bf16.vlgmr.msra.gmra.mrb[100].mxu1 %vm13710_vm6, %v23822_v48  ;;  %16712 = vmatmul.mubr.msk.bf16.vlgmr.msra.gmra.mrb[88].mxu0 %vm13710_vm6, %v23822_v48 }
 0xab7   :  { %14371 = vmatpush1.bf16.msra.mxu1 %v19927_v10  ;;  %14576 = vmatpush1.bf16.msra.mxu0 %v19930_v62  ;;  %v24277_v10 = vsub.s32 7, %v24753_v0  ;;  %v12976_v62 = vrot.slane %v24268_v46, %v24260_v29 }
 0xab8   :  { %14372 = vmatprep.subr.bf16.mxu1 %v19935_v43  ;;  %14577 = vmatprep.subr.bf16.mxu0 %v19938_v14  ;;  %v13000_v43 = vrot.slane %v24268_v46, %v24271_v2  ;;  %v12980_v14 = vrot.slane %v24268_v46, %v24274_v30 }
 0xab9   :  { %14402 = vmatprep.mubr.bf16.mxu1 %v20061_v50  ;;  %14607 = vmatprep.mubr.bf16.mxu0 %v20061_v50 }
 0xabb   :  { %14373 = vmatpush1.bf16.msra.mxu1 %v19933_v42  ;;  %14578 = vmatpush1.bf16.msra.mxu0 %v19936_v55  ;;  %v13004_v42 = vrot.slane %v24268_v46, %v24277_v10  ;;  %v24288_v55 = vsub.s32 2, %v24753_v0 }
 0xabc   :  { %14452 = vmatprep.subr.bf16.mxu1 %v19941_v20  ;;  %14657 = vmatprep.subr.bf16.mxu0 %v19944_v53 }
 0xabe   :  { %16709 = vmatmul.mubr.msk.bf16.vlgmr.msra.gmra.mrb[104].mxu1 %vm13710_vm6, %v23822_v48  ;;  %16714 = vmatmul.mubr.msk.bf16.vlgmr.msra.gmra.mrb[92].mxu0 %vm13710_vm6, %v23822_v48 }
 0xabf   :  { %14453 = vmatpush1.bf16.msra.mxu1 %v19939_v24  ;;  %14658 = vmatpush1.bf16.msra.mxu0 %v19942_v52 }
 0xac0   :  { %14454 = vmatprep.subr.bf16.mxu1 %v19947_v58  ;;  %14659 = vmatprep.subr.bf16.mxu0 %v19950_v18 }
 0xac1   :  { %14484 = vmatprep.mubr.bf16.mxu1 %v20061_v50  ;;  %14689 = vmatprep.mubr.bf16.mxu0 %v20061_v50 }
 0xac3   :  { %14455 = vmatpush1.bf16.msra.mxu1 %v19945_v1  ;;  %14660 = vmatpush1.bf16.msra.mxu0 %v19948_v17  ;;  %v24293_v1 = vld [vmem:[%s24662_s8 + $0x8] sm:$0xff]  ;;  %v24296_v17 = vsub.s32 3, %v24753_v0 }
 0xac4   :  { %14534 = vmatprep.subr.bf16.mxu1 %v19953_v12  ;;  %15021 = vmatprep.subr.bf16.mxu0 %v19967_v15 }
 0xac6   :  { %16711 = vmatmul.mubr.msk.bf16.vlgmr.msra.gmra.mrb[108].mxu1 %vm13710_vm6, %v23822_v48  ;;  %16716 = vmatmul.mubr.msk.bf16.vlgmr.msra.gmra.mrb[96].mxu0 %vm13710_vm6, %v23822_v48 }
 0xac7   :  { %14535 = vmatpush1.bf16.msra.mxu1 %v19951_v36  ;;  %14566 = vmatprep.mubr.bf16.mxu1 %v20061_v50 }
 0xac8   :  { %14536 = vmatprep.subr.bf16.mxu1 %v19956_v25  ;;  %15022 = vmatpush1.bf16.msra.mxu0 %v19965_v59 }
 0xac9   :  { %15053 = vmatprep.mubr.bf16.mxu0 %v20061_v50  ;;  %15023 = vmatprep.subr.bf16.mxu0 %v19973_v49 }
 0xacb   :  { %14537 = vmatpush1.bf16.msra.mxu1 %v19954_v6 }
 0xacc   :  { %14616 = vmatprep.subr.bf16.mxu1 %v19959_v13  ;;  %15024 = vmatpush1.bf16.msra.mxu0 %v19971_v39  ;;  %v12984_v13 = vrot.slane %v24268_v46, %v24288_v55  ;;  %v13020_v39 = vrot.slane %v24293_v1, %v24296_v17 }
 0xacd   :  { %15025 = vmatprep.subr.bf16.mxu0 %v19979_v32  ;;  %v24307_v32 = vsub.s32 4, %v24753_v0 }
 0xace   :  { %16713 = vmatmul.mubr.msk.bf16.vlgmr.msra.gmra.mrb[112].mxu1 %vm13710_vm6, %v23822_v48 }
 0xacf   :  { %14617 = vmatpush1.bf16.msra.mxu1 %v19957_v51  ;;  %14648 = vmatprep.mubr.bf16.mxu1 %v20061_v50  ;;  %v13016_v51 = vrot.slane %v24293_v1, %v24288_v55 }
 0xad0   :  { %14618 = vmatprep.subr.bf16.mxu1 %v19962_v21  ;;  %15026 = vmatpush1.bf16.msra.mxu0 %v19977_v27  ;;  %v12988_v21 = vrot.slane %v24268_v46, %v24296_v17  ;;  %v24310_v27 = vsub.s32 5, %v24753_v0  ;;  %v13012_v0 = vrot.slane %v24293_v1, %v24274_v30 }
 0xad1   :  { %15027 = vmatprep.subr.bf16.mxu0 %v19985_v38 }
 0xad3   :  { %14619 = vmatpush1.bf16.msra.mxu1 %v19960_v3 }
 0xad4   :  { %18770 = vmatprep.subr.bf16.mxu1 %v23748_v33  ;;  %15028 = vmatpush1.bf16.msra.mxu0 %v19983_v54 }
 0xad5   :  { %15029 = vmatprep.subr.bf16.mxu0 %v19991_v11 }
 0xad6   :  { %16715 = vmatmul.mubr.msk.bf16.vlgmr.msra.gmra.mrb[116].mxu1 %vm13710_vm6, %v23822_v48 }
 0xad7   :  { %18771 = vmatpush3.bf16.msra.mxu1 %v19963_v16  ;;  %18774 = vmatprep.mubr.msk.bf16.mxu1 %vm20060_vm5, %v23748_v33 }
 0xad8   :  { %18772 = vmatprep.subr.bf16.mxu1 %v23748_v33  ;;  %v19976_v33 = vld [vmem:[%s24661_s9 + $0x2c] ss:$16 sps:$4 sm:$0xff]   ;;  %15030 = vmatpush1.bf16.msra.mxu0 %v19989_v26 }
 0xad9   :  { %15031 = vmatprep.subr.bf16.mxu0 %v19997_v60  ;;  %v12992_v60 = vrot.slane %v24268_v46, %v24307_v32 }
 0xadb   :  { %18773 = vmatpush3.bf16.msra.mxu1 %v19964_v7 }
 0xadc   :  { %15122 = vmatprep.subr.bf16.mxu1 %v19970_v5  ;;  %15032 = vmatpush1.bf16.msra.mxu0 %v19995_v22 }
 0xadd   :  { %15033 = vmatprep.subr.bf16.mxu0 %v20003_v9  ;;  %v13032_v9 = vrot.slane %v24293_v1, %v24271_v2 }
 0xade   :  { %18775 = vmatmul.mubr.msk.bf16.vlgmr.msra.gmra.mrb[120].mxu1 %vm13710_vm6, %v23822_v48  ;;  %v20001_v48 = vld [vmem:[%s24661_s9 + $0xc0] ss:$16 sps:$4 sm:$0xff]  }
 0xadf   :  { %15123 = vmatpush1.bf16.msra.mxu1 %v19968_v63  ;;  %15154 = vmatprep.mubr.bf16.mxu1 %v20061_v50 }
 0xae0   :  { %15124 = vmatprep.subr.bf16.mxu1 %v19976_v33  ;;  %15034 = vmatpush1.bf16.msra.mxu0 %v20001_v48 }
 0xae1   :  { %15035 = vmatprep.subr.bf16.mxu0 %v20009_v35 }
 0xae3   :  { %15125 = vmatpush1.bf16.msra.mxu1 %v19974_v57  ;;  %v12996_v57 = vrot.slane %v24268_v46, %v24310_v27 }
 0xae4   :  { %15126 = vmatprep.subr.bf16.mxu1 %v19982_v47  ;;  %15036 = vmatpush1.bf16.msra.mxu0 %v20007_v45  ;;  %v13036_v47 = vrot.slane %v24293_v1, %v24277_v10 }
 0xae5   :  { %17760 = vmatprep.subr.bf16.mxu0 %v20013_v41 }
 0xae7   :  { %15127 = vmatpush1.bf16.msra.mxu1 %v19980_v4 }
 0xae8   :  { %15128 = vmatprep.subr.bf16.mxu1 %v19988_v34  ;;  %v24323_v34 = vld [vmem:[%s24662_s8 + $0x10] sm:$0xff] }
 0xae9   :  { %v13048_v41 = vrot.slane %v24323_v34, %v24288_v55 }
 0xaeb   :  { %15129 = vmatpush1.bf16.msra.mxu1 %v19986_v19 }
 0xaec   :  { %15130 = vmatprep.subr.bf16.mxu1 %v19994_v37 }
 0xaef   :  { %15131 = vmatpush1.bf16.msra.mxu1 %v19992_v61 }
 0xaf0   :  { %15132 = vmatprep.subr.bf16.mxu1 %v20000_v8 }
 0xaf3   :  { %15133 = vmatpush1.bf16.msra.mxu1 %v19998_v31 }
 0xaf4   :  { %15134 = vmatprep.subr.bf16.mxu1 %v20006_v44 }
 0xaf7   :  { %15135 = vmatpush1.bf16.msra.mxu1 %v20004_v23 }
 0xaf8   :  { %15136 = vmatprep.subr.bf16.mxu1 %v20012_v40 }
 0xafb   :  { %15137 = vmatpush1.bf16.msra.mxu1 %v20010_v56  ;;  %v13008_v56 = vrot.slane %v24293_v1, %v24260_v29 }
 0xafc   :  { %17818 = vmatprep.subr.bf16.mxu1 %v20014_v28  ;;  %v13052_v28 = vrot.slane %v24323_v34, %v24296_v17 }
 0xb49   :  { %v13748_v20 = vpop.f32.mrb[68].mxu1  ;;  %v13871_v53 = vpop.f32.mrb[56].mxu0 }
 0xb4a   :  { %v13749_v24 = vadd.f32 %v13748_v20, %v12976_v62  ;;  %v13872_v52 = vadd.f32 %v13871_v53, %v13000_v43  ;;  %v13750_v58 = vpop.f32.mrb[69].mxu1  ;;  %v13873_v18 = vpop.f32.mrb[57].mxu0 }
 0xb4b   :  { %v13751_v12 = vadd.f32 %v13750_v58, %v12980_v14  ;;  %v13874_v15 = vadd.f32 %v13873_v18, %v13004_v42  ;;  %v13752_v36 = vpop.f32.mrb[70].mxu1  ;;  %v13875_v25 = vpop.f32.mrb[58].mxu0 }
 0xb4c   :  { %14738 = vst [vmem:[#allocation5] sm:$0x3] %v13749_v24  ;;  %14744 = vst [vmem:[#allocation5 + $0xc] sm:$0x3] %v13872_v52  ;;  %v13753_v59 = vpop.f32.mrb[71].mxu1  ;;  %v13876_v6 = vpop.f32.mrb[59].mxu0 }
 0xb4d   :  { %14739 = vst [vmem:[#allocation5 + $0x2] sm:$0x3] %v13751_v12  ;;  %14745 = vst [vmem:[#allocation5 + $0xe] sm:$0x3] %v13874_v15  ;;  %v20015_v59 = vld [vmem:[%s24663_s11] sm:$0xff]  }
 0xb4e   :  { %v20016_v6 = vld [vmem:[%s24663_s11 + $0x80] sm:$0xff]  }
 0xb51   :  { %v13789_v49 = vpop.f32.mrb[72].mxu1  ;;  %v13953_v3 = vpop.f32.mrb[60].mxu0 }
 0xb52   :  { %v13790_v16 = vadd.f32 %v13789_v49, %v12984_v13  ;;  %v13954_v54 = vadd.f32 %v13953_v3, %v13016_v51  ;;  %v13791_v38 = vpop.f32.mrb[73].mxu1  ;;  %v13955_v11 = vpop.f32.mrb[61].mxu0  ;;  %v13024_v13 = vrot.slane %v24293_v1, %v24307_v32  ;;  %v13064_v51 = vrot.slane %v24323_v34, %v24271_v2 }
 0xb53   :  { %v13792_v7 = vadd.f32 %v13791_v38, %v12988_v21  ;;  %v13956_v5 = vadd.f32 %v13955_v11, %v13020_v39  ;;  %v13793_v26 = vpop.f32.mrb[74].mxu1  ;;  %v13957_v63 = vpop.f32.mrb[62].mxu0  ;;  %v20017_v21 = vld [vmem:[%s24663_s11 + $0x48] sm:$0xff]   ;;  %v13028_v49 = vrot.slane %v24293_v1, %v24310_v27  ;;  %v13068_v3 = vrot.slane %v24323_v34, %v24277_v10 }
 0xb54   :  { %14740 = vst [vmem:[#allocation5 + $0x4] sm:$0x3] %v13790_v16  ;;  %14748 = vst [vmem:[#allocation5 + $0x14] sm:$0x3] %v13954_v54  ;;  %v13794_v33 = vpop.f32.mrb[75].mxu1  ;;  %v13958_v22 = vpop.f32.mrb[63].mxu0 }
 0xb55   :  { %14741 = vst [vmem:[#allocation5 + $0x6] sm:$0x3] %v13792_v7  ;;  %14749 = vst [vmem:[#allocation5 + $0x16] sm:$0x3] %v13956_v5  ;;  %v20018_v39 = vld [vmem:[%s24663_s11 + $0xc8] sm:$0xff]   ;;  %v20021_v63 = vld [vmem:[%s24663_s11 + $0x50] sm:$0xff]  }
 0xb56   :  { %v20019_v38 = vld [vmem:[%s24663_s11 + $0x8] sm:$0xff]   ;;  %v20022_v33 = vld [vmem:[%s24663_s11 + $0xd0] sm:$0xff]  }
 0xb57   :  { %v20020_v11 = vld [vmem:[%s24663_s11 + $0x88] sm:$0xff]  }
 0xb59   :  { %v13830_v48 = vpop.f32.mrb[76].mxu1  ;;  %v14035_v4 = vpop.f32.mrb[64].mxu0 }
 0xb5a   :  { %v13831_v45 = vadd.f32 %v13830_v48, %v12992_v60  ;;  %v14036_v35 = vadd.f32 %v14035_v4, %v13032_v9  ;;  %v13832_v19 = vpop.f32.mrb[77].mxu1  ;;  %v14037_v37 = vpop.f32.mrb[65].mxu0 }
 0xb5b   :  { %v13833_v61 = vadd.f32 %v13832_v19, %v12996_v57  ;;  %v14038_v8 = vadd.f32 %v14037_v37, %v13036_v47  ;;  %v13834_v31 = vpop.f32.mrb[78].mxu1  ;;  %v14039_v44 = vpop.f32.mrb[66].mxu0  ;;  %v24370_v47 = vld [vmem:[%s24662_s8 + $0x18] sm:$0xff]  ;;  %v13040_v19 = vrot.slane %v24323_v34, %v24260_v29 }
 0xb5c   :  { %14742 = vst [vmem:[#allocation5 + $0x8] sm:$0x3] %v13831_v45  ;;  %14752 = vst [vmem:[#allocation5 + $0x1c] sm:$0x3] %v14036_v35  ;;  %v13835_v23 = vpop.f32.mrb[79].mxu1  ;;  %v14040_v40 = vpop.f32.mrb[67].mxu0  ;;  %v13080_v37 = vrot.slane %v24370_v47, %v24288_v55  ;;  %v13044_v31 = vrot.slane %v24323_v34, %v24274_v30  ;;  %v13084_v44 = vrot.slane %v24370_v47, %v24296_v17 }
 0xb5d   :  { %14743 = vst [vmem:[#allocation5 + $0xa] sm:$0x3] %v13833_v61  ;;  %14753 = vst [vmem:[#allocation5 + $0x1e] sm:$0x3] %v14038_v8  ;;  %v14787_v15 = vld [vmem:[#allocation5] sm:$0xff]  ;;  %v20023_v45 = vld [vmem:[%s24663_s11 + $0x10] sm:$0xff]  }
 0xb5e   :  { %v20024_v35 = vld [vmem:[%s24663_s11 + $0x90] sm:$0xff]   ;;  %v20025_v61 = vld [vmem:[%s24663_s11 + $0x58] sm:$0xff]  }
 0xb5f   :  { %v20026_v8 = vld [vmem:[%s24663_s11 + $0xd8] sm:$0xff]  }
 0xb61   :  { %v13912_v46 = vpop.f32.mrb[80].mxu1  ;;  %v14117_v62 = vpop.f32.mrb[68].mxu0 }
 0xb62   :  { %v13913_v43 = vadd.f32 %v13912_v46, %v13008_v56  ;;  %v14118_v14 = vadd.f32 %v14117_v62, %v13048_v41  ;;  %v13914_v42 = vpop.f32.mrb[81].mxu1  ;;  %v14119_v20 = vpop.f32.mrb[69].mxu0  ;;  %v20027_v56 = vld [vmem:[%s24663_s11 + $0x18] sm:$0xff]  }
 0xb63   :  { %v13915_v53 = vadd.f32 %v13914_v42, %v13012_v0  ;;  %v14120_v24 = vadd.f32 %v14119_v20, %v13052_v28  ;;  %v13916_v52 = vpop.f32.mrb[82].mxu1  ;;  %v14121_v58 = vpop.f32.mrb[70].mxu0  ;;  %v20028_v41 = vld [vmem:[%s24663_s11 + $0x98] sm:$0xff]  }
 0xb64   :  { %14746 = vst [vmem:[#allocation5 + $0x10] sm:$0x3] %v13913_v43  ;;  %14756 = vst [vmem:[#allocation5 + $0x24] sm:$0x3] %v14118_v14  ;;  %v13917_v18 = vpop.f32.mrb[83].mxu1  ;;  %v14122_v12 = vpop.f32.mrb[71].mxu0 }
 0xb65   :  { %v14788_v36 = vld [vmem:[#allocation5 + $0x8] sm:$0xff]  ;;  %14747 = vst [vmem:[#allocation5 + $0x12] sm:$0x3] %v13915_v53  ;;  %14757 = vst [vmem:[#allocation5 + $0x26] sm:$0x3] %v14120_v24  ;;  %v20029_v43 = vld [vmem:[%s24663_s11 + $0x60] sm:$0xff]  }
 0xb66   :  { %v14800_v25 = vpack.c.bf16 %v14788_v36, %v14787_v15  ;;  %v20030_v14 = vld [vmem:[%s24663_s11 + $0xe0] sm:$0xff]  }
 0xb67   :  { %v20031_v36 = vld [vmem:[%s24663_s11 + $0x20] sm:$0xff]  }
 0xb68   :  { %15054 = vmatmul.mubr.bf16.vlgmr.msra.gmra.mrb[100].mxu0 %v14800_v25  ;;  %15155 = vmatmul.mubr.bf16.vlgmr.msra.gmra.mrb[124].mxu1 %v14800_v25  ;;  %v20032_v25 = vld [vmem:[%s24663_s11 + $0xa0] sm:$0xff]  }
 0xb69   :  { %15063 = vmatprep.mubr.bf16.mxu0 %v20061_v50  ;;  %15164 = vmatprep.mubr.bf16.mxu1 %v20061_v50  ;;  %v13994_v16 = vpop.f32.mrb[84].mxu1  ;;  %v14199_v54 = vpop.f32.mrb[72].mxu0 }
 0xb6a   :  { %17761 = vmatpush3.bf16.msra.mxu0 %v20015_v59  ;;  %17819 = vmatpush3.bf16.msra.mxu1 %v20016_v6  ;;  %v13995_v1 = vadd.f32 %v13994_v16, %v13024_v13  ;;  %v14200_v7 = vadd.f32 %v14199_v54, %v13064_v51  ;;  %v13996_v5 = vpop.f32.mrb[85].mxu1  ;;  %v14201_v26 = vpop.f32.mrb[73].mxu0  ;;  %v13056_v59 = vrot.slane %v24323_v34, %v24307_v32  ;;  %v20033_v13 = vld [vmem:[%s24663_s11 + $0x68] sm:$0xff]  }
 0xb6b   :  { %17762 = vmatprep.subr.bf16.mxu0 %v20017_v21  ;;  %17820 = vmatprep.subr.bf16.mxu1 %v20018_v39  ;;  %v13997_v22 = vadd.f32 %v13996_v5, %v13028_v49  ;;  %v14202_v60 = vadd.f32 %v14201_v26, %v13068_v3  ;;  %v13998_v9 = vpop.f32.mrb[86].mxu1  ;;  %v14203_v57 = vpop.f32.mrb[74].mxu0  ;;  %v13096_v6 = vrot.slane %v24370_v47, %v24271_v2  ;;  %v20034_v51 = vld [vmem:[%s24663_s11 + $0xe8] sm:$0xff]   ;;  %v24429_v26 = vld [vmem:[%s24662_s8 + $0x20] sm:$0xff] }
 0xb6c   :  { %14750 = vst [vmem:[#allocation5 + $0x18] sm:$0x3] %v13995_v1  ;;  %14760 = vst [vmem:[#allocation5 + $0x2c] sm:$0x3] %v14200_v7  ;;  %v13999_v48 = vpop.f32.mrb[87].mxu1  ;;  %v14204_v4 = vpop.f32.mrb[75].mxu0  ;;  %v13060_v21 = vrot.slane %v24323_v34, %v24310_v27  ;;  %v13100_v39 = vrot.slane %v24370_v47, %v24277_v10  ;;  %v13076_v9 = vrot.slane %v24370_v47, %v24274_v30 }
 0xb6d   :  { %14751 = vst [vmem:[#allocation5 + $0x1a] sm:$0x3] %v13997_v22  ;;  %14761 = vst [vmem:[#allocation5 + $0x2e] sm:$0x3] %v14202_v60  ;;  %v14789_v18 = vld [vmem:[#allocation5 + $0x10] sm:$0xff]  ;;  %v13072_v22 = vrot.slane %v24370_v47, %v24260_v29  ;;  %v13112_v60 = vrot.slane %v24429_v26, %v24288_v55  ;;  %v13116_v57 = vrot.slane %v24429_v26, %v24296_v17 }
 0xb6e   :  { %17763 = vmatpush3.bf16.msra.mxu0 %v20019_v38  ;;  %17821 = vmatpush3.bf16.msra.mxu1 %v20020_v11 }
 0xb6f   :  { %17764 = vmatprep.subr.bf16.mxu0 %v20021_v63  ;;  %17822 = vmatprep.subr.bf16.mxu1 %v20022_v33 }
 0xb71   :  { %v14076_v23 = vpop.f32.mrb[88].mxu1  ;;  %v14281_v40 = vpop.f32.mrb[76].mxu0 }
 0xb72   :  { %17765 = vmatpush3.bf16.msra.mxu0 %v20023_v45  ;;  %17823 = vmatpush3.bf16.msra.mxu1 %v20024_v35  ;;  %v14077_v0 = vadd.f32 %v14076_v23, %v13040_v19  ;;  %v14282_v28 = vadd.f32 %v14281_v40, %v13080_v37  ;;  %v14078_v46 = vpop.f32.mrb[89].mxu1  ;;  %v14283_v62 = vpop.f32.mrb[77].mxu0 }
 0xb73   :  { %17766 = vmatprep.subr.bf16.mxu0 %v20025_v61  ;;  %17824 = vmatprep.subr.bf16.mxu1 %v20026_v8  ;;  %v14079_v42 = vadd.f32 %v14078_v46, %v13044_v31  ;;  %v14284_v20 = vadd.f32 %v14283_v62, %v13084_v44  ;;  %v14080_v53 = vpop.f32.mrb[90].mxu1  ;;  %v14285_v24 = vpop.f32.mrb[78].mxu0  ;;  %v13128_v46 = vrot.slane %v24429_v26, %v24271_v2 }
 0xb74   :  { %14754 = vst [vmem:[#allocation5 + $0x20] sm:$0x3] %v14077_v0  ;;  %14764 = vst [vmem:[#allocation5 + $0x34] sm:$0x3] %v14282_v28  ;;  %v14081_v52 = vpop.f32.mrb[91].mxu1  ;;  %v14286_v58 = vpop.f32.mrb[79].mxu0  ;;  %v13088_v28 = vrot.slane %v24370_v47, %v24307_v32  ;;  %v13092_v62 = vrot.slane %v24370_v47, %v24310_v27 }
 0xb75   :  { %v14790_v12 = vld [vmem:[#allocation5 + $0x18] sm:$0xff]  ;;  %14755 = vst [vmem:[#allocation5 + $0x22] sm:$0x3] %v14079_v42  ;;  %14765 = vst [vmem:[#allocation5 + $0x36] sm:$0x3] %v14284_v20  ;;  %v24452_v47 = vld [vmem:[%s24662_s8 + $0x28] sm:$0xff] }
 0xb76   :  { %v14801_v15 = vpack.c.bf16 %v14790_v12, %v14789_v18  ;;  %17767 = vmatpush3.bf16.msra.mxu0 %v20027_v56  ;;  %17825 = vmatpush3.bf16.msra.mxu1 %v20028_v41 }
 0xb77   :  { %17768 = vmatprep.subr.bf16.mxu0 %v20029_v43  ;;  %17826 = vmatprep.subr.bf16.mxu1 %v20030_v14  ;;  %v13132_v43 = vrot.slane %v24429_v26, %v24277_v10 }
 0xb78   :  { %15064 = vmatmul.mubr.bf16.gmra.mrb[104].mxu0 %v14801_v15  ;;  %15165 = vmatmul.mubr.bf16.gmra.mrb[128].mxu1 %v14801_v15 }
 0xb79   :  { %15073 = vmatprep.mubr.bf16.mxu0 %v20061_v50  ;;  %15174 = vmatprep.mubr.bf16.mxu1 %v20061_v50  ;;  %v14158_v49 = vpop.f32.mrb[92].mxu1  ;;  %v14363_v3 = vpop.f32.mrb[80].mxu0 }
 0xb7a   :  { %17769 = vmatpush3.bf16.msra.mxu0 %v20031_v36  ;;  %17827 = vmatpush3.bf16.msra.mxu1 %v20032_v25  ;;  %v14159_v16 = vadd.f32 %v14158_v49, %v13056_v59  ;;  %v14364_v54 = vadd.f32 %v14363_v3, %v13096_v6  ;;  %v14160_v38 = vpop.f32.mrb[93].mxu1  ;;  %v14365_v11 = vpop.f32.mrb[81].mxu0  ;;  %v13104_v59 = vrot.slane %v24429_v26, %v24260_v29 }
 0xb7b   :  { %17770 = vmatprep.subr.bf16.mxu0 %v20033_v13  ;;  %17828 = vmatprep.subr.bf16.mxu1 %v20034_v51  ;;  %v14161_v1 = vadd.f32 %v14160_v38, %v13060_v21  ;;  %v14366_v7 = vadd.f32 %v14365_v11, %v13100_v39  ;;  %v14162_v34 = vpop.f32.mrb[94].mxu1  ;;  %v14367_v5 = vpop.f32.mrb[82].mxu0  ;;  %v13144_v6 = vrot.slane %v24452_v47, %v24288_v55 }
 0xb7c   :  { %14758 = vst [vmem:[#allocation5 + $0x28] sm:$0x3] %v14159_v16  ;;  %14768 = vst [vmem:[#allocation5 + $0x3c] sm:$0x3] %v14364_v54  ;;  %v14163_v63 = vpop.f32.mrb[95].mxu1  ;;  %v14368_v33 = vpop.f32.mrb[83].mxu0  ;;  %v13108_v13 = vrot.slane %v24429_v26, %v24274_v30  ;;  %v13148_v51 = vrot.slane %v24452_v47, %v24296_v17 }
 0xb7d   :  { %14759 = vst [vmem:[#allocation5 + $0x2a] sm:$0x3] %v14161_v1  ;;  %14769 = vst [vmem:[#allocation5 + $0x3e] sm:$0x3] %v14366_v7  ;;  %v14791_v56 = vld [vmem:[#allocation5 + $0x20] sm:$0xff] }
 0xb81   :  { %v14240_v48 = vpop.f32.mrb[96].mxu1  ;;  %v14445_v4 = vpop.f32.mrb[84].mxu0 }
 0xb82   :  { %v14241_v45 = vadd.f32 %v14240_v48, %v13072_v22  ;;  %v14446_v35 = vadd.f32 %v14445_v4, %v13112_v60  ;;  %v14242_v19 = vpop.f32.mrb[97].mxu1  ;;  %v14447_v37 = vpop.f32.mrb[85].mxu0  ;;  %v13120_v60 = vrot.slane %v24429_v26, %v24307_v32  ;;  %v13164_v48 = vrot.slane %v24452_v47, %v24277_v10 }
 0xb83   :  { %v14243_v61 = vadd.f32 %v14242_v19, %v13076_v9  ;;  %v14448_v8 = vadd.f32 %v14447_v37, %v13116_v57  ;;  %v14244_v31 = vpop.f32.mrb[98].mxu1  ;;  %v14449_v44 = vpop.f32.mrb[86].mxu0  ;;  %v13160_v9 = vrot.slane %v24452_v47, %v24271_v2  ;;  %v13124_v57 = vrot.slane %v24429_v26, %v24310_v27 }
 0xb84   :  { %14762 = vst [vmem:[#allocation5 + $0x30] sm:$0x3] %v14241_v45  ;;  %14772 = vst [vmem:[#allocation5 + $0x44] sm:$0x3] %v14446_v35  ;;  %v14245_v23 = vpop.f32.mrb[99].mxu1  ;;  %v14450_v40 = vpop.f32.mrb[87].mxu0  ;;  %v13136_v10 = vrot.slane %v24452_v47, %v24260_v29 }
 0xb85   :  { %v14792_v41 = vld [vmem:[#allocation5 + $0x28] sm:$0xff]  ;;  %14763 = vst [vmem:[#allocation5 + $0x32] sm:$0x3] %v14243_v61  ;;  %14773 = vst [vmem:[#allocation5 + $0x46] sm:$0x3] %v14448_v8  ;;  %v13140_v40 = vrot.slane %v24452_v47, %v24274_v30 }
 0xb86   :  { %v14802_v0 = vpack.c.bf16 %v14792_v41, %v14791_v56 }
 0xb88   :  { %15074 = vmatmul.mubr.bf16.gmra.mrb[108].mxu0 %v14802_v0  ;;  %15175 = vmatmul.mubr.bf16.gmra.mrb[132].mxu1 %v14802_v0 }
 0xb89   :  { %15083 = vmatprep.mubr.bf16.mxu0 %v20061_v50  ;;  %15184 = vmatprep.mubr.bf16.mxu1 %v20061_v50  ;;  %v14322_v14 = vpop.f32.mrb[100].mxu1  ;;  %v14527_v42 = vpop.f32.mrb[88].mxu0 }
 0xb8a   :  { %v14323_v20 = vadd.f32 %v14322_v14, %v13088_v28  ;;  %v14528_v53 = vadd.f32 %v14527_v42, %v13128_v46  ;;  %v14324_v24 = vpop.f32.mrb[101].mxu1  ;;  %v14529_v52 = vpop.f32.mrb[89].mxu0 }
 0xb8b   :  { %v14325_v58 = vadd.f32 %v14324_v24, %v13092_v62  ;;  %v14530_v18 = vadd.f32 %v14529_v52, %v13132_v43  ;;  %v14326_v12 = vpop.f32.mrb[102].mxu1  ;;  %v14531_v15 = vpop.f32.mrb[90].mxu0 }
 0xb8c   :  { %14766 = vst [vmem:[#allocation5 + $0x38] sm:$0x3] %v14323_v20  ;;  %14776 = vst [vmem:[#allocation5 + $0x4c] sm:$0x3] %v14528_v53  ;;  %v14327_v36 = vpop.f32.mrb[103].mxu1  ;;  %v14532_v25 = vpop.f32.mrb[91].mxu0  ;;  %v13152_v20 = vrot.slane %v24452_v47, %v24307_v32  ;;  %v13156_v53 = vrot.slane %v24452_v47, %v24310_v27 }
 0xb8d   :  { %14767 = vst [vmem:[#allocation5 + $0x3a] sm:$0x3] %v14325_v58  ;;  %14777 = vst [vmem:[#allocation5 + $0x4e] sm:$0x3] %v14530_v18  ;;  %v14793_v63 = vld [vmem:[#allocation5 + $0x30] sm:$0xff] }
 0xb8e   :  { %v16594_v32 = vld [vmem:[%s24662_s8 + $0x30] ss:$0 sm:$0xff] }
 0xb91   :  { %v14404_v21 = vpop.f32.mrb[104].mxu1  ;;  %v14609_v39 = vpop.f32.mrb[92].mxu0 }
 0xb92   :  { %v14405_v49 = vadd.f32 %v14404_v21, %v13104_v59  ;;  %v14610_v3 = vadd.f32 %v14609_v39, %v13144_v6  ;;  %v14406_v16 = vpop.f32.mrb[105].mxu1  ;;  %v14611_v54 = vpop.f32.mrb[93].mxu0 }
 0xb93   :  { %v14407_v38 = vadd.f32 %v14406_v16, %v13108_v13  ;;  %v14612_v11 = vadd.f32 %v14611_v54, %v13148_v51  ;;  %v14408_v1 = vpop.f32.mrb[106].mxu1  ;;  %v14613_v7 = vpop.f32.mrb[94].mxu0  ;;  %v20037_v16 = vld [vmem:[%s24663_s11 + $0x70] sm:$0xff]  }
 0xb94   :  { %14770 = vst [vmem:[#allocation5 + $0x40] sm:$0x3] %v14405_v49  ;;  %14780 = vst [vmem:[#allocation5 + $0x54] sm:$0x3] %v14610_v3  ;;  %v14409_v34 = vpop.f32.mrb[107].mxu1  ;;  %v14614_v5 = vpop.f32.mrb[95].mxu0 }
 0xb95   :  { %v14794_v33 = vld [vmem:[#allocation5 + $0x38] sm:$0xff]  ;;  %14771 = vst [vmem:[#allocation5 + $0x42] sm:$0x3] %v14407_v38  ;;  %14781 = vst [vmem:[#allocation5 + $0x56] sm:$0x3] %v14612_v11  ;;  %v20035_v49 = vld [vmem:[%s24663_s11 + $0x28] sm:$0xff]  }
 0xb96   :  { %v14803_v22 = vpack.c.bf16 %v14794_v33, %v14793_v63  ;;  %v20036_v3 = vld [vmem:[%s24663_s11 + $0xa8] sm:$0xff]   ;;  %17771 = vmatpush3.bf16.msra.mxu0 %v20035_v49  ;;  %v20039_v54 = vld [vmem:[%s24663_s11 + $0x30] sm:$0xff]   ;;  %v20041_v11 = vld [vmem:[%s24663_s11 + $0x78] sm:$0xff]  }
 0xb97   :  { %17829 = vmatpush3.bf16.msra.mxu1 %v20036_v3  ;;  %v20040_v38 = vld [vmem:[%s24663_s11 + $0xb0] sm:$0xff]   ;;  %v20042_v1 = vld [vmem:[%s24663_s11 + $0xf8] sm:$0xff]   ;;  %17772 = vmatprep.subr.bf16.mxu0 %v20037_v16  ;;  %v14839_v5 = vld [vmem:[%s24664_s10] sm:$0xf] }
 0xb98   :  { %15084 = vmatmul.mubr.bf16.gmra.mrb[112].mxu0 %v14803_v22  ;;  %15185 = vmatmul.mubr.bf16.gmra.mrb[136].mxu1 %v14803_v22  ;;  %v20043_v7 = vld [vmem:[%s24663_s11 + $0x38] sm:$0xff]   ;;  %v24521_v63 = vrot.slane %v14839_v5, %v24260_v29  ;;  %v24524_v33 = vrot.slane %v14839_v5, %v24288_v55  ;;  %v24527_v22 = vrot.slane %v14839_v5, %v24274_v30 }
 0xb99   :  { %15093 = vmatprep.mubr.bf16.mxu0 %v20061_v50  ;;  %15194 = vmatprep.mubr.bf16.mxu1 %v20061_v50  ;;  %v14486_v4 = vpop.f32.mrb[108].mxu1  ;;  %v14691_v45 = vpop.f32.mrb[96].mxu0  ;;  %v20044_v34 = vld [vmem:[%s24663_s11 + $0xb8] sm:$0xff]  }
 0xb9a   :  { %v14487_v35 = vadd.f32 %v14486_v4, %v13120_v60  ;;  %v14692_v19 = vadd.f32 %v14691_v45, %v13160_v9  ;;  %v14488_v37 = vpop.f32.mrb[109].mxu1  ;;  %v14693_v61 = vpop.f32.mrb[97].mxu0  ;;  %17773 = vmatpush3.bf16.msra.mxu0 %v20039_v54  ;;  %v24530_v60 = vrot.slane %v14839_v5, %v24296_v17 }
 0xb9b   :  { %v14489_v8 = vadd.f32 %v14488_v37, %v13124_v57  ;;  %v14694_v2 = vadd.f32 %v14693_v61, %v13164_v48  ;;  %v14490_v31 = vpop.f32.mrb[110].mxu1  ;;  %v14695_v44 = vpop.f32.mrb[98].mxu0  ;;  %17774 = vmatprep.subr.bf16.mxu0 %v20041_v11 }
 0xb9c   :  { %14774 = vst [vmem:[#allocation5 + $0x48] sm:$0x3] %v14487_v35  ;;  %14784 = vst [vmem:[#allocation5 + $0x5c] sm:$0x3] %v14692_v19  ;;  %v14491_v26 = vpop.f32.mrb[111].mxu1  ;;  %v14696_v23 = vpop.f32.mrb[99].mxu0 }
 0xb9d   :  { %14775 = vst [vmem:[#allocation5 + $0x4a] sm:$0x3] %v14489_v8  ;;  %14785 = vst [vmem:[#allocation5 + $0x5e] sm:$0x3] %v14694_v2  ;;  %v14795_v43 = vld [vmem:[#allocation5 + $0x40] sm:$0xff] }
 0xb9e   :  { %17775 = vmatpush3.bf16.msra.mxu0 %v20043_v7 }
 0xba1   :  { %v14568_v56 = vpop.f32.mrb[112].mxu1 }
 0xba2   :  { %v14569_v41 = vadd.f32 %v14568_v56, %v13136_v10  ;;  %v14570_v0 = vpop.f32.mrb[113].mxu1 }
 0xba3   :  { %v14571_v28 = vadd.f32 %v14570_v0, %v13140_v40  ;;  %v14572_v46 = vpop.f32.mrb[114].mxu1 }
 0xba4   :  { %14778 = vst [vmem:[#allocation5 + $0x50] sm:$0x3] %v14569_v41  ;;  %v14573_v62 = vpop.f32.mrb[115].mxu1  ;;  %v14796_v14 = vld [vmem:[#allocation5 + $0x48] sm:$0xff] }
 0xba5   :  { %14779 = vst [vmem:[#allocation5 + $0x52] sm:$0x3] %v14571_v28  ;;  %v14804_v42 = vpack.c.bf16 %v14796_v14, %v14795_v43 }
 0xba7   :  { %15094 = vmatmul.mubr.bf16.gmra.mrb[116].mxu0 %v14804_v42  ;;  %15195 = vmatmul.mubr.bf16.gmra.mrb[140].mxu1 %v14804_v42 }
 0xba8   :  { %15103 = vmatprep.mubr.bf16.mxu0 %v20061_v50  ;;  %15204 = vmatprep.mubr.bf16.mxu1 %v20061_v50 }
 0xba9   :  { %v14650_v24 = vpop.f32.mrb[116].mxu1 }
 0xbaa   :  { %v14651_v52 = vadd.f32 %v14650_v24, %v13152_v20  ;;  %v14652_v58 = vpop.f32.mrb[117].mxu1 }
 0xbab   :  { %v14653_v18 = vadd.f32 %v14652_v58, %v13156_v53  ;;  %v14654_v12 = vpop.f32.mrb[118].mxu1 }
 0xbac   :  { %14782 = vst [vmem:[#allocation5 + $0x58] sm:$0x3] %v14651_v52  ;;  %v14655_v15 = vpop.f32.mrb[119].mxu1  ;;  %v14797_v6 = vld [vmem:[#allocation5 + $0x50] sm:$0xff] }
 0xbad   :  { %14783 = vst [vmem:[#allocation5 + $0x5a] sm:$0x3] %v14653_v18 }
 0xbb1   :  { %v14732_v36 = vpop.f32.mrb[120].mxu1 }
 0xbb2   :  { %v14733_v25 = vadd.f32 %v16594_v32, %v14732_v36  ;;  %v18776_v59 = vpop.f32.mrb[121].mxu1 }
 0xbb3   :  { %v14735_v27 = vpop.f32.mrb[122].mxu1 }
 0xbb4   :  { %14786 = vst [vmem:[#allocation5 + $0x60] sm:$0x3] %v14733_v25  ;;  %v18777_v47 = vpop.f32.mrb[123].mxu1  ;;  %v14798_v13 = vld [vmem:[#allocation5 + $0x58] sm:$0xff] }
 0xbb5   :  { %v14805_v51 = vpack.c.bf16 %v14798_v13, %v14797_v6 }
 0xbb7   :  { %15104 = vmatmul.mubr.bf16.gmra.mrb[120].mxu0 %v14805_v51  ;;  %15205 = vmatmul.mubr.bf16.gmra.mrb[144].mxu1 %v14805_v51 }
 0xbb8   :  { %15113 = vmatprep.mubr.bf16.mxu0 %v20061_v50  ;;  %15214 = vmatprep.mubr.bf16.mxu1 %v20061_v50  ;;  %v20038_v50 = vld [vmem:[%s24663_s11 + $0xf0] sm:$0xff]  }
 0xbb9   :  { %17830 = vmatprep.subr.bf16.mxu1 %v20038_v50 }
 0xbba   :  { %17831 = vmatpush3.bf16.msra.mxu1 %v20040_v38 }
 0xbbb   :  { %v14799_v21 = vld [vmem:[#allocation5 + $0x60] sm:$0x3]  ;;  %17832 = vmatprep.subr.bf16.mxu1 %v20042_v1 }
 0xbbc   :  { %v14806_v39 = vpack.c.bf16 %v14799_v21, %v14799_v21 }
 0xbbe   :  { %17833 = vmatpush3.bf16.msra.mxu1 %v20044_v34 }
 0xbbf   :  { %15114 = vmatmul.mubr.bf16.gmra.mrb[124].mxu0 %v14806_v39  ;;  %15215 = vmatmul.mubr.bf16.gmra.mrb[148].mxu1 %v14806_v39 }
 0xc3b   :  { %v15055_v9 = vpop.f32.mrb[100].mxu0  ;;  %v15156_v57 = vpop.f32.mrb[124].mxu1 }
 0xc3c   :  { %v15056_v48 = vadd.f32 %v15055_v9, %v24521_v63  ;;  %v15157_v4 = vadd.f32 %v15156_v57, %v24524_v33  ;;  %v15057_v45 = vpop.f32.mrb[101].mxu0  ;;  %v15158_v35 = vpop.f32.mrb[125].mxu1 }
 0xc3d   :  { %v15058_v29 = vadd.f32 %v15057_v45, %v24527_v22  ;;  %v15159_v19 = vadd.f32 %v15158_v35, %v24530_v60  ;;  %v15059_v55 = vpop.f32.mrb[102].mxu0  ;;  %v15160_v37 = vpop.f32.mrb[126].mxu1 }
 0xc3e   :  { %v15060_v30 = vadd.f32 %v15059_v55, %v24521_v63  ;;  %v15161_v61 = vadd.f32 %v15160_v37, %v24524_v33  ;;  %v15061_v17 = vpop.f32.mrb[103].mxu0  ;;  %v15162_v8 = vpop.f32.mrb[127].mxu1  ;;  %v15223_v44 = vmax.f32 %v15056_v48, 0.0  ;;  %v15225_v26 = vmax.f32 %v15157_v4, 0.0 }
 0xc3f   :  { %v15062_v2 = vadd.f32 %v15061_v17, %v24527_v22  ;;  %v15163_v31 = vadd.f32 %v15162_v8, %v24530_v60  ;;  %v15224_v40 = vmax.f32 %v15058_v29, 0.0  ;;  %v15226_v56 = vmax.f32 %v15159_v19, 0.0 }
 0xc40   :  { %v15227_v23 = vmax.f32 %v15060_v30, 0.0  ;;  %v15229_v10 = vmax.f32 %v15161_v61, 0.0 }
 0xc41   :  { %v15228_v41 = vmax.f32 %v15062_v2, 0.0  ;;  %v15230_v0 = vmax.f32 %v15163_v31, 0.0 }
 0xc42   :  { %v15275_v28 = vpack.c.bf16 %v15227_v23, %v15223_v44  ;;  %v15277_v46 = vpack.c.bf16 %v15229_v10, %v15225_v26 }
 0xc43   :  { %v15276_v62 = vpack.c.bf16 %v15228_v41, %v15224_v40  ;;  %v15278_v43 = vpack.c.bf16 %v15230_v0, %v15226_v56 }
 0xc45   :  { %15598 = vmatprep.mubr.bf16.mxu0 %v15276_v62  ;;  %15686 = vmatprep.mubr.bf16.mxu1 %v15278_v43 }
 0xc46   :  { %15599 = vmatmul.mubr.bf16.vlgmr.msra.gmra.mrb[128].mxu0 %v15275_v28  ;;  %15687 = vmatmul.mubr.bf16.vlgmr.msra.gmra.mrb[152].mxu1 %v15277_v46 }
 0xc4b   :  { %v15065_v14 = vpop.f32.mrb[104].mxu0  ;;  %v15166_v42 = vpop.f32.mrb[128].mxu1 }
 0xc4c   :  { %v15066_v20 = vadd.f32 %v15065_v14, %v24521_v63  ;;  %v15167_v53 = vadd.f32 %v15166_v42, %v24524_v33  ;;  %v15067_v24 = vpop.f32.mrb[105].mxu0  ;;  %v15168_v52 = vpop.f32.mrb[129].mxu1 }
 0xc4d   :  { %v15068_v58 = vadd.f32 %v15067_v24, %v24527_v22  ;;  %v15169_v18 = vadd.f32 %v15168_v52, %v24530_v60  ;;  %v15069_v12 = vpop.f32.mrb[106].mxu0  ;;  %v15170_v15 = vpop.f32.mrb[130].mxu1 }
 0xc4e   :  { %v15070_v32 = vadd.f32 %v15069_v12, %v24521_v63  ;;  %v15171_v36 = vadd.f32 %v15170_v15, %v24524_v33  ;;  %v15071_v25 = vpop.f32.mrb[107].mxu0  ;;  %v15172_v59 = vpop.f32.mrb[131].mxu1  ;;  %v15231_v6 = vmax.f32 %v15066_v20, 0.0  ;;  %v15233_v13 = vmax.f32 %v15167_v53, 0.0 }
 0xc4f   :  { %v15072_v27 = vadd.f32 %v15071_v25, %v24527_v22  ;;  %v15173_v47 = vadd.f32 %v15172_v59, %v24530_v60  ;;  %v15232_v39 = vmax.f32 %v15068_v58, 0.0  ;;  %v15234_v49 = vmax.f32 %v15169_v18, 0.0 }
 0xc50   :  { %v15235_v51 = vmax.f32 %v15070_v32, 0.0  ;;  %v15237_v21 = vmax.f32 %v15171_v36, 0.0 }
 0xc51   :  { %v15236_v3 = vmax.f32 %v15072_v27, 0.0  ;;  %v15238_v16 = vmax.f32 %v15173_v47, 0.0 }
 0xc52   :  { %v15279_v50 = vpack.c.bf16 %v15235_v51, %v15231_v6  ;;  %v15281_v54 = vpack.c.bf16 %v15237_v21, %v15233_v13 }
 0xc53   :  { %v15280_v38 = vpack.c.bf16 %v15236_v3, %v15232_v39  ;;  %v15282_v11 = vpack.c.bf16 %v15238_v16, %v15234_v49 }
 0xc55   :  { %15606 = vmatprep.mubr.bf16.mxu0 %v15280_v38  ;;  %15694 = vmatprep.mubr.bf16.mxu1 %v15282_v11 }
 0xc56   :  { %15607 = vmatmul.mubr.bf16.gmra.mrb[132].mxu0 %v15279_v50  ;;  %15695 = vmatmul.mubr.bf16.gmra.mrb[156].mxu1 %v15281_v54 }
 0xc5b   :  { %v15075_v1 = vpop.f32.mrb[108].mxu0  ;;  %v15176_v7 = vpop.f32.mrb[132].mxu1 }
 0xc5c   :  { %v15076_v34 = vadd.f32 %v15075_v1, %v24521_v63  ;;  %v15177_v5 = vadd.f32 %v15176_v7, %v24524_v33  ;;  %v15077_v9 = vpop.f32.mrb[109].mxu0  ;;  %v15178_v57 = vpop.f32.mrb[133].mxu1 }
 0xc5d   :  { %v15078_v48 = vadd.f32 %v15077_v9, %v24527_v22  ;;  %v15179_v4 = vadd.f32 %v15178_v57, %v24530_v60  ;;  %v15079_v45 = vpop.f32.mrb[110].mxu0  ;;  %v15180_v35 = vpop.f32.mrb[134].mxu1 }
 0xc5e   :  { %v15080_v29 = vadd.f32 %v15079_v45, %v24521_v63  ;;  %v15181_v19 = vadd.f32 %v15180_v35, %v24524_v33  ;;  %v15081_v55 = vpop.f32.mrb[111].mxu0  ;;  %v15182_v37 = vpop.f32.mrb[135].mxu1  ;;  %v15239_v17 = vmax.f32 %v15076_v34, 0.0  ;;  %v15241_v8 = vmax.f32 %v15177_v5, 0.0 }
 0xc5f   :  { %v15082_v30 = vadd.f32 %v15081_v55, %v24527_v22  ;;  %v15183_v61 = vadd.f32 %v15182_v37, %v24530_v60  ;;  %v15240_v44 = vmax.f32 %v15078_v48, 0.0  ;;  %v15242_v26 = vmax.f32 %v15179_v4, 0.0 }
 0xc60   :  { %v15243_v2 = vmax.f32 %v15080_v29, 0.0  ;;  %v15245_v31 = vmax.f32 %v15181_v19, 0.0 }
 0xc61   :  { %v15244_v23 = vmax.f32 %v15082_v30, 0.0  ;;  %v15246_v10 = vmax.f32 %v15183_v61, 0.0 }
 0xc62   :  { %v15283_v40 = vpack.c.bf16 %v15243_v2, %v15239_v17  ;;  %v15285_v56 = vpack.c.bf16 %v15245_v31, %v15241_v8 }
 0xc63   :  { %v15284_v41 = vpack.c.bf16 %v15244_v23, %v15240_v44  ;;  %v15286_v0 = vpack.c.bf16 %v15246_v10, %v15242_v26 }
 0xc65   :  { %15614 = vmatprep.mubr.bf16.mxu0 %v15284_v41  ;;  %15702 = vmatprep.mubr.bf16.mxu1 %v15286_v0 }
 0xc66   :  { %15615 = vmatmul.mubr.bf16.gmra.mrb[136].mxu0 %v15283_v40  ;;  %15703 = vmatmul.mubr.bf16.gmra.mrb[160].mxu1 %v15285_v56 }
 0xc6b   :  { %v15085_v28 = vpop.f32.mrb[112].mxu0  ;;  %v15186_v46 = vpop.f32.mrb[136].mxu1 }
 0xc6c   :  { %v15086_v62 = vadd.f32 %v15085_v28, %v24521_v63  ;;  %v15187_v43 = vadd.f32 %v15186_v46, %v24524_v33  ;;  %v15087_v14 = vpop.f32.mrb[113].mxu0  ;;  %v15188_v42 = vpop.f32.mrb[137].mxu1 }
 0xc6d   :  { %v15088_v20 = vadd.f32 %v15087_v14, %v24527_v22  ;;  %v15189_v53 = vadd.f32 %v15188_v42, %v24530_v60  ;;  %v15089_v24 = vpop.f32.mrb[114].mxu0  ;;  %v15190_v52 = vpop.f32.mrb[138].mxu1 }
 0xc6e   :  { %v15090_v58 = vadd.f32 %v15089_v24, %v24521_v63  ;;  %v15191_v18 = vadd.f32 %v15190_v52, %v24524_v33  ;;  %v15091_v12 = vpop.f32.mrb[115].mxu0  ;;  %v15192_v15 = vpop.f32.mrb[139].mxu1  ;;  %v15247_v25 = vmax.f32 %v15086_v62, 0.0  ;;  %v15249_v59 = vmax.f32 %v15187_v43, 0.0 }
 0xc6f   :  { %v15092_v32 = vadd.f32 %v15091_v12, %v24527_v22  ;;  %v15193_v36 = vadd.f32 %v15192_v15, %v24530_v60  ;;  %v15248_v6 = vmax.f32 %v15088_v20, 0.0  ;;  %v15250_v13 = vmax.f32 %v15189_v53, 0.0 }
 0xc70   :  { %v15251_v27 = vmax.f32 %v15090_v58, 0.0  ;;  %v15253_v47 = vmax.f32 %v15191_v18, 0.0 }
 0xc71   :  { %v15252_v51 = vmax.f32 %v15092_v32, 0.0  ;;  %v15254_v21 = vmax.f32 %v15193_v36, 0.0 }
 0xc72   :  { %v15287_v39 = vpack.c.bf16 %v15251_v27, %v15247_v25  ;;  %v15289_v49 = vpack.c.bf16 %v15253_v47, %v15249_v59 }
 0xc73   :  { %v15288_v3 = vpack.c.bf16 %v15252_v51, %v15248_v6  ;;  %v15290_v16 = vpack.c.bf16 %v15254_v21, %v15250_v13 }
 0xc75   :  { %15622 = vmatprep.mubr.bf16.mxu0 %v15288_v3  ;;  %15710 = vmatprep.mubr.bf16.mxu1 %v15290_v16 }
 0xc76   :  { %15623 = vmatmul.mubr.bf16.gmra.mrb[140].mxu0 %v15287_v39  ;;  %15711 = vmatmul.mubr.bf16.gmra.mrb[164].mxu1 %v15289_v49 }
 0xc7a   :  { %v15095_v50 = vpop.f32.mrb[116].mxu0  ;;  %v15196_v54 = vpop.f32.mrb[140].mxu1 }
 0xc7b   :  { %v15096_v38 = vadd.f32 %v15095_v50, %v24521_v63  ;;  %v15197_v11 = vadd.f32 %v15196_v54, %v24524_v33  ;;  %v15097_v1 = vpop.f32.mrb[117].mxu0  ;;  %v15198_v7 = vpop.f32.mrb[141].mxu1 }
 0xc7c   :  { %v15098_v34 = vadd.f32 %v15097_v1, %v24527_v22  ;;  %v15199_v5 = vadd.f32 %v15198_v7, %v24530_v60  ;;  %v15099_v9 = vpop.f32.mrb[118].mxu0  ;;  %v15200_v57 = vpop.f32.mrb[142].mxu1 }
 0xc7d   :  { %v15100_v48 = vadd.f32 %v15099_v9, %v24521_v63  ;;  %v15201_v4 = vadd.f32 %v15200_v57, %v24524_v33  ;;  %v15101_v45 = vpop.f32.mrb[119].mxu0  ;;  %v15202_v35 = vpop.f32.mrb[143].mxu1  ;;  %v15255_v55 = vmax.f32 %v15096_v38, 0.0  ;;  %v15257_v37 = vmax.f32 %v15197_v11, 0.0 }
 0xc7e   :  { %v15102_v29 = vadd.f32 %v15101_v45, %v24527_v22  ;;  %v15203_v19 = vadd.f32 %v15202_v35, %v24530_v60  ;;  %v15256_v17 = vmax.f32 %v15098_v34, 0.0  ;;  %v15258_v8 = vmax.f32 %v15199_v5, 0.0 }
 0xc7f   :  { %v15259_v30 = vmax.f32 %v15100_v48, 0.0  ;;  %v15261_v61 = vmax.f32 %v15201_v4, 0.0 }
 0xc80   :  { %v15260_v2 = vmax.f32 %v15102_v29, 0.0  ;;  %v15262_v31 = vmax.f32 %v15203_v19, 0.0  ;;  %v24587_v29 = vld [vmem:[%s24665_s12] ss:$0 sm:$0xff] }
 0xc81   :  { %v15291_v44 = vpack.c.bf16 %v15259_v30, %v15255_v55  ;;  %v15293_v26 = vpack.c.bf16 %v15261_v61, %v15257_v37 }
 0xc82   :  { %v15292_v23 = vpack.c.bf16 %v15260_v2, %v15256_v17  ;;  %v15294_v10 = vpack.c.bf16 %v15262_v31, %v15258_v8 }
 0xc84   :  { %15630 = vmatprep.mubr.bf16.mxu0 %v15292_v23  ;;  %15718 = vmatprep.mubr.bf16.mxu1 %v15294_v10 }
 0xc85   :  { %15631 = vmatmul.mubr.bf16.gmra.mrb[144].mxu0 %v15291_v44  ;;  %15719 = vmatmul.mubr.bf16.gmra.mrb[168].mxu1 %v15293_v26 }
 0xc8a   :  { %v15105_v40 = vpop.f32.mrb[120].mxu0  ;;  %v15206_v56 = vpop.f32.mrb[144].mxu1 }
 0xc8b   :  { %v15106_v41 = vadd.f32 %v15105_v40, %v24521_v63  ;;  %v15207_v0 = vadd.f32 %v15206_v56, %v24524_v33  ;;  %v15107_v28 = vpop.f32.mrb[121].mxu0  ;;  %v15208_v46 = vpop.f32.mrb[145].mxu1 }
 0xc8c   :  { %v15108_v62 = vadd.f32 %v15107_v28, %v24527_v22  ;;  %v15209_v43 = vadd.f32 %v15208_v46, %v24530_v60  ;;  %v15109_v14 = vpop.f32.mrb[122].mxu0  ;;  %v15210_v42 = vpop.f32.mrb[146].mxu1 }
 0xc8d   :  { %v15110_v20 = vadd.f32 %v15109_v14, %v24521_v63  ;;  %v15211_v53 = vadd.f32 %v15210_v42, %v24524_v33  ;;  %v15111_v24 = vpop.f32.mrb[123].mxu0  ;;  %v15212_v52 = vpop.f32.mrb[147].mxu1  ;;  %v15263_v12 = vmax.f32 %v15106_v41, 0.0  ;;  %v15265_v15 = vmax.f32 %v15207_v0, 0.0 }
 0xc8e   :  { %v15112_v58 = vadd.f32 %v15111_v24, %v24527_v22  ;;  %v15213_v18 = vadd.f32 %v15212_v52, %v24530_v60  ;;  %v15264_v25 = vmax.f32 %v15108_v62, 0.0  ;;  %v15266_v59 = vmax.f32 %v15209_v43, 0.0 }
 0xc8f   :  { %v15267_v32 = vmax.f32 %v15110_v20, 0.0  ;;  %v15269_v36 = vmax.f32 %v15211_v53, 0.0 }
 0xc90   :  { %v15268_v27 = vmax.f32 %v15112_v58, 0.0  ;;  %v15270_v47 = vmax.f32 %v15213_v18, 0.0 }
 0xc91   :  { %v15295_v6 = vpack.c.bf16 %v15267_v32, %v15263_v12  ;;  %v15297_v13 = vpack.c.bf16 %v15269_v36, %v15265_v15 }
 0xc92   :  { %v15296_v51 = vpack.c.bf16 %v15268_v27, %v15264_v25  ;;  %v15298_v21 = vpack.c.bf16 %v15270_v47, %v15266_v59  ;;  %v15115_v39 = vpop.f32.mrb[124].mxu0  ;;  %v15216_v49 = vpop.f32.mrb[148].mxu1 }
 0xc93   :  { %v15116_v3 = vadd.f32 %v15115_v39, %v24521_v63  ;;  %v15217_v16 = vadd.f32 %v15216_v49, %v24524_v33  ;;  %v15117_v50 = vpop.f32.mrb[125].mxu0  ;;  %v15218_v54 = vpop.f32.mrb[149].mxu1 }
 0xc94   :  { %v15118_v38 = vadd.f32 %v15117_v50, %v24527_v22  ;;  %v15219_v11 = vadd.f32 %v15218_v54, %v24530_v60  ;;  %v15119_v1 = vpop.f32.mrb[126].mxu0  ;;  %v15220_v7 = vpop.f32.mrb[150].mxu1  ;;  %15638 = vmatprep.mubr.bf16.mxu0 %v15296_v51  ;;  %15726 = vmatprep.mubr.bf16.mxu1 %v15298_v21 }
 0xc95   :  { %v15120_v34 = vpop.f32.mrb[127].mxu0  ;;  %v15221_v5 = vpop.f32.mrb[151].mxu1  ;;  %15639 = vmatmul.mubr.bf16.gmra.mrb[148].mxu0 %v15295_v6  ;;  %15727 = vmatmul.mubr.bf16.gmra.mrb[172].mxu1 %v15297_v13  ;;  %v15271_v48 = vmax.f32 %v15116_v3, 0.0  ;;  %v15273_v63 = vmax.f32 %v15217_v16, 0.0 }
 0xc96   :  { %v15272_v9 = vmax.f32 %v15118_v38, 0.0  ;;  %v15274_v57 = vmax.f32 %v15219_v11, 0.0 }
 0xc97   :  { %v15299_v45 = vpack.c.bf16 %v15271_v48, %v15271_v48  ;;  %v15301_v22 = vpack.c.bf16 %v15273_v63, %v15273_v63 }
 0xc98   :  { %v15300_v4 = vpack.c.bf16 %v15272_v9, %v15272_v9  ;;  %v15302_v33 = vpack.c.bf16 %v15274_v57, %v15274_v57 }
 0xc9a   :  { %15646 = vmatprep.mubr.bf16.mxu0 %v15300_v4  ;;  %15734 = vmatprep.mubr.bf16.mxu1 %v15302_v33 }
 0xc9d   :  { %15647 = vmatmul.mubr.bf16.gmra.mrb[152].mxu0 %v15299_v45  ;;  %15735 = vmatmul.mubr.bf16.gmra.mrb[176].mxu1 %v15301_v22 }
 0xd19   :  { %v17776_v60 = vpop.f32.mrb[128].mxu0  ;;  %v17834_v35 = vpop.f32.mrb[152].mxu1 }
 0xd1a   :  { %v17777_v19 = vpop.f32.mrb[129].mxu0  ;;  %v17835_v55 = vpop.f32.mrb[153].mxu1 }
 0xd1b   :  { %v17778_v37 = vadd.f32 %v17777_v19, %v17776_v60  ;;  %v17836_v30 = vadd.f32 %v17835_v55, %v17834_v35  ;;  %v17779_v61 = vpop.f32.mrb[130].mxu0  ;;  %v17837_v17 = vpop.f32.mrb[154].mxu1 }
 0xd1c   :  { %v17780_v8 = vpop.f32.mrb[131].mxu0  ;;  %v17838_v2 = vpop.f32.mrb[155].mxu1 }
 0xd1d   :  { %v15601_v31 = vadd.f32 %v17778_v37, %v24587_v29  ;;  %v17781_v44 = vadd.f32 %v17780_v8, %v17779_v61  ;;  %v17839_v26 = vadd.f32 %v17838_v2, %v17837_v17 }
 0xd1f   :  { %v15689_v23 = vadd.f32 %v17836_v30, %v15601_v31  ;;  %v15604_v10 = vadd.f32 %v17781_v44, %v24587_v29 }
 0xd21   :  { %v15742_v40 = vmax.f32 %v15689_v23, 0.0  ;;  %v15692_v56 = vadd.f32 %v17839_v26, %v15604_v10 }
 0xd23   :  { %15755 = vst.msk [vmem:[%s24666_s13] sm:$0xff] %vm844_vm0, %v15742_v40  ;;  %v15743_v41 = vmax.f32 %v15692_v56, 0.0 }
 0xd25   :  { %15756 = vst.msk [vmem:[%s24666_s13 + $0x8] sm:$0xff] %vm844_vm0, %v15743_v41 }
 0xd29   :  { %v17782_v0 = vpop.f32.mrb[132].mxu0  ;;  %v17840_v28 = vpop.f32.mrb[156].mxu1 }
 0xd2a   :  { %v17783_v46 = vpop.f32.mrb[133].mxu0  ;;  %v17841_v62 = vpop.f32.mrb[157].mxu1 }
 0xd2b   :  { %v17784_v43 = vadd.f32 %v17783_v46, %v17782_v0  ;;  %v17842_v14 = vadd.f32 %v17841_v62, %v17840_v28  ;;  %v17785_v42 = vpop.f32.mrb[134].mxu0  ;;  %v17843_v20 = vpop.f32.mrb[158].mxu1 }
 0xd2c   :  { %v17786_v53 = vpop.f32.mrb[135].mxu0  ;;  %v17844_v24 = vpop.f32.mrb[159].mxu1 }
 0xd2d   :  { %v15609_v52 = vadd.f32 %v17784_v43, %v24587_v29  ;;  %v17787_v58 = vadd.f32 %v17786_v53, %v17785_v42  ;;  %v17845_v18 = vadd.f32 %v17844_v24, %v17843_v20 }
 0xd2f   :  { %v15697_v12 = vadd.f32 %v17842_v14, %v15609_v52  ;;  %v15612_v15 = vadd.f32 %v17787_v58, %v24587_v29 }
 0xd31   :  { %v15744_v32 = vmax.f32 %v15697_v12, 0.0  ;;  %v15700_v36 = vadd.f32 %v17845_v18, %v15612_v15 }
 0xd33   :  { %15757 = vst.msk [vmem:[%s24666_s13 + $0x10] sm:$0xff] %vm844_vm0, %v15744_v32  ;;  %v15745_v25 = vmax.f32 %v15700_v36, 0.0 }
 0xd35   :  { %15758 = vst.msk [vmem:[%s24666_s13 + $0x18] sm:$0xff] %vm844_vm0, %v15745_v25 }
 0xd39   :  { %v17788_v59 = vpop.f32.mrb[136].mxu0  ;;  %v17846_v27 = vpop.f32.mrb[160].mxu1 }
 0xd3a   :  { %v17789_v47 = vpop.f32.mrb[137].mxu0  ;;  %v17847_v6 = vpop.f32.mrb[161].mxu1 }
 0xd3b   :  { %v17790_v13 = vadd.f32 %v17789_v47, %v17788_v59  ;;  %v17848_v51 = vadd.f32 %v17847_v6, %v17846_v27  ;;  %v17791_v21 = vpop.f32.mrb[138].mxu0  ;;  %v17849_v39 = vpop.f32.mrb[162].mxu1 }
 0xd3c   :  { %v17792_v49 = vpop.f32.mrb[139].mxu0  ;;  %v17850_v3 = vpop.f32.mrb[163].mxu1 }
 0xd3d   :  { %v15617_v16 = vadd.f32 %v17790_v13, %v24587_v29  ;;  %v17793_v50 = vadd.f32 %v17792_v49, %v17791_v21  ;;  %v17851_v54 = vadd.f32 %v17850_v3, %v17849_v39 }
 0xd3f   :  { %v15705_v38 = vadd.f32 %v17848_v51, %v15617_v16  ;;  %v15620_v11 = vadd.f32 %v17793_v50, %v24587_v29 }
 0xd41   :  { %v15746_v1 = vmax.f32 %v15705_v38, 0.0  ;;  %v15708_v7 = vadd.f32 %v17851_v54, %v15620_v11 }
 0xd43   :  { %15759 = vst.msk [vmem:[%s24666_s13 + $0x20] sm:$0xff] %vm844_vm0, %v15746_v1  ;;  %v15747_v34 = vmax.f32 %v15708_v7, 0.0 }
 0xd45   :  { %15760 = vst.msk [vmem:[%s24666_s13 + $0x28] sm:$0xff] %vm844_vm0, %v15747_v34 }
 0xd49   :  { %v17794_v5 = vpop.f32.mrb[140].mxu0  ;;  %v17852_v9 = vpop.f32.mrb[164].mxu1 }
 0xd4a   :  { %v17795_v57 = vpop.f32.mrb[141].mxu0  ;;  %v17853_v48 = vpop.f32.mrb[165].mxu1 }
 0xd4b   :  { %v17796_v63 = vadd.f32 %v17795_v57, %v17794_v5  ;;  %v17854_v4 = vadd.f32 %v17853_v48, %v17852_v9  ;;  %v17797_v33 = vpop.f32.mrb[142].mxu0  ;;  %v17855_v45 = vpop.f32.mrb[166].mxu1 }
 0xd4c   :  { %v17798_v22 = vpop.f32.mrb[143].mxu0  ;;  %v17856_v60 = vpop.f32.mrb[167].mxu1 }
 0xd4d   :  { %v15625_v35 = vadd.f32 %v17796_v63, %v24587_v29  ;;  %v17799_v19 = vadd.f32 %v17798_v22, %v17797_v33  ;;  %v17857_v55 = vadd.f32 %v17856_v60, %v17855_v45 }
 0xd4f   :  { %v15713_v37 = vadd.f32 %v17854_v4, %v15625_v35  ;;  %v15628_v30 = vadd.f32 %v17799_v19, %v24587_v29 }
 0xd51   :  { %v15748_v61 = vmax.f32 %v15713_v37, 0.0  ;;  %v15716_v17 = vadd.f32 %v17857_v55, %v15628_v30 }
 0xd53   :  { %15761 = vst.msk [vmem:[%s24666_s13 + $0x30] sm:$0xff] %vm844_vm0, %v15748_v61  ;;  %v15749_v8 = vmax.f32 %v15716_v17, 0.0 }
 0xd55   :  { %15762 = vst.msk [vmem:[%s24666_s13 + $0x38] sm:$0xff] %vm844_vm0, %v15749_v8 }
 0xd58   :  { %v17800_v2 = vpop.f32.mrb[144].mxu0  ;;  %v17858_v31 = vpop.f32.mrb[168].mxu1 }
 0xd59   :  { %v17801_v44 = vpop.f32.mrb[145].mxu0  ;;  %v17859_v26 = vpop.f32.mrb[169].mxu1 }
 0xd5a   :  { %v17802_v23 = vadd.f32 %v17801_v44, %v17800_v2  ;;  %v17860_v10 = vadd.f32 %v17859_v26, %v17858_v31  ;;  %v17803_v40 = vpop.f32.mrb[146].mxu0  ;;  %v17861_v56 = vpop.f32.mrb[170].mxu1 }
 0xd5b   :  { %v17804_v41 = vpop.f32.mrb[147].mxu0  ;;  %v17862_v0 = vpop.f32.mrb[171].mxu1 }
 0xd5c   :  { %v15633_v28 = vadd.f32 %v17802_v23, %v24587_v29  ;;  %v17805_v46 = vadd.f32 %v17804_v41, %v17803_v40  ;;  %v17863_v62 = vadd.f32 %v17862_v0, %v17861_v56 }
 0xd5e   :  { %v15721_v43 = vadd.f32 %v17860_v10, %v15633_v28  ;;  %v15636_v14 = vadd.f32 %v17805_v46, %v24587_v29 }
 0xd60   :  { %v15750_v42 = vmax.f32 %v15721_v43, 0.0  ;;  %v15724_v20 = vadd.f32 %v17863_v62, %v15636_v14 }
 0xd62   :  { %15763 = vst.msk [vmem:[%s24666_s13 + $0x40] sm:$0xff] %vm844_vm0, %v15750_v42  ;;  %v15751_v53 = vmax.f32 %v15724_v20, 0.0 }
 0xd64   :  { %15764 = vst.msk [vmem:[%s24666_s13 + $0x48] sm:$0xff] %vm844_vm0, %v15751_v53 }
 0xd68   :  { %v17806_v24 = vpop.f32.mrb[148].mxu0  ;;  %v17864_v52 = vpop.f32.mrb[172].mxu1 }
 0xd69   :  { %v17807_v58 = vpop.f32.mrb[149].mxu0  ;;  %v17865_v18 = vpop.f32.mrb[173].mxu1 }
 0xd6a   :  { %v17808_v12 = vadd.f32 %v17807_v58, %v17806_v24  ;;  %v17866_v15 = vadd.f32 %v17865_v18, %v17864_v52  ;;  %v17809_v32 = vpop.f32.mrb[150].mxu0  ;;  %v17867_v36 = vpop.f32.mrb[174].mxu1 }
 0xd6b   :  { %v17810_v25 = vpop.f32.mrb[151].mxu0  ;;  %v17868_v59 = vpop.f32.mrb[175].mxu1 }
 0xd6c   :  { %v15641_v27 = vadd.f32 %v17808_v12, %v24587_v29  ;;  %v17811_v47 = vadd.f32 %v17810_v25, %v17809_v32  ;;  %v17869_v6 = vadd.f32 %v17868_v59, %v17867_v36 }
 0xd6e   :  { %v15729_v13 = vadd.f32 %v17866_v15, %v15641_v27  ;;  %v15644_v51 = vadd.f32 %v17811_v47, %v24587_v29 }
 0xd70   :  { %v15752_v21 = vmax.f32 %v15729_v13, 0.0  ;;  %v15732_v39 = vadd.f32 %v17869_v6, %v15644_v51  ;;  %v17812_v49 = vpop.f32.mrb[152].mxu0  ;;  %v17870_v3 = vpop.f32.mrb[176].mxu1 }
 0xd71   :  { %v17813_v16 = vpop.f32.mrb[153].mxu0  ;;  %v17871_v50 = vpop.f32.mrb[177].mxu1 }
 0xd72   :  { %15765 = vst.msk [vmem:[%s24666_s13 + $0x50] sm:$0xff] %vm844_vm0, %v15752_v21  ;;  %v15753_v54 = vmax.f32 %v15732_v39, 0.0  ;;  %v17814_v38 = vadd.f32 %v17813_v16, %v17812_v49  ;;  %v17872_v11 = vadd.f32 %v17871_v50, %v17870_v3  ;;  %v17815_v1 = vpop.f32.mrb[154].mxu0  ;;  %v17873_v7 = vpop.f32.mrb[178].mxu1 }
 0xd73   :  { %v17816_v34 = vpop.f32.mrb[155].mxu0  ;;  %v17874_v5 = vpop.f32.mrb[179].mxu1 }
 0xd74   :  { %15766 = vst.msk [vmem:[%s24666_s13 + $0x58] sm:$0xff] %vm844_vm0, %v15753_v54  ;;  %v15649_v9 = vadd.f32 %v17814_v38, %v24587_v29 }
 0xd76   :  { %v15737_v57 = vadd.f32 %v17872_v11, %v15649_v9 }
 0xd78   :  { %v15754_v48 = vmax.f32 %v15737_v57, 0.0 }
 0xd7a   :  { %15768 = vst.msk [vmem:[%s24666_s13 + $0x60] sm:$0x3] %vm15767_vm7, %v15754_v48 }

</bundles_post_ra>
